<compile_context>
chip_gen: v5e
topology: v5e:2x2
jax: 0.10.0
libtpu: 0.0.40
codegen_flags: <defaults>
</compile_context>

<pallas_src>
import jax
import jax.numpy as jnp
from jax.experimental import pallas as pl
from jax.experimental.pallas import tpu as pltpu

BN_EPS = 1e-5

# ----- static network geometry (input length 200 -> the 40*17 flatten of the module) -----
L_IN = 200
K1, C1 = 20, 10
K2, C2 = 10, 20
K3, C3 = 5, 40
L1 = L_IN - K1 + 1            # 181
P1 = (L1 - 4) // 2 + 1        # 89   (MaxPool1d(4,2))
L2 = P1 - K2 + 1              # 80
P2 = (L2 - 4) // 2 + 1        # 39
L3 = P2 - K3 + 1              # 35
P3 = (L3 - 2) // 2 + 1        # 17   (MaxPool1d(2,2))
FLAT = C3 * P3                # 680
H1, H2, OUT = 160, 80, 10


# --------------------------------- in-kernel helpers ---------------------------------- #
def _tanh_bn(acc, b_ref, scale_ref, shift_ref):
    # conv bias + Tanh + BatchNorm1d (inference affine); channels sit on the lane axis,
    # so this is pure VPU/EUP work with lane-broadcast params.
    return jnp.tanh(acc + b_ref[...]) * scale_ref[...] + shift_ref[...]


def _conv_from(src_ref, w_ref, ksz, lout, cout):
    # src_ref: (Lin, Cin) VMEM ref; w_ref: (K, Cin, Cout).  y = sum_k src[k:k+Lout] @ W_k
    # K shifted-slice matmuls -> MXU, no im2col materialization.
    acc = jnp.zeros((lout, cout), jnp.float32)
    for k in range(ksz):
        acc = acc + jnp.dot(src_ref[pl.ds(k, lout), :], w_ref[k],
                            preferred_element_type=jnp.float32)
    return acc


def _maxpool_into(src_ref, dst_ref, lout, ksz, stride):
    # MaxPool1d along the sublane (L) axis via strided reads of the VMEM scratch.
    lp = (lout - ksz) // stride + 1
    m = src_ref[pl.ds(0, lp, stride=stride), :]
    for j in range(1, ksz):
        m = jnp.maximum(m, src_ref[pl.ds(j, lp, stride=stride), :])
    dst_ref[...] = m


# ------------------------------------ fused kernel ------------------------------------ #
def cnn_fused_kernel(
    x_ref,                                            # (L_IN, 1) per-sample input, channels-last
    cw1_ref, cb1_ref, bn1s_ref, bn1t_ref,             # conv1 params
    cw2_ref, cb2_ref, bn2s_ref, bn2t_ref,             # conv2 params
    cw3_ref, cb3_ref, bn3s_ref, bn3t_ref,             # conv3 params
    mw1_ref, mb1_ref, mw2_ref, mb2_ref, mw3_ref, mb3_ref,   # MLP params
    o_ref,                                            # (1, 10) per-sample output
    y1s, p1s, y2s, p2s, y3s, p3s,                     # VMEM activation scratch
):
    # ---- block 1: Conv1d(1,10,20) + Tanh + BN(10) + MaxPool1d(4,2) ----
    # Cin == 1 -> per-tap broadcast MAC instead of a degenerate K=1 matmul.
    acc = jnp.zeros((L1, C1), jnp.float32)
    for k in range(K1):
        acc = acc + x_ref[pl.ds(k, L1), :] * cw1_ref[k]        # (L1,1) * (1,C1) -> (L1,C1)
    y1s[...] = _tanh_bn(acc, cb1_ref, bn1s_ref, bn1t_ref)
    _maxpool_into(y1s, p1s, L1, 4, 2)

    # ---- block 2: Conv1d(10,20,10) + Tanh + BN(20) + MaxPool1d(4,2) ----
    acc = _conv_from(p1s, cw2_ref, K2, L2, C2)
    y2s[...] = _tanh_bn(acc, cb2_ref, bn2s_ref, bn2t_ref)
    _maxpool_into(y2s, p2s, L2, 4, 2)

    # ---- block 3: Conv1d(20,40,5) + Tanh + BN(40) + MaxPool1d(2,2) ----
    acc = _conv_from(p2s, cw3_ref, K3, L3, C3)
    y3s[...] = _tanh_bn(acc, cb3_ref, bn3s_ref, bn3t_ref)
    _maxpool_into(y3s, p3s, L3, 2, 2)

    # ---- MLP: the 680-wide flatten is folded into per-row matmuls; mw1 rows were
    #      pre-permuted on the host to the kernel's (L, C) order, so no in-kernel
    #      transpose/reshape is needed (row offsets l*40 are 8-aligned).
    acc = jnp.zeros((1, H1), jnp.float32)
    for l in range(P3):
        acc = acc + jnp.dot(p3s[pl.ds(l, 1), :],
                            mw1_ref[pl.ds(l * C3, C3), :],
                            preferred_element_type=jnp.float32)
    z = jnp.tanh(acc + mb1_ref[...])
    z = jnp.tanh(jnp.dot(z, mw2_ref[...], preferred_element_type=jnp.float32) + mb2_ref[...])
    o_ref[...] = jnp.dot(z, mw3_ref[...], preferred_element_type=jnp.float32) + mb3_ref[...]


# -------------------------------------- wrapper ---------------------------------------- #
def cnn_forward(x, p):
    B, L = x.shape
    assert L == L_IN
    x3 = x.reshape(B, L_IN, 1)        # unsqueeze(1) in channels-last form: (B, L, Cin=1)

    vmem = pl.BlockSpec(memory_space=pltpu.MemorySpace.VMEM)   # whole-array VMEM operand
    weight_args = (
        p["cw1"], p["cb1"], p["bn1_scale"], p["bn1_shift"],
        p["cw2"], p["cb2"], p["bn2_scale"], p["bn2_shift"],
        p["cw3"], p["cb3"], p["bn3_scale"], p["bn3_shift"],
        p["mw1"], p["mb1"], p["mw2"], p["mb2"], p["mw3"], p["mb3"],
    )

    out = pl.pallas_call(
        cnn_fused_kernel,
        out_shape=jax.ShapeDtypeStruct((B, 1, OUT), jnp.float32),
        grid=(B,),
        in_specs=[pl.BlockSpec((None, L_IN, 1), lambda b: (b, 0, 0))]
                 + [vmem] * len(weight_args),
        out_specs=pl.BlockSpec((None, 1, OUT), lambda b: (b, 0, 0)),
        scratch_shapes=[
            pltpu.VMEM((L1, C1), jnp.float32),   # conv1 output
            pltpu.VMEM((P1, C1), jnp.float32),   # pool1 output
            pltpu.VMEM((L2, C2), jnp.float32),   # conv2 output
            pltpu.VMEM((P2, C2), jnp.float32),   # pool2 output
            pltpu.VMEM((L3, C3), jnp.float32),   # conv3 output
            pltpu.VMEM((P3, C3), jnp.float32),   # pool3 output (flatten source)
        ],
        compiler_params=pltpu.CompilerParams(
            dimension_semantics=("parallel",),          # batch across TCs (v7x megacore)
            vmem_limit_bytes=32 * 1024 * 1024,          # safe on v5e/v6e/v7x; usage << 2 MiB
        ),
    )(x3, *weight_args)
    return out.reshape(B, OUT)


# ------------------------------------- parameters -------------------------------------- #
def init_params(key):
    ks = jax.random.split(key, 9)

    def conv_layer(kw, kb, cout, cin, ksz):
        w_pt = jax.random.normal(kw, (cout, cin, ksz), jnp.float32) * 0.1   # PyTorch (Cout,Cin,K)
        b_pt = jax.random.normal(kb, (cout,), jnp.float32) * 0.01
        w_k = jnp.transpose(w_pt, (2, 1, 0))                                 # kernel layout (K,Cin,Cout)
        return w_k, b_pt.reshape(1, cout)

    def bn(cout):
        # TODO(synk): BatchNorm1d implemented with inference (running-stats) semantics;
        # training-mode batch statistics are not computed in-kernel.
        gamma = jnp.ones((1, cout), jnp.float32)
        beta = jnp.zeros((1, cout), jnp.float32)
        rmean = jnp.zeros((1, cout), jnp.float32)
        rvar = jnp.ones((1, cout), jnp.float32)
        scale = gamma / jnp.sqrt(rvar + BN_EPS)
        shift = beta - rmean * scale
        return scale, shift

    p = {}
    p["cw1"], p["cb1"] = conv_layer(ks[0], ks[1], C1, 1, K1)
    p["bn1_scale"], p["bn1_shift"] = bn(C1)
    p["cw2"], p["cb2"] = conv_layer(ks[2], ks[3], C2, C1, K2)
    p["bn2_scale"], p["bn2_shift"] = bn(C2)
    p["cw3"], p["cb3"] = conv_layer(ks[4], ks[5], C3, C2, K3)
    p["bn3_scale"], p["bn3_shift"] = bn(C3)

    # fc1: PyTorch layout (160, 680) with input index c*17 + l (view(-1, 40*17) order);
    # permute the input dimension to the kernel's (L, C)-major order l*40 + c and
    # transpose so the kernel computes x_flat @ mw1.
    w1_pt = jax.random.normal(ks[6], (H1, FLAT), jnp.float32) * 0.05
    p["mw1"] = jnp.transpose(w1_pt.reshape(H1, C3, P3), (2, 1, 0)).reshape(FLAT, H1)
    p["mb1"] = jnp.zeros((1, H1), jnp.float32)
    w2_pt = jax.random.normal(ks[7], (H2, H1), jnp.float32) * 0.05
    p["mw2"] = w2_pt.T
    p["mb2"] = jnp.zeros((1, H2), jnp.float32)
    w3_pt = jax.random.normal(ks[8], (OUT, H2), jnp.float32) * 0.05
    p["mw3"] = w3_pt.T
    p["mb3"] = jnp.zeros((1, OUT), jnp.float32)
    return p


if __name__ == "__main__":
    key = jax.random.PRNGKey(0)
    pkey, xkey = jax.random.split(key)
    params = init_params(pkey)
    # L=200 is consistent with the 40*17 flatten in the module.
    x = jax.random.normal(xkey, (2, L_IN), jnp.float32)
    out = jax.jit(cnn_forward)(x, params)
    out = jax.block_until_ready(out)
    assert out.shape == (2, 10)
    assert bool(jnp.all(jnp.isfinite(out)))
    print("KERNEL_OK")
</pallas_src>

<mosaic_0001>
module attributes {stable_mosaic.version = 11 : i64} {
  func.func @cnn_fused_kernel(%arg0: i32, %arg1: memref<1x200x1xf32, #tpu.memory_space<vmem>>, %arg2: memref<20x1x10xf32, #tpu.memory_space<vmem>>, %arg3: memref<1x10xf32, #tpu.memory_space<vmem>>, %arg4: memref<1x10xf32, #tpu.memory_space<vmem>>, %arg5: memref<1x10xf32, #tpu.memory_space<vmem>>, %arg6: memref<10x10x20xf32, #tpu.memory_space<vmem>>, %arg7: memref<1x20xf32, #tpu.memory_space<vmem>>, %arg8: memref<1x20xf32, #tpu.memory_space<vmem>>, %arg9: memref<1x20xf32, #tpu.memory_space<vmem>>, %arg10: memref<5x20x40xf32, #tpu.memory_space<vmem>>, %arg11: memref<1x40xf32, #tpu.memory_space<vmem>>, %arg12: memref<1x40xf32, #tpu.memory_space<vmem>>, %arg13: memref<1x40xf32, #tpu.memory_space<vmem>>, %arg14: memref<680x160xf32, #tpu.memory_space<vmem>>, %arg15: memref<1x160xf32, #tpu.memory_space<vmem>>, %arg16: memref<160x80xf32, #tpu.memory_space<vmem>>, %arg17: memref<1x80xf32, #tpu.memory_space<vmem>>, %arg18: memref<80x10xf32, #tpu.memory_space<vmem>>, %arg19: memref<1x10xf32, #tpu.memory_space<vmem>>, %arg20: memref<1x1x10xf32, #tpu.memory_space<vmem>>, %arg21: memref<181x10xf32, #tpu.memory_space<vmem>>, %arg22: memref<89x10xf32, #tpu.memory_space<vmem>>, %arg23: memref<80x20xf32, #tpu.memory_space<vmem>>, %arg24: memref<39x20xf32, #tpu.memory_space<vmem>>, %arg25: memref<35x40xf32, #tpu.memory_space<vmem>>, %arg26: memref<17x40xf32, #tpu.memory_space<vmem>>) attributes {dimension_semantics = [#tpu.dimension_semantics<parallel>], iteration_bounds = array<i64: 2>, scalar_prefetch = 0 : i64, scratch_operands = 6 : i64, tpu.core_type = #tpu.core_type<tc>, window_params = [{transform_indices = @transform_0, window_bounds = array<i64: 1, 200, 1>}, {pipeline_mode = #tpu.pipeline_mode<synchronous>, transform_indices = @transform_1, window_bounds = array<i64: 20, 1, 10>}, {pipeline_mode = #tpu.pipeline_mode<synchronous>, transform_indices = @transform_2, window_bounds = array<i64: 1, 10>}, {pipeline_mode = #tpu.pipeline_mode<synchronous>, transform_indices = @transform_3, window_bounds = array<i64: 1, 10>}, {pipeline_mode = #tpu.pipeline_mode<synchronous>, transform_indices = @transform_4, window_bounds = array<i64: 1, 10>}, {pipeline_mode = #tpu.pipeline_mode<synchronous>, transform_indices = @transform_5, window_bounds = array<i64: 10, 10, 20>}, {pipeline_mode = #tpu.pipeline_mode<synchronous>, transform_indices = @transform_6, window_bounds = array<i64: 1, 20>}, {pipeline_mode = #tpu.pipeline_mode<synchronous>, transform_indices = @transform_7, window_bounds = array<i64: 1, 20>}, {pipeline_mode = #tpu.pipeline_mode<synchronous>, transform_indices = @transform_8, window_bounds = array<i64: 1, 20>}, {pipeline_mode = #tpu.pipeline_mode<synchronous>, transform_indices = @transform_9, window_bounds = array<i64: 5, 20, 40>}, {pipeline_mode = #tpu.pipeline_mode<synchronous>, transform_indices = @transform_10, window_bounds = array<i64: 1, 40>}, {pipeline_mode = #tpu.pipeline_mode<synchronous>, transform_indices = @transform_11, window_bounds = array<i64: 1, 40>}, {pipeline_mode = #tpu.pipeline_mode<synchronous>, transform_indices = @transform_12, window_bounds = array<i64: 1, 40>}, {pipeline_mode = #tpu.pipeline_mode<synchronous>, transform_indices = @transform_13, window_bounds = array<i64: 680, 160>}, {pipeline_mode = #tpu.pipeline_mode<synchronous>, transform_indices = @transform_14, window_bounds = array<i64: 1, 160>}, {pipeline_mode = #tpu.pipeline_mode<synchronous>, transform_indices = @transform_15, window_bounds = array<i64: 160, 80>}, {pipeline_mode = #tpu.pipeline_mode<synchronous>, transform_indices = @transform_16, window_bounds = array<i64: 1, 80>}, {pipeline_mode = #tpu.pipeline_mode<synchronous>, transform_indices = @transform_17, window_bounds = array<i64: 80, 10>}, {pipeline_mode = #tpu.pipeline_mode<synchronous>, transform_indices = @transform_18, window_bounds = array<i64: 1, 10>}, {transform_indices = @transform_19, window_bounds = array<i64: 1, 1, 10>}]} {
    %cst = arith.constant 0.000000e+00 : f32
    %0 = vector.broadcast %cst : f32 to vector<181x10xf32>
    %c0 = arith.constant 0 : index
    %c0_0 = arith.constant 0 : index
    %c0_1 = arith.constant 0 : index
    %1 = vector.load %arg1[%c0, %c0_0, %c0_1] : memref<1x200x1xf32, #tpu.memory_space<vmem>>, vector<1x181x1xf32>
    %2 = vector.shape_cast %1 : vector<1x181x1xf32> to vector<181x1xf32>
    %c0_2 = arith.constant 0 : index
    %c0_3 = arith.constant 0 : index
    %c0_4 = arith.constant 0 : index
    %3 = vector.load %arg2[%c0_2, %c0_3, %c0_4] : memref<20x1x10xf32, #tpu.memory_space<vmem>>, vector<1x1x10xf32>
    %4 = vector.shape_cast %3 : vector<1x1x10xf32> to vector<1x10xf32>
    %5 = vector.broadcast %2 : vector<181x1xf32> to vector<181x10xf32>
    %6 = vector.broadcast %4 : vector<1x10xf32> to vector<181x10xf32>
    %7 = arith.mulf %5, %6 : vector<181x10xf32>
    %8 = arith.addf %0, %7 : vector<181x10xf32>
    %c0_5 = arith.constant 0 : index
    %c1 = arith.constant 1 : index
    %c0_6 = arith.constant 0 : index
    %9 = vector.load %arg1[%c0_5, %c1, %c0_6] : memref<1x200x1xf32, #tpu.memory_space<vmem>>, vector<1x181x1xf32>
    %10 = vector.shape_cast %9 : vector<1x181x1xf32> to vector<181x1xf32>
    %c1_7 = arith.constant 1 : index
    %c0_8 = arith.constant 0 : index
    %c0_9 = arith.constant 0 : index
    %11 = vector.load %arg2[%c1_7, %c0_8, %c0_9] : memref<20x1x10xf32, #tpu.memory_space<vmem>>, vector<1x1x10xf32>
    %12 = vector.shape_cast %11 : vector<1x1x10xf32> to vector<1x10xf32>
    %13 = vector.broadcast %10 : vector<181x1xf32> to vector<181x10xf32>
    %14 = vector.broadcast %12 : vector<1x10xf32> to vector<181x10xf32>
    %15 = arith.mulf %13, %14 : vector<181x10xf32>
    %16 = arith.addf %8, %15 : vector<181x10xf32>
    %c0_10 = arith.constant 0 : index
    %c2 = arith.constant 2 : index
    %c0_11 = arith.constant 0 : index
    %17 = vector.load %arg1[%c0_10, %c2, %c0_11] : memref<1x200x1xf32, #tpu.memory_space<vmem>>, vector<1x181x1xf32>
    %18 = vector.shape_cast %17 : vector<1x181x1xf32> to vector<181x1xf32>
    %c2_12 = arith.constant 2 : index
    %c0_13 = arith.constant 0 : index
    %c0_14 = arith.constant 0 : index
    %19 = vector.load %arg2[%c2_12, %c0_13, %c0_14] : memref<20x1x10xf32, #tpu.memory_space<vmem>>, vector<1x1x10xf32>
    %20 = vector.shape_cast %19 : vector<1x1x10xf32> to vector<1x10xf32>
    %21 = vector.broadcast %18 : vector<181x1xf32> to vector<181x10xf32>
    %22 = vector.broadcast %20 : vector<1x10xf32> to vector<181x10xf32>
    %23 = arith.mulf %21, %22 : vector<181x10xf32>
    %24 = arith.addf %16, %23 : vector<181x10xf32>
    %c0_15 = arith.constant 0 : index
    %c3 = arith.constant 3 : index
    %c0_16 = arith.constant 0 : index
    %25 = vector.load %arg1[%c0_15, %c3, %c0_16] : memref<1x200x1xf32, #tpu.memory_space<vmem>>, vector<1x181x1xf32>
    %26 = vector.shape_cast %25 : vector<1x181x1xf32> to vector<181x1xf32>
    %c3_17 = arith.constant 3 : index
    %c0_18 = arith.constant 0 : index
    %c0_19 = arith.constant 0 : index
    %27 = vector.load %arg2[%c3_17, %c0_18, %c0_19] : memref<20x1x10xf32, #tpu.memory_space<vmem>>, vector<1x1x10xf32>
    %28 = vector.shape_cast %27 : vector<1x1x10xf32> to vector<1x10xf32>
    %29 = vector.broadcast %26 : vector<181x1xf32> to vector<181x10xf32>
    %30 = vector.broadcast %28 : vector<1x10xf32> to vector<181x10xf32>
    %31 = arith.mulf %29, %30 : vector<181x10xf32>
    %32 = arith.addf %24, %31 : vector<181x10xf32>
    %c0_20 = arith.constant 0 : index
    %c4 = arith.constant 4 : index
    %c0_21 = arith.constant 0 : index
    %33 = vector.load %arg1[%c0_20, %c4, %c0_21] : memref<1x200x1xf32, #tpu.memory_space<vmem>>, vector<1x181x1xf32>
    %34 = vector.shape_cast %33 : vector<1x181x1xf32> to vector<181x1xf32>
    %c4_22 = arith.constant 4 : index
    %c0_23 = arith.constant 0 : index
    %c0_24 = arith.constant 0 : index
    %35 = vector.load %arg2[%c4_22, %c0_23, %c0_24] : memref<20x1x10xf32, #tpu.memory_space<vmem>>, vector<1x1x10xf32>
    %36 = vector.shape_cast %35 : vector<1x1x10xf32> to vector<1x10xf32>
    %37 = vector.broadcast %34 : vector<181x1xf32> to vector<181x10xf32>
    %38 = vector.broadcast %36 : vector<1x10xf32> to vector<181x10xf32>
    %39 = arith.mulf %37, %38 : vector<181x10xf32>
    %40 = arith.addf %32, %39 : vector<181x10xf32>
    %c0_25 = arith.constant 0 : index
    %c5 = arith.constant 5 : index
    %c0_26 = arith.constant 0 : index
    %41 = vector.load %arg1[%c0_25, %c5, %c0_26] : memref<1x200x1xf32, #tpu.memory_space<vmem>>, vector<1x181x1xf32>
    %42 = vector.shape_cast %41 : vector<1x181x1xf32> to vector<181x1xf32>
    %c5_27 = arith.constant 5 : index
    %c0_28 = arith.constant 0 : index
    %c0_29 = arith.constant 0 : index
    %43 = vector.load %arg2[%c5_27, %c0_28, %c0_29] : memref<20x1x10xf32, #tpu.memory_space<vmem>>, vector<1x1x10xf32>
    %44 = vector.shape_cast %43 : vector<1x1x10xf32> to vector<1x10xf32>
    %45 = vector.broadcast %42 : vector<181x1xf32> to vector<181x10xf32>
    %46 = vector.broadcast %44 : vector<1x10xf32> to vector<181x10xf32>
    %47 = arith.mulf %45, %46 : vector<181x10xf32>
    %48 = arith.addf %40, %47 : vector<181x10xf32>
    %c0_30 = arith.constant 0 : index
    %c6 = arith.constant 6 : index
    %c0_31 = arith.constant 0 : index
    %49 = vector.load %arg1[%c0_30, %c6, %c0_31] : memref<1x200x1xf32, #tpu.memory_space<vmem>>, vector<1x181x1xf32>
    %50 = vector.shape_cast %49 : vector<1x181x1xf32> to vector<181x1xf32>
    %c6_32 = arith.constant 6 : index
    %c0_33 = arith.constant 0 : index
    %c0_34 = arith.constant 0 : index
    %51 = vector.load %arg2[%c6_32, %c0_33, %c0_34] : memref<20x1x10xf32, #tpu.memory_space<vmem>>, vector<1x1x10xf32>
    %52 = vector.shape_cast %51 : vector<1x1x10xf32> to vector<1x10xf32>
    %53 = vector.broadcast %50 : vector<181x1xf32> to vector<181x10xf32>
    %54 = vector.broadcast %52 : vector<1x10xf32> to vector<181x10xf32>
    %55 = arith.mulf %53, %54 : vector<181x10xf32>
    %56 = arith.addf %48, %55 : vector<181x10xf32>
    %c0_35 = arith.constant 0 : index
    %c7 = arith.constant 7 : index
    %c0_36 = arith.constant 0 : index
    %57 = vector.load %arg1[%c0_35, %c7, %c0_36] : memref<1x200x1xf32, #tpu.memory_space<vmem>>, vector<1x181x1xf32>
    %58 = vector.shape_cast %57 : vector<1x181x1xf32> to vector<181x1xf32>
    %c7_37 = arith.constant 7 : index
    %c0_38 = arith.constant 0 : index
    %c0_39 = arith.constant 0 : index
    %59 = vector.load %arg2[%c7_37, %c0_38, %c0_39] : memref<20x1x10xf32, #tpu.memory_space<vmem>>, vector<1x1x10xf32>
    %60 = vector.shape_cast %59 : vector<1x1x10xf32> to vector<1x10xf32>
    %61 = vector.broadcast %58 : vector<181x1xf32> to vector<181x10xf32>
    %62 = vector.broadcast %60 : vector<1x10xf32> to vector<181x10xf32>
    %63 = arith.mulf %61, %62 : vector<181x10xf32>
    %64 = arith.addf %56, %63 : vector<181x10xf32>
    %c0_40 = arith.constant 0 : index
    %c8 = arith.constant 8 : index
    %c0_41 = arith.constant 0 : index
    %65 = vector.load %arg1[%c0_40, %c8, %c0_41] : memref<1x200x1xf32, #tpu.memory_space<vmem>>, vector<1x181x1xf32>
    %66 = vector.shape_cast %65 : vector<1x181x1xf32> to vector<181x1xf32>
    %c8_42 = arith.constant 8 : index
    %c0_43 = arith.constant 0 : index
    %c0_44 = arith.constant 0 : index
    %67 = vector.load %arg2[%c8_42, %c0_43, %c0_44] : memref<20x1x10xf32, #tpu.memory_space<vmem>>, vector<1x1x10xf32>
    %68 = vector.shape_cast %67 : vector<1x1x10xf32> to vector<1x10xf32>
    %69 = vector.broadcast %66 : vector<181x1xf32> to vector<181x10xf32>
    %70 = vector.broadcast %68 : vector<1x10xf32> to vector<181x10xf32>
    %71 = arith.mulf %69, %70 : vector<181x10xf32>
    %72 = arith.addf %64, %71 : vector<181x10xf32>
    %c0_45 = arith.constant 0 : index
    %c9 = arith.constant 9 : index
    %c0_46 = arith.constant 0 : index
    %73 = vector.load %arg1[%c0_45, %c9, %c0_46] : memref<1x200x1xf32, #tpu.memory_space<vmem>>, vector<1x181x1xf32>
    %74 = vector.shape_cast %73 : vector<1x181x1xf32> to vector<181x1xf32>
    %c9_47 = arith.constant 9 : index
    %c0_48 = arith.constant 0 : index
    %c0_49 = arith.constant 0 : index
    %75 = vector.load %arg2[%c9_47, %c0_48, %c0_49] : memref<20x1x10xf32, #tpu.memory_space<vmem>>, vector<1x1x10xf32>
    %76 = vector.shape_cast %75 : vector<1x1x10xf32> to vector<1x10xf32>
    %77 = vector.broadcast %74 : vector<181x1xf32> to vector<181x10xf32>
    %78 = vector.broadcast %76 : vector<1x10xf32> to vector<181x10xf32>
    %79 = arith.mulf %77, %78 : vector<181x10xf32>
    %80 = arith.addf %72, %79 : vector<181x10xf32>
    %c0_50 = arith.constant 0 : index
    %c10 = arith.constant 10 : index
    %c0_51 = arith.constant 0 : index
    %81 = vector.load %arg1[%c0_50, %c10, %c0_51] : memref<1x200x1xf32, #tpu.memory_space<vmem>>, vector<1x181x1xf32>
    %82 = vector.shape_cast %81 : vector<1x181x1xf32> to vector<181x1xf32>
    %c10_52 = arith.constant 10 : index
    %c0_53 = arith.constant 0 : index
    %c0_54 = arith.constant 0 : index
    %83 = vector.load %arg2[%c10_52, %c0_53, %c0_54] : memref<20x1x10xf32, #tpu.memory_space<vmem>>, vector<1x1x10xf32>
    %84 = vector.shape_cast %83 : vector<1x1x10xf32> to vector<1x10xf32>
    %85 = vector.broadcast %82 : vector<181x1xf32> to vector<181x10xf32>
    %86 = vector.broadcast %84 : vector<1x10xf32> to vector<181x10xf32>
    %87 = arith.mulf %85, %86 : vector<181x10xf32>
    %88 = arith.addf %80, %87 : vector<181x10xf32>
    %c0_55 = arith.constant 0 : index
    %c11 = arith.constant 11 : index
    %c0_56 = arith.constant 0 : index
    %89 = vector.load %arg1[%c0_55, %c11, %c0_56] : memref<1x200x1xf32, #tpu.memory_space<vmem>>, vector<1x181x1xf32>
    %90 = vector.shape_cast %89 : vector<1x181x1xf32> to vector<181x1xf32>
    %c11_57 = arith.constant 11 : index
    %c0_58 = arith.constant 0 : index
    %c0_59 = arith.constant 0 : index
    %91 = vector.load %arg2[%c11_57, %c0_58, %c0_59] : memref<20x1x10xf32, #tpu.memory_space<vmem>>, vector<1x1x10xf32>
    %92 = vector.shape_cast %91 : vector<1x1x10xf32> to vector<1x10xf32>
    %93 = vector.broadcast %90 : vector<181x1xf32> to vector<181x10xf32>
    %94 = vector.broadcast %92 : vector<1x10xf32> to vector<181x10xf32>
    %95 = arith.mulf %93, %94 : vector<181x10xf32>
    %96 = arith.addf %88, %95 : vector<181x10xf32>
    %c0_60 = arith.constant 0 : index
    %c12 = arith.constant 12 : index
    %c0_61 = arith.constant 0 : index
    %97 = vector.load %arg1[%c0_60, %c12, %c0_61] : memref<1x200x1xf32, #tpu.memory_space<vmem>>, vector<1x181x1xf32>
    %98 = vector.shape_cast %97 : vector<1x181x1xf32> to vector<181x1xf32>
    %c12_62 = arith.constant 12 : index
    %c0_63 = arith.constant 0 : index
    %c0_64 = arith.constant 0 : index
    %99 = vector.load %arg2[%c12_62, %c0_63, %c0_64] : memref<20x1x10xf32, #tpu.memory_space<vmem>>, vector<1x1x10xf32>
    %100 = vector.shape_cast %99 : vector<1x1x10xf32> to vector<1x10xf32>
    %101 = vector.broadcast %98 : vector<181x1xf32> to vector<181x10xf32>
    %102 = vector.broadcast %100 : vector<1x10xf32> to vector<181x10xf32>
    %103 = arith.mulf %101, %102 : vector<181x10xf32>
    %104 = arith.addf %96, %103 : vector<181x10xf32>
    %c0_65 = arith.constant 0 : index
    %c13 = arith.constant 13 : index
    %c0_66 = arith.constant 0 : index
    %105 = vector.load %arg1[%c0_65, %c13, %c0_66] : memref<1x200x1xf32, #tpu.memory_space<vmem>>, vector<1x181x1xf32>
    %106 = vector.shape_cast %105 : vector<1x181x1xf32> to vector<181x1xf32>
    %c13_67 = arith.constant 13 : index
    %c0_68 = arith.constant 0 : index
    %c0_69 = arith.constant 0 : index
    %107 = vector.load %arg2[%c13_67, %c0_68, %c0_69] : memref<20x1x10xf32, #tpu.memory_space<vmem>>, vector<1x1x10xf32>
    %108 = vector.shape_cast %107 : vector<1x1x10xf32> to vector<1x10xf32>
    %109 = vector.broadcast %106 : vector<181x1xf32> to vector<181x10xf32>
    %110 = vector.broadcast %108 : vector<1x10xf32> to vector<181x10xf32>
    %111 = arith.mulf %109, %110 : vector<181x10xf32>
    %112 = arith.addf %104, %111 : vector<181x10xf32>
    %c0_70 = arith.constant 0 : index
    %c14 = arith.constant 14 : index
    %c0_71 = arith.constant 0 : index
    %113 = vector.load %arg1[%c0_70, %c14, %c0_71] : memref<1x200x1xf32, #tpu.memory_space<vmem>>, vector<1x181x1xf32>
    %114 = vector.shape_cast %113 : vector<1x181x1xf32> to vector<181x1xf32>
    %c14_72 = arith.constant 14 : index
    %c0_73 = arith.constant 0 : index
    %c0_74 = arith.constant 0 : index
    %115 = vector.load %arg2[%c14_72, %c0_73, %c0_74] : memref<20x1x10xf32, #tpu.memory_space<vmem>>, vector<1x1x10xf32>
    %116 = vector.shape_cast %115 : vector<1x1x10xf32> to vector<1x10xf32>
    %117 = vector.broadcast %114 : vector<181x1xf32> to vector<181x10xf32>
    %118 = vector.broadcast %116 : vector<1x10xf32> to vector<181x10xf32>
    %119 = arith.mulf %117, %118 : vector<181x10xf32>
    %120 = arith.addf %112, %119 : vector<181x10xf32>
    %c0_75 = arith.constant 0 : index
    %c15 = arith.constant 15 : index
    %c0_76 = arith.constant 0 : index
    %121 = vector.load %arg1[%c0_75, %c15, %c0_76] : memref<1x200x1xf32, #tpu.memory_space<vmem>>, vector<1x181x1xf32>
    %122 = vector.shape_cast %121 : vector<1x181x1xf32> to vector<181x1xf32>
    %c15_77 = arith.constant 15 : index
    %c0_78 = arith.constant 0 : index
    %c0_79 = arith.constant 0 : index
    %123 = vector.load %arg2[%c15_77, %c0_78, %c0_79] : memref<20x1x10xf32, #tpu.memory_space<vmem>>, vector<1x1x10xf32>
    %124 = vector.shape_cast %123 : vector<1x1x10xf32> to vector<1x10xf32>
    %125 = vector.broadcast %122 : vector<181x1xf32> to vector<181x10xf32>
    %126 = vector.broadcast %124 : vector<1x10xf32> to vector<181x10xf32>
    %127 = arith.mulf %125, %126 : vector<181x10xf32>
    %128 = arith.addf %120, %127 : vector<181x10xf32>
    %c0_80 = arith.constant 0 : index
    %c16 = arith.constant 16 : index
    %c0_81 = arith.constant 0 : index
    %129 = vector.load %arg1[%c0_80, %c16, %c0_81] : memref<1x200x1xf32, #tpu.memory_space<vmem>>, vector<1x181x1xf32>
    %130 = vector.shape_cast %129 : vector<1x181x1xf32> to vector<181x1xf32>
    %c16_82 = arith.constant 16 : index
    %c0_83 = arith.constant 0 : index
    %c0_84 = arith.constant 0 : index
    %131 = vector.load %arg2[%c16_82, %c0_83, %c0_84] : memref<20x1x10xf32, #tpu.memory_space<vmem>>, vector<1x1x10xf32>
    %132 = vector.shape_cast %131 : vector<1x1x10xf32> to vector<1x10xf32>
    %133 = vector.broadcast %130 : vector<181x1xf32> to vector<181x10xf32>
    %134 = vector.broadcast %132 : vector<1x10xf32> to vector<181x10xf32>
    %135 = arith.mulf %133, %134 : vector<181x10xf32>
    %136 = arith.addf %128, %135 : vector<181x10xf32>
    %c0_85 = arith.constant 0 : index
    %c17 = arith.constant 17 : index
    %c0_86 = arith.constant 0 : index
    %137 = vector.load %arg1[%c0_85, %c17, %c0_86] : memref<1x200x1xf32, #tpu.memory_space<vmem>>, vector<1x181x1xf32>
    %138 = vector.shape_cast %137 : vector<1x181x1xf32> to vector<181x1xf32>
    %c17_87 = arith.constant 17 : index
    %c0_88 = arith.constant 0 : index
    %c0_89 = arith.constant 0 : index
    %139 = vector.load %arg2[%c17_87, %c0_88, %c0_89] : memref<20x1x10xf32, #tpu.memory_space<vmem>>, vector<1x1x10xf32>
    %140 = vector.shape_cast %139 : vector<1x1x10xf32> to vector<1x10xf32>
    %141 = vector.broadcast %138 : vector<181x1xf32> to vector<181x10xf32>
    %142 = vector.broadcast %140 : vector<1x10xf32> to vector<181x10xf32>
    %143 = arith.mulf %141, %142 : vector<181x10xf32>
    %144 = arith.addf %136, %143 : vector<181x10xf32>
    %c0_90 = arith.constant 0 : index
    %c18 = arith.constant 18 : index
    %c0_91 = arith.constant 0 : index
    %145 = vector.load %arg1[%c0_90, %c18, %c0_91] : memref<1x200x1xf32, #tpu.memory_space<vmem>>, vector<1x181x1xf32>
    %146 = vector.shape_cast %145 : vector<1x181x1xf32> to vector<181x1xf32>
    %c18_92 = arith.constant 18 : index
    %c0_93 = arith.constant 0 : index
    %c0_94 = arith.constant 0 : index
    %147 = vector.load %arg2[%c18_92, %c0_93, %c0_94] : memref<20x1x10xf32, #tpu.memory_space<vmem>>, vector<1x1x10xf32>
    %148 = vector.shape_cast %147 : vector<1x1x10xf32> to vector<1x10xf32>
    %149 = vector.broadcast %146 : vector<181x1xf32> to vector<181x10xf32>
    %150 = vector.broadcast %148 : vector<1x10xf32> to vector<181x10xf32>
    %151 = arith.mulf %149, %150 : vector<181x10xf32>
    %152 = arith.addf %144, %151 : vector<181x10xf32>
    %c0_95 = arith.constant 0 : index
    %c19 = arith.constant 19 : index
    %c0_96 = arith.constant 0 : index
    %153 = vector.load %arg1[%c0_95, %c19, %c0_96] : memref<1x200x1xf32, #tpu.memory_space<vmem>>, vector<1x181x1xf32>
    %154 = vector.shape_cast %153 : vector<1x181x1xf32> to vector<181x1xf32>
    %c19_97 = arith.constant 19 : index
    %c0_98 = arith.constant 0 : index
    %c0_99 = arith.constant 0 : index
    %155 = vector.load %arg2[%c19_97, %c0_98, %c0_99] : memref<20x1x10xf32, #tpu.memory_space<vmem>>, vector<1x1x10xf32>
    %156 = vector.shape_cast %155 : vector<1x1x10xf32> to vector<1x10xf32>
    %157 = vector.broadcast %154 : vector<181x1xf32> to vector<181x10xf32>
    %158 = vector.broadcast %156 : vector<1x10xf32> to vector<181x10xf32>
    %159 = arith.mulf %157, %158 : vector<181x10xf32>
    %160 = arith.addf %152, %159 : vector<181x10xf32>
    %c0_100 = arith.constant 0 : index
    %c0_101 = arith.constant 0 : index
    %161 = vector.load %arg3[%c0_100, %c0_101] : memref<1x10xf32, #tpu.memory_space<vmem>>, vector<1x10xf32>
    %162 = vector.broadcast %161 : vector<1x10xf32> to vector<181x10xf32>
    %163 = arith.addf %160, %162 : vector<181x10xf32>
    %164 = math.tanh %163 : vector<181x10xf32>
    %c0_102 = arith.constant 0 : index
    %c0_103 = arith.constant 0 : index
    %165 = vector.load %arg4[%c0_102, %c0_103] : memref<1x10xf32, #tpu.memory_space<vmem>>, vector<1x10xf32>
    %166 = vector.broadcast %165 : vector<1x10xf32> to vector<181x10xf32>
    %167 = arith.mulf %164, %166 : vector<181x10xf32>
    %c0_104 = arith.constant 0 : index
    %c0_105 = arith.constant 0 : index
    %168 = vector.load %arg5[%c0_104, %c0_105] : memref<1x10xf32, #tpu.memory_space<vmem>>, vector<1x10xf32>
    %169 = vector.broadcast %168 : vector<1x10xf32> to vector<181x10xf32>
    %170 = arith.addf %167, %169 : vector<181x10xf32>
    %c0_106 = arith.constant 0 : index
    %c0_107 = arith.constant 0 : index
    %171 = vector.load %arg21[%c0_106, %c0_107] : memref<181x10xf32, #tpu.memory_space<vmem>>, vector<181x10xf32>
    tpu.vector_store %arg21[%c0_106, %c0_107], %170 {strides = array<i32>} : memref<181x10xf32, #tpu.memory_space<vmem>>, vector<181x10xf32>,
    %c0_108 = arith.constant 0 : index
    %c0_109 = arith.constant 0 : index
    %172 = tpu.strided_load %arg21[%c0_108, %c0_109] {strides = array<i32: 2, 1>} : memref<181x10xf32, #tpu.memory_space<vmem>>, vector<89x10xf32>
    %c1_110 = arith.constant 1 : index
    %c0_111 = arith.constant 0 : index
    %173 = tpu.strided_load %arg21[%c1_110, %c0_111] {strides = array<i32: 2, 1>} : memref<181x10xf32, #tpu.memory_space<vmem>>, vector<89x10xf32>
    %174 = arith.maximumf %172, %173 : vector<89x10xf32>
    %c2_112 = arith.constant 2 : index
    %c0_113 = arith.constant 0 : index
    %175 = tpu.strided_load %arg21[%c2_112, %c0_113] {strides = array<i32: 2, 1>} : memref<181x10xf32, #tpu.memory_space<vmem>>, vector<89x10xf32>
    %176 = arith.maximumf %174, %175 : vector<89x10xf32>
    %c3_114 = arith.constant 3 : index
    %c0_115 = arith.constant 0 : index
    %177 = tpu.strided_load %arg21[%c3_114, %c0_115] {strides = array<i32: 2, 1>} : memref<181x10xf32, #tpu.memory_space<vmem>>, vector<89x10xf32>
    %178 = arith.maximumf %176, %177 : vector<89x10xf32>
    %c0_116 = arith.constant 0 : index
    %c0_117 = arith.constant 0 : index
    %179 = vector.load %arg22[%c0_116, %c0_117] : memref<89x10xf32, #tpu.memory_space<vmem>>, vector<89x10xf32>
    tpu.vector_store %arg22[%c0_116, %c0_117], %178 {strides = array<i32>} : memref<89x10xf32, #tpu.memory_space<vmem>>, vector<89x10xf32>,
    %cst_118 = arith.constant 0.000000e+00 : f32
    %180 = vector.broadcast %cst_118 : f32 to vector<80x20xf32>
    %c0_119 = arith.constant 0 : index
    %c0_120 = arith.constant 0 : index
    %181 = vector.load %arg22[%c0_119, %c0_120] : memref<89x10xf32, #tpu.memory_space<vmem>>, vector<80x10xf32>
    %c0_121 = arith.constant 0 : index
    %c0_122 = arith.constant 0 : index
    %c0_123 = arith.constant 0 : index
    %182 = vector.load %arg6[%c0_121, %c0_122, %c0_123] : memref<10x10x20xf32, #tpu.memory_space<vmem>>, vector<1x10x20xf32>
    %183 = vector.shape_cast %182 : vector<1x10x20xf32> to vector<10x20xf32>
    %cst_124 = arith.constant dense<0.000000e+00> : vector<80x20xf32>
    %184 = tpu.matmul %181, %183, %cst_124 {dimension_numbers = #tpu.dot_dimension_numbers<[1], [0], [0], [1], [0, 0, 1, 1], [], []>} : vector<80x10xf32>, vector<10x20xf32>, vector<80x20xf32> -> vector<80x20xf32>
    %185 = arith.addf %180, %184 : vector<80x20xf32>
    %c1_125 = arith.constant 1 : index
    %c0_126 = arith.constant 0 : index
    %186 = vector.load %arg22[%c1_125, %c0_126] : memref<89x10xf32, #tpu.memory_space<vmem>>, vector<80x10xf32>
    %c1_127 = arith.constant 1 : index
    %c0_128 = arith.constant 0 : index
    %c0_129 = arith.constant 0 : index
    %187 = vector.load %arg6[%c1_127, %c0_128, %c0_129] : memref<10x10x20xf32, #tpu.memory_space<vmem>>, vector<1x10x20xf32>
    %188 = vector.shape_cast %187 : vector<1x10x20xf32> to vector<10x20xf32>
    %cst_130 = arith.constant dense<0.000000e+00> : vector<80x20xf32>
    %189 = tpu.matmul %186, %188, %cst_130 {dimension_numbers = #tpu.dot_dimension_numbers<[1], [0], [0], [1], [0, 0, 1, 1], [], []>} : vector<80x10xf32>, vector<10x20xf32>, vector<80x20xf32> -> vector<80x20xf32>
    %190 = arith.addf %185, %189 : vector<80x20xf32>
    %c2_131 = arith.constant 2 : index
    %c0_132 = arith.constant 0 : index
    %191 = vector.load %arg22[%c2_131, %c0_132] : memref<89x10xf32, #tpu.memory_space<vmem>>, vector<80x10xf32>
    %c2_133 = arith.constant 2 : index
    %c0_134 = arith.constant 0 : index
    %c0_135 = arith.constant 0 : index
    %192 = vector.load %arg6[%c2_133, %c0_134, %c0_135] : memref<10x10x20xf32, #tpu.memory_space<vmem>>, vector<1x10x20xf32>
    %193 = vector.shape_cast %192 : vector<1x10x20xf32> to vector<10x20xf32>
    %cst_136 = arith.constant dense<0.000000e+00> : vector<80x20xf32>
    %194 = tpu.matmul %191, %193, %cst_136 {dimension_numbers = #tpu.dot_dimension_numbers<[1], [0], [0], [1], [0, 0, 1, 1], [], []>} : vector<80x10xf32>, vector<10x20xf32>, vector<80x20xf32> -> vector<80x20xf32>
    %195 = arith.addf %190, %194 : vector<80x20xf32>
    %c3_137 = arith.constant 3 : index
    %c0_138 = arith.constant 0 : index
    %196 = vector.load %arg22[%c3_137, %c0_138] : memref<89x10xf32, #tpu.memory_space<vmem>>, vector<80x10xf32>
    %c3_139 = arith.constant 3 : index
    %c0_140 = arith.constant 0 : index
    %c0_141 = arith.constant 0 : index
    %197 = vector.load %arg6[%c3_139, %c0_140, %c0_141] : memref<10x10x20xf32, #tpu.memory_space<vmem>>, vector<1x10x20xf32>
    %198 = vector.shape_cast %197 : vector<1x10x20xf32> to vector<10x20xf32>
    %cst_142 = arith.constant dense<0.000000e+00> : vector<80x20xf32>
    %199 = tpu.matmul %196, %198, %cst_142 {dimension_numbers = #tpu.dot_dimension_numbers<[1], [0], [0], [1], [0, 0, 1, 1], [], []>} : vector<80x10xf32>, vector<10x20xf32>, vector<80x20xf32> -> vector<80x20xf32>
    %200 = arith.addf %195, %199 : vector<80x20xf32>
    %c4_143 = arith.constant 4 : index
    %c0_144 = arith.constant 0 : index
    %201 = vector.load %arg22[%c4_143, %c0_144] : memref<89x10xf32, #tpu.memory_space<vmem>>, vector<80x10xf32>
    %c4_145 = arith.constant 4 : index
    %c0_146 = arith.constant 0 : index
    %c0_147 = arith.constant 0 : index
    %202 = vector.load %arg6[%c4_145, %c0_146, %c0_147] : memref<10x10x20xf32, #tpu.memory_space<vmem>>, vector<1x10x20xf32>
    %203 = vector.shape_cast %202 : vector<1x10x20xf32> to vector<10x20xf32>
    %cst_148 = arith.constant dense<0.000000e+00> : vector<80x20xf32>
    %204 = tpu.matmul %201, %203, %cst_148 {dimension_numbers = #tpu.dot_dimension_numbers<[1], [0], [0], [1], [0, 0, 1, 1], [], []>} : vector<80x10xf32>, vector<10x20xf32>, vector<80x20xf32> -> vector<80x20xf32>
    %205 = arith.addf %200, %204 : vector<80x20xf32>
    %c5_149 = arith.constant 5 : index
    %c0_150 = arith.constant 0 : index
    %206 = vector.load %arg22[%c5_149, %c0_150] : memref<89x10xf32, #tpu.memory_space<vmem>>, vector<80x10xf32>
    %c5_151 = arith.constant 5 : index
    %c0_152 = arith.constant 0 : index
    %c0_153 = arith.constant 0 : index
    %207 = vector.load %arg6[%c5_151, %c0_152, %c0_153] : memref<10x10x20xf32, #tpu.memory_space<vmem>>, vector<1x10x20xf32>
    %208 = vector.shape_cast %207 : vector<1x10x20xf32> to vector<10x20xf32>
    %cst_154 = arith.constant dense<0.000000e+00> : vector<80x20xf32>
    %209 = tpu.matmul %206, %208, %cst_154 {dimension_numbers = #tpu.dot_dimension_numbers<[1], [0], [0], [1], [0, 0, 1, 1], [], []>} : vector<80x10xf32>, vector<10x20xf32>, vector<80x20xf32> -> vector<80x20xf32>
    %210 = arith.addf %205, %209 : vector<80x20xf32>
    %c6_155 = arith.constant 6 : index
    %c0_156 = arith.constant 0 : index
    %211 = vector.load %arg22[%c6_155, %c0_156] : memref<89x10xf32, #tpu.memory_space<vmem>>, vector<80x10xf32>
    %c6_157 = arith.constant 6 : index
    %c0_158 = arith.constant 0 : index
    %c0_159 = arith.constant 0 : index
    %212 = vector.load %arg6[%c6_157, %c0_158, %c0_159] : memref<10x10x20xf32, #tpu.memory_space<vmem>>, vector<1x10x20xf32>
    %213 = vector.shape_cast %212 : vector<1x10x20xf32> to vector<10x20xf32>
    %cst_160 = arith.constant dense<0.000000e+00> : vector<80x20xf32>
    %214 = tpu.matmul %211, %213, %cst_160 {dimension_numbers = #tpu.dot_dimension_numbers<[1], [0], [0], [1], [0, 0, 1, 1], [], []>} : vector<80x10xf32>, vector<10x20xf32>, vector<80x20xf32> -> vector<80x20xf32>
    %215 = arith.addf %210, %214 : vector<80x20xf32>
    %c7_161 = arith.constant 7 : index
    %c0_162 = arith.constant 0 : index
    %216 = vector.load %arg22[%c7_161, %c0_162] : memref<89x10xf32, #tpu.memory_space<vmem>>, vector<80x10xf32>
    %c7_163 = arith.constant 7 : index
    %c0_164 = arith.constant 0 : index
    %c0_165 = arith.constant 0 : index
    %217 = vector.load %arg6[%c7_163, %c0_164, %c0_165] : memref<10x10x20xf32, #tpu.memory_space<vmem>>, vector<1x10x20xf32>
    %218 = vector.shape_cast %217 : vector<1x10x20xf32> to vector<10x20xf32>
    %cst_166 = arith.constant dense<0.000000e+00> : vector<80x20xf32>
    %219 = tpu.matmul %216, %218, %cst_166 {dimension_numbers = #tpu.dot_dimension_numbers<[1], [0], [0], [1], [0, 0, 1, 1], [], []>} : vector<80x10xf32>, vector<10x20xf32>, vector<80x20xf32> -> vector<80x20xf32>
    %220 = arith.addf %215, %219 : vector<80x20xf32>
    %c8_167 = arith.constant 8 : index
    %c0_168 = arith.constant 0 : index
    %221 = vector.load %arg22[%c8_167, %c0_168] : memref<89x10xf32, #tpu.memory_space<vmem>>, vector<80x10xf32>
    %c8_169 = arith.constant 8 : index
    %c0_170 = arith.constant 0 : index
    %c0_171 = arith.constant 0 : index
    %222 = vector.load %arg6[%c8_169, %c0_170, %c0_171] : memref<10x10x20xf32, #tpu.memory_space<vmem>>, vector<1x10x20xf32>
    %223 = vector.shape_cast %222 : vector<1x10x20xf32> to vector<10x20xf32>
    %cst_172 = arith.constant dense<0.000000e+00> : vector<80x20xf32>
    %224 = tpu.matmul %221, %223, %cst_172 {dimension_numbers = #tpu.dot_dimension_numbers<[1], [0], [0], [1], [0, 0, 1, 1], [], []>} : vector<80x10xf32>, vector<10x20xf32>, vector<80x20xf32> -> vector<80x20xf32>
    %225 = arith.addf %220, %224 : vector<80x20xf32>
    %c9_173 = arith.constant 9 : index
    %c0_174 = arith.constant 0 : index
    %226 = vector.load %arg22[%c9_173, %c0_174] : memref<89x10xf32, #tpu.memory_space<vmem>>, vector<80x10xf32>
    %c9_175 = arith.constant 9 : index
    %c0_176 = arith.constant 0 : index
    %c0_177 = arith.constant 0 : index
    %227 = vector.load %arg6[%c9_175, %c0_176, %c0_177] : memref<10x10x20xf32, #tpu.memory_space<vmem>>, vector<1x10x20xf32>
    %228 = vector.shape_cast %227 : vector<1x10x20xf32> to vector<10x20xf32>
    %cst_178 = arith.constant dense<0.000000e+00> : vector<80x20xf32>
    %229 = tpu.matmul %226, %228, %cst_178 {dimension_numbers = #tpu.dot_dimension_numbers<[1], [0], [0], [1], [0, 0, 1, 1], [], []>} : vector<80x10xf32>, vector<10x20xf32>, vector<80x20xf32> -> vector<80x20xf32>
    %230 = arith.addf %225, %229 : vector<80x20xf32>
    %c0_179 = arith.constant 0 : index
    %c0_180 = arith.constant 0 : index
    %231 = vector.load %arg7[%c0_179, %c0_180] : memref<1x20xf32, #tpu.memory_space<vmem>>, vector<1x20xf32>
    %232 = vector.broadcast %231 : vector<1x20xf32> to vector<80x20xf32>
    %233 = arith.addf %230, %232 : vector<80x20xf32>
    %234 = math.tanh %233 : vector<80x20xf32>
    %c0_181 = arith.constant 0 : index
    %c0_182 = arith.constant 0 : index
    %235 = vector.load %arg8[%c0_181, %c0_182] : memref<1x20xf32, #tpu.memory_space<vmem>>, vector<1x20xf32>
    %236 = vector.broadcast %235 : vector<1x20xf32> to vector<80x20xf32>
    %237 = arith.mulf %234, %236 : vector<80x20xf32>
    %c0_183 = arith.constant 0 : index
    %c0_184 = arith.constant 0 : index
    %238 = vector.load %arg9[%c0_183, %c0_184] : memref<1x20xf32, #tpu.memory_space<vmem>>, vector<1x20xf32>
    %239 = vector.broadcast %238 : vector<1x20xf32> to vector<80x20xf32>
    %240 = arith.addf %237, %239 : vector<80x20xf32>
    %c0_185 = arith.constant 0 : index
    %c0_186 = arith.constant 0 : index
    %241 = vector.load %arg23[%c0_185, %c0_186] : memref<80x20xf32, #tpu.memory_space<vmem>>, vector<80x20xf32>
    tpu.vector_store %arg23[%c0_185, %c0_186], %240 {strides = array<i32>} : memref<80x20xf32, #tpu.memory_space<vmem>>, vector<80x20xf32>,
    %c0_187 = arith.constant 0 : index
    %c0_188 = arith.constant 0 : index
    %242 = tpu.strided_load %arg23[%c0_187, %c0_188] {strides = array<i32: 2, 1>} : memref<80x20xf32, #tpu.memory_space<vmem>>, vector<39x20xf32>
    %c1_189 = arith.constant 1 : index
    %c0_190 = arith.constant 0 : index
    %243 = tpu.strided_load %arg23[%c1_189, %c0_190] {strides = array<i32: 2, 1>} : memref<80x20xf32, #tpu.memory_space<vmem>>, vector<39x20xf32>
    %244 = arith.maximumf %242, %243 : vector<39x20xf32>
    %c2_191 = arith.constant 2 : index
    %c0_192 = arith.constant 0 : index
    %245 = tpu.strided_load %arg23[%c2_191, %c0_192] {strides = array<i32: 2, 1>} : memref<80x20xf32, #tpu.memory_space<vmem>>, vector<39x20xf32>
    %246 = arith.maximumf %244, %245 : vector<39x20xf32>
    %c3_193 = arith.constant 3 : index
    %c0_194 = arith.constant 0 : index
    %247 = tpu.strided_load %arg23[%c3_193, %c0_194] {strides = array<i32: 2, 1>} : memref<80x20xf32, #tpu.memory_space<vmem>>, vector<39x20xf32>
    %248 = arith.maximumf %246, %247 : vector<39x20xf32>
    %c0_195 = arith.constant 0 : index
    %c0_196 = arith.constant 0 : index
    %249 = vector.load %arg24[%c0_195, %c0_196] : memref<39x20xf32, #tpu.memory_space<vmem>>, vector<39x20xf32>
    tpu.vector_store %arg24[%c0_195, %c0_196], %248 {strides = array<i32>} : memref<39x20xf32, #tpu.memory_space<vmem>>, vector<39x20xf32>,
    %cst_197 = arith.constant 0.000000e+00 : f32
    %250 = vector.broadcast %cst_197 : f32 to vector<35x40xf32>
    %c0_198 = arith.constant 0 : index
    %c0_199 = arith.constant 0 : index
    %251 = vector.load %arg24[%c0_198, %c0_199] : memref<39x20xf32, #tpu.memory_space<vmem>>, vector<35x20xf32>
    %c0_200 = arith.constant 0 : index
    %c0_201 = arith.constant 0 : index
    %c0_202 = arith.constant 0 : index
    %252 = vector.load %arg10[%c0_200, %c0_201, %c0_202] : memref<5x20x40xf32, #tpu.memory_space<vmem>>, vector<1x20x40xf32>
    %253 = vector.shape_cast %252 : vector<1x20x40xf32> to vector<20x40xf32>
    %cst_203 = arith.constant dense<0.000000e+00> : vector<35x40xf32>
    %254 = tpu.matmul %251, %253, %cst_203 {dimension_numbers = #tpu.dot_dimension_numbers<[1], [0], [0], [1], [0, 0, 1, 1], [], []>} : vector<35x20xf32>, vector<20x40xf32>, vector<35x40xf32> -> vector<35x40xf32>
    %255 = arith.addf %250, %254 : vector<35x40xf32>
    %c1_204 = arith.constant 1 : index
    %c0_205 = arith.constant 0 : index
    %256 = vector.load %arg24[%c1_204, %c0_205] : memref<39x20xf32, #tpu.memory_space<vmem>>, vector<35x20xf32>
    %c1_206 = arith.constant 1 : index
    %c0_207 = arith.constant 0 : index
    %c0_208 = arith.constant 0 : index
    %257 = vector.load %arg10[%c1_206, %c0_207, %c0_208] : memref<5x20x40xf32, #tpu.memory_space<vmem>>, vector<1x20x40xf32>
    %258 = vector.shape_cast %257 : vector<1x20x40xf32> to vector<20x40xf32>
    %cst_209 = arith.constant dense<0.000000e+00> : vector<35x40xf32>
    %259 = tpu.matmul %256, %258, %cst_209 {dimension_numbers = #tpu.dot_dimension_numbers<[1], [0], [0], [1], [0, 0, 1, 1], [], []>} : vector<35x20xf32>, vector<20x40xf32>, vector<35x40xf32> -> vector<35x40xf32>
    %260 = arith.addf %255, %259 : vector<35x40xf32>
    %c2_210 = arith.constant 2 : index
    %c0_211 = arith.constant 0 : index
    %261 = vector.load %arg24[%c2_210, %c0_211] : memref<39x20xf32, #tpu.memory_space<vmem>>, vector<35x20xf32>
    %c2_212 = arith.constant 2 : index
    %c0_213 = arith.constant 0 : index
    %c0_214 = arith.constant 0 : index
    %262 = vector.load %arg10[%c2_212, %c0_213, %c0_214] : memref<5x20x40xf32, #tpu.memory_space<vmem>>, vector<1x20x40xf32>
    %263 = vector.shape_cast %262 : vector<1x20x40xf32> to vector<20x40xf32>
    %cst_215 = arith.constant dense<0.000000e+00> : vector<35x40xf32>
    %264 = tpu.matmul %261, %263, %cst_215 {dimension_numbers = #tpu.dot_dimension_numbers<[1], [0], [0], [1], [0, 0, 1, 1], [], []>} : vector<35x20xf32>, vector<20x40xf32>, vector<35x40xf32> -> vector<35x40xf32>
    %265 = arith.addf %260, %264 : vector<35x40xf32>
    %c3_216 = arith.constant 3 : index
    %c0_217 = arith.constant 0 : index
    %266 = vector.load %arg24[%c3_216, %c0_217] : memref<39x20xf32, #tpu.memory_space<vmem>>, vector<35x20xf32>
    %c3_218 = arith.constant 3 : index
    %c0_219 = arith.constant 0 : index
    %c0_220 = arith.constant 0 : index
    %267 = vector.load %arg10[%c3_218, %c0_219, %c0_220] : memref<5x20x40xf32, #tpu.memory_space<vmem>>, vector<1x20x40xf32>
    %268 = vector.shape_cast %267 : vector<1x20x40xf32> to vector<20x40xf32>
    %cst_221 = arith.constant dense<0.000000e+00> : vector<35x40xf32>
    %269 = tpu.matmul %266, %268, %cst_221 {dimension_numbers = #tpu.dot_dimension_numbers<[1], [0], [0], [1], [0, 0, 1, 1], [], []>} : vector<35x20xf32>, vector<20x40xf32>, vector<35x40xf32> -> vector<35x40xf32>
    %270 = arith.addf %265, %269 : vector<35x40xf32>
    %c4_222 = arith.constant 4 : index
    %c0_223 = arith.constant 0 : index
    %271 = vector.load %arg24[%c4_222, %c0_223] : memref<39x20xf32, #tpu.memory_space<vmem>>, vector<35x20xf32>
    %c4_224 = arith.constant 4 : index
    %c0_225 = arith.constant 0 : index
    %c0_226 = arith.constant 0 : index
    %272 = vector.load %arg10[%c4_224, %c0_225, %c0_226] : memref<5x20x40xf32, #tpu.memory_space<vmem>>, vector<1x20x40xf32>
    %273 = vector.shape_cast %272 : vector<1x20x40xf32> to vector<20x40xf32>
    %cst_227 = arith.constant dense<0.000000e+00> : vector<35x40xf32>
    %274 = tpu.matmul %271, %273, %cst_227 {dimension_numbers = #tpu.dot_dimension_numbers<[1], [0], [0], [1], [0, 0, 1, 1], [], []>} : vector<35x20xf32>, vector<20x40xf32>, vector<35x40xf32> -> vector<35x40xf32>
    %275 = arith.addf %270, %274 : vector<35x40xf32>
    %c0_228 = arith.constant 0 : index
    %c0_229 = arith.constant 0 : index
    %276 = vector.load %arg11[%c0_228, %c0_229] : memref<1x40xf32, #tpu.memory_space<vmem>>, vector<1x40xf32>
    %277 = vector.broadcast %276 : vector<1x40xf32> to vector<35x40xf32>
    %278 = arith.addf %275, %277 : vector<35x40xf32>
    %279 = math.tanh %278 : vector<35x40xf32>
    %c0_230 = arith.constant 0 : index
    %c0_231 = arith.constant 0 : index
    %280 = vector.load %arg12[%c0_230, %c0_231] : memref<1x40xf32, #tpu.memory_space<vmem>>, vector<1x40xf32>
    %281 = vector.broadcast %280 : vector<1x40xf32> to vector<35x40xf32>
    %282 = arith.mulf %279, %281 : vector<35x40xf32>
    %c0_232 = arith.constant 0 : index
    %c0_233 = arith.constant 0 : index
    %283 = vector.load %arg13[%c0_232, %c0_233] : memref<1x40xf32, #tpu.memory_space<vmem>>, vector<1x40xf32>
    %284 = vector.broadcast %283 : vector<1x40xf32> to vector<35x40xf32>
    %285 = arith.addf %282, %284 : vector<35x40xf32>
    %c0_234 = arith.constant 0 : index
    %c0_235 = arith.constant 0 : index
    %286 = vector.load %arg25[%c0_234, %c0_235] : memref<35x40xf32, #tpu.memory_space<vmem>>, vector<35x40xf32>
    tpu.vector_store %arg25[%c0_234, %c0_235], %285 {strides = array<i32>} : memref<35x40xf32, #tpu.memory_space<vmem>>, vector<35x40xf32>,
    %c0_236 = arith.constant 0 : index
    %c0_237 = arith.constant 0 : index
    %287 = tpu.strided_load %arg25[%c0_236, %c0_237] {strides = array<i32: 2, 1>} : memref<35x40xf32, #tpu.memory_space<vmem>>, vector<17x40xf32>
    %c1_238 = arith.constant 1 : index
    %c0_239 = arith.constant 0 : index
    %288 = tpu.strided_load %arg25[%c1_238, %c0_239] {strides = array<i32: 2, 1>} : memref<35x40xf32, #tpu.memory_space<vmem>>, vector<17x40xf32>
    %289 = arith.maximumf %287, %288 : vector<17x40xf32>
    %c0_240 = arith.constant 0 : index
    %c0_241 = arith.constant 0 : index
    %290 = vector.load %arg26[%c0_240, %c0_241] : memref<17x40xf32, #tpu.memory_space<vmem>>, vector<17x40xf32>
    tpu.vector_store %arg26[%c0_240, %c0_241], %289 {strides = array<i32>} : memref<17x40xf32, #tpu.memory_space<vmem>>, vector<17x40xf32>,
    %cst_242 = arith.constant 0.000000e+00 : f32
    %291 = vector.broadcast %cst_242 : f32 to vector<1x160xf32>
    %c0_243 = arith.constant 0 : index
    %c0_244 = arith.constant 0 : index
    %292 = vector.load %arg26[%c0_243, %c0_244] : memref<17x40xf32, #tpu.memory_space<vmem>>, vector<1x40xf32>
    %c0_245 = arith.constant 0 : index
    %c0_246 = arith.constant 0 : index
    %293 = vector.load %arg14[%c0_245, %c0_246] : memref<680x160xf32, #tpu.memory_space<vmem>>, vector<40x160xf32>
    %cst_247 = arith.constant dense<0.000000e+00> : vector<1x160xf32>
    %294 = tpu.matmul %292, %293, %cst_247 {dimension_numbers = #tpu.dot_dimension_numbers<[1], [0], [0], [1], [0, 0, 1, 1], [], []>} : vector<1x40xf32>, vector<40x160xf32>, vector<1x160xf32> -> vector<1x160xf32>
    %295 = arith.addf %291, %294 : vector<1x160xf32>
    %c1_248 = arith.constant 1 : index
    %c0_249 = arith.constant 0 : index
    %296 = vector.load %arg26[%c1_248, %c0_249] : memref<17x40xf32, #tpu.memory_space<vmem>>, vector<1x40xf32>
    %c40 = arith.constant 40 : index
    %c0_250 = arith.constant 0 : index
    %297 = vector.load %arg14[%c40, %c0_250] : memref<680x160xf32, #tpu.memory_space<vmem>>, vector<40x160xf32>
    %cst_251 = arith.constant dense<0.000000e+00> : vector<1x160xf32>
    %298 = tpu.matmul %296, %297, %cst_251 {dimension_numbers = #tpu.dot_dimension_numbers<[1], [0], [0], [1], [0, 0, 1, 1], [], []>} : vector<1x40xf32>, vector<40x160xf32>, vector<1x160xf32> -> vector<1x160xf32>
    %299 = arith.addf %295, %298 : vector<1x160xf32>
    %c2_252 = arith.constant 2 : index
    %c0_253 = arith.constant 0 : index
    %300 = vector.load %arg26[%c2_252, %c0_253] : memref<17x40xf32, #tpu.memory_space<vmem>>, vector<1x40xf32>
    %c80 = arith.constant 80 : index
    %c0_254 = arith.constant 0 : index
    %301 = vector.load %arg14[%c80, %c0_254] : memref<680x160xf32, #tpu.memory_space<vmem>>, vector<40x160xf32>
    %cst_255 = arith.constant dense<0.000000e+00> : vector<1x160xf32>
    %302 = tpu.matmul %300, %301, %cst_255 {dimension_numbers = #tpu.dot_dimension_numbers<[1], [0], [0], [1], [0, 0, 1, 1], [], []>} : vector<1x40xf32>, vector<40x160xf32>, vector<1x160xf32> -> vector<1x160xf32>
    %303 = arith.addf %299, %302 : vector<1x160xf32>
    %c3_256 = arith.constant 3 : index
    %c0_257 = arith.constant 0 : index
    %304 = vector.load %arg26[%c3_256, %c0_257] : memref<17x40xf32, #tpu.memory_space<vmem>>, vector<1x40xf32>
    %c120 = arith.constant 120 : index
    %c0_258 = arith.constant 0 : index
    %305 = vector.load %arg14[%c120, %c0_258] : memref<680x160xf32, #tpu.memory_space<vmem>>, vector<40x160xf32>
    %cst_259 = arith.constant dense<0.000000e+00> : vector<1x160xf32>
    %306 = tpu.matmul %304, %305, %cst_259 {dimension_numbers = #tpu.dot_dimension_numbers<[1], [0], [0], [1], [0, 0, 1, 1], [], []>} : vector<1x40xf32>, vector<40x160xf32>, vector<1x160xf32> -> vector<1x160xf32>
    %307 = arith.addf %303, %306 : vector<1x160xf32>
    %c4_260 = arith.constant 4 : index
    %c0_261 = arith.constant 0 : index
    %308 = vector.load %arg26[%c4_260, %c0_261] : memref<17x40xf32, #tpu.memory_space<vmem>>, vector<1x40xf32>
    %c160 = arith.constant 160 : index
    %c0_262 = arith.constant 0 : index
    %309 = vector.load %arg14[%c160, %c0_262] : memref<680x160xf32, #tpu.memory_space<vmem>>, vector<40x160xf32>
    %cst_263 = arith.constant dense<0.000000e+00> : vector<1x160xf32>
    %310 = tpu.matmul %308, %309, %cst_263 {dimension_numbers = #tpu.dot_dimension_numbers<[1], [0], [0], [1], [0, 0, 1, 1], [], []>} : vector<1x40xf32>, vector<40x160xf32>, vector<1x160xf32> -> vector<1x160xf32>
    %311 = arith.addf %307, %310 : vector<1x160xf32>
    %c5_264 = arith.constant 5 : index
    %c0_265 = arith.constant 0 : index
    %312 = vector.load %arg26[%c5_264, %c0_265] : memref<17x40xf32, #tpu.memory_space<vmem>>, vector<1x40xf32>
    %c200 = arith.constant 200 : index
    %c0_266 = arith.constant 0 : index
    %313 = vector.load %arg14[%c200, %c0_266] : memref<680x160xf32, #tpu.memory_space<vmem>>, vector<40x160xf32>
    %cst_267 = arith.constant dense<0.000000e+00> : vector<1x160xf32>
    %314 = tpu.matmul %312, %313, %cst_267 {dimension_numbers = #tpu.dot_dimension_numbers<[1], [0], [0], [1], [0, 0, 1, 1], [], []>} : vector<1x40xf32>, vector<40x160xf32>, vector<1x160xf32> -> vector<1x160xf32>
    %315 = arith.addf %311, %314 : vector<1x160xf32>
    %c6_268 = arith.constant 6 : index
    %c0_269 = arith.constant 0 : index
    %316 = vector.load %arg26[%c6_268, %c0_269] : memref<17x40xf32, #tpu.memory_space<vmem>>, vector<1x40xf32>
    %c240 = arith.constant 240 : index
    %c0_270 = arith.constant 0 : index
    %317 = vector.load %arg14[%c240, %c0_270] : memref<680x160xf32, #tpu.memory_space<vmem>>, vector<40x160xf32>
    %cst_271 = arith.constant dense<0.000000e+00> : vector<1x160xf32>
    %318 = tpu.matmul %316, %317, %cst_271 {dimension_numbers = #tpu.dot_dimension_numbers<[1], [0], [0], [1], [0, 0, 1, 1], [], []>} : vector<1x40xf32>, vector<40x160xf32>, vector<1x160xf32> -> vector<1x160xf32>
    %319 = arith.addf %315, %318 : vector<1x160xf32>
    %c7_272 = arith.constant 7 : index
    %c0_273 = arith.constant 0 : index
    %320 = vector.load %arg26[%c7_272, %c0_273] : memref<17x40xf32, #tpu.memory_space<vmem>>, vector<1x40xf32>
    %c280 = arith.constant 280 : index
    %c0_274 = arith.constant 0 : index
    %321 = vector.load %arg14[%c280, %c0_274] : memref<680x160xf32, #tpu.memory_space<vmem>>, vector<40x160xf32>
    %cst_275 = arith.constant dense<0.000000e+00> : vector<1x160xf32>
    %322 = tpu.matmul %320, %321, %cst_275 {dimension_numbers = #tpu.dot_dimension_numbers<[1], [0], [0], [1], [0, 0, 1, 1], [], []>} : vector<1x40xf32>, vector<40x160xf32>, vector<1x160xf32> -> vector<1x160xf32>
    %323 = arith.addf %319, %322 : vector<1x160xf32>
    %c8_276 = arith.constant 8 : index
    %c0_277 = arith.constant 0 : index
    %324 = vector.load %arg26[%c8_276, %c0_277] : memref<17x40xf32, #tpu.memory_space<vmem>>, vector<1x40xf32>
    %c320 = arith.constant 320 : index
    %c0_278 = arith.constant 0 : index
    %325 = vector.load %arg14[%c320, %c0_278] : memref<680x160xf32, #tpu.memory_space<vmem>>, vector<40x160xf32>
    %cst_279 = arith.constant dense<0.000000e+00> : vector<1x160xf32>
    %326 = tpu.matmul %324, %325, %cst_279 {dimension_numbers = #tpu.dot_dimension_numbers<[1], [0], [0], [1], [0, 0, 1, 1], [], []>} : vector<1x40xf32>, vector<40x160xf32>, vector<1x160xf32> -> vector<1x160xf32>
    %327 = arith.addf %323, %326 : vector<1x160xf32>
    %c9_280 = arith.constant 9 : index
    %c0_281 = arith.constant 0 : index
    %328 = vector.load %arg26[%c9_280, %c0_281] : memref<17x40xf32, #tpu.memory_space<vmem>>, vector<1x40xf32>
    %c360 = arith.constant 360 : index
    %c0_282 = arith.constant 0 : index
    %329 = vector.load %arg14[%c360, %c0_282] : memref<680x160xf32, #tpu.memory_space<vmem>>, vector<40x160xf32>
    %cst_283 = arith.constant dense<0.000000e+00> : vector<1x160xf32>
    %330 = tpu.matmul %328, %329, %cst_283 {dimension_numbers = #tpu.dot_dimension_numbers<[1], [0], [0], [1], [0, 0, 1, 1], [], []>} : vector<1x40xf32>, vector<40x160xf32>, vector<1x160xf32> -> vector<1x160xf32>
    %331 = arith.addf %327, %330 : vector<1x160xf32>
    %c10_284 = arith.constant 10 : index
    %c0_285 = arith.constant 0 : index
    %332 = vector.load %arg26[%c10_284, %c0_285] : memref<17x40xf32, #tpu.memory_space<vmem>>, vector<1x40xf32>
    %c400 = arith.constant 400 : index
    %c0_286 = arith.constant 0 : index
    %333 = vector.load %arg14[%c400, %c0_286] : memref<680x160xf32, #tpu.memory_space<vmem>>, vector<40x160xf32>
    %cst_287 = arith.constant dense<0.000000e+00> : vector<1x160xf32>
    %334 = tpu.matmul %332, %333, %cst_287 {dimension_numbers = #tpu.dot_dimension_numbers<[1], [0], [0], [1], [0, 0, 1, 1], [], []>} : vector<1x40xf32>, vector<40x160xf32>, vector<1x160xf32> -> vector<1x160xf32>
    %335 = arith.addf %331, %334 : vector<1x160xf32>
    %c11_288 = arith.constant 11 : index
    %c0_289 = arith.constant 0 : index
    %336 = vector.load %arg26[%c11_288, %c0_289] : memref<17x40xf32, #tpu.memory_space<vmem>>, vector<1x40xf32>
    %c440 = arith.constant 440 : index
    %c0_290 = arith.constant 0 : index
    %337 = vector.load %arg14[%c440, %c0_290] : memref<680x160xf32, #tpu.memory_space<vmem>>, vector<40x160xf32>
    %cst_291 = arith.constant dense<0.000000e+00> : vector<1x160xf32>
    %338 = tpu.matmul %336, %337, %cst_291 {dimension_numbers = #tpu.dot_dimension_numbers<[1], [0], [0], [1], [0, 0, 1, 1], [], []>} : vector<1x40xf32>, vector<40x160xf32>, vector<1x160xf32> -> vector<1x160xf32>
    %339 = arith.addf %335, %338 : vector<1x160xf32>
    %c12_292 = arith.constant 12 : index
    %c0_293 = arith.constant 0 : index
    %340 = vector.load %arg26[%c12_292, %c0_293] : memref<17x40xf32, #tpu.memory_space<vmem>>, vector<1x40xf32>
    %c480 = arith.constant 480 : index
    %c0_294 = arith.constant 0 : index
    %341 = vector.load %arg14[%c480, %c0_294] : memref<680x160xf32, #tpu.memory_space<vmem>>, vector<40x160xf32>
    %cst_295 = arith.constant dense<0.000000e+00> : vector<1x160xf32>
    %342 = tpu.matmul %340, %341, %cst_295 {dimension_numbers = #tpu.dot_dimension_numbers<[1], [0], [0], [1], [0, 0, 1, 1], [], []>} : vector<1x40xf32>, vector<40x160xf32>, vector<1x160xf32> -> vector<1x160xf32>
    %343 = arith.addf %339, %342 : vector<1x160xf32>
    %c13_296 = arith.constant 13 : index
    %c0_297 = arith.constant 0 : index
    %344 = vector.load %arg26[%c13_296, %c0_297] : memref<17x40xf32, #tpu.memory_space<vmem>>, vector<1x40xf32>
    %c520 = arith.constant 520 : index
    %c0_298 = arith.constant 0 : index
    %345 = vector.load %arg14[%c520, %c0_298] : memref<680x160xf32, #tpu.memory_space<vmem>>, vector<40x160xf32>
    %cst_299 = arith.constant dense<0.000000e+00> : vector<1x160xf32>
    %346 = tpu.matmul %344, %345, %cst_299 {dimension_numbers = #tpu.dot_dimension_numbers<[1], [0], [0], [1], [0, 0, 1, 1], [], []>} : vector<1x40xf32>, vector<40x160xf32>, vector<1x160xf32> -> vector<1x160xf32>
    %347 = arith.addf %343, %346 : vector<1x160xf32>
    %c14_300 = arith.constant 14 : index
    %c0_301 = arith.constant 0 : index
    %348 = vector.load %arg26[%c14_300, %c0_301] : memref<17x40xf32, #tpu.memory_space<vmem>>, vector<1x40xf32>
    %c560 = arith.constant 560 : index
    %c0_302 = arith.constant 0 : index
    %349 = vector.load %arg14[%c560, %c0_302] : memref<680x160xf32, #tpu.memory_space<vmem>>, vector<40x160xf32>
    %cst_303 = arith.constant dense<0.000000e+00> : vector<1x160xf32>
    %350 = tpu.matmul %348, %349, %cst_303 {dimension_numbers = #tpu.dot_dimension_numbers<[1], [0], [0], [1], [0, 0, 1, 1], [], []>} : vector<1x40xf32>, vector<40x160xf32>, vector<1x160xf32> -> vector<1x160xf32>
    %351 = arith.addf %347, %350 : vector<1x160xf32>
    %c15_304 = arith.constant 15 : index
    %c0_305 = arith.constant 0 : index
    %352 = vector.load %arg26[%c15_304, %c0_305] : memref<17x40xf32, #tpu.memory_space<vmem>>, vector<1x40xf32>
    %c600 = arith.constant 600 : index
    %c0_306 = arith.constant 0 : index
    %353 = vector.load %arg14[%c600, %c0_306] : memref<680x160xf32, #tpu.memory_space<vmem>>, vector<40x160xf32>
    %cst_307 = arith.constant dense<0.000000e+00> : vector<1x160xf32>
    %354 = tpu.matmul %352, %353, %cst_307 {dimension_numbers = #tpu.dot_dimension_numbers<[1], [0], [0], [1], [0, 0, 1, 1], [], []>} : vector<1x40xf32>, vector<40x160xf32>, vector<1x160xf32> -> vector<1x160xf32>
    %355 = arith.addf %351, %354 : vector<1x160xf32>
    %c16_308 = arith.constant 16 : index
    %c0_309 = arith.constant 0 : index
    %356 = vector.load %arg26[%c16_308, %c0_309] : memref<17x40xf32, #tpu.memory_space<vmem>>, vector<1x40xf32>
    %c640 = arith.constant 640 : index
    %c0_310 = arith.constant 0 : index
    %357 = vector.load %arg14[%c640, %c0_310] : memref<680x160xf32, #tpu.memory_space<vmem>>, vector<40x160xf32>
    %cst_311 = arith.constant dense<0.000000e+00> : vector<1x160xf32>
    %358 = tpu.matmul %356, %357, %cst_311 {dimension_numbers = #tpu.dot_dimension_numbers<[1], [0], [0], [1], [0, 0, 1, 1], [], []>} : vector<1x40xf32>, vector<40x160xf32>, vector<1x160xf32> -> vector<1x160xf32>
    %359 = arith.addf %355, %358 : vector<1x160xf32>
    %c0_312 = arith.constant 0 : index
    %c0_313 = arith.constant 0 : index
    %360 = vector.load %arg15[%c0_312, %c0_313] : memref<1x160xf32, #tpu.memory_space<vmem>>, vector<1x160xf32>
    %361 = arith.addf %359, %360 : vector<1x160xf32>
    %362 = math.tanh %361 : vector<1x160xf32>
    %c0_314 = arith.constant 0 : index
    %c0_315 = arith.constant 0 : index
    %363 = vector.load %arg16[%c0_314, %c0_315] : memref<160x80xf32, #tpu.memory_space<vmem>>, vector<160x80xf32>
    %cst_316 = arith.constant dense<0.000000e+00> : vector<1x80xf32>
    %364 = tpu.matmul %362, %363, %cst_316 {dimension_numbers = #tpu.dot_dimension_numbers<[1], [0], [0], [1], [0, 0, 1, 1], [], []>} : vector<1x160xf32>, vector<160x80xf32>, vector<1x80xf32> -> vector<1x80xf32>
    %c0_317 = arith.constant 0 : index
    %c0_318 = arith.constant 0 : index
    %365 = vector.load %arg17[%c0_317, %c0_318] : memref<1x80xf32, #tpu.memory_space<vmem>>, vector<1x80xf32>
    %366 = arith.addf %364, %365 : vector<1x80xf32>
    %367 = math.tanh %366 : vector<1x80xf32>
    %c0_319 = arith.constant 0 : index
    %c0_320 = arith.constant 0 : index
    %368 = vector.load %arg18[%c0_319, %c0_320] : memref<80x10xf32, #tpu.memory_space<vmem>>, vector<80x10xf32>
    %cst_321 = arith.constant dense<0.000000e+00> : vector<1x10xf32>
    %369 = tpu.matmul %367, %368, %cst_321 {dimension_numbers = #tpu.dot_dimension_numbers<[1], [0], [0], [1], [0, 0, 1, 1], [], []>} : vector<1x80xf32>, vector<80x10xf32>, vector<1x10xf32> -> vector<1x10xf32>
    %c0_322 = arith.constant 0 : index
    %c0_323 = arith.constant 0 : index
    %370 = vector.load %arg19[%c0_322, %c0_323] : memref<1x10xf32, #tpu.memory_space<vmem>>, vector<1x10xf32>
    %371 = arith.addf %369, %370 : vector<1x10xf32>
    %c0_324 = arith.constant 0 : index
    %c0_325 = arith.constant 0 : index
    %c0_326 = arith.constant 0 : index
    %372 = vector.load %arg20[%c0_324, %c0_325, %c0_326] : memref<1x1x10xf32, #tpu.memory_space<vmem>>, vector<1x1x10xf32>
    %373 = vector.shape_cast %372 : vector<1x1x10xf32> to vector<1x10xf32>
    %374 = vector.shape_cast %371 : vector<1x10xf32> to vector<1x1x10xf32>
    tpu.vector_store %arg20[%c0_324, %c0_325, %c0_326], %374 {strides = array<i32>} : memref<1x1x10xf32, #tpu.memory_space<vmem>>, vector<1x1x10xf32>,
    return
  }
  func.func @transform_0(%arg0: i32) -> (i32, i32, i32) {
    %c0_i32 = arith.constant 0 : i32
    %c0_i32_0 = arith.constant 0 : i32
    %c0_i32_1 = arith.constant 0 : i32
    return %arg0, %c0_i32, %c0_i32_0 : i32, i32, i32
  }
  func.func @transform_1(%arg0: i32) -> (i32, i32, i32) {
    %c0_i32 = arith.constant 0 : i32
    %c0_i32_0 = arith.constant 0 : i32
    %c0_i32_1 = arith.constant 0 : i32
    %c0_i32_2 = arith.constant 0 : i32
    return %c0_i32, %c0_i32_0, %c0_i32_1 : i32, i32, i32
  }
  func.func @transform_2(%arg0: i32) -> (i32, i32) {
    %c0_i32 = arith.constant 0 : i32
    %c0_i32_0 = arith.constant 0 : i32
    %c0_i32_1 = arith.constant 0 : i32
    return %c0_i32, %c0_i32_0 : i32, i32
  }
  func.func @transform_3(%arg0: i32) -> (i32, i32) {
    %c0_i32 = arith.constant 0 : i32
    %c0_i32_0 = arith.constant 0 : i32
    %c0_i32_1 = arith.constant 0 : i32
    return %c0_i32, %c0_i32_0 : i32, i32
  }
  func.func @transform_4(%arg0: i32) -> (i32, i32) {
    %c0_i32 = arith.constant 0 : i32
    %c0_i32_0 = arith.constant 0 : i32
    %c0_i32_1 = arith.constant 0 : i32
    return %c0_i32, %c0_i32_0 : i32, i32
  }
  func.func @transform_5(%arg0: i32) -> (i32, i32, i32) {
    %c0_i32 = arith.constant 0 : i32
    %c0_i32_0 = arith.constant 0 : i32
    %c0_i32_1 = arith.constant 0 : i32
    %c0_i32_2 = arith.constant 0 : i32
    return %c0_i32, %c0_i32_0, %c0_i32_1 : i32, i32, i32
  }
  func.func @transform_6(%arg0: i32) -> (i32, i32) {
    %c0_i32 = arith.constant 0 : i32
    %c0_i32_0 = arith.constant 0 : i32
    %c0_i32_1 = arith.constant 0 : i32
    return %c0_i32, %c0_i32_0 : i32, i32
  }
  func.func @transform_7(%arg0: i32) -> (i32, i32) {
    %c0_i32 = arith.constant 0 : i32
    %c0_i32_0 = arith.constant 0 : i32
    %c0_i32_1 = arith.constant 0 : i32
    return %c0_i32, %c0_i32_0 : i32, i32
  }
  func.func @transform_8(%arg0: i32) -> (i32, i32) {
    %c0_i32 = arith.constant 0 : i32
    %c0_i32_0 = arith.constant 0 : i32
    %c0_i32_1 = arith.constant 0 : i32
    return %c0_i32, %c0_i32_0 : i32, i32
  }
  func.func @transform_9(%arg0: i32) -> (i32, i32, i32) {
    %c0_i32 = arith.constant 0 : i32
    %c0_i32_0 = arith.constant 0 : i32
    %c0_i32_1 = arith.constant 0 : i32
    %c0_i32_2 = arith.constant 0 : i32
    return %c0_i32, %c0_i32_0, %c0_i32_1 : i32, i32, i32
  }
  func.func @transform_10(%arg0: i32) -> (i32, i32) {
    %c0_i32 = arith.constant 0 : i32
    %c0_i32_0 = arith.constant 0 : i32
    %c0_i32_1 = arith.constant 0 : i32
    return %c0_i32, %c0_i32_0 : i32, i32
  }
  func.func @transform_11(%arg0: i32) -> (i32, i32) {
    %c0_i32 = arith.constant 0 : i32
    %c0_i32_0 = arith.constant 0 : i32
    %c0_i32_1 = arith.constant 0 : i32
    return %c0_i32, %c0_i32_0 : i32, i32
  }
  func.func @transform_12(%arg0: i32) -> (i32, i32) {
    %c0_i32 = arith.constant 0 : i32
    %c0_i32_0 = arith.constant 0 : i32
    %c0_i32_1 = arith.constant 0 : i32
    return %c0_i32, %c0_i32_0 : i32, i32
  }
  func.func @transform_13(%arg0: i32) -> (i32, i32) {
    %c0_i32 = arith.constant 0 : i32
    %c0_i32_0 = arith.constant 0 : i32
    %c0_i32_1 = arith.constant 0 : i32
    return %c0_i32, %c0_i32_0 : i32, i32
  }
  func.func @transform_14(%arg0: i32) -> (i32, i32) {
    %c0_i32 = arith.constant 0 : i32
    %c0_i32_0 = arith.constant 0 : i32
    %c0_i32_1 = arith.constant 0 : i32
    return %c0_i32, %c0_i32_0 : i32, i32
  }
  func.func @transform_15(%arg0: i32) -> (i32, i32) {
    %c0_i32 = arith.constant 0 : i32
    %c0_i32_0 = arith.constant 0 : i32
    %c0_i32_1 = arith.constant 0 : i32
    return %c0_i32, %c0_i32_0 : i32, i32
  }
  func.func @transform_16(%arg0: i32) -> (i32, i32) {
    %c0_i32 = arith.constant 0 : i32
    %c0_i32_0 = arith.constant 0 : i32
    %c0_i32_1 = arith.constant 0 : i32
    return %c0_i32, %c0_i32_0 : i32, i32
  }
  func.func @transform_17(%arg0: i32) -> (i32, i32) {
    %c0_i32 = arith.constant 0 : i32
    %c0_i32_0 = arith.constant 0 : i32
    %c0_i32_1 = arith.constant 0 : i32
    return %c0_i32, %c0_i32_0 : i32, i32
  }
  func.func @transform_18(%arg0: i32) -> (i32, i32) {
    %c0_i32 = arith.constant 0 : i32
    %c0_i32_0 = arith.constant 0 : i32
    %c0_i32_1 = arith.constant 0 : i32
    return %c0_i32, %c0_i32_0 : i32, i32
  }
  func.func @transform_19(%arg0: i32) -> (i32, i32, i32) {
    %c0_i32 = arith.constant 0 : i32
    %c0_i32_0 = arith.constant 0 : i32
    %c0_i32_1 = arith.constant 0 : i32
    return %arg0, %c0_i32, %c0_i32_0 : i32, i32, i32
  }
}

</mosaic_0001>

<bundles_post_ra>
// kernel: cnn_forward.1
= control target key start
LH: loop header
LB: loop body
LE: loop exit
PB: predicated region body
PF: predicated region fallthrough
CT: control target
= control target key end

     0   :  { %s11796_s0 = inlined_call_operand.vmem [shape: f32[2,200,1], index: 0, kind: input, shape index: {}]   ;;  %s11797_s1 = inlined_call_operand.vmem [shape: f32[20,1,10], index: 1, kind: input, shape index: {}]   ;;  %s11798_s2 = inlined_call_operand.vmem [shape: f32[1,10], index: 2, kind: input, shape index: {}]   ;;  %s11799_s3 = inlined_call_operand.vmem [shape: f32[1,10], index: 3, kind: input, shape index: {}]   ;;  %s11800_s4 = inlined_call_operand.vmem [shape: f32[1,10], index: 4, kind: input, shape index: {}]   ;;  %s11801_s5 = inlined_call_operand.vmem [shape: f32[10,10,20], index: 5, kind: input, shape index: {}]   ;;  %s11802_s6 = inlined_call_operand.vmem [shape: f32[1,20], index: 6, kind: input, shape index: {}]   ;;  %s11803_s7 = inlined_call_operand.vmem [shape: f32[1,20], index: 7, kind: input, shape index: {}]   ;;  %s11804_s8 = inlined_call_operand.vmem [shape: f32[1,20], index: 8, kind: input, shape index: {}]   ;;  %s11805_s9 = inlined_call_operand.vmem [shape: f32[5,20,40], index: 9, kind: input, shape index: {}]   ;;  %s11806_s10 = inlined_call_operand.vmem [shape: f32[1,40], index: 10, kind: input, shape index: {}]   ;;  %s11807_s11 = inlined_call_operand.vmem [shape: f32[1,40], index: 11, kind: input, shape index: {}]   ;;  %s11808_s12 = inlined_call_operand.vmem [shape: f32[1,40], index: 12, kind: input, shape index: {}]   ;;  %s11809_s13 = inlined_call_operand.vmem [shape: f32[680,160], index: 13, kind: input, shape index: {}]   ;;  %s11810_s14 = inlined_call_operand.vmem [shape: f32[1,160], index: 14, kind: input, shape index: {}]   ;;  %s11811_s15 = inlined_call_operand.vmem [shape: f32[160,80], index: 15, kind: input, shape index: {}]   ;;  %s11812_s16 = inlined_call_operand.vmem [shape: f32[1,80], index: 16, kind: input, shape index: {}]   ;;  %s11813_s17 = inlined_call_operand.vmem [shape: f32[80,10], index: 17, kind: input, shape index: {}]   ;;  %s11814_s18 = inlined_call_operand.vmem [shape: f32[1,10], index: 18, kind: input, shape index: {}]   ;;  %s11815_s19 = inlined_call_operand.hbm [shape: f32[2,1,10], index: 19, kind: output, shape index: {}]  }
   0x1   :  { %11827 = sst [smem:[#allocation254_spill]] %s11796_s0 }
   0x2   :  { %11828 = sst [smem:[#allocation255_spill]] %s11797_s1 }
   0x3   :  { %11829 = sst [smem:[#allocation256_spill]] %s11798_s2 }
   0x4   :  { %11830 = sst [smem:[#allocation257_spill]] %s11799_s3 }
   0x5   :  { %11831 = sst [smem:[#allocation258_spill]] %s11800_s4 }
   0x6   :  { %11832 = sst [smem:[#allocation259_spill]] %s11801_s5 }
   0x7   :  { %11833 = sst [smem:[#allocation260_spill]] %s11802_s6 }
   0x8   :  { %11834 = sst [smem:[#allocation261_spill]] %s11803_s7 }
   0x9   :  { %11835 = sst [smem:[#allocation262_spill]] %s11804_s8 }
   0xa   :  { %24 = vsyncpa [#allocation9], 0 }
   0xb   :  { %26 = vsyncpa [#allocation9 + $0x1], 0  ;;  %s7881_s0 = smov 0   ;;  %s7883_s30 = smov 0  }
   0xc   :  { %s7885_s20 = smov 0   ;;  %s7887_s21 = smov 0  }
   0xd LB: > { %11836 = sst [smem:[#allocation11_spill]] %s7774_s20  ;;  %s7902_s1 = sadd.s32 4294967295, %s7778_s21   ;;  %s7778_s21 = sphi %s7887_s21, %s12356_s21   ;;  %s7774_s20 = sphi %s7885_s20, %s12358_s20   ;;  %s7770_s30 = sphi %s7883_s30, %s12360_s30   ;;  %s7766_s0 = sphi %s7881_s0, %s12359_s0  }
   0xe   : > { %s7280_s22 = sadd.s32 4294967294, %s7778_s21   ;;  %s7906_s2 = sadd.s32 1, %s7778_s21  }
   0xf   : > { %11837 = sst [smem:[#allocation12_spill]] %s7906_s2  ;;  %s443_s23 = sadd.s32 1, %s7774_s20 }
  0x10   : > { %s440_s24 = ssub.s32 %s7778_s21, %s7906_s2  ;;  %p453_p0 = scmp.ne.s32.totalorder %s7774_s20, %s7770_s30 }
  0x11   : > { %p441_p1 = scmp.eq.s32.totalorder %s440_s24, 0  ;;  %p454_p2 = scmp.eq.s32.totalorder %s7902_s1, 1 }
  0x12   : > { %p459_p3 = scmp.ne.s32.totalorder %s7770_s30, %s7766_s0  ;;  %p460_p4 = scmp.eq.s32.totalorder %s7280_s22, 1 }
  0x13   : > { %s7917_s25 = scalar_select %p441_p1, %s7774_s20, %s443_s23  }
  0x14   : > { %p7919_p5 = por %p454_p2, %p453_p0  ;;  %p7923_p6 = por %p460_p4, %p459_p3 }
  0x15   : > { %11838 = sst [smem:[#allocation13_spill]] %s7917_s25  ;;  %p7283_p7 = scmp.ge.s32.totalorder %s7778_s21, 1 }
  0x16   : > { %s11840_s26 = scalar_select %p7923_p6, 1, 0 }
  0x17   : > { %p540_p8 = scmp.lt.s32.totalorder %s7778_s21, 3 }
  0x18   : > { %11841 = sst [smem:[#allocation14_spill]] %s11840_s26 }
  0x19   : > { %p541_p9 = pnand %p7283_p7, %p540_p8 }
  0x1b   : > { %544 = sbr.rel (%p541_p9) target bundleno = 2442 (0x98a), region = 96 }
  0x20   : > { %p595_p10 = scmp.lt.s32.totalorder %s7902_s1, 1  ;;  %v7780_v0 = vmov 0   ;;  %s11842_s23 = sld [smem:[#allocation254_spill]]  ;;  %vm4483_vm0 = vcmask 80896   ;;  %vm4707_vm1 = vcmask 1041408   ;;  %vm4506_vm2 = vcmask 77824  }
  0x21   : > { %7557 = vset.pattern.permute.xlu2 %v7780_v0  ;;  %7556 = vset.pattern.permute.xlu1 %v7780_v0  ;;  %s12077_s29 = sld [smem:[#allocation255_spill]]  ;;  %vm4650_vm3 = vcmask 73728   ;;  %vm5817_vm4 = vcmask 1043456   ;;  %vm5714_vm5 = vcmask 162816   ;;  %vm5783_vm6 = vcmask 161792   ;;  %s7221_s26 = scalar_lea.hbm %s11815_s19, %s7902_s1 }
  0x22   : > { %7555 = vset.pattern.permute.xlu0 %v7780_v0  ;;  %s596_s27 = scalar_select %p595_p10, %s7902_s1, 1  ;;  %vm6127_vm7 = vcmask 326656   ;;  %vm6132_vm8 = vcmask 321536   ;;  %vm6150_vm9 = vcmask 319488   ;;  %vm7131_vm10 = vcmask 261120  }
  0x23   : > { %s12085_s4 = sld [smem:[#allocation258_spill]]  ;;  %vm7187_vm11 = vcmask 654336   ;;  %s7225_s20 = sshll.u32 %s7221_s26, 4  ;;  %s7226_s20 = int_to_ptr.hbm [resolvable:$true] %s7225_s20 }
  0x24   : > { %s7514_s28 = smul.u32 200, %s596_s27  ;;  %s12083_s27 = sld [smem:[#allocation256_spill]] }
  0x25   : > { %s12105_s5 = sld [smem:[#allocation259_spill]]  ;;  %s7736_s2 = scalar_lea.hbm %s11815_s19, 2 }
  0x26   : > { %s7934_s24 = scalar_lea.vmem %s11842_s23, %s7514_s28  ;;  %s12084_s23 = sld [smem:[#allocation257_spill]] }
  0x27   : > { %v604_v1 = vld [vmem:[%s7934_s24 + $0x20] sm:$0xff]  ;;  %v602_v2 = vld [vmem:[%s7934_s24 + $0x10] sm:$0xff]  ;;  %v605_v4 = vld [vmem:[%s7934_s24 + $0x28] sm:$0xff]  ;;  %s12343_s6 = sld [smem:[#allocation260_spill]] }
  0x28   : > { %v600_v3 = vld [vmem:[%s7934_s24] sm:$0xff]  ;;  %646 = vperm.xlu2 %7557, %v604_v1   ;;  %636 = vperm.xlu1 %7556, %v602_v2   ;;  %v603_v5 = vld [vmem:[%s7934_s24 + $0x18] sm:$0xff]  ;;  %v601_v6 = vld [vmem:[%s7934_s24 + $0x8] sm:$0xff]  ;;  %s12344_s7 = sld [smem:[#allocation261_spill]] }
  0x29   : > { %626 = vperm.xlu0 %7555, %v600_v3   ;;  %v608_v7 = vld [vmem:[%s7934_s24 + $0x40] sm:$0xff]  ;;  %v607_v8 = vld [vmem:[%s7934_s24 + $0x38] sm:$0xff]  ;;  %v606_v9 = vld [vmem:[%s7934_s24 + $0x30] sm:$0xff]  ;;  %s12345_s8 = sld [smem:[#allocation262_spill]] }
  0x2a   : > { %v611_v10 = vld [vmem:[%s7934_s24 + $0x58] sm:$0xff]  ;;  %v610_v11 = vld [vmem:[%s7934_s24 + $0x50] sm:$0xff]  ;;  %v609_v12 = vld [vmem:[%s7934_s24 + $0x48] sm:$0xff] }
  0x2b   : > { %v614_v13 = vld [vmem:[%s7934_s24 + $0x70] sm:$0xff]  ;;  %v613_v14 = vld [vmem:[%s7934_s24 + $0x68] sm:$0xff]  ;;  %v612_v15 = vld [vmem:[%s7934_s24 + $0x60] sm:$0xff] }
  0x2c   : > { %v617_v16 = vld [vmem:[%s7934_s24 + $0x88] sm:$0xff]  ;;  %v616_v17 = vld [vmem:[%s7934_s24 + $0x80] sm:$0xff]  ;;  %v615_v18 = vld [vmem:[%s7934_s24 + $0x78] sm:$0xff] }
  0x2d   : > { %v620_v19 = vld [vmem:[%s7934_s24 + $0xa0] sm:$0xff]  ;;  %v619_v20 = vld [vmem:[%s7934_s24 + $0x98] sm:$0xff]  ;;  %v618_v21 = vld [vmem:[%s7934_s24 + $0x90] sm:$0xff] }
  0x2e   : > { %v788_v22 = vld [vmem:[%s7934_s24 + $0x1] sm:$0xff]  ;;  %v622_v23 = vld [vmem:[%s7934_s24 + $0xb0] sm:$0x1f]  ;;  %v791_v25 = vld [vmem:[%s7934_s24 + $0x19] sm:$0xff] }
  0x2f   : > { %v621_v24 = vld [vmem:[%s7934_s24 + $0xa8] sm:$0xff]  ;;  %v790_v26 = vld [vmem:[%s7934_s24 + $0x11] sm:$0xff]  ;;  %v795_v33 = vld [vmem:[%s7934_s24 + $0x39] sm:$0xff] }
  0x30   : > { %651 = vperm.xlu2 %7557, %v605_v4   ;;  %641 = vperm.xlu1 %7556, %v603_v5   ;;  %v789_v27 = vld [vmem:[%s7934_s24 + $0x9] sm:$0xff]  ;;  %v794_v28 = vld [vmem:[%s7934_s24 + $0x31] sm:$0xff]  ;;  %v792_v30 = vld [vmem:[%s7934_s24 + $0x21] sm:$0xff] }
  0x31   : > { %631 = vperm.xlu0 %7555, %v601_v6   ;;  %v793_v29 = vld [vmem:[%s7934_s24 + $0x29] sm:$0xff]  ;;  %v796_v32 = vld [vmem:[%s7934_s24 + $0x41] sm:$0xff]  ;;  %v799_v35 = vld [vmem:[%s7934_s24 + $0x59] sm:$0xff] }
  0x32   : > { %v797_v31 = vld [vmem:[%s7934_s24 + $0x49] sm:$0xff]  ;;  %v800_v34 = vld [vmem:[%s7934_s24 + $0x61] sm:$0xff]  ;;  %v798_v36 = vld [vmem:[%s7934_s24 + $0x51] sm:$0xff] }
  0x33   : > { %v803_v38 = vld [vmem:[%s7934_s24 + $0x79] sm:$0xff]  ;;  %v802_v39 = vld [vmem:[%s7934_s24 + $0x71] sm:$0xff]  ;;  %v801_v40 = vld [vmem:[%s7934_s24 + $0x69] sm:$0xff] }
  0x34   : > { %v806_v42 = vld [vmem:[%s7934_s24 + $0x91] sm:$0xff]  ;;  %v805_v43 = vld [vmem:[%s7934_s24 + $0x89] sm:$0xff]  ;;  %v804_v44 = vld [vmem:[%s7934_s24 + $0x81] sm:$0xff] }
  0x35   : > { %v809_v46 = vld [vmem:[%s7934_s24 + $0xa9] sm:$0xff]  ;;  %v808_v47 = vld [vmem:[%s7934_s24 + $0xa1] sm:$0xff]  ;;  %v807_v48 = vld [vmem:[%s7934_s24 + $0x99] sm:$0xff] }
  0x36   : > { %v978_v52 = vld [vmem:[%s7934_s24 + $0xa] sm:$0xff]  ;;  %v977_v53 = vld [vmem:[%s7934_s24 + $0x2] sm:$0xff]  ;;  %v980_v59 = vld [vmem:[%s7934_s24 + $0x1a] sm:$0xff] }
  0x37   : > { %v810_v54 = vld [vmem:[%s7934_s24 + $0xb1] sm:$0x1f]  ;;  %v981_v58 = vld [vmem:[%s7934_s24 + $0x22] sm:$0xff]  ;;  %v984_v0 = vld [vmem:[%s7934_s24 + $0x3a] sm:$0xff] }
  0x38   : > { %666 = vperm.xlu2 %7557, %v608_v7   ;;  %661 = vperm.xlu1 %7556, %v607_v8   ;;  %v979_v60 = vld [vmem:[%s7934_s24 + $0x12] sm:$0xff]  ;;  %v982_v2 = vld [vmem:[%s7934_s24 + $0x2a] sm:$0xff]  ;;  %v985_v8 = vld [vmem:[%s7934_s24 + $0x42] sm:$0xff] }
  0x39   : > { %656 = vperm.xlu0 %7555, %v606_v9   ;;  %v983_v1 = vld [vmem:[%s7934_s24 + $0x32] sm:$0xff]  ;;  %v986_v7 = vld [vmem:[%s7934_s24 + $0x4a] sm:$0xff] }
  0x3a   : > { %v987_v6 = vld [vmem:[%s7934_s24 + $0x52] sm:$0xff] }
  0x40   : > { %681 = vperm.xlu2 %7557, %v611_v10   ;;  %676 = vperm.xlu1 %7556, %v610_v11  }
  0x41   : > { %671 = vperm.xlu0 %7555, %v609_v12   ;;  %v990_v12 = vld [vmem:[%s7934_s24 + $0x6a] sm:$0xff] }
  0x48   : > { %696 = vperm.xlu2 %7557, %v614_v13   ;;  %691 = vperm.xlu1 %7556, %v613_v14   ;;  %v989_v13 = vld [vmem:[%s7934_s24 + $0x62] sm:$0xff]  ;;  %v988_v14 = vld [vmem:[%s7934_s24 + $0x5a] sm:$0xff] }
  0x49   : > { %686 = vperm.xlu0 %7555, %v612_v15  }
  0x50   : > { %711 = vperm.xlu2 %7557, %v617_v16   ;;  %706 = vperm.xlu1 %7556, %v616_v17  }
  0x51   : > { %701 = vperm.xlu0 %7555, %v615_v18   ;;  %v993_v18 = vld [vmem:[%s7934_s24 + $0x82] sm:$0xff] }
  0x58   : > { %726 = vperm.xlu2 %7557, %v620_v19   ;;  %721 = vperm.xlu1 %7556, %v619_v20   ;;  %v992_v19 = vld [vmem:[%s7934_s24 + $0x7a] sm:$0xff]  ;;  %v991_v20 = vld [vmem:[%s7934_s24 + $0x72] sm:$0xff] }
  0x59   : > { %716 = vperm.xlu0 %7555, %v618_v21  }
  0x60   : > { %815 = vperm.xlu2 %7557, %v788_v22   ;;  %736 = vperm.xlu1 %7556, %v622_v23  }
  0x61   : > { %731 = vperm.xlu0 %7555, %v621_v24   ;;  %v996_v24 = vld [vmem:[%s7934_s24 + $0x9a] sm:$0xff] }
  0x68   : > { %830 = vperm.xlu2 %7557, %v791_v25   ;;  %825 = vperm.xlu1 %7556, %v790_v26   ;;  %v995_v25 = vld [vmem:[%s7934_s24 + $0x92] sm:$0xff]  ;;  %v994_v26 = vld [vmem:[%s7934_s24 + $0x8a] sm:$0xff] }
  0x69   : > { %820 = vperm.xlu0 %7555, %v789_v27  }
  0x70   : > { %845 = vperm.xlu2 %7557, %v794_v28   ;;  %840 = vperm.xlu1 %7556, %v793_v29  }
  0x71   : > { %835 = vperm.xlu0 %7555, %v792_v30   ;;  %v999_v30 = vld [vmem:[%s7934_s24 + $0xb2] sm:$0x1f] }
  0x78   : > { %860 = vperm.xlu2 %7557, %v797_v31   ;;  %855 = vperm.xlu1 %7556, %v796_v32   ;;  %v998_v31 = vld [vmem:[%s7934_s24 + $0xaa] sm:$0xff]  ;;  %v997_v32 = vld [vmem:[%s7934_s24 + $0xa2] sm:$0xff] }
  0x79   : > { %850 = vperm.xlu0 %7555, %v795_v33  }
  0x80   : > { %875 = vperm.xlu2 %7557, %v800_v34   ;;  %870 = vperm.xlu1 %7556, %v799_v35  }
  0x81   : > { %865 = vperm.xlu0 %7555, %v798_v36   ;;  %v1168_v36 = vld [vmem:[%s7934_s24 + $0x13] sm:$0xff] }
  0x82   : > { %v7972_v37 = vpop.permute.xlu2 %646 }
  0x83   : > { %11843 = vst [vmem:[#allocation15_spill] sm:$0xff] %v7972_v37  ;;  %v3056_v37 = vld [vmem:[%s7934_s24 + $0xd] sm:$0xff] }
  0x88   : > { %890 = vperm.xlu2 %7557, %v803_v38   ;;  %885 = vperm.xlu1 %7556, %v802_v39   ;;  %v1167_v38 = vld [vmem:[%s7934_s24 + $0xb] sm:$0xff]  ;;  %v1166_v39 = vld [vmem:[%s7934_s24 + $0x3] sm:$0xff] }
  0x89   : > { %880 = vperm.xlu0 %7555, %v801_v40  }
  0x8a   : > { %v7977_v41 = vpop.permute.xlu2 %651 }
  0x8b   : > { %11844 = vst [vmem:[#allocation16_spill] sm:$0xff] %v7977_v41  ;;  %v2498_v41 = vld [vmem:[%s7934_s24 + $0x52] sm:$0xff] }
  0x90   : > { %905 = vperm.xlu2 %7557, %v806_v42   ;;  %900 = vperm.xlu1 %7556, %v805_v43  }
  0x91   : > { %895 = vperm.xlu0 %7555, %v804_v44   ;;  %v1171_v44 = vld [vmem:[%s7934_s24 + $0x2b] sm:$0xff] }
  0x92   : > { %v7982_v45 = vpop.permute.xlu2 %666 }
  0x93   : > { %11845 = vst [vmem:[#allocation17_spill] sm:$0xff] %v7982_v45  ;;  %v2117_v45 = vld [vmem:[%s7934_s24 + $0x38] sm:$0xff] }
  0x98   : > { %920 = vperm.xlu2 %7557, %v809_v46   ;;  %915 = vperm.xlu1 %7556, %v808_v47   ;;  %v1170_v46 = vld [vmem:[%s7934_s24 + $0x23] sm:$0xff]  ;;  %v1169_v47 = vld [vmem:[%s7934_s24 + $0x1b] sm:$0xff] }
  0x99   : > { %910 = vperm.xlu0 %7555, %v807_v48  }
  0x9a   : > { %v7987_v49 = vpop.permute.xlu2 %681  ;;  %v7989_v50 = vpop.permute.xlu1 %636 }
  0x9b   : > { %11846 = vst [vmem:[#allocation18_spill] sm:$0xff] %v7987_v49  ;;  %v7991_v51 = vpop.permute.xlu0 %626  ;;  %v1755_v49 = vld [vmem:[%s7934_s24 + $0xb6] sm:$0x1f] }
  0xa0   : > { %1009 = vperm.xlu2 %7557, %v978_v52   ;;  %1004 = vperm.xlu1 %7556, %v977_v53  }
  0xa1   : > { %925 = vperm.xlu0 %7555, %v810_v54   ;;  %v1174_v54 = vld [vmem:[%s7934_s24 + $0x43] sm:$0xff] }
  0xa2   : > { %v7996_v55 = vpop.permute.xlu2 %696  ;;  %v7998_v56 = vpop.permute.xlu1 %641 }
  0xa3   : > { %11847 = vst [vmem:[#allocation19_spill] sm:$0xff] %v7996_v55  ;;  %v8000_v57 = vpop.permute.xlu0 %631  ;;  %v1553_v55 = vld [vmem:[%s7934_s24 + $0x4d] sm:$0xff] }
  0xa4   : > { %11848 = vst [vmem:[#allocation20_spill] sm:$0xff] %v7998_v56  ;;  %v2867_v56 = vld [vmem:[%s7934_s24 + $0xc] sm:$0xff] }
  0xa8   : > { %1024 = vperm.xlu2 %7557, %v981_v58   ;;  %1019 = vperm.xlu1 %7556, %v980_v59   ;;  %v1173_v58 = vld [vmem:[%s7934_s24 + $0x3b] sm:$0xff]  ;;  %v1172_v59 = vld [vmem:[%s7934_s24 + $0x33] sm:$0xff] }
  0xa9   : > { %1014 = vperm.xlu0 %7555, %v979_v60  }
  0xaa   : > { %v8005_v61 = vpop.permute.xlu2 %711  ;;  %v8007_v62 = vpop.permute.xlu1 %661 }
  0xab   : > { %11849 = vst [vmem:[#allocation21_spill] sm:$0xff] %v8005_v61  ;;  %v8009_v63 = vpop.permute.xlu0 %656  ;;  %v1546_v61 = vld [vmem:[%s7934_s24 + $0x15] sm:$0xff] }
  0xac   : > { %11850 = vst [vmem:[#allocation22_spill] sm:$0xff] %v8007_v62  ;;  %v1932_v62 = vld [vmem:[%s7934_s24 + $0x57] sm:$0xff] }
  0xad   : > { %11851 = vst [vmem:[#allocation23_spill] sm:$0xff] %v8009_v63 }
  0xb0   : > { %1039 = vperm.xlu2 %7557, %v984_v0   ;;  %1034 = vperm.xlu1 %7556, %v983_v1  }
  0xb1   : > { %1029 = vperm.xlu0 %7555, %v982_v2   ;;  %v1177_v2 = vld [vmem:[%s7934_s24 + $0x5b] sm:$0xff] }
  0xb2   : > { %v8014_v3 = vpop.permute.xlu2 %726  ;;  %v8016_v4 = vpop.permute.xlu1 %676 }
  0xb3   : > { %11852 = vst [vmem:[#allocation24_spill] sm:$0xff] %v8014_v3  ;;  %v8018_v5 = vpop.permute.xlu0 %671  ;;  %v1367_v3 = vld [vmem:[%s7934_s24 + $0x64] sm:$0xff] }
  0xb4   : > { %11853 = vst [vmem:[#allocation25_spill] sm:$0xff] %v8016_v4  ;;  %v1742_v4 = vld [vmem:[%s7934_s24 + $0x4e] sm:$0xff] }
  0xb5   : > { %11854 = vst [vmem:[#allocation26_spill] sm:$0xff] %v8018_v5  ;;  %v8510_v5 = vld [vmem:[%s7934_s24 + $0x21] sm:$0xff] }
  0xb8   : > { %1054 = vperm.xlu2 %7557, %v987_v6   ;;  %1049 = vperm.xlu1 %7556, %v986_v7   ;;  %v1176_v6 = vld [vmem:[%s7934_s24 + $0x53] sm:$0xff]  ;;  %v1175_v7 = vld [vmem:[%s7934_s24 + $0x4b] sm:$0xff] }
  0xb9   : > { %1044 = vperm.xlu0 %7555, %v985_v8  }
  0xba   : > { %v8023_v9 = vpop.permute.xlu2 %815  ;;  %v8025_v10 = vpop.permute.xlu1 %691 }
  0xbb   : > { %11855 = vst [vmem:[#allocation27_spill] sm:$0xff] %v8025_v10  ;;  %v8027_v11 = vpop.permute.xlu0 %686  ;;  %v1736_v10 = vld [vmem:[%s7934_s24 + $0x1e] sm:$0xff] }
  0xbc   : > { %11856 = vst [vmem:[#allocation28_spill] sm:$0xff] %v8027_v11  ;;  %v1558_v11 = vld [vmem:[%s7934_s24 + $0x75] sm:$0xff] }
  0xc0   : > { %1069 = vperm.xlu2 %7557, %v990_v12   ;;  %1064 = vperm.xlu1 %7556, %v989_v13  }
  0xc1   : > { %1059 = vperm.xlu0 %7555, %v988_v14   ;;  %v1180_v14 = vld [vmem:[%s7934_s24 + $0x73] sm:$0xff] }
  0xc2   : > { %v8032_v15 = vpop.permute.xlu2 %830  ;;  %v8034_v16 = vpop.permute.xlu1 %706 }
  0xc3   : > { %11857 = vst [vmem:[#allocation29_spill] sm:$0xff] %v8032_v15  ;;  %v8036_v17 = vpop.permute.xlu0 %701  ;;  %v3057_v15 = vld [vmem:[%s7934_s24 + $0x15] sm:$0xff] }
  0xc4   : > { %11858 = vst [vmem:[#allocation30_spill] sm:$0xff] %v8034_v16  ;;  %v1545_v16 = vld [vmem:[%s7934_s24 + $0xd] sm:$0xff] }
  0xc5   : > { %11859 = vst [vmem:[#allocation31_spill] sm:$0xff] %v8036_v17  ;;  %v1555_v17 = vld [vmem:[%s7934_s24 + $0x5d] sm:$0xff] }
  0xc8   : > { %1084 = vperm.xlu2 %7557, %v993_v18   ;;  %1079 = vperm.xlu1 %7556, %v992_v19   ;;  %v1179_v18 = vld [vmem:[%s7934_s24 + $0x6b] sm:$0xff]  ;;  %v1178_v19 = vld [vmem:[%s7934_s24 + $0x63] sm:$0xff] }
  0xc9   : > { %1074 = vperm.xlu0 %7555, %v991_v20  }
  0xca   : > { %v8041_v21 = vpop.permute.xlu2 %845  ;;  %v8043_v22 = vpop.permute.xlu1 %721 }
  0xcb   : > { %11860 = vst [vmem:[#allocation32_spill] sm:$0xff] %v8041_v21  ;;  %v8045_v23 = vpop.permute.xlu0 %716 }
  0xcc   : > { %11861 = vst [vmem:[#allocation33_spill] sm:$0xff] %v8043_v22  ;;  %v1371_v22 = vld [vmem:[%s7934_s24 + $0x84] sm:$0xff] }
  0xcd   : > { %11862 = vst [vmem:[#allocation34_spill] sm:$0xff] %v8045_v23  ;;  %v1368_v23 = vld [vmem:[%s7934_s24 + $0x6c] sm:$0xff] }
  0xd0   : > { %1099 = vperm.xlu2 %7557, %v996_v24   ;;  %1094 = vperm.xlu1 %7556, %v995_v25  }
  0xd1   : > { %1089 = vperm.xlu0 %7555, %v994_v26   ;;  %v1183_v26 = vld [vmem:[%s7934_s24 + $0x8b] sm:$0xff] }
  0xd2   : > { %v8050_v27 = vpop.permute.xlu2 %860  ;;  %v8052_v28 = vpop.permute.xlu1 %736 }
  0xd3   : > { %11863 = vst [vmem:[#allocation35_spill] sm:$0xff] %v8050_v27  ;;  %v8054_v29 = vpop.permute.xlu0 %731  ;;  %v2308_v27 = vld [vmem:[%s7934_s24 + $0x49] sm:$0xff] }
  0xd4   : > { %11864 = vst [vmem:[#allocation36_spill] sm:$0xff] %v8052_v28  ;;  %v1363_v28 = vld [vmem:[%s7934_s24 + $0x44] sm:$0xff] }
  0xd5   : > { %11865 = vst [vmem:[#allocation37_spill] sm:$0xff] %v8054_v29  ;;  %v1365_v29 = vld [vmem:[%s7934_s24 + $0x54] sm:$0xff] }
  0xd8   : > { %1114 = vperm.xlu2 %7557, %v999_v30   ;;  %1109 = vperm.xlu1 %7556, %v998_v31   ;;  %v1182_v30 = vld [vmem:[%s7934_s24 + $0x83] sm:$0xff]  ;;  %v1181_v31 = vld [vmem:[%s7934_s24 + $0x7b] sm:$0xff] }
  0xd9   : > { %1104 = vperm.xlu0 %7555, %v997_v32  }
  0xda   : > { %v8059_v33 = vpop.permute.xlu2 %875  ;;  %v8061_v34 = vpop.permute.xlu1 %825 }
  0xdb   : > { %11866 = vst [vmem:[#allocation38_spill] sm:$0xff] %v8059_v33  ;;  %v8063_v35 = vpop.permute.xlu0 %820  ;;  %v1562_v33 = vld [vmem:[%s7934_s24 + $0x95] sm:$0xff] }
  0xe0   : > { %1203 = vperm.xlu2 %7557, %v1168_v36   ;;  %1198 = vperm.xlu1 %7556, %v1167_v38  }
  0xe1   : > { %1193 = vperm.xlu0 %7555, %v1166_v39   ;;  %v1186_v39 = vld [vmem:[%s7934_s24 + $0xa3] sm:$0xff] }
  0xe2   : > { %v8068_v40 = vpop.permute.xlu2 %890  ;;  %v8070_v42 = vpop.permute.xlu1 %840 }
  0xe3   : > { %11867 = vst [vmem:[#allocation39_spill] sm:$0xff] %v8068_v40  ;;  %v8072_v43 = vpop.permute.xlu0 %835  ;;  %v1560_v40 = vld [vmem:[%s7934_s24 + $0x85] sm:$0xff] }
  0xe4   : > { %11868 = vst [vmem:[#allocation40_spill] sm:$0xff] %v8070_v42  ;;  %v2497_v42 = vld [vmem:[%s7934_s24 + $0x4a] sm:$0xff] }
  0xe5   : > { %11869 = vst [vmem:[#allocation41_spill] sm:$0xff] %v8072_v43 }
  0xe8   : > { %1218 = vperm.xlu2 %7557, %v1171_v44   ;;  %1213 = vperm.xlu1 %7556, %v1170_v46   ;;  %v1185_v44 = vld [vmem:[%s7934_s24 + $0x9b] sm:$0xff]  ;;  %v1184_v46 = vld [vmem:[%s7934_s24 + $0x93] sm:$0xff] }
  0xe9   : > { %1208 = vperm.xlu0 %7555, %v1169_v47  }
  0xea   : > { %v8077_v48 = vpop.permute.xlu2 %905  ;;  %v8079_v52 = vpop.permute.xlu1 %855 }
  0xeb   : > { %11870 = vst [vmem:[#allocation42_spill] sm:$0xff] %v8077_v48  ;;  %v8081_v53 = vpop.permute.xlu0 %850  ;;  %v1373_v48 = vld [vmem:[%s7934_s24 + $0x94] sm:$0xff] }
  0xec   : > { %11871 = vst [vmem:[#allocation43_spill] sm:$0xff] %v8079_v52  ;;  %v2116_v52 = vld [vmem:[%s7934_s24 + $0x30] sm:$0xff] }
  0xed   : > { %11872 = vst [vmem:[#allocation44_spill] sm:$0xff] %v8081_v53  ;;  %v1939_v53 = vld [vmem:[%s7934_s24 + $0x8f] sm:$0xff] }
  0xf0   : > { %1233 = vperm.xlu2 %7557, %v1174_v54   ;;  %1228 = vperm.xlu1 %7556, %v1173_v58  }
  0xf1   : > { %1223 = vperm.xlu0 %7555, %v1172_v59   ;;  %v1355_v59 = vld [vmem:[%s7934_s24 + $0x4] sm:$0xff] }
  0xf2   : > { %v8086_v60 = vpop.permute.xlu2 %920  ;;  %v8088_v0 = vpop.permute.xlu1 %870 }
  0xf3   : > { %11873 = vst [vmem:[#allocation45_spill] sm:$0xff] %v8086_v60  ;;  %v8090_v1 = vpop.permute.xlu0 %865  ;;  %v1369_v60 = vld [vmem:[%s7934_s24 + $0x74] sm:$0xff] }
  0xf4   : > { %11874 = vst [vmem:[#allocation46_spill] sm:$0xff] %v8088_v0  ;;  %v1923_v0 = vld [vmem:[%s7934_s24 + $0xf] sm:$0xff] }
  0xf5   : > { %11875 = vst [vmem:[#allocation47_spill] sm:$0xff] %v8090_v1  ;;  %v1749_v1 = vld [vmem:[%s7934_s24 + $0x86] sm:$0xff] }
  0xf8   : > { %1248 = vperm.xlu2 %7557, %v1177_v2   ;;  %1243 = vperm.xlu1 %7556, %v1176_v6   ;;  %v1188_v2 = vld [vmem:[%s7934_s24 + $0xb3] sm:$0x1f]  ;;  %v1187_v6 = vld [vmem:[%s7934_s24 + $0xab] sm:$0xff] }
  0xf9   : > { %1238 = vperm.xlu0 %7555, %v1175_v7  }
  0xfa   : > { %v8095_v8 = vpop.permute.xlu2 %1009  ;;  %v8097_v12 = vpop.permute.xlu1 %885 }
  0xfb   : > { %11876 = vst [vmem:[#allocation48_spill] sm:$0xff] %v8097_v12  ;;  %v8099_v13 = vpop.permute.xlu0 %880  ;;  %v1552_v12 = vld [vmem:[%s7934_s24 + $0x45] sm:$0xff] }
  0xfc   : > { %11877 = vst [vmem:[#allocation49_spill] sm:$0xff] %v8099_v13  ;;  %v1739_v13 = vld [vmem:[%s7934_s24 + $0x36] sm:$0xff] }
 0x100   : > { %1263 = vperm.xlu2 %7557, %v1180_v14   ;;  %1258 = vperm.xlu1 %7556, %v1179_v18  }
 0x101   : > { %1253 = vperm.xlu0 %7555, %v1178_v19   ;;  %v1358_v19 = vld [vmem:[%s7934_s24 + $0x1c] sm:$0xff] }
 0x102   : > { %v8104_v20 = vpop.permute.xlu2 %1024  ;;  %v8106_v24 = vpop.permute.xlu1 %900 }
 0x103   : > { %11878 = vst [vmem:[#allocation50_spill] sm:$0xff] %v8104_v20  ;;  %v8108_v25 = vpop.permute.xlu0 %895  ;;  %v2689_v20 = vld [vmem:[%s7934_s24 + $0x63] sm:$0xff] }
 0x104   : > { %11879 = vst [vmem:[#allocation51_spill] sm:$0xff] %v8106_v24  ;;  %v1550_v24 = vld [vmem:[%s7934_s24 + $0x35] sm:$0xff] }
 0x105   : > { %11880 = vst [vmem:[#allocation52_spill] sm:$0xff] %v8108_v25  ;;  %v1544_v25 = vld [vmem:[%s7934_s24 + $0x5] sm:$0xff] }
 0x108   : > { %1278 = vperm.xlu2 %7557, %v1183_v26   ;;  %1273 = vperm.xlu1 %7556, %v1182_v30   ;;  %v1357_v26 = vld [vmem:[%s7934_s24 + $0x14] sm:$0xff]  ;;  %v1356_v30 = vld [vmem:[%s7934_s24 + $0xc] sm:$0xff] }
 0x109   : > { %1268 = vperm.xlu0 %7555, %v1181_v31  }
 0x10a   : > { %v8113_v32 = vpop.permute.xlu2 %1039  ;;  %v8115_v36 = vpop.permute.xlu1 %915 }
 0x10b   : > { %11881 = vst [vmem:[#allocation53_spill] sm:$0xff] %v8113_v32  ;;  %v8117_v38 = vpop.permute.xlu0 %910  ;;  %v1933_v32 = vld [vmem:[%s7934_s24 + $0x5f] sm:$0xff] }
 0x10c   : > { %11882 = vst [vmem:[#allocation54_spill] sm:$0xff] %v8115_v36  ;;  %v1366_v36 = vld [vmem:[%s7934_s24 + $0x5c] sm:$0xff] }
 0x10d   : > { %11883 = vst [vmem:[#allocation55_spill] sm:$0xff] %v8117_v38  ;;  %v1376_v38 = vld [vmem:[%s7934_s24 + $0xac] sm:$0xff] }
 0x110   : > { %1293 = vperm.xlu2 %7557, %v1186_v39   ;;  %1288 = vperm.xlu1 %7556, %v1185_v44  }
 0x111   : > { %1283 = vperm.xlu0 %7555, %v1184_v46   ;;  %v1361_v46 = vld [vmem:[%s7934_s24 + $0x34] sm:$0xff] }
 0x112   : > { %v8122_v47 = vpop.permute.xlu2 %1054  ;;  %v8124_v54 = vpop.permute.xlu1 %1004 }
 0x113   : > { %11884 = vst [vmem:[#allocation56_spill] sm:$0xff] %v8122_v47  ;;  %v8126_v58 = vpop.permute.xlu0 %925  ;;  %v1743_v47 = vld [vmem:[%s7934_s24 + $0x56] sm:$0xff] }
 0x114   : > { %11885 = vst [vmem:[#allocation57_spill] sm:$0xff] %v8126_v58  ;;  %v1362_v58 = vld [vmem:[%s7934_s24 + $0x3c] sm:$0xff] }
 0x118   : > { %1382 = vperm.xlu2 %7557, %v1355_v59   ;;  %1303 = vperm.xlu1 %7556, %v1188_v2   ;;  %v1360_v59 = vld [vmem:[%s7934_s24 + $0x2c] sm:$0xff]  ;;  %v1359_v2 = vld [vmem:[%s7934_s24 + $0x24] sm:$0xff] }
 0x119   : > { %1298 = vperm.xlu0 %7555, %v1187_v6  }
 0x11a   : > { %v8131_v7 = vpop.permute.xlu2 %1069  ;;  %v8133_v14 = vpop.permute.xlu1 %1019 }
 0x11b   : > { %11886 = vst [vmem:[#allocation58_spill] sm:$0xff] %v8131_v7  ;;  %v8135_v18 = vpop.permute.xlu0 %1014  ;;  %v1734_v7 = vld [vmem:[%s7934_s24 + $0xe] sm:$0xff] }
 0x11c   : > { %11887 = vst [vmem:[#allocation59_spill] sm:$0xff] %v8133_v14 }
 0x120   : > { %1397 = vperm.xlu2 %7557, %v1358_v19   ;;  %1392 = vperm.xlu1 %7556, %v1357_v26  }
 0x121   : > { %1387 = vperm.xlu0 %7555, %v1356_v30   ;;  %v1364_v30 = vld [vmem:[%s7934_s24 + $0x4c] sm:$0xff] }
 0x122   : > { %v8140_v31 = vpop.permute.xlu2 %1084  ;;  %v8142_v39 = vpop.permute.xlu1 %1034 }
 0x123   : > { %11888 = vst [vmem:[#allocation60_spill] sm:$0xff] %v8140_v31  ;;  %v8144_v44 = vpop.permute.xlu0 %1029  ;;  %v1375_v31 = vld [vmem:[%s7934_s24 + $0xa4] sm:$0xff] }
 0x124   : > { %11889 = vst [vmem:[#allocation61_spill] sm:$0xff] %v8142_v39  ;;  %v2306_v39 = vld [vmem:[%s7934_s24 + $0x39] sm:$0xff] }
 0x125   : > { %11890 = vst [vmem:[#allocation62_spill] sm:$0xff] %v8144_v44  ;;  %v8600_v44 = vld [vmem:[%s7934_s24 + $0x2a] sm:$0xff] }
 0x128   : > { %1412 = vperm.xlu2 %7557, %v1361_v46   ;;  %1407 = vperm.xlu1 %7556, %v1360_v59  }
 0x129   : > { %1402 = vperm.xlu0 %7555, %v1359_v2  }
 0x12a   : > { %v8149_v6 = vpop.permute.xlu2 %1099  ;;  %v8151_v19 = vpop.permute.xlu1 %1049 }
 0x12b   : > { %11891 = vst [vmem:[#allocation63_spill] sm:$0xff] %v8149_v6  ;;  %v8153_v26 = vpop.permute.xlu0 %1044  ;;  %v1372_v6 = vld [vmem:[%s7934_s24 + $0x8c] sm:$0xff] }
 0x12c   : > { %11892 = vst [vmem:[#allocation64_spill] sm:$0xff] %v8151_v19  ;;  %v2126_v19 = vld [vmem:[%s7934_s24 + $0x80] sm:$0xff] }
 0x12d   : > { %11893 = vst [vmem:[#allocation65_spill] sm:$0xff] %v8153_v26  ;;  %v2118_v26 = vld [vmem:[%s7934_s24 + $0x40] sm:$0xff] }
 0x130   : > { %1427 = vperm.xlu2 %7557, %v1364_v30   ;;  %1422 = vperm.xlu1 %7556, %v1363_v28  }
 0x131   : > { %1417 = vperm.xlu0 %7555, %v1362_v58  }
 0x132   : > { %v8158_v46 = vpop.permute.xlu2 %1114  ;;  %v8160_v59 = vpop.permute.xlu1 %1064 }
 0x133   : > { %11894 = vst [vmem:[#allocation66_spill] sm:$0xff] %v8158_v46  ;;  %v8162_v2 = vpop.permute.xlu0 %1059  ;;  %v1370_v46 = vld [vmem:[%s7934_s24 + $0x7c] sm:$0xff] }
 0x134   : > { %11895 = vst [vmem:[#allocation67_spill] sm:$0xff] %v8160_v59  ;;  %v1559_v59 = vld [vmem:[%s7934_s24 + $0x7d] sm:$0xff] }
 0x135   : > { %11896 = vst [vmem:[#allocation68_spill] sm:$0xff] %v8162_v2  ;;  %v1752_v2 = vld [vmem:[%s7934_s24 + $0x9e] sm:$0xff] }
 0x138   : > { %1442 = vperm.xlu2 %7557, %v1367_v3   ;;  %1437 = vperm.xlu1 %7556, %v1366_v36  }
 0x139   : > { %1432 = vperm.xlu0 %7555, %v1365_v29  }
 0x13a   : > { %v8167_v30 = vpop.permute.xlu2 %1203  ;;  %v8169_v28 = vpop.permute.xlu1 %1079 }
 0x13b   : > { %11897 = vst [vmem:[#allocation69_spill] sm:$0xff] %v8169_v28  ;;  %v8171_v58 = vpop.permute.xlu0 %1074  ;;  %v1556_v28 = vld [vmem:[%s7934_s24 + $0x65] sm:$0xff] }
 0x13c   : > { %11898 = vst [vmem:[#allocation70_spill] sm:$0xff] %v8171_v58  ;;  %v1549_v58 = vld [vmem:[%s7934_s24 + $0x2d] sm:$0xff] }
 0x140   : > { %1457 = vperm.xlu2 %7557, %v1370_v46   ;;  %1452 = vperm.xlu1 %7556, %v1369_v60  }
 0x141   : > { %1447 = vperm.xlu0 %7555, %v1368_v23  }
 0x142   : > { %v8176_v3 = vpop.permute.xlu2 %1218  ;;  %v8178_v36 = vpop.permute.xlu1 %1094 }
 0x143   : > { %11899 = vst [vmem:[#allocation71_spill] sm:$0xff] %v8176_v3  ;;  %v8180_v29 = vpop.permute.xlu0 %1089  ;;  %v8597_v3 = vld [vmem:[%s7934_s24 + $0x32] sm:$0xff] }
 0x144   : > { %11900 = vst [vmem:[#allocation72_spill] sm:$0xff] %v8178_v36  ;;  %v1374_v36 = vld [vmem:[%s7934_s24 + $0x9c] sm:$0xff] }
 0x145   : > { %11901 = vst [vmem:[#allocation73_spill] sm:$0xff] %v8180_v29  ;;  %v1547_v29 = vld [vmem:[%s7934_s24 + $0x1d] sm:$0xff] }
 0x148   : > { %1472 = vperm.xlu2 %7557, %v1373_v48   ;;  %1467 = vperm.xlu1 %7556, %v1372_v6  }
 0x149   : > { %1462 = vperm.xlu0 %7555, %v1371_v22  }
 0x14a   : > { %v8185_v46 = vpop.permute.xlu2 %1233  ;;  %v8187_v60 = vpop.permute.xlu1 %1109 }
 0x14b   : > { %11902 = vst [vmem:[#allocation74_spill] sm:$0xff] %v8185_v46  ;;  %v8189_v23 = vpop.permute.xlu0 %1104  ;;  %v8424_v46 = vld [vmem:[%s7934_s24 + $0x18] sm:$0xff] }
 0x14c   : > { %11903 = vst [vmem:[#allocation75_spill] sm:$0xff] %v8187_v60  ;;  %v1377_v60 = vld [vmem:[%s7934_s24 + $0xb4] sm:$0x1f] }
 0x14d   : > { %11904 = vst [vmem:[#allocation76_spill] sm:$0xff] %v8189_v23  ;;  %v1548_v23 = vld [vmem:[%s7934_s24 + $0x25] sm:$0xff] }
 0x150   : > { %1487 = vperm.xlu2 %7557, %v1376_v38   ;;  %1482 = vperm.xlu1 %7556, %v1375_v31  }
 0x151   : > { %1477 = vperm.xlu0 %7555, %v1374_v36  }
 0x152   : > { %v8194_v48 = vpop.permute.xlu2 %1248  ;;  %v8196_v6 = vpop.permute.xlu1 %1198 }
 0x153   : > { %11905 = vst [vmem:[#allocation77_spill] sm:$0xff] %v8194_v48  ;;  %v8198_v22 = vpop.permute.xlu0 %1193  ;;  %v1746_v48 = vld [vmem:[%s7934_s24 + $0x6e] sm:$0xff] }
 0x158   : > { %1576 = vperm.xlu2 %7557, %v1545_v16   ;;  %1571 = vperm.xlu1 %7556, %v1544_v25  }
 0x159   : > { %1492 = vperm.xlu0 %7555, %v1377_v60  }
 0x15a   : > { %v8203_v38 = vpop.permute.xlu2 %1263  ;;  %v8205_v31 = vpop.permute.xlu1 %1213 }
 0x15b   : > { %11906 = vst [vmem:[#allocation78_spill] sm:$0xff] %v8203_v38  ;;  %v8207_v36 = vpop.permute.xlu0 %1208  ;;  %v1551_v38 = vld [vmem:[%s7934_s24 + $0x3d] sm:$0xff] }
 0x15c   : > { %11907 = vst [vmem:[#allocation79_spill] sm:$0xff] %v8205_v31  ;;  %v8712_v31 = vld [vmem:[%s7934_s24 + $0x4b] sm:$0xff] }
 0x15d   : > { %11908 = vst [vmem:[#allocation80_spill] sm:$0xff] %v8207_v36  ;;  %v8709_v36 = vld [vmem:[%s7934_s24 + $0x53] sm:$0xff] }
 0x15e   : > { %12035 = vst [vmem:[#allocation207_spill] sm:$0xff] %v8709_v36 }
 0x15f   : > { %12036 = vst [vmem:[#allocation208_spill] sm:$0xff] %v8712_v31 }
 0x160   : > { %1591 = vperm.xlu2 %7557, %v1548_v23   ;;  %1586 = vperm.xlu1 %7556, %v1547_v29  }
 0x161   : > { %1581 = vperm.xlu0 %7555, %v1546_v61  }
 0x162   : > { %v8212_v16 = vpop.permute.xlu2 %1278  ;;  %v8214_v25 = vpop.permute.xlu1 %1228 }
 0x163   : > { %11909 = vst [vmem:[#allocation81_spill] sm:$0xff] %v8212_v16  ;;  %v8216_v60 = vpop.permute.xlu0 %1223  ;;  %v1554_v16 = vld [vmem:[%s7934_s24 + $0x55] sm:$0xff] }
 0x164   : > { %11910 = vst [vmem:[#allocation82_spill] sm:$0xff] %v8214_v25  ;;  %v1929_v25 = vld [vmem:[%s7934_s24 + $0x3f] sm:$0xff] }
 0x165   : > { %11911 = vst [vmem:[#allocation83_spill] sm:$0xff] %v8216_v60  ;;  %v2307_v60 = vld [vmem:[%s7934_s24 + $0x41] sm:$0xff] }
 0x168   : > { %1606 = vperm.xlu2 %7557, %v1551_v38   ;;  %1601 = vperm.xlu1 %7556, %v1550_v24  }
 0x169   : > { %1596 = vperm.xlu0 %7555, %v1549_v58  }
 0x16a   : > { %v8221_v23 = vpop.permute.xlu2 %1293  ;;  %v8223_v29 = vpop.permute.xlu1 %1243 }
 0x16b   : > { %11912 = vst [vmem:[#allocation84_spill] sm:$0xff] %v8221_v23  ;;  %v8225_v61 = vpop.permute.xlu0 %1238  ;;  %v1557_v23 = vld [vmem:[%s7934_s24 + $0x6d] sm:$0xff] }
 0x16c   : > { %11913 = vst [vmem:[#allocation85_spill] sm:$0xff] %v8223_v29  ;;  %v1740_v29 = vld [vmem:[%s7934_s24 + $0x3e] sm:$0xff] }
 0x16d   : > { %11914 = vst [vmem:[#allocation86_spill] sm:$0xff] %v8225_v61  ;;  %v2120_v61 = vld [vmem:[%s7934_s24 + $0x50] sm:$0xff] }
 0x170   : > { %1621 = vperm.xlu2 %7557, %v1554_v16   ;;  %1616 = vperm.xlu1 %7556, %v1553_v55  }
 0x171   : > { %1611 = vperm.xlu0 %7555, %v1552_v12  }
 0x172   : > { %v8230_v38 = vpop.permute.xlu2 %1382  ;;  %v8232_v24 = vpop.permute.xlu1 %1258 }
 0x173   : > { %11915 = vst [vmem:[#allocation87_spill] sm:$0xff] %v8232_v24  ;;  %v8234_v58 = vpop.permute.xlu0 %1253  ;;  %v1565_v24 = vld [vmem:[%s7934_s24 + $0xad] sm:$0xff] }
 0x174   : > { %11916 = vst [vmem:[#allocation88_spill] sm:$0xff] %v8234_v58  ;;  %v1563_v58 = vld [vmem:[%s7934_s24 + $0x9d] sm:$0xff] }
 0x178   : > { %1636 = vperm.xlu2 %7557, %v1557_v23   ;;  %1631 = vperm.xlu1 %7556, %v1556_v28  }
 0x179   : > { %1626 = vperm.xlu0 %7555, %v1555_v17  }
 0x17a   : > { %v8239_v16 = vpop.permute.xlu2 %1397  ;;  %v8241_v55 = vpop.permute.xlu1 %1273 }
 0x17b   : > { %11917 = vst [vmem:[#allocation89_spill] sm:$0xff] %v8239_v16  ;;  %v8243_v12 = vpop.permute.xlu0 %1268  ;;  %v8696_v16 = vld [vmem:[%s7934_s24 + $0x33] sm:$0xff] }
 0x17c   : > { %11918 = vst [vmem:[#allocation90_spill] sm:$0xff] %v8241_v55  ;;  %v1561_v55 = vld [vmem:[%s7934_s24 + $0x8d] sm:$0xff] }
 0x17d   : > { %11919 = vst [vmem:[#allocation91_spill] sm:$0xff] %v8243_v12  ;;  %v1566_v12 = vld [vmem:[%s7934_s24 + $0xb5] sm:$0x1f] }
 0x180   : > { %1651 = vperm.xlu2 %7557, %v1560_v40   ;;  %1646 = vperm.xlu1 %7556, %v1559_v59  }
 0x181   : > { %1641 = vperm.xlu0 %7555, %v1558_v11  }
 0x182   : > { %v8248_v23 = vpop.permute.xlu2 %1412  ;;  %v8250_v28 = vpop.permute.xlu1 %1288 }
 0x183   : > { %11920 = vst [vmem:[#allocation92_spill] sm:$0xff] %v8248_v23  ;;  %v8252_v17 = vpop.permute.xlu0 %1283 }
 0x184   : > { %11921 = vst [vmem:[#allocation93_spill] sm:$0xff] %v8250_v28  ;;  %v1564_v28 = vld [vmem:[%s7934_s24 + $0xa5] sm:$0xff] }
 0x185   : > { %11922 = vst [vmem:[#allocation94_spill] sm:$0xff] %v8252_v17  ;;  %v1735_v17 = vld [vmem:[%s7934_s24 + $0x16] sm:$0xff] }
 0x188   : > { %1666 = vperm.xlu2 %7557, %v1563_v58   ;;  %1661 = vperm.xlu1 %7556, %v1562_v33  }
 0x189   : > { %1656 = vperm.xlu0 %7555, %v1561_v55  }
 0x18a   : > { %v8257_v40 = vpop.permute.xlu2 %1427  ;;  %v8259_v59 = vpop.permute.xlu1 %1303 }
 0x18b   : > { %11923 = vst [vmem:[#allocation95_spill] sm:$0xff] %v8257_v40  ;;  %v8261_v11 = vpop.permute.xlu0 %1298 }
 0x18c   : > { %11924 = vst [vmem:[#allocation96_spill] sm:$0xff] %v8259_v59  ;;  %v1733_v59 = vld [vmem:[%s7934_s24 + $0x6] sm:$0xff] }
 0x18d   : > { %11925 = vst [vmem:[#allocation97_spill] sm:$0xff] %v8261_v11  ;;  %v1738_v11 = vld [vmem:[%s7934_s24 + $0x2e] sm:$0xff] }
 0x190   : > { %1681 = vperm.xlu2 %7557, %v1566_v12   ;;  %1676 = vperm.xlu1 %7556, %v1565_v24  }
 0x191   : > { %1671 = vperm.xlu0 %7555, %v1564_v28  }
 0x192   : > { %v8266_v58 = vpop.permute.xlu2 %1442  ;;  %v8268_v33 = vpop.permute.xlu1 %1392 }
 0x193   : > { %11926 = vst [vmem:[#allocation98_spill] sm:$0xff] %v8266_v58  ;;  %v8270_v55 = vpop.permute.xlu0 %1387  ;;  %v1737_v58 = vld [vmem:[%s7934_s24 + $0x26] sm:$0xff] }
 0x198   : > { %1770 = vperm.xlu2 %7557, %v1735_v17   ;;  %1765 = vperm.xlu1 %7556, %v1734_v7  }
 0x199   : > { %1760 = vperm.xlu0 %7555, %v1733_v59  }
 0x19a   : > { %v8275_v12 = vpop.permute.xlu2 %1457  ;;  %v8277_v24 = vpop.permute.xlu1 %1407 }
 0x19b   : > { %11927 = vst [vmem:[#allocation99_spill] sm:$0xff] %v8275_v12  ;;  %v8279_v28 = vpop.permute.xlu0 %1402  ;;  %v1741_v12 = vld [vmem:[%s7934_s24 + $0x46] sm:$0xff] }
 0x19c   : > { %11928 = vst [vmem:[#allocation100_spill] sm:$0xff] %v8277_v24  ;;  %v2319_v24 = vld [vmem:[%s7934_s24 + $0xa1] sm:$0xff] }
 0x19d   : > { %11929 = vst [vmem:[#allocation101_spill] sm:$0xff] %v8279_v28  ;;  %v2688_v28 = vld [vmem:[%s7934_s24 + $0x5b] sm:$0xff] }
 0x1a0   : > { %1785 = vperm.xlu2 %7557, %v1738_v11   ;;  %1780 = vperm.xlu1 %7556, %v1737_v58  }
 0x1a1   : > { %1775 = vperm.xlu0 %7555, %v1736_v10  }
 0x1a2   : > { %v8284_v17 = vpop.permute.xlu2 %1472  ;;  %v8286_v7 = vpop.permute.xlu1 %1422 }
 0x1a3   : > { %11930 = vst [vmem:[#allocation102_spill] sm:$0xff] %v8284_v17  ;;  %v8288_v59 = vpop.permute.xlu0 %1417  ;;  %v1744_v17 = vld [vmem:[%s7934_s24 + $0x5e] sm:$0xff] }
 0x1a4   : > { %11931 = vst [vmem:[#allocation103_spill] sm:$0xff] %v8286_v7  ;;  %v1942_v7 = vld [vmem:[%s7934_s24 + $0xa7] sm:$0xff] }
 0x1a5   : > { %11932 = vst [vmem:[#allocation104_spill] sm:$0xff] %v8288_v59  ;;  %v1930_v59 = vld [vmem:[%s7934_s24 + $0x47] sm:$0xff] }
 0x1a8   : > { %1800 = vperm.xlu2 %7557, %v1741_v12   ;;  %1795 = vperm.xlu1 %7556, %v1740_v29  }
 0x1a9   : > { %1790 = vperm.xlu0 %7555, %v1739_v13  }
 0x1aa   : > { %v8293_v11 = vpop.permute.xlu2 %1487  ;;  %v8295_v58 = vpop.permute.xlu1 %1437 }
 0x1ab   : > { %11933 = vst [vmem:[#allocation105_spill] sm:$0xff] %v8293_v11  ;;  %v8297_v10 = vpop.permute.xlu0 %1432  ;;  %v1747_v11 = vld [vmem:[%s7934_s24 + $0x76] sm:$0xff] }
 0x1ac   : > { %11934 = vst [vmem:[#allocation106_spill] sm:$0xff] %v8295_v58  ;;  %v1745_v58 = vld [vmem:[%s7934_s24 + $0x66] sm:$0xff] }
 0x1ad   : > { %11935 = vst [vmem:[#allocation107_spill] sm:$0xff] %v8297_v10  ;;  %v1750_v10 = vld [vmem:[%s7934_s24 + $0x8e] sm:$0xff] }
 0x1b0   : > { %1815 = vperm.xlu2 %7557, %v1744_v17   ;;  %1810 = vperm.xlu1 %7556, %v1743_v47  }
 0x1b1   : > { %1805 = vperm.xlu0 %7555, %v1742_v4  }
 0x1b2   : > { %v8302_v12 = vpop.permute.xlu2 %1576  ;;  %v8304_v29 = vpop.permute.xlu1 %1452 }
 0x1b3   : > { %11936 = vst [vmem:[#allocation108_spill] sm:$0xff] %v8304_v29  ;;  %v8306_v13 = vpop.permute.xlu0 %1447  ;;  %v1748_v29 = vld [vmem:[%s7934_s24 + $0x7e] sm:$0xff] }
 0x1b4   : > { %11937 = vst [vmem:[#allocation109_spill] sm:$0xff] %v8306_v13  ;;  %v1753_v13 = vld [vmem:[%s7934_s24 + $0xa6] sm:$0xff] }
 0x1b8   : > { %1830 = vperm.xlu2 %7557, %v1747_v11   ;;  %1825 = vperm.xlu1 %7556, %v1746_v48  }
 0x1b9   : > { %1820 = vperm.xlu0 %7555, %v1745_v58  }
 0x1ba   : > { %v8311_v17 = vpop.permute.xlu2 %1591  ;;  %v8313_v47 = vpop.permute.xlu1 %1467 }
 0x1bb   : > { %11938 = vst [vmem:[#allocation110_spill] sm:$0xff] %v8311_v17  ;;  %v8315_v4 = vpop.permute.xlu0 %1462  ;;  %v8678_v17 = vld [vmem:[%s7934_s24 + $0x1b] sm:$0xff] }
 0x1bc   : > { %11939 = vst [vmem:[#allocation111_spill] sm:$0xff] %v8313_v47  ;;  %v1751_v47 = vld [vmem:[%s7934_s24 + $0x96] sm:$0xff] }
 0x1bd   : > { %11940 = vst [vmem:[#allocation112_spill] sm:$0xff] %v8315_v4  ;;  %v1922_v4 = vld [vmem:[%s7934_s24 + $0x7] sm:$0xff] }
 0x1c0   : > { %1845 = vperm.xlu2 %7557, %v1750_v10   ;;  %1840 = vperm.xlu1 %7556, %v1749_v1  }
 0x1c1   : > { %1835 = vperm.xlu0 %7555, %v1748_v29  }
 0x1c2   : > { %v8320_v11 = vpop.permute.xlu2 %1606  ;;  %v8322_v48 = vpop.permute.xlu1 %1482 }
 0x1c3   : > { %11941 = vst [vmem:[#allocation113_spill] sm:$0xff] %v8320_v11  ;;  %v8324_v58 = vpop.permute.xlu0 %1477  ;;  %v1926_v11 = vld [vmem:[%s7934_s24 + $0x27] sm:$0xff] }
 0x1c4   : > { %11942 = vst [vmem:[#allocation114_spill] sm:$0xff] %v8322_v48  ;;  %v1754_v48 = vld [vmem:[%s7934_s24 + $0xae] sm:$0xff] }
 0x1c5   : > { %11943 = vst [vmem:[#allocation115_spill] sm:$0xff] %v8324_v58  ;;  %v1925_v58 = vld [vmem:[%s7934_s24 + $0x1f] sm:$0xff] }
 0x1c8   : > { %1860 = vperm.xlu2 %7557, %v1753_v13   ;;  %1855 = vperm.xlu1 %7556, %v1752_v2  }
 0x1c9   : > { %1850 = vperm.xlu0 %7555, %v1751_v47  }
 0x1ca   : > { %v8329_v10 = vpop.permute.xlu2 %1621  ;;  %v8331_v1 = vpop.permute.xlu1 %1571 }
 0x1cb   : > { %11944 = vst [vmem:[#allocation116_spill] sm:$0xff] %v8329_v10  ;;  %v8333_v29 = vpop.permute.xlu0 %1492  ;;  %v1924_v10 = vld [vmem:[%s7934_s24 + $0x17] sm:$0xff] }
 0x1cc   : > { %11945 = vst [vmem:[#allocation117_spill] sm:$0xff] %v8333_v29  ;;  %v1928_v29 = vld [vmem:[%s7934_s24 + $0x37] sm:$0xff] }
 0x1d0   : > { %1949 = vperm.xlu2 %7557, %v1922_v4   ;;  %1870 = vperm.xlu1 %7556, %v1755_v49  }
 0x1d1   : > { %1865 = vperm.xlu0 %7555, %v1754_v48  }
 0x1d2   : > { %v8338_v13 = vpop.permute.xlu2 %1636  ;;  %v8340_v2 = vpop.permute.xlu1 %1586 }
 0x1d3   : > { %11946 = vst [vmem:[#allocation118_spill] sm:$0xff] %v8338_v13  ;;  %v8342_v47 = vpop.permute.xlu0 %1581  ;;  %v1927_v13 = vld [vmem:[%s7934_s24 + $0x2f] sm:$0xff] }
 0x1d4   : > { %11947 = vst [vmem:[#allocation119_spill] sm:$0xff] %v8340_v2  ;;  %v2506_v2 = vld [vmem:[%s7934_s24 + $0x92] sm:$0xff] }
 0x1d8   : > { %1964 = vperm.xlu2 %7557, %v1925_v58   ;;  %1959 = vperm.xlu1 %7556, %v1924_v10  }
 0x1d9   : > { %1954 = vperm.xlu0 %7555, %v1923_v0  }
 0x1da   : > { %v8347_v4 = vpop.permute.xlu2 %1651  ;;  %v8349_v49 = vpop.permute.xlu1 %1601 }
 0x1db   : > { %11948 = vst [vmem:[#allocation120_spill] sm:$0xff] %v8347_v4  ;;  %v8351_v48 = vpop.permute.xlu0 %1596  ;;  %v1931_v4 = vld [vmem:[%s7934_s24 + $0x4f] sm:$0xff] }
 0x1dc   : > { %11949 = vst [vmem:[#allocation121_spill] sm:$0xff] %v8349_v49  ;;  %v2129_v49 = vld [vmem:[%s7934_s24 + $0x98] sm:$0xff] }
 0x1dd   : > { %11950 = vst [vmem:[#allocation122_spill] sm:$0xff] %v8351_v48  ;;  %v2316_v48 = vld [vmem:[%s7934_s24 + $0x89] sm:$0xff] }
 0x1e0   : > { %1979 = vperm.xlu2 %7557, %v1928_v29   ;;  %1974 = vperm.xlu1 %7556, %v1927_v13  }
 0x1e1   : > { %1969 = vperm.xlu0 %7555, %v1926_v11  }
 0x1e2   : > { %v8356_v58 = vpop.permute.xlu2 %1666  ;;  %v8358_v10 = vpop.permute.xlu1 %1616 }
 0x1e3   : > { %11951 = vst [vmem:[#allocation123_spill] sm:$0xff] %v8356_v58  ;;  %v8360_v0 = vpop.permute.xlu0 %1611  ;;  %v1934_v58 = vld [vmem:[%s7934_s24 + $0x67] sm:$0xff] }
 0x1e4   : > { %11952 = vst [vmem:[#allocation124_spill] sm:$0xff] %v8358_v10 }
 0x1e5   : > { %11953 = vst [vmem:[#allocation125_spill] sm:$0xff] %v8360_v0  ;;  %v1936_v0 = vld [vmem:[%s7934_s24 + $0x77] sm:$0xff] }
 0x1e8   : > { %1994 = vperm.xlu2 %7557, %v1931_v4   ;;  %1989 = vperm.xlu1 %7556, %v1930_v59  }
 0x1e9   : > { %1984 = vperm.xlu0 %7555, %v1929_v25  }
 0x1ea   : > { %v8365_v29 = vpop.permute.xlu2 %1681  ;;  %v8367_v13 = vpop.permute.xlu1 %1631 }
 0x1eb   : > { %11954 = vst [vmem:[#allocation126_spill] sm:$0xff] %v8365_v29  ;;  %v8369_v11 = vpop.permute.xlu0 %1626  ;;  %v1937_v29 = vld [vmem:[%s7934_s24 + $0x7f] sm:$0xff] }
 0x1ec   : > { %11955 = vst [vmem:[#allocation127_spill] sm:$0xff] %v8367_v13  ;;  %v1935_v13 = vld [vmem:[%s7934_s24 + $0x6f] sm:$0xff] }
 0x1ed   : > { %11956 = vst [vmem:[#allocation128_spill] sm:$0xff] %v8369_v11  ;;  %v1940_v11 = vld [vmem:[%s7934_s24 + $0x97] sm:$0xff] }
 0x1f0   : > { %2009 = vperm.xlu2 %7557, %v1934_v58   ;;  %2004 = vperm.xlu1 %7556, %v1933_v32  }
 0x1f1   : > { %1999 = vperm.xlu0 %7555, %v1932_v62  }
 0x1f2   : > { %v8374_v4 = vpop.permute.xlu2 %1770  ;;  %v8376_v59 = vpop.permute.xlu1 %1646 }
 0x1f3   : > { %11957 = vst [vmem:[#allocation129_spill] sm:$0xff] %v8376_v59  ;;  %v8378_v25 = vpop.permute.xlu0 %1641  ;;  %v1938_v59 = vld [vmem:[%s7934_s24 + $0x87] sm:$0xff] }
 0x1f4   : > { %11958 = vst [vmem:[#allocation130_spill] sm:$0xff] %v8378_v25  ;;  %v1943_v25 = vld [vmem:[%s7934_s24 + $0xaf] sm:$0xff] }
 0x1f8   : > { %2024 = vperm.xlu2 %7557, %v1937_v29   ;;  %2019 = vperm.xlu1 %7556, %v1936_v0  }
 0x1f9   : > { %2014 = vperm.xlu0 %7555, %v1935_v13  }
 0x1fa   : > { %v8383_v58 = vpop.permute.xlu2 %1785  ;;  %v8385_v32 = vpop.permute.xlu1 %1661 }
 0x1fb   : > { %11959 = vst [vmem:[#allocation131_spill] sm:$0xff] %v8383_v58  ;;  %v8387_v62 = vpop.permute.xlu0 %1656  ;;  %v2310_v58 = vld [vmem:[%s7934_s24 + $0x59] sm:$0xff] }
 0x1fc   : > { %11960 = vst [vmem:[#allocation132_spill] sm:$0xff] %v8385_v32  ;;  %v1941_v32 = vld [vmem:[%s7934_s24 + $0x9f] sm:$0xff] }
 0x1fd   : > { %11961 = vst [vmem:[#allocation133_spill] sm:$0xff] %v8387_v62  ;;  %v8408_v62 = vld [vmem:[%s7934_s24 + $0x10] sm:$0xff] }
 0x200   : > { %2039 = vperm.xlu2 %7557, %v1940_v11   ;;  %2034 = vperm.xlu1 %7556, %v1939_v53  }
 0x201   : > { %2029 = vperm.xlu0 %7555, %v1938_v59  }
 0x202   : > { %v8392_v29 = vpop.permute.xlu2 %1800  ;;  %v8394_v0 = vpop.permute.xlu1 %1676 }
 0x203   : > { %11962 = vst [vmem:[#allocation134_spill] sm:$0xff] %v8392_v29  ;;  %v8396_v13 = vpop.permute.xlu0 %1671  ;;  %v1944_v29 = vld [vmem:[%s7934_s24 + $0xb7] sm:$0x1f] }
 0x204   : > { %11963 = vst [vmem:[#allocation135_spill] sm:$0xff] %v8394_v0  ;;  %v2111_v0 = vld [vmem:[%s7934_s24 + $0x8] sm:$0xff] }
 0x205   : > { %11964 = vst [vmem:[#allocation136_spill] sm:$0xff] %v8396_v13  ;;  %v2115_v13 = vld [vmem:[%s7934_s24 + $0x28] sm:$0xff] }
 0x208   : > { %2054 = vperm.xlu2 %7557, %v1943_v25   ;;  %2049 = vperm.xlu1 %7556, %v1942_v7  }
 0x209   : > { %2044 = vperm.xlu0 %7555, %v1941_v32  }
 0x20a   : > { %v8401_v11 = vpop.permute.xlu2 %1815  ;;  %v8403_v53 = vpop.permute.xlu1 %1765 }
 0x20b   : > { %11965 = vst [vmem:[#allocation137_spill] sm:$0xff] %v8401_v11  ;;  %v8405_v59 = vpop.permute.xlu0 %1760  ;;  %v8421_v11 = vld [vmem:[%s7934_s24 + $0x20] sm:$0xff] }
 0x210   : > { %2143 = vperm.xlu2 %7557, %v8408_v62   ;;  %2138 = vperm.xlu1 %7556, %v2111_v0  }
 0x211   : > { %2059 = vperm.xlu0 %7555, %v1944_v29  }
 0x212   : > { %v8413_v7 = vpop.permute.xlu2 %1830  ;;  %v8415_v25 = vpop.permute.xlu1 %1780 }
 0x213   : > { %11966 = vst [vmem:[#allocation138_spill] sm:$0xff] %v8413_v7  ;;  %v8417_v32 = vpop.permute.xlu0 %1775 }
 0x214   : > { %11967 = vst [vmem:[#allocation139_spill] sm:$0xff] %v8415_v25  ;;  %v2503_v25 = vld [vmem:[%s7934_s24 + $0x7a] sm:$0xff] }
 0x215   : > { %11968 = vst [vmem:[#allocation140_spill] sm:$0xff] %v8417_v32 }
 0x218   : > { %2158 = vperm.xlu2 %7557, %v2115_v13   ;;  %2153 = vperm.xlu1 %7556, %v8421_v11  }
 0x219   : > { %2148 = vperm.xlu0 %7555, %v8424_v46  }
 0x21a   : > { %v8428_v29 = vpop.permute.xlu2 %1845  ;;  %v8430_v0 = vpop.permute.xlu1 %1795 }
 0x21b   : > { %11969 = vst [vmem:[#allocation141_spill] sm:$0xff] %v8428_v29  ;;  %v8432_v7 = vpop.permute.xlu0 %1790  ;;  %v2121_v29 = vld [vmem:[%s7934_s24 + $0x58] sm:$0xff] }
 0x21c   : > { %11970 = vst [vmem:[#allocation142_spill] sm:$0xff] %v8430_v0  ;;  %v2119_v0 = vld [vmem:[%s7934_s24 + $0x48] sm:$0xff] }
 0x21d   : > { %11971 = vst [vmem:[#allocation143_spill] sm:$0xff] %v8432_v7  ;;  %v2123_v7 = vld [vmem:[%s7934_s24 + $0x68] sm:$0xff] }
 0x220   : > { %2173 = vperm.xlu2 %7557, %v2118_v26   ;;  %2168 = vperm.xlu1 %7556, %v2117_v45  }
 0x221   : > { %2163 = vperm.xlu0 %7555, %v2116_v52  }
 0x222   : > { %v8437_v13 = vpop.permute.xlu2 %1860  ;;  %v8439_v10 = vpop.permute.xlu1 %1810 }
 0x223   : > { %11972 = vst [vmem:[#allocation144_spill] sm:$0xff] %v8437_v13  ;;  %v8441_v40 = vpop.permute.xlu0 %1805  ;;  %v2124_v13 = vld [vmem:[%s7934_s24 + $0x70] sm:$0xff] }
 0x224   : > { %11973 = vst [vmem:[#allocation145_spill] sm:$0xff] %v8439_v10  ;;  %v2122_v10 = vld [vmem:[%s7934_s24 + $0x60] sm:$0xff] }
 0x225   : > { %11974 = vst [vmem:[#allocation146_spill] sm:$0xff] %v8441_v40  ;;  %v2127_v40 = vld [vmem:[%s7934_s24 + $0x88] sm:$0xff] }
 0x228   : > { %2188 = vperm.xlu2 %7557, %v2121_v29   ;;  %2183 = vperm.xlu1 %7556, %v2120_v61  }
 0x229   : > { %2178 = vperm.xlu0 %7555, %v2119_v0  }
 0x22a   : > { %v8446_v26 = vpop.permute.xlu2 %1949  ;;  %v8448_v45 = vpop.permute.xlu1 %1825 }
 0x22b   : > { %11975 = vst [vmem:[#allocation147_spill] sm:$0xff] %v8448_v45  ;;  %v8450_v52 = vpop.permute.xlu0 %1820  ;;  %v2125_v45 = vld [vmem:[%s7934_s24 + $0x78] sm:$0xff] }
 0x22c   : > { %11976 = vst [vmem:[#allocation148_spill] sm:$0xff] %v8450_v52  ;;  %v2130_v52 = vld [vmem:[%s7934_s24 + $0xa0] sm:$0xff] }
 0x230   : > { %2203 = vperm.xlu2 %7557, %v2124_v13   ;;  %2198 = vperm.xlu1 %7556, %v2123_v7  }
 0x231   : > { %2193 = vperm.xlu0 %7555, %v2122_v10  }
 0x232   : > { %v8455_v29 = vpop.permute.xlu2 %1964  ;;  %v8457_v61 = vpop.permute.xlu1 %1840 }
 0x233   : > { %11977 = vst [vmem:[#allocation149_spill] sm:$0xff] %v8455_v29  ;;  %v8459_v0 = vpop.permute.xlu0 %1835 }
 0x234   : > { %11978 = vst [vmem:[#allocation150_spill] sm:$0xff] %v8457_v61  ;;  %v2128_v61 = vld [vmem:[%s7934_s24 + $0x90] sm:$0xff] }
 0x235   : > { %11979 = vst [vmem:[#allocation151_spill] sm:$0xff] %v8459_v0  ;;  %v2133_v0 = vld [vmem:[%s7934_s24 + $0xb8] sm:$0x1f] }
 0x238   : > { %2218 = vperm.xlu2 %7557, %v2127_v40   ;;  %2213 = vperm.xlu1 %7556, %v2126_v19  }
 0x239   : > { %2208 = vperm.xlu0 %7555, %v2125_v45  }
 0x23a   : > { %v8464_v13 = vpop.permute.xlu2 %1979  ;;  %v8466_v7 = vpop.permute.xlu1 %1855 }
 0x23b   : > { %11980 = vst [vmem:[#allocation152_spill] sm:$0xff] %v8464_v13  ;;  %v8468_v10 = vpop.permute.xlu0 %1850  ;;  %v2132_v13 = vld [vmem:[%s7934_s24 + $0xb0] sm:$0xff] }
 0x23c   : > { %11981 = vst [vmem:[#allocation153_spill] sm:$0xff] %v8466_v7  ;;  %v2131_v7 = vld [vmem:[%s7934_s24 + $0xa8] sm:$0xff] }
 0x23d   : > { %11982 = vst [vmem:[#allocation154_spill] sm:$0xff] %v8468_v10  ;;  %v8489_v10 = vld [vmem:[%s7934_s24 + $0x19] sm:$0xff] }
 0x240   : > { %2233 = vperm.xlu2 %7557, %v2130_v52   ;;  %2228 = vperm.xlu1 %7556, %v2129_v49  }
 0x241   : > { %2223 = vperm.xlu0 %7555, %v2128_v61  }
 0x242   : > { %v8473_v40 = vpop.permute.xlu2 %1994  ;;  %v8475_v19 = vpop.permute.xlu1 %1870 }
 0x243   : > { %11983 = vst [vmem:[#allocation155_spill] sm:$0xff] %v8473_v40  ;;  %v8477_v45 = vpop.permute.xlu0 %1865  ;;  %v8507_v40 = vld [vmem:[%s7934_s24 + $0x29] sm:$0xff] }
 0x244   : > { %11984 = vst [vmem:[#allocation156_spill] sm:$0xff] %v8475_v19  ;;  %v8492_v19 = vld [vmem:[%s7934_s24 + $0x11] sm:$0xff] }
 0x245   : > { %11985 = vst [vmem:[#allocation157_spill] sm:$0xff] %v8477_v45  ;;  %v2300_v45 = vld [vmem:[%s7934_s24 + $0x9] sm:$0xff] }
 0x248   : > { %2248 = vperm.xlu2 %7557, %v2133_v0   ;;  %2243 = vperm.xlu1 %7556, %v2132_v13  }
 0x249   : > { %2238 = vperm.xlu0 %7555, %v2131_v7  }
 0x24a   : > { %v8482_v52 = vpop.permute.xlu2 %2009  ;;  %v8484_v49 = vpop.permute.xlu1 %1959 }
 0x24b   : > { %11986 = vst [vmem:[#allocation158_spill] sm:$0xff] %v8482_v52  ;;  %v8486_v61 = vpop.permute.xlu0 %1954  ;;  %v8504_v52 = vld [vmem:[%s7934_s24 + $0x31] sm:$0xff] }
 0x250   : > { %2337 = vperm.xlu2 %7557, %v8489_v10   ;;  %2332 = vperm.xlu1 %7556, %v8492_v19  }
 0x251   : > { %2327 = vperm.xlu0 %7555, %v2300_v45  }
 0x252   : > { %v8497_v0 = vpop.permute.xlu2 %2024  ;;  %v8499_v13 = vpop.permute.xlu1 %1974 }
 0x253   : > { %11987 = vst [vmem:[#allocation159_spill] sm:$0xff] %v8497_v0  ;;  %v8501_v7 = vpop.permute.xlu0 %1969 }
 0x254   : > { %11988 = vst [vmem:[#allocation160_spill] sm:$0xff] %v8499_v13 }
 0x255   : > { %11989 = vst [vmem:[#allocation161_spill] sm:$0xff] %v8501_v7  ;;  %v2500_v7 = vld [vmem:[%s7934_s24 + $0x62] sm:$0xff] }
 0x258   : > { %2352 = vperm.xlu2 %7557, %v8504_v52   ;;  %2347 = vperm.xlu1 %7556, %v8507_v40  }
 0x259   : > { %2342 = vperm.xlu0 %7555, %v8510_v5  }
 0x25a   : > { %v8515_v45 = vpop.permute.xlu2 %2039  ;;  %v8517_v0 = vpop.permute.xlu1 %1989 }
 0x25b   : > { %11990 = vst [vmem:[#allocation162_spill] sm:$0xff] %v8515_v45  ;;  %v8519_v23 = vpop.permute.xlu0 %1984  ;;  %v2311_v45 = vld [vmem:[%s7934_s24 + $0x61] sm:$0xff] }
 0x25c   : > { %11991 = vst [vmem:[#allocation163_spill] sm:$0xff] %v8517_v0  ;;  %v2309_v0 = vld [vmem:[%s7934_s24 + $0x51] sm:$0xff] }
 0x25d   : > { %11992 = vst [vmem:[#allocation164_spill] sm:$0xff] %v8519_v23  ;;  %v2313_v23 = vld [vmem:[%s7934_s24 + $0x71] sm:$0xff] }
 0x260   : > { %2367 = vperm.xlu2 %7557, %v2308_v27   ;;  %2362 = vperm.xlu1 %7556, %v2307_v60  }
 0x261   : > { %2357 = vperm.xlu0 %7555, %v2306_v39  }
 0x262   : > { %v8524_v63 = vpop.permute.xlu2 %2054  ;;  %v8526_v21 = vpop.permute.xlu1 %2004 }
 0x263   : > { %11993 = vst [vmem:[#allocation165_spill] sm:$0xff] %v8524_v63  ;;  %v8528_v13 = vpop.permute.xlu0 %1999  ;;  %v2314_v63 = vld [vmem:[%s7934_s24 + $0x79] sm:$0xff] }
 0x264   : > { %11994 = vst [vmem:[#allocation166_spill] sm:$0xff] %v8526_v21  ;;  %v2312_v21 = vld [vmem:[%s7934_s24 + $0x69] sm:$0xff] }
 0x265   : > { %11995 = vst [vmem:[#allocation167_spill] sm:$0xff] %v8528_v13  ;;  %v2317_v13 = vld [vmem:[%s7934_s24 + $0x91] sm:$0xff] }
 0x268   : > { %2382 = vperm.xlu2 %7557, %v2311_v45   ;;  %2377 = vperm.xlu1 %7556, %v2310_v58  }
 0x269   : > { %2372 = vperm.xlu0 %7555, %v2309_v0  }
 0x26a   : > { %v8533_v27 = vpop.permute.xlu2 %2143  ;;  %v8535_v60 = vpop.permute.xlu1 %2019 }
 0x26b   : > { %11996 = vst [vmem:[#allocation168_spill] sm:$0xff] %v8535_v60  ;;  %v8537_v39 = vpop.permute.xlu0 %2014  ;;  %v2315_v60 = vld [vmem:[%s7934_s24 + $0x81] sm:$0xff] }
 0x26c   : > { %11997 = vst [vmem:[#allocation169_spill] sm:$0xff] %v8537_v39  ;;  %v2320_v39 = vld [vmem:[%s7934_s24 + $0xa9] sm:$0xff] }
 0x270   : > { %2397 = vperm.xlu2 %7557, %v2314_v63   ;;  %2392 = vperm.xlu1 %7556, %v2313_v23  }
 0x271   : > { %2387 = vperm.xlu0 %7555, %v2312_v21  }
 0x272   : > { %v8542_v45 = vpop.permute.xlu2 %2158  ;;  %v8544_v58 = vpop.permute.xlu1 %2034 }
 0x273   : > { %11998 = vst [vmem:[#allocation170_spill] sm:$0xff] %v8542_v45  ;;  %v8546_v0 = vpop.permute.xlu0 %2029 }
 0x274   : > { %11999 = vst [vmem:[#allocation171_spill] sm:$0xff] %v8544_v58  ;;  %v2318_v58 = vld [vmem:[%s7934_s24 + $0x99] sm:$0xff] }
 0x275   : > { %12000 = vst [vmem:[#allocation172_spill] sm:$0xff] %v8546_v0  ;;  %v2489_v0 = vld [vmem:[%s7934_s24 + $0xa] sm:$0xff] }
 0x278   : > { %2412 = vperm.xlu2 %7557, %v2317_v13   ;;  %2407 = vperm.xlu1 %7556, %v2316_v48  }
 0x279   : > { %2402 = vperm.xlu0 %7555, %v2315_v60  }
 0x27a   : > { %v8551_v63 = vpop.permute.xlu2 %2173  ;;  %v8553_v23 = vpop.permute.xlu1 %2049 }
 0x27b   : > { %12001 = vst [vmem:[#allocation173_spill] sm:$0xff] %v8551_v63  ;;  %v8555_v21 = vpop.permute.xlu0 %2044  ;;  %v2322_v63 = vld [vmem:[%s7934_s24 + $0xb9] sm:$0x1f] }
 0x27c   : > { %12002 = vst [vmem:[#allocation174_spill] sm:$0xff] %v8553_v23  ;;  %v2321_v23 = vld [vmem:[%s7934_s24 + $0xb1] sm:$0xff] }
 0x27d   : > { %12003 = vst [vmem:[#allocation175_spill] sm:$0xff] %v8555_v21  ;;  %v8576_v21 = vld [vmem:[%s7934_s24 + $0x22] sm:$0xff] }
 0x280   : > { %2427 = vperm.xlu2 %7557, %v2320_v39   ;;  %2422 = vperm.xlu1 %7556, %v2319_v24  }
 0x281   : > { %2417 = vperm.xlu0 %7555, %v2318_v58  }
 0x282   : > { %v8560_v13 = vpop.permute.xlu2 %2188  ;;  %v8562_v48 = vpop.permute.xlu1 %2138 }
 0x283   : > { %12004 = vst [vmem:[#allocation176_spill] sm:$0xff] %v8560_v13  ;;  %v8564_v60 = vpop.permute.xlu0 %2059  ;;  %v8579_v13 = vld [vmem:[%s7934_s24 + $0x1a] sm:$0xff] }
 0x284   : > { %12005 = vst [vmem:[#allocation177_spill] sm:$0xff] %v8564_v60  ;;  %v8582_v60 = vld [vmem:[%s7934_s24 + $0x12] sm:$0xff] }
 0x288   : > { %2516 = vperm.xlu2 %7557, %v2489_v0   ;;  %2437 = vperm.xlu1 %7556, %v2322_v63  }
 0x289   : > { %2432 = vperm.xlu0 %7555, %v2321_v23  }
 0x28a   : > { %v8569_v39 = vpop.permute.xlu2 %2203  ;;  %v8571_v24 = vpop.permute.xlu1 %2153 }
 0x28b   : > { %12006 = vst [vmem:[#allocation178_spill] sm:$0xff] %v8569_v39  ;;  %v8573_v58 = vpop.permute.xlu0 %2148  ;;  %v8594_v39 = vld [vmem:[%s7934_s24 + $0x3a] sm:$0xff] }
 0x28c   : > { %12007 = vst [vmem:[#allocation179_spill] sm:$0xff] %v8571_v24  ;;  %v8614_v24 = vld [vmem:[%s7934_s24 + $0x42] sm:$0xff] }
 0x290   : > { %2531 = vperm.xlu2 %7557, %v8576_v21   ;;  %2526 = vperm.xlu1 %7556, %v8579_v13  }
 0x291   : > { %2521 = vperm.xlu0 %7555, %v8582_v60  }
 0x292   : > { %v8587_v0 = vpop.permute.xlu2 %2218  ;;  %v8589_v63 = vpop.permute.xlu1 %2168 }
 0x293   : > { %12008 = vst [vmem:[#allocation180_spill] sm:$0xff] %v8587_v0  ;;  %v8591_v23 = vpop.permute.xlu0 %2163 }
 0x294   : > { %12009 = vst [vmem:[#allocation181_spill] sm:$0xff] %v8589_v63 }
 0x295   : > { %12010 = vst [vmem:[#allocation182_spill] sm:$0xff] %v8591_v23 }
 0x298   : > { %2546 = vperm.xlu2 %7557, %v8594_v39   ;;  %2541 = vperm.xlu1 %7556, %v8597_v3  }
 0x299   : > { %2536 = vperm.xlu0 %7555, %v8600_v44  }
 0x29a   : > { %v8605_v0 = vpop.permute.xlu2 %2233  ;;  %v8607_v63 = vpop.permute.xlu1 %2183 }
 0x29b   : > { %12011 = vst [vmem:[#allocation183_spill] sm:$0xff] %v8605_v0  ;;  %v8609_v23 = vpop.permute.xlu0 %2178 }
 0x29c   : > { %12012 = vst [vmem:[#allocation184_spill] sm:$0xff] %v8607_v63  ;;  %v2501_v63 = vld [vmem:[%s7934_s24 + $0x6a] sm:$0xff] }
 0x29d   : > { %12013 = vst [vmem:[#allocation185_spill] sm:$0xff] %v8609_v23  ;;  %v2499_v23 = vld [vmem:[%s7934_s24 + $0x5a] sm:$0xff] }
 0x2a0   : > { %2561 = vperm.xlu2 %7557, %v2498_v41   ;;  %2556 = vperm.xlu1 %7556, %v2497_v42  }
 0x2a1   : > { %2551 = vperm.xlu0 %7555, %v8614_v24  }
 0x2a2   : > { %v8617_v45 = vpop.permute.xlu2 %2248  ;;  %v8619_v29 = vpop.permute.xlu1 %2198 }
 0x2a3   : > { %12014 = vst [vmem:[#allocation186_spill] sm:$0xff] %v8617_v45  ;;  %v8621_v0 = vpop.permute.xlu0 %2193  ;;  %v2504_v45 = vld [vmem:[%s7934_s24 + $0x82] sm:$0xff] }
 0x2a4   : > { %12015 = vst [vmem:[#allocation187_spill] sm:$0xff] %v8619_v29  ;;  %v2502_v29 = vld [vmem:[%s7934_s24 + $0x72] sm:$0xff] }
 0x2a5   : > { %12016 = vst [vmem:[#allocation188_spill] sm:$0xff] %v8621_v0  ;;  %v2507_v0 = vld [vmem:[%s7934_s24 + $0x9a] sm:$0xff] }
 0x2a8   : > { %2576 = vperm.xlu2 %7557, %v2501_v63   ;;  %2571 = vperm.xlu1 %7556, %v2500_v7  }
 0x2a9   : > { %2566 = vperm.xlu0 %7555, %v2499_v23  }
 0x2aa   : > { %v8626_v41 = vpop.permute.xlu2 %2337  ;;  %v8628_v42 = vpop.permute.xlu1 %2213 }
 0x2ab   : > { %12017 = vst [vmem:[#allocation189_spill] sm:$0xff] %v8628_v42  ;;  %v8630_v32 = vpop.permute.xlu0 %2208  ;;  %v2505_v42 = vld [vmem:[%s7934_s24 + $0x8a] sm:$0xff] }
 0x2ac   : > { %12018 = vst [vmem:[#allocation190_spill] sm:$0xff] %v8630_v32  ;;  %v2510_v32 = vld [vmem:[%s7934_s24 + $0xb2] sm:$0xff] }
 0x2b0   : > { %2591 = vperm.xlu2 %7557, %v2504_v45   ;;  %2586 = vperm.xlu1 %7556, %v2503_v25  }
 0x2b1   : > { %2581 = vperm.xlu0 %7555, %v2502_v29  }
 0x2b2   : > { %v8635_v63 = vpop.permute.xlu2 %2352  ;;  %v8637_v7 = vpop.permute.xlu1 %2228 }
 0x2b3   : > { %12019 = vst [vmem:[#allocation191_spill] sm:$0xff] %v8635_v63  ;;  %v8639_v23 = vpop.permute.xlu0 %2223  ;;  %v2509_v63 = vld [vmem:[%s7934_s24 + $0xaa] sm:$0xff] }
 0x2b4   : > { %12020 = vst [vmem:[#allocation192_spill] sm:$0xff] %v8637_v7  ;;  %v2508_v7 = vld [vmem:[%s7934_s24 + $0xa2] sm:$0xff] }
 0x2b5   : > { %12021 = vst [vmem:[#allocation193_spill] sm:$0xff] %v8639_v23  ;;  %v8660_v23 = vld [vmem:[%s7934_s24 + $0x13] sm:$0xff] }
 0x2b8   : > { %2606 = vperm.xlu2 %7557, %v2507_v0   ;;  %2601 = vperm.xlu1 %7556, %v2506_v2  }
 0x2b9   : > { %2596 = vperm.xlu0 %7555, %v2505_v42  }
 0x2ba   : > { %v8644_v45 = vpop.permute.xlu2 %2367  ;;  %v8646_v25 = vpop.permute.xlu1 %2243 }
 0x2bb   : > { %12022 = vst [vmem:[#allocation194_spill] sm:$0xff] %v8644_v45  ;;  %v8648_v29 = vpop.permute.xlu0 %2238  ;;  %v2511_v45 = vld [vmem:[%s7934_s24 + $0xba] sm:$0x1f] }
 0x2bc   : > { %12023 = vst [vmem:[#allocation195_spill] sm:$0xff] %v8646_v25  ;;  %v2678_v25 = vld [vmem:[%s7934_s24 + $0xb] sm:$0xff] }
 0x2bd   : > { %12024 = vst [vmem:[#allocation196_spill] sm:$0xff] %v8648_v29  ;;  %v8672_v29 = vld [vmem:[%s7934_s24 + $0x2b] sm:$0xff] }
 0x2c0   : > { %2621 = vperm.xlu2 %7557, %v2510_v32   ;;  %2616 = vperm.xlu1 %7556, %v2509_v63  }
 0x2c1   : > { %2611 = vperm.xlu0 %7555, %v2508_v7  }
 0x2c2   : > { %v8653_v0 = vpop.permute.xlu2 %2382  ;;  %v8655_v2 = vpop.permute.xlu1 %2332 }
 0x2c3   : > { %12025 = vst [vmem:[#allocation197_spill] sm:$0xff] %v8653_v0  ;;  %v8657_v42 = vpop.permute.xlu0 %2327  ;;  %v8675_v0 = vld [vmem:[%s7934_s24 + $0x23] sm:$0xff] }
 0x2c8   : > { %2710 = vperm.xlu2 %7557, %v8660_v23   ;;  %2705 = vperm.xlu1 %7556, %v2678_v25  }
 0x2c9   : > { %2626 = vperm.xlu0 %7555, %v2511_v45  }
 0x2ca   : > { %v8665_v32 = vpop.permute.xlu2 %2397  ;;  %v8667_v63 = vpop.permute.xlu1 %2347 }
 0x2cb   : > { %12026 = vst [vmem:[#allocation198_spill] sm:$0xff] %v8665_v32  ;;  %v8669_v7 = vpop.permute.xlu0 %2342 }
 0x2cc   : > { %12027 = vst [vmem:[#allocation199_spill] sm:$0xff] %v8667_v63  ;;  %v8693_v63 = vld [vmem:[%s7934_s24 + $0x3b] sm:$0xff] }
 0x2cd   : > { %12028 = vst [vmem:[#allocation200_spill] sm:$0xff] %v8669_v7  ;;  %v8690_v7 = vld [vmem:[%s7934_s24 + $0x43] sm:$0xff] }
 0x2d0   : > { %2725 = vperm.xlu2 %7557, %v8672_v29   ;;  %2720 = vperm.xlu1 %7556, %v8675_v0  }
 0x2d1   : > { %2715 = vperm.xlu0 %7555, %v8678_v17  }
 0x2d2   : > { %v8683_v45 = vpop.permute.xlu2 %2412  ;;  %v8685_v25 = vpop.permute.xlu1 %2362 }
 0x2d3   : > { %12029 = vst [vmem:[#allocation201_spill] sm:$0xff] %v8683_v45  ;;  %v8687_v32 = vpop.permute.xlu0 %2357 }
 0x2d4   : > { %12030 = vst [vmem:[#allocation202_spill] sm:$0xff] %v8685_v25 }
 0x2d5   : > { %12031 = vst [vmem:[#allocation203_spill] sm:$0xff] %v8687_v32 }
 0x2d8   : > { %2740 = vperm.xlu2 %7557, %v8690_v7   ;;  %2735 = vperm.xlu1 %7556, %v8693_v63  }
 0x2d9   : > { %2730 = vperm.xlu0 %7555, %v8696_v16  }
 0x2da   : > { %v8701_v45 = vpop.permute.xlu2 %2427  ;;  %v8703_v25 = vpop.permute.xlu1 %2377 }
 0x2db   : > { %12032 = vst [vmem:[#allocation204_spill] sm:$0xff] %v8701_v45  ;;  %v8705_v32 = vpop.permute.xlu0 %2372 }
 0x2dc   : > { %12033 = vst [vmem:[#allocation205_spill] sm:$0xff] %v8703_v25 }
 0x2dd   : > { %12034 = vst [vmem:[#allocation206_spill] sm:$0xff] %v8705_v32  ;;  %v2868_v32 = vld [vmem:[%s7934_s24 + $0x14] sm:$0xff] }
 0x2e0   : > { %2755 = vperm.xlu2 %7557, %v2688_v28   ;;  %2750 = vperm.xlu1 %7556, %v8709_v36  }
 0x2e1   : > { %2745 = vperm.xlu0 %7555, %v8712_v31  }
 0x2e2   : > { %v8716_v14 = vpop.permute.xlu2 %2516  ;;  %v8718_v45 = vpop.permute.xlu1 %2392 }
 0x2e3   : > { %12037 = vst [vmem:[#allocation209_spill] sm:$0xff] %v8718_v45  ;;  %v8720_v25 = vpop.permute.xlu0 %2387  ;;  %v2869_v45 = vld [vmem:[%s7934_s24 + $0x1c] sm:$0xff] }
 0x2e4   : > { %12038 = vst [vmem:[#allocation210_spill] sm:$0xff] %v8720_v25  ;;  %v3246_v25 = vld [vmem:[%s7934_s24 + $0x16] sm:$0xff] }
 0x2e8   : > { %2899 = vperm.xlu2 %7557, %v2868_v32   ;;  %2894 = vperm.xlu1 %7556, %v2867_v56  }
 0x2e9   : > { %2760 = vperm.xlu0 %7555, %v2689_v20  }
 0x2ea   : > { %v8725_v28 = vpop.permute.xlu2 %2531  ;;  %v8727_v36 = vpop.permute.xlu1 %2407 }
 0x2eb   : > { %12039 = vst [vmem:[#allocation211_spill] sm:$0xff] %v8725_v28  ;;  %v8729_v31 = vpop.permute.xlu0 %2402  ;;  %v3245_v28 = vld [vmem:[%s7934_s24 + $0xe] sm:$0xff] }
 0x2ec   : > { %12040 = vst [vmem:[#allocation212_spill] sm:$0xff] %v8727_v36  ;;  %v3058_v36 = vld [vmem:[%s7934_s24 + $0x1d] sm:$0xff] }
 0x2ed   : > { %12041 = vst [vmem:[#allocation213_spill] sm:$0xff] %v8729_v31  ;;  %v3434_v31 = vld [vmem:[%s7934_s24 + $0xf] sm:$0xff] }
 0x2f0   : > { %3088 = vperm.xlu2 %7557, %v3057_v15   ;;  %3083 = vperm.xlu1 %7556, %v3056_v37  }
 0x2f1   : > { %2904 = vperm.xlu0 %7555, %v2869_v45  }
 0x2f2   : > { %v8734_v32 = vpop.permute.xlu2 %2546  ;;  %v8736_v56 = vpop.permute.xlu1 %2422 }
 0x2f3   : > { %12042 = vst [vmem:[#allocation214_spill] sm:$0xff] %v8734_v32  ;;  %v8738_v20 = vpop.permute.xlu0 %2417  ;;  %v3247_v32 = vld [vmem:[%s7934_s24 + $0x1e] sm:$0xff] }
 0x2f4   : > { %12043 = vst [vmem:[#allocation215_spill] sm:$0xff] %v8736_v56  ;;  %v2870_v56 = vld [vmem:[%s7934_s24 + $0x24] sm:$0xff] }
 0x2f5   : > { %12044 = vst [vmem:[#allocation216_spill] sm:$0xff] %v8738_v20 }
 0x2f8   : > { %3277 = vperm.xlu2 %7557, %v3246_v25   ;;  %3272 = vperm.xlu1 %7556, %v3245_v28  }
 0x2f9   : > { %3093 = vperm.xlu0 %7555, %v3058_v36   ;;  %v3059_v36 = vld [vmem:[%s7934_s24 + $0x25] sm:$0xff] }
 0x2fa   : > { %v8743_v15 = vpop.permute.xlu2 %2561  ;;  %v8745_v37 = vpop.permute.xlu1 %2437 }
 0x2fb   : > { %12045 = vst [vmem:[#allocation217_spill] sm:$0xff] %v8743_v15  ;;  %v8747_v45 = vpop.permute.xlu0 %2432  ;;  %v2871_v15 = vld [vmem:[%s7934_s24 + $0x2c] sm:$0xff] }
 0x2fc   : > { %12046 = vst [vmem:[#allocation218_spill] sm:$0xff] %v8745_v37  ;;  %v3435_v37 = vld [vmem:[%s7934_s24 + $0x17] sm:$0xff] }
 0x2fd   : > { %12047 = vst [vmem:[#allocation219_spill] sm:$0xff] %v8747_v45 }
 0x300   : > { %3461 = vperm.xlu2 %7557, %v3434_v31   ;;  %3282 = vperm.xlu1 %7556, %v3247_v32   ;;  %v3436_v32 = vld [vmem:[%s7934_s24 + $0x1f] sm:$0xff] }
 0x301   : > { %2909 = vperm.xlu0 %7555, %v2870_v56  }
 0x302   : > { %v8752_v20 = vpop.permute.xlu2 %2576  ;;  %v8754_v25 = vpop.permute.xlu1 %2526 }
 0x303   : > { %12048 = vst [vmem:[#allocation220_spill] sm:$0xff] %v8752_v20  ;;  %v8756_v28 = vpop.permute.xlu0 %2521 }
 0x308   : > { %3098 = vperm.xlu2 %7557, %v3059_v36   ;;  %2914 = vperm.xlu1 %7556, %v2871_v15   ;;  %v3248_v15 = vld [vmem:[%s7934_s24 + $0x26] sm:$0xff] }
 0x309   : > { %3466 = vperm.xlu0 %7555, %v3435_v37   ;;  %v3060_v37 = vld [vmem:[%s7934_s24 + $0x2d] sm:$0xff] }
 0x30a   : > { %v8761_v45 = vpop.permute.xlu2 %2591  ;;  %v8763_v43 = vpop.permute.xlu1 %2541 }
 0x30b   : > { %12049 = vst [vmem:[#allocation221_spill] sm:$0xff] %v8761_v45  ;;  %v8765_v31 = vpop.permute.xlu0 %2536 }
 0x30c   : > { %12050 = vst [vmem:[#allocation222_spill] sm:$0xff] %v8763_v43 }
 0x30d   : > { %12051 = vst [vmem:[#allocation223_spill] sm:$0xff] %v8765_v31 }
 0x310   : > { %3655 = vperm.xlu2 %7557, %v8424_v46   ;;  %3650 = vperm.xlu1 %7556, %v8408_v62   ;;  %v3249_v62 = vld [vmem:[%s7934_s24 + $0x2e] sm:$0xff] }
 0x311   : > { %3471 = vperm.xlu0 %7555, %v3436_v32  }
 0x312   : > { %v8770_v56 = vpop.permute.xlu2 %2606  ;;  %v8772_v20 = vpop.permute.xlu1 %2556 }
 0x313   : > { %12052 = vst [vmem:[#allocation224_spill] sm:$0xff] %v8770_v56  ;;  %v8774_v36 = vpop.permute.xlu0 %2551 }
 0x314   : > { %12053 = vst [vmem:[#allocation225_spill] sm:$0xff] %v8772_v20  ;;  %v8885_v20 = vld [vmem:[%s12077_s29] ss:$0 sm:$0xff] }
 0x315   : > { %12054 = vst [vmem:[#allocation226_spill] sm:$0xff] %v8774_v36  ;;  %v3629_v36 = vld [vmem:[%s7934_s24 + $0x40] sm:$0xff] }
 0x318   : > { %3660 = vperm.xlu2 %7557, %v8421_v11   ;;  %3287 = vperm.xlu1 %7556, %v3248_v15   ;;  %v3437_v15 = vld [vmem:[%s7934_s24 + $0x27] sm:$0xff] }
 0x319   : > { %3103 = vperm.xlu0 %7555, %v3060_v37  }
 0x31a   : > { %v8779_v45 = vpop.permute.xlu2 %2621  ;;  %v8781_v43 = vpop.permute.xlu1 %2571 }
 0x31b   : > { %12055 = vst [vmem:[#allocation227_spill] sm:$0xff] %v8779_v45  ;;  %v8783_v46 = vpop.permute.xlu0 %2566  ;;  %v2872_v45 = vld [vmem:[%s7934_s24 + $0x34] sm:$0xff] }
 0x31c   : > { %12056 = vst [vmem:[#allocation228_spill] sm:$0xff] %v8781_v43 }
 0x31d   : > { %12057 = vst [vmem:[#allocation229_spill] sm:$0xff] %v8783_v46 }
 0x320   : > { %3292 = vperm.xlu2 %7557, %v3249_v62   ;;  %3844 = vperm.xlu1 %7556, %v8489_v10  }
 0x321   : > { %3839 = vperm.xlu0 %7555, %v8492_v19   ;;  %v3438_v19 = vld [vmem:[%s7934_s24 + $0x2f] sm:$0xff] }
 0x322   : > { %v8788_v32 = vpop.permute.xlu2 %2710  ;;  %v8790_v56 = vpop.permute.xlu1 %2586 }
 0x323   : > { %12058 = vst [vmem:[#allocation230_spill] sm:$0xff] %v8790_v56  ;;  %v8792_v11 = vpop.permute.xlu0 %2581 }
 0x324   : > { %12059 = vst [vmem:[#allocation231_spill] sm:$0xff] %v8792_v11 }
 0x328   : > { %4028 = vperm.xlu2 %7557, %v8582_v60   ;;  %3849 = vperm.xlu1 %7556, %v8510_v5  }
 0x329   : > { %3476 = vperm.xlu0 %7555, %v3437_v15   ;;  %v3626_v15 = vld [vmem:[%s7934_s24 + $0x28] sm:$0xff] }
 0x32a   : > { %v8797_v37 = vpop.permute.xlu2 %2725  ;;  %v8799_v62 = vpop.permute.xlu1 %2601 }
 0x32b   : > { %12060 = vst [vmem:[#allocation232_spill] sm:$0xff] %v8797_v37  ;;  %v8801_v10 = vpop.permute.xlu0 %2596 }
 0x32c   : > { %12061 = vst [vmem:[#allocation233_spill] sm:$0xff] %v8799_v62 }
 0x32d   : > { %12062 = vst [vmem:[#allocation234_spill] sm:$0xff] %v8801_v10 }
 0x330   : > { %3481 = vperm.xlu2 %7557, %v3438_v19   ;;  %2919 = vperm.xlu1 %7556, %v2872_v45   ;;  %v2873_v19 = vld [vmem:[%s7934_s24 + $0x3c] sm:$0xff] }
 0x331   : > { %4033 = vperm.xlu0 %7555, %v8579_v13   ;;  %v3061_v13 = vld [vmem:[%s7934_s24 + $0x35] sm:$0xff] }
 0x332   : > { %v8806_v56 = vpop.permute.xlu2 %2740  ;;  %v8808_v60 = vpop.permute.xlu1 %2616 }
 0x333   : > { %12063 = vst [vmem:[#allocation235_spill] sm:$0xff] %v8806_v56  ;;  %v8810_v5 = vpop.permute.xlu0 %2611  ;;  %v3440_v56 = vld [vmem:[%s7934_s24 + $0x3f] sm:$0xff] }
 0x334   : > { %12064 = vst [vmem:[#allocation236_spill] sm:$0xff] %v8808_v60 }
 0x335   : > { %12065 = vst [vmem:[#allocation237_spill] sm:$0xff] %v8810_v5  ;;  %v3062_v5 = vld [vmem:[%s7934_s24 + $0x3d] sm:$0xff] }
 0x338   : > { %4217 = vperm.xlu2 %7557, %v8660_v23   ;;  %4038 = vperm.xlu1 %7556, %v8576_v21  }
 0x339   : > { %3665 = vperm.xlu0 %7555, %v3626_v15   ;;  %v3627_v15 = vld [vmem:[%s7934_s24 + $0x30] sm:$0xff] }
 0x33a   : > { %v8815_v10 = vpop.permute.xlu2 %2755  ;;  %v8817_v62 = vpop.permute.xlu1 %2705 }
 0x33b   : > { %12066 = vst [vmem:[#allocation238_spill] sm:$0xff] %v8815_v10  ;;  %v8819_v45 = vpop.permute.xlu0 %2626 }
 0x33c   : > { %12067 = vst [vmem:[#allocation239_spill] sm:$0xff] %v8819_v45 }
 0x340   : > { %3108 = vperm.xlu2 %7557, %v3061_v13   ;;  %2924 = vperm.xlu1 %7556, %v2873_v19  }
 0x341   : > { %4222 = vperm.xlu0 %7555, %v8678_v17   ;;  %v3250_v17 = vld [vmem:[%s7934_s24 + $0x36] sm:$0xff] }
 0x342   : > { %v8824_v60 = vpop.permute.xlu2 %2899  ;;  %v8826_v23 = vpop.permute.xlu1 %2720 }
 0x343   : > { %12068 = vst [vmem:[#allocation240_spill] sm:$0xff] %v8826_v23  ;;  %v8828_v21 = vpop.permute.xlu0 %2715  ;;  %v3064_v23 = vld [vmem:[%s7934_s24 + $0x4d] sm:$0xff] }
 0x348   : > { %4227 = vperm.xlu2 %7557, %v8675_v0   ;;  %3854 = vperm.xlu1 %7556, %v8507_v40   ;;  %v3439_v40 = vld [vmem:[%s7934_s24 + $0x37] sm:$0xff] }
 0x349   : > { %3670 = vperm.xlu0 %7555, %v3627_v15   ;;  %v3251_v15 = vld [vmem:[%s7934_s24 + $0x3e] sm:$0xff] }
 0x34a   : > { %v8833_v45 = vpop.permute.xlu2 %3088  ;;  %v8835_v13 = vpop.permute.xlu1 %2735 }
 0x34b   : > { %12069 = vst [vmem:[#allocation241_spill] sm:$0xff] %v8835_v13  ;;  %v8837_v19 = vpop.permute.xlu0 %2730 }
 0x34c   : > { %12070 = vst [vmem:[#allocation242_spill] sm:$0xff] %v8837_v19  ;;  %v8902_v19 = vld [vmem:[%s12077_s29 + $0x3] ss:$0 sm:$0xff] }
 0x350   : > { %3859 = vperm.xlu2 %7557, %v8504_v52   ;;  %3297 = vperm.xlu1 %7556, %v3250_v17  }
 0x351   : > { %3113 = vperm.xlu0 %7555, %v3062_v5   ;;  %v2874_v5 = vld [vmem:[%s7934_s24 + $0x44] sm:$0xff] }
 0x352   : > { %v8842_v11 = vpop.permute.xlu2 %3277  ;;  %v8844_v10 = vpop.permute.xlu1 %2750 }
 0x353   : > { %12071 = vst [vmem:[#allocation243_spill] sm:$0xff] %v8842_v11  ;;  %v8846_v0 = vpop.permute.xlu0 %2745 }
 0x354   : > { %12072 = vst [vmem:[#allocation244_spill] sm:$0xff] %v8844_v10  ;;  %v742_v10 = vmul.f32 %v8885_v20, %v7991_v51 }
 0x355   : > { %12073 = vst [vmem:[#allocation245_spill] sm:$0xff] %v8846_v0  ;;  %v3063_v0 = vld [vmem:[%s7934_s24 + $0x45] sm:$0xff] }
 0x358   : > { %3486 = vperm.xlu2 %7557, %v3439_v40   ;;  %3302 = vperm.xlu1 %7556, %v3251_v15   ;;  %v3628_v15 = vld [vmem:[%s7934_s24 + $0x38] sm:$0xff] }
 0x359   : > { %4043 = vperm.xlu0 %7555, %v8600_v44  }
 0x35a   : > { %v8851_v46 = vpop.permute.xlu2 %3461  ;;  %v8853_v43 = vpop.permute.xlu1 %2894 }
 0x35b   : > { %v8855_v52 = vpop.permute.xlu0 %2760 }
 0x35c   : > { %12074 = vst [vmem:[#allocation246_spill] sm:$0xff] %v8855_v52 }
 0x360   : > { %2929 = vperm.xlu2 %7557, %v2874_v5   ;;  %4232 = vperm.xlu1 %7556, %v8672_v29  }
 0x361   : > { %4048 = vperm.xlu0 %7555, %v8597_v3   ;;  %v8878_v3 = vld [vmem:[%s12077_s29 + $0x1] ss:$0 sm:$0xff] }
 0x362   : > { %v8860_v17 = vpop.permute.xlu2 %3098  ;;  %v8862_v40 = vpop.permute.xlu1 %3083 }
 0x363   : > { %12075 = vst [vmem:[#allocation247_spill] sm:$0xff] %v8860_v17  ;;  %v8864_v44 = vpop.permute.xlu0 %2904  ;;  %v3252_v17 = vld [vmem:[%s7934_s24 + $0x46] sm:$0xff] }
 0x368   : > { %4237 = vperm.xlu2 %7557, %v8696_v16   ;;  %3675 = vperm.xlu1 %7556, %v3628_v15   ;;  %v2875_v16 = vld [vmem:[%s7934_s24 + $0x4c] sm:$0xff]  ;;  %v8893_v15 = vld [vmem:[%s12077_s29 + $0x2] ss:$0 sm:$0xff] }
 0x369   : > { %3491 = vperm.xlu0 %7555, %v3440_v56   ;;  %v931_v56 = vmul.f32 %v8878_v3, %v8023_v9  ;;  %v1120_v13 = vmul.f32 %v8893_v15, %v8124_v54  ;;  %v8907_v9 = vld [vmem:[%s12077_s29 + $0x4] ss:$0 sm:$0xff]  ;;  %v1309_v54 = vmul.f32 %v8902_v19, %v8198_v22  ;;  %v8932_v22 = vld [vmem:[%s12077_s29 + $0x6] ss:$0 sm:$0xff] }
 0x36a   : > { %v8869_v52 = vpop.permute.xlu2 %3655  ;;  %v8871_v5 = vpop.permute.xlu1 %3272  ;;  %v1498_v31 = vmul.f32 %v8907_v9, %v8230_v38  ;;  %v8937_v38 = vld [vmem:[%s12077_s29 + $0x7] ss:$0 sm:$0xff] }
 0x36b   : > { %12076 = vst [vmem:[#allocation248_spill] sm:$0xff] %v8869_v52  ;;  %v8873_v29 = vpop.permute.xlu0 %3093  ;;  %v954_v51 = vadd.f32 %v931_v56, %v742_v10  ;;  %v8924_v52 = vld [vmem:[%s12077_s29 + $0x5] ss:$0 sm:$0xff] }
 0x36c   : > { %v1687_v10 = vmul.f32 %v8924_v52, %v8331_v1 }
 0x36d   : > { %v1143_v37 = vadd.f32 %v1120_v13, %v954_v51 }
 0x36f   : > { %v1332_v11 = vadd.f32 %v1309_v54, %v1143_v37  ;;  %v1876_v37 = vmul.f32 %v8932_v22, %v8405_v59 }
 0x370   : > { %3680 = vperm.xlu2 %7557, %v3629_v36   ;;  %3118 = vperm.xlu1 %7556, %v3063_v0  }
 0x371   : > { %2934 = vperm.xlu0 %7555, %v2875_v16   ;;  %v1521_v13 = vadd.f32 %v1498_v31, %v1332_v11  ;;  %v8960_v11 = vld [vmem:[%s12077_s29 + $0x9] ss:$0 sm:$0xff] }
 0x372   : > { %v8909_v36 = vpop.permute.xlu2 %3660  ;;  %v8911_v0 = vpop.permute.xlu1 %3282 }
 0x373   : > { %12078 = vst [vmem:[#allocation249_spill] sm:$0xff] %v8909_v36  ;;  %v8913_v16 = vpop.permute.xlu0 %2909  ;;  %v3817_v36 = vld [vmem:[%s7934_s24 + $0x39] sm:$0xff]  ;;  %v1710_v54 = vadd.f32 %v1687_v10, %v1521_v13  ;;  %v2443_v13 = vmul.f32 %v8960_v11, %v8657_v42 }
 0x374   : > { %12079 = vst [vmem:[#allocation250_spill] sm:$0xff] %v8913_v16  ;;  %v2065_v16 = vmul.f32 %v8937_v38, %v8446_v26  ;;  %v3818_v26 = vld [vmem:[%s7934_s24 + $0x41] sm:$0xff] }
 0x375   : > { %v1899_v31 = vadd.f32 %v1876_v37, %v1710_v54  ;;  %v8976_v54 = vld [vmem:[%s12077_s29 + $0xb] ss:$0 sm:$0xff] }
 0x377   : > { %v2088_v10 = vadd.f32 %v2065_v16, %v1899_v31 }
 0x378   : > { %3307 = vperm.xlu2 %7557, %v3252_v17   ;;  %3123 = vperm.xlu1 %7556, %v3064_v23   ;;  %v8952_v17 = vld [vmem:[%s12077_s29 + $0x8] ss:$0 sm:$0xff]  ;;  %v3253_v23 = vld [vmem:[%s7934_s24 + $0x4e] sm:$0xff] }
 0x379   : > { %3864 = vperm.xlu0 %7555, %v3817_v36   ;;  %v2254_v59 = vmul.f32 %v8952_v17, %v8562_v48  ;;  %v8965_v36 = vld [vmem:[%s12077_s29 + $0xa] ss:$0 sm:$0xff] }
 0x37a   : > { %v8941_v56 = vpop.permute.xlu2 %3292  ;;  %v8943_v1 = vpop.permute.xlu1 %2914  ;;  %v2632_v37 = vmul.f32 %v8965_v36, %v8716_v14  ;;  %v933_v14 = vmul.f32 %v8878_v3, %v8061_v34  ;;  %v9006_v34 = vld [vmem:[%s12077_s29 + $0xe] ss:$0 sm:$0xff] }
 0x37b   : > { %12080 = vst [vmem:[#allocation251_spill] sm:$0xff] %v8941_v56  ;;  %v8945_v51 = vpop.permute.xlu0 %3466  ;;  %v2277_v48 = vadd.f32 %v2254_v59, %v2088_v10 }
 0x37c   : > { %12081 = vst [vmem:[#allocation252_spill] sm:$0xff] %v8943_v1 }
 0x37d   : > { %v2466_v42 = vadd.f32 %v2443_v13, %v2277_v48  ;;  %v3441_v13 = vld [vmem:[%s7934_s24 + $0x47] sm:$0xff]  ;;  %v1122_v48 = vmul.f32 %v8893_v15, %v8135_v18 }
 0x37f   : > { %v2655_v59 = vadd.f32 %v2632_v37, %v2466_v42  ;;  %v3388_v42 = vmul.f32 %v9006_v34, %v8871_v5 }
 0x380   : > { %3312 = vperm.xlu2 %7557, %v3253_v23   ;;  %4053 = vperm.xlu1 %7556, %v8594_v39   ;;  %v2821_v23 = vmul.f32 %v8976_v54, %v8817_v62  ;;  %v8987_v39 = vld [vmem:[%s12077_s29 + $0xc] ss:$0 sm:$0xff]  ;;  %v744_v62 = vmul.f32 %v8885_v20, %v7989_v50  ;;  %v1311_v50 = vmul.f32 %v8902_v19, %v8167_v30 }
 0x381   : > { %3869 = vperm.xlu0 %7555, %v3818_v26   ;;  %v8994_v26 = vld [vmem:[%s12077_s29 + $0xd] ss:$0 sm:$0xff]  ;;  %v3010_v10 = vmul.f32 %v8987_v39, %v8853_v43 }
 0x382   : > { %v8978_v56 = vpop.permute.xlu2 %4028  ;;  %v3651_v16 = vpop.permute.xlu1 %3650  ;;  %v2844_v1 = vadd.f32 %v2821_v23, %v2655_v59  ;;  %v3199_v37 = vmul.f32 %v8994_v26, %v8862_v40  ;;  %v956_v43 = vadd.f32 %v933_v14, %v744_v62  ;;  %v1500_v40 = vmul.f32 %v8907_v9, %v8268_v33  ;;  %v3630_v62 = vld [vmem:[%s7934_s24 + $0x48] sm:$0xff] }
 0x383   : > { %v8980_v31 = vpop.permute.xlu0 %3471  ;;  %v743_v14 = vmul.f32 %v8885_v20, %v8000_v57  ;;  %v3442_v33 = vld [vmem:[%s7934_s24 + $0x4f] sm:$0xff]  ;;  %v1310_v57 = vmul.f32 %v8902_v19, %v8196_v6  ;;  %v1499_v6 = vmul.f32 %v8907_v9, %v8270_v55  ;;  %v1688_v55 = vmul.f32 %v8924_v52, %v8302_v12  ;;  %v2877_v12 = vld [vmem:[%s7934_s24 + $0x5c] sm:$0xff] }
 0x384   : > { %v3033_v18 = vadd.f32 %v3010_v10, %v2844_v1  ;;  %v9029_v1 = vld [vmem:[%s12077_s29 + $0xf] ss:$0 sm:$0xff]  ;;  %v1121_v10 = vmul.f32 %v8893_v15, %v8095_v8  ;;  %v1878_v8 = vmul.f32 %v8932_v22, %v8374_v4  ;;  %v2067_v4 = vmul.f32 %v8937_v38, %v8484_v49 }
 0x385   : > { %v2256_v49 = vmul.f32 %v8952_v17, %v8573_v58 }
 0x386   : > { %v3222_v5 = vadd.f32 %v3199_v37, %v3033_v18 }
 0x388   : > { %4242 = vperm.xlu2 %7557, %v8693_v63   ;;  %4058 = vperm.xlu1 %7556, %v8614_v24   ;;  %v932_v63 = vmul.f32 %v8878_v3, %v8063_v35  ;;  %v1145_v24 = vadd.f32 %v1122_v48, %v956_v43  ;;  %v1689_v35 = vmul.f32 %v8924_v52, %v8342_v47  ;;  %v9042_v48 = vld [vmem:[%s12077_s29 + $0x10] ss:$0 sm:$0xff] }
 0x389   : > { %3496 = vperm.xlu0 %7555, %v3441_v13   ;;  %v3411_v43 = vadd.f32 %v3388_v42, %v3222_v5  ;;  %v3577_v47 = vmul.f32 %v9029_v1, %v8851_v46  ;;  %v9055_v42 = vld [vmem:[%s12077_s29 + $0x11] ss:$0 sm:$0xff]  ;;  %v9064_v46 = vld [vmem:[%s12077_s29 + $0x12] ss:$0 sm:$0xff] }
 0x38a   : > { %v9016_v23 = vpop.permute.xlu2 %3481  ;;  %v9018_v59 = vpop.permute.xlu1 %3287  ;;  %v1334_v13 = vadd.f32 %v1311_v50, %v1145_v24  ;;  %v955_v37 = vadd.f32 %v932_v63, %v743_v14  ;;  %v3766_v50 = vmul.f32 %v9042_v48, %v3651_v16  ;;  %v4144_v58 = vmul.f32 %v9064_v46, %v8978_v56 }
 0x38b   : > { %12082 = vst [vmem:[#allocation253_spill] sm:$0xff] %v9016_v23  ;;  %v9024_v30 = vpop.permute.xlu0 %3103  ;;  %v2876_v23 = vld [vmem:[%s7934_s24 + $0x54] sm:$0xff]  ;;  %v3600_v16 = vadd.f32 %v3577_v47, %v3411_v43 }
 0x38c   : > { %v1523_v18 = vadd.f32 %v1500_v40, %v1334_v13  ;;  %v1144_v63 = vadd.f32 %v1121_v10, %v955_v37  ;;  %v2445_v37 = vmul.f32 %v8960_v11, %v8626_v41  ;;  %v9094_v41 = vld [vmem:[%s12083_s27] ss:$0 sm:$0xff] }
 0x38d   : > { %v3789_v13 = vadd.f32 %v3766_v50, %v3600_v16 }
 0x38e   : > { %v1712_v24 = vadd.f32 %v1689_v35, %v1523_v18  ;;  %v1333_v14 = vadd.f32 %v1310_v57, %v1144_v63  ;;  %v9075_v35 = vld [vmem:[%s12077_s29 + $0x13] ss:$0 sm:$0xff]  ;;  %v3065_v57 = vld [vmem:[%s7934_s24 + $0x55] sm:$0xff]  ;;  %v1877_v18 = vmul.f32 %v8932_v22, %v8403_v53  ;;  %v2634_v63 = vmul.f32 %v8965_v36, %v8754_v25 }
 0x390   : > { %3685 = vperm.xlu2 %7557, %v3630_v62   ;;  %3501 = vperm.xlu1 %7556, %v3442_v33   ;;  %v1901_v10 = vadd.f32 %v1878_v8, %v1712_v24  ;;  %v1522_v33 = vadd.f32 %v1499_v6, %v1333_v14  ;;  %v2066_v6 = vmul.f32 %v8937_v38, %v8486_v61 }
 0x391   : > { %2939 = vperm.xlu0 %7555, %v2876_v23   ;;  %v2255_v61 = vmul.f32 %v8952_v17, %v8533_v27  ;;  %v3201_v27 = vmul.f32 %v8994_v26, %v8873_v29  ;;  %v3579_v29 = vmul.f32 %v9029_v1, %v8980_v31  ;;  %v9135_v31 = vld [vmem:[%s12085_s4] ss:$0 sm:$0xff] }
 0x392   : > { %v4218_v40 = vpop.permute.xlu2 %4217  ;;  %v9066_v5 = vpop.permute.xlu1 %3844  ;;  %v2090_v43 = vadd.f32 %v2067_v4, %v1901_v10  ;;  %v1711_v47 = vadd.f32 %v1688_v55, %v1522_v33  ;;  %v2823_v4 = vmul.f32 %v8976_v54, %v8828_v21  ;;  %v3012_v10 = vmul.f32 %v8987_v39, %v8864_v44  ;;  %v3819_v33 = vld [vmem:[%s7934_s24 + $0x49] sm:$0xff] }
 0x393   : > { %v3840_v23 = vpop.permute.xlu0 %3839  ;;  %v4333_v24 = vmul.f32 %v9075_v35, %v4218_v40  ;;  %v2444_v21 = vmul.f32 %v8960_v11, %v8655_v2  ;;  %v3631_v44 = vld [vmem:[%s7934_s24 + $0x50] sm:$0xff]  ;;  %v2822_v2 = vmul.f32 %v8976_v54, %v8788_v32 }
 0x394   : > { %v3955_v62 = vmul.f32 %v9055_v42, %v3840_v23  ;;  %v2279_v50 = vadd.f32 %v2256_v49, %v2090_v43  ;;  %v1900_v25 = vadd.f32 %v1877_v18, %v1711_v47 }
 0x396   : > { %v3978_v8 = vadd.f32 %v3955_v62, %v3789_v13  ;;  %v2468_v56 = vadd.f32 %v2445_v37, %v2279_v50  ;;  %v2089_v23 = vadd.f32 %v2066_v6, %v1900_v25  ;;  %v3066_v62 = vld [vmem:[%s7934_s24 + $0x5d] sm:$0xff]  ;;  %v2633_v37 = vmul.f32 %v8965_v36, %v8756_v28  ;;  %v3820_v25 = vld [vmem:[%s7934_s24 + $0x51] sm:$0xff] }
 0x397   : > { %v9126_v28 = vld [vmem:[%s12084_s23] ss:$0 sm:$0xff] }
 0x398   : > { %v4167_v53 = vadd.f32 %v4144_v58, %v3978_v8  ;;  %3128 = vperm.xlu2 %7557, %v3065_v57   ;;  %2944 = vperm.xlu1 %7556, %v2877_v12   ;;  %v2657_v55 = vadd.f32 %v2634_v63, %v2468_v56  ;;  %v2278_v43 = vadd.f32 %v2255_v61, %v2089_v23  ;;  %v12087_v23 = vld [vmem:[#allocation249_spill] sm:$0xff] }
 0x399   : > { %4247 = vperm.xlu0 %7555, %v8690_v7   ;;  %v3390_v12 = vmul.f32 %v9006_v34, %v8911_v0  ;;  %v3011_v0 = vmul.f32 %v8987_v39, %v8824_v60  ;;  %v4008_v60 = vld [vmem:[%s7934_s24 + $0x4a] sm:$0xff] }
 0x39a   : > { %v4356_v16 = vadd.f32 %v4333_v24, %v4167_v53  ;;  %v9101_v40 = vpop.permute.xlu2 %3108  ;;  %v3850_v14 = vpop.permute.xlu1 %3849  ;;  %v2846_v13 = vadd.f32 %v2823_v4, %v2657_v55  ;;  %v2467_v18 = vadd.f32 %v2444_v21, %v2278_v43  ;;  %v3200_v53 = vmul.f32 %v8994_v26, %v8833_v45 }
 0x39b   : > { %v9105_v49 = vpop.permute.xlu0 %3476  ;;  %v3768_v21 = vmul.f32 %v9042_v48, %v12087_v23  ;;  %v3578_v45 = vmul.f32 %v9029_v1, %v8945_v51  ;;  %v12095_v23 = vld [vmem:[#allocation248_spill] sm:$0xff] }
 0x39c   : > { %v4383_v7 = vadd.f32 %v9094_v41, %v4356_v16  ;;  %v3035_v57 = vadd.f32 %v3012_v10, %v2846_v13  ;;  %v2656_v8 = vadd.f32 %v2633_v37, %v2467_v18  ;;  %v12086_v16 = vld [vmem:[#allocation243_spill] sm:$0xff]  ;;  %v3957_v13 = vmul.f32 %v9055_v42, %v3850_v14  ;;  %v12090_v18 = vld [vmem:[#allocation29_spill] sm:$0xff] }
 0x39d   : > { %v3389_v55 = vmul.f32 %v9006_v34, %v12086_v16  ;;  %v3254_v10 = vld [vmem:[%s7934_s24 + $0x56] sm:$0xff]  ;;  %v934_v51 = vmul.f32 %v8878_v3, %v12090_v18  ;;  %v12098_v18 = vld [vmem:[#allocation89_spill] sm:$0xff] }
 0x39e   : > { %7587 = vtanh.f32 %v4383_v7  ;;  %v3224_v58 = vadd.f32 %v3201_v27, %v3035_v57  ;;  %v2845_v24 = vadd.f32 %v2822_v2, %v2656_v8  ;;  %v12089_v37 = vld [vmem:[#allocation15_spill] sm:$0xff]  ;;  %v12091_v2 = vld [vmem:[#allocation50_spill] sm:$0xff] }
 0x39f   : > { %v3443_v16 = vld [vmem:[%s7934_s24 + $0x57] sm:$0xff] }
 0x3a0   : > { %3133 = vperm.xlu2 %7557, %v3066_v62   ;;  %3874 = vperm.xlu1 %7556, %v3819_v33   ;;  %v3413_v50 = vadd.f32 %v3390_v12, %v3224_v58  ;;  %v3034_v61 = vadd.f32 %v3011_v0, %v2845_v24  ;;  %v12088_v62 = vld [vmem:[#allocation41_spill] sm:$0xff]  ;;  %v1124_v58 = vmul.f32 %v8893_v15, %v12091_v2 }
 0x3a1   : > { %3690 = vperm.xlu0 %7555, %v3631_v44   ;;  %v935_v33 = vmul.f32 %v8878_v3, %v12088_v62  ;;  %v746_v44 = vmul.f32 %v8885_v20, %v12089_v37  ;;  %v12096_v62 = vld [vmem:[#allocation80_spill] sm:$0xff]  ;;  %v1501_v2 = vmul.f32 %v8907_v9, %v12098_v18 }
 0x3a2   : > { %v4228_v32 = vpop.permute.xlu2 %4227  ;;  %v9130_v47 = vpop.permute.xlu1 %2919  ;;  %v3602_v56 = vadd.f32 %v3579_v29, %v3413_v50  ;;  %v3223_v27 = vadd.f32 %v3200_v53, %v3034_v61  ;;  %v12092_v50 = vld [vmem:[#allocation20_spill] sm:$0xff]  ;;  %v4009_v61 = vld [vmem:[%s7934_s24 + $0x52] sm:$0xff] }
 0x3a3   : > { %v4034_v63 = vpop.permute.xlu0 %4033  ;;  %v958_v53 = vadd.f32 %v935_v33, %v746_v44  ;;  %v1312_v33 = vmul.f32 %v8902_v19, %v12096_v62 }
 0x3a4   : > { %v7588_v6 = vpop.eup %7587  ;;  %v3791_v43 = vadd.f32 %v3768_v21, %v3602_v56  ;;  %v3412_v57 = vadd.f32 %v3389_v55, %v3223_v27  ;;  %v12093_v56 = vld [vmem:[#allocation59_spill] sm:$0xff]  ;;  %v3767_v21 = vmul.f32 %v9042_v48, %v12095_v23 }
 0x3a5   : > { %v4433_v4 = vmul.f32 %v7588_v6, %v9126_v28  ;;  %v745_v6 = vmul.f32 %v8885_v20, %v12092_v50  ;;  %v12094_v55 = vld [vmem:[#allocation79_spill] sm:$0xff] }
 0x3a6   : > { %v3980_v29 = vadd.f32 %v3957_v13, %v3791_v43  ;;  %v3601_v24 = vadd.f32 %v3578_v45, %v3412_v57  ;;  %v3255_v13 = vld [vmem:[%s7934_s24 + $0x5e] sm:$0xff]  ;;  %v1147_v45 = vadd.f32 %v1124_v58, %v958_v53  ;;  %v4145_v57 = vmul.f32 %v9064_v46, %v4034_v63  ;;  %v12099_v58 = vld [vmem:[#allocation110_spill] sm:$0xff] }
 0x3a7   : > { %v4460_v7 = vadd.f32 %v9135_v31, %v4433_v4  ;;  %v1123_v4 = vmul.f32 %v8893_v15, %v12093_v56  ;;  %v957_v27 = vadd.f32 %v934_v51, %v745_v6 }
 0x3a8   : > { %4063 = vperm.xlu2 %7557, %v4008_v60   ;;  %3879 = vperm.xlu1 %7556, %v3820_v25   ;;  %v4335_v60 = vmul.f32 %v9075_v35, %v4228_v32  ;;  %v12097_v32 = vld [vmem:[#allocation101_spill] sm:$0xff]  ;;  %v3790_v44 = vadd.f32 %v3767_v21, %v3601_v24  ;;  %v12100_v24 = vld [vmem:[#allocation119_spill] sm:$0xff] }
 0x3a9   : > { %4484 = vst.msk [vmem:[#allocation2] sm:$0xff] %vm4483_vm0, %v4460_v7  ;;  %3317 = vperm.xlu0 %7555, %v3254_v10   ;;  %v1313_v10 = vmul.f32 %v8902_v19, %v12094_v55  ;;  %v3956_v7 = vmul.f32 %v9055_v42, %v9066_v5  ;;  %v1502_v37 = vmul.f32 %v8907_v9, %v12097_v32  ;;  %v2878_v21 = vld [vmem:[%s7934_s24 + $0x64] sm:$0xff] }
 0x3aa   : > { %v9156_v14 = vpop.permute.xlu2 %3859  ;;  %v4039_v12 = vpop.permute.xlu1 %4038  ;;  %v1690_v53 = vmul.f32 %v8924_v52, %v12100_v24  ;;  %v12109_v24 = vld [vmem:[#allocation199_spill] sm:$0xff] }
 0x3ab   : > { %v4146_v8 = vmul.f32 %v9064_v46, %v4039_v12  ;;  %v9163_v0 = vpop.permute.xlu0 %3665  ;;  %v1146_v12 = vadd.f32 %v1123_v4, %v957_v27  ;;  %v1336_v51 = vadd.f32 %v1313_v10, %v1147_v45  ;;  %v12102_v10 = vld [vmem:[#allocation140_spill] sm:$0xff]  ;;  %v12103_v27 = vld [vmem:[#allocation161_spill] sm:$0xff] }
 0x3ac   : > { %v1879_v23 = vmul.f32 %v8932_v22, %v12102_v10  ;;  %v2069_v45 = vmul.f32 %v8937_v38, %v12103_v27 }
 0x3ad   : > { %v4169_v25 = vadd.f32 %v4146_v8, %v3980_v29  ;;  %v1691_v29 = vmul.f32 %v8924_v52, %v12099_v58  ;;  %v3979_v8 = vadd.f32 %v3956_v7, %v3790_v44  ;;  %v1335_v63 = vadd.f32 %v1312_v33, %v1146_v12  ;;  %v9202_v7 = vld [vmem:[%s7934_s24 + $0x6b] sm:$0xff] }
 0x3ae   : > { %v1525_v4 = vadd.f32 %v1502_v37, %v1336_v51  ;;  %v4663_v37 = vld [vmem:[%s12105_s5 + $0x8] sm:$0x3]  ;;  %v12107_v51 = vld [vmem:[#allocation179_spill] sm:$0xff] }
 0x3af   : > { %v4358_v43 = vadd.f32 %v4335_v60, %v4169_v25  ;;  %v12101_v60 = vld [vmem:[#allocation139_spill] sm:$0xff]  ;;  %v1524_v55 = vadd.f32 %v1501_v2, %v1335_v63  ;;  %v2257_v58 = vmul.f32 %v8952_v17, %v12107_v51  ;;  %7317 = vmatpush.msk.msra.mxu1 %vm4707_vm1, %v4663_v37  ;;  %v12113_v37 = vld [vmem:[#allocation232_spill] sm:$0xff] }
 0x3b0   : > { %4068 = vperm.xlu2 %7557, %v4009_v61   ;;  %3506 = vperm.xlu1 %7556, %v3443_v16   ;;  %v1880_v25 = vmul.f32 %v8932_v22, %v12101_v60  ;;  %v4168_v61 = vadd.f32 %v4145_v57, %v3979_v8  ;;  %v12106_v57 = vld [vmem:[#allocation170_spill] sm:$0xff]  ;;  %v4662_v8 = vld [vmem:[%s12105_s5] sm:$0xff] }
 0x3b1   : > { %v4385_v5 = vadd.f32 %v9094_v41, %v4358_v43  ;;  %3322 = vperm.xlu0 %7555, %v3255_v13   ;;  %v1714_v13 = vadd.f32 %v1691_v29, %v1525_v4  ;;  %v1713_v33 = vadd.f32 %v1690_v53, %v1524_v55  ;;  %v12104_v43 = vld [vmem:[#allocation149_spill] sm:$0xff]  ;;  %v2258_v12 = vmul.f32 %v8952_v17, %v12106_v57  ;;  %v12108_v29 = vld [vmem:[#allocation208_spill] sm:$0xff] }
 0x3b2   : > { %v9189_v50 = vpop.permute.xlu2 %3486  ;;  %v9191_v6 = vpop.permute.xlu1 %2924  ;;  %v2068_v32 = vmul.f32 %v8937_v38, %v12104_v43  ;;  %v2447_v53 = vmul.f32 %v8960_v11, %v12109_v24  ;;  %4806 = vmatpush.msra.mxu1 %v4662_v8  ;;  %v12115_v51 = vld [vmem:[#allocation252_spill] sm:$0xff] }
 0x3b3   : > { %7589 = vtanh.f32 %v4385_v5  ;;  %v4223_v56 = vpop.permute.xlu0 %4222  ;;  %v1903_v44 = vadd.f32 %v1880_v25, %v1714_v13  ;;  %v1902_v5 = vadd.f32 %v1879_v23, %v1713_v33  ;;  %v12111_v23 = vld [vmem:[#allocation223_spill] sm:$0xff] }
 0x3b4   : > { %v4334_v16 = vmul.f32 %v9075_v35, %v4223_v56  ;;  %v3632_v33 = vld [vmem:[%s7934_s24 + $0x58] sm:$0xff] }
 0x3b5   : > { %v2092_v63 = vadd.f32 %v2069_v45, %v1903_v44  ;;  %v2091_v25 = vadd.f32 %v2068_v32, %v1902_v5  ;;  %v12112_v45 = vld [vmem:[#allocation211_spill] sm:$0xff]  ;;  %v2825_v32 = vmul.f32 %v8976_v54, %v12113_v37  ;;  %v3444_v44 = vld [vmem:[%s7934_s24 + $0x5f] sm:$0xff] }
 0x3b6   : > { %v4357_v62 = vadd.f32 %v4334_v16, %v4168_v61  ;;  %v12110_v61 = vld [vmem:[#allocation200_spill] sm:$0xff]  ;;  %v12118_v37 = vld [vmem:[#allocation247_spill] sm:$0xff] }
 0x3b7   : > { %v2446_v16 = vmul.f32 %v8960_v11, %v12110_v61  ;;  %v2281_v10 = vadd.f32 %v2258_v12, %v2092_v63  ;;  %v2280_v27 = vadd.f32 %v2257_v58, %v2091_v25  ;;  %v3014_v58 = vmul.f32 %v8987_v39, %v12115_v51  ;;  %v12117_v63 = vld [vmem:[#allocation250_spill] sm:$0xff] }
 0x3b8   : > { %v4384_v18 = vadd.f32 %v9094_v41, %v4357_v62  ;;  %2949 = vperm.xlu2 %7557, %v2878_v21   ;;  %2765 = vperm.xlu1 %7556, %v9202_v7   ;;  %v2636_v21 = vmul.f32 %v8965_v36, %v12111_v23  ;;  %v2635_v62 = vmul.f32 %v8965_v36, %v12112_v45  ;;  %v3633_v45 = vld [vmem:[%s7934_s24 + $0x60] sm:$0xff] }
 0x3b9   : > { %v7590_v2 = vpop.eup %7589  ;;  %4252 = vperm.xlu0 %7555, %v12108_v29   ;;  %v2470_v43 = vadd.f32 %v2447_v53, %v2281_v10  ;;  %v2469_v57 = vadd.f32 %v2446_v16, %v2280_v27  ;;  %v12116_v29 = vld [vmem:[#allocation207_spill] sm:$0xff]  ;;  %v3013_v24 = vmul.f32 %v8987_v39, %v12117_v63  ;;  %v3203_v25 = vmul.f32 %v8994_v26, %v9024_v30 }
 0x3ba   : > { %v4435_v56 = vmul.f32 %v7590_v2, %v9126_v28  ;;  %7591 = vtanh.f32 %v4384_v18  ;;  %v9225_v4 = vpop.permute.xlu2 %2929  ;;  %v3855_v60 = vpop.permute.xlu1 %3854  ;;  %v12114_v18 = vld [vmem:[#allocation240_spill] sm:$0xff]  ;;  %v3202_v30 = vmul.f32 %v8994_v26, %v12118_v37 }
 0x3bb   : > { %v3671_v55 = vpop.permute.xlu0 %3670  ;;  %v2824_v12 = vmul.f32 %v8976_v54, %v12114_v18  ;;  %v2659_v5 = vadd.f32 %v2636_v21, %v2470_v43  ;;  %v2658_v8 = vadd.f32 %v2635_v62, %v2469_v57  ;;  %v3067_v62 = vld [vmem:[%s7934_s24 + $0x65] sm:$0xff] }
 0x3bc   : > { %v4462_v13 = vadd.f32 %v9135_v31, %v4435_v56  ;;  %v2879_v43 = vld [vmem:[%s7934_s24 + $0x6c] sm:$0xff] }
 0x3bd   : > { %v2848_v56 = vadd.f32 %v2825_v32, %v2659_v5  ;;  %v2847_v10 = vadd.f32 %v2824_v12, %v2658_v8  ;;  %v3391_v32 = vmul.f32 %v9006_v34, %v9018_v59  ;;  %v3580_v12 = vmul.f32 %v9029_v1, %v9105_v49 }
 0x3be   : > { %4486 = vst.msk [vmem:[#allocation2 + $0x10] sm:$0xff] %vm4483_vm0, %v4462_v13  ;;  %v3769_v8 = vmul.f32 %v9042_v48, %v9163_v0 }
 0x3bf   : > { %v3037_v13 = vadd.f32 %v3014_v58, %v2848_v56  ;;  %v3036_v27 = vadd.f32 %v3013_v24, %v2847_v10  ;;  %v12121_v24 = vld [vmem:[#allocation16_spill] sm:$0xff] }
 0x3c0   : > { %v7592_v2 = vpop.eup %7591  ;;  %4257 = vperm.xlu2 %7557, %v12116_v29   ;;  %3695 = vperm.xlu1 %7556, %v3632_v33   ;;  %v747_v49 = vmul.f32 %v8885_v20, %v12121_v24 }
 0x3c1   : > { %v4434_v53 = vmul.f32 %v7592_v2, %v9126_v28  ;;  %3511 = vperm.xlu0 %7555, %v3444_v44   ;;  %v3226_v33 = vadd.f32 %v3203_v25, %v3037_v13  ;;  %v12119_v44 = vld [vmem:[#allocation251_spill] sm:$0xff]  ;;  %v3225_v18 = vadd.f32 %v3202_v30, %v3036_v27  ;;  %v12120_v2 = vld [vmem:[#allocation40_spill] sm:$0xff]  ;;  %v3770_v25 = vmul.f32 %v9042_v48, %v3671_v55  ;;  %v12123_v13 = vld [vmem:[#allocation62_spill] sm:$0xff] }
 0x3c2   : > { %v9249_v61 = vpop.permute.xlu2 %4237  ;;  %v9251_v16 = vpop.permute.xlu1 %3297  ;;  %v3392_v57 = vmul.f32 %v9006_v34, %v12119_v44  ;;  %v936_v5 = vmul.f32 %v8878_v3, %v12120_v2  ;;  %v1125_v27 = vmul.f32 %v8893_v15, %v12123_v13 }
 0x3c3   : > { %v4461_v23 = vadd.f32 %v9135_v31, %v4434_v53  ;;  %v9254_v21 = vpop.permute.xlu0 %3113  ;;  %v3414_v59 = vadd.f32 %v3391_v32, %v3225_v18  ;;  %v12122_v53 = vld [vmem:[#allocation253_spill] sm:$0xff]  ;;  %v3821_v32 = vld [vmem:[%s7934_s24 + $0x59] sm:$0xff] }
 0x3c4   : > { %v3415_v51 = vadd.f32 %v3392_v57, %v3226_v33  ;;  %v3581_v56 = vmul.f32 %v9029_v1, %v12122_v53  ;;  %v3256_v33 = vld [vmem:[%s7934_s24 + $0x66] sm:$0xff]  ;;  %v959_v37 = vadd.f32 %v936_v5, %v747_v49  ;;  %v12124_v57 = vld [vmem:[#allocation71_spill] sm:$0xff] }
 0x3c5   : > { %4485 = vst.msk [vmem:[#allocation2 + $0x8] sm:$0xff] %vm4483_vm0, %v4461_v23  ;;  %v1314_v18 = vmul.f32 %v8902_v19, %v12124_v57 }
 0x3c6   : > { %v3604_v30 = vadd.f32 %v3581_v56, %v3415_v51  ;;  %v3959_v51 = vmul.f32 %v9055_v42, %v9156_v14  ;;  %v12127_v56 = vld [vmem:[#allocation122_spill] sm:$0xff] }
 0x3c8   : > { %3700 = vperm.xlu2 %7557, %v3633_v45   ;;  %3138 = vperm.xlu1 %7556, %v3067_v62   ;;  %v3603_v45 = vadd.f32 %v3580_v12, %v3414_v59  ;;  %v3958_v62 = vmul.f32 %v9055_v42, %v3855_v60  ;;  %v3793_v53 = vadd.f32 %v3770_v25, %v3604_v30  ;;  %v12125_v60 = vld [vmem:[#allocation100_spill] sm:$0xff] }
 0x3c9   : > { %2954 = vperm.xlu0 %7555, %v2879_v43   ;;  %v3068_v43 = vld [vmem:[%s7934_s24 + $0x6d] sm:$0xff]  ;;  %v1148_v59 = vadd.f32 %v1125_v27, %v959_v37  ;;  %v1503_v13 = vmul.f32 %v8907_v9, %v12125_v60  ;;  %v1692_v25 = vmul.f32 %v8924_v52, %v12127_v56 }
 0x3ca   : > { %v9270_v58 = vpop.permute.xlu2 %3680  ;;  %v9272_v29 = vpop.permute.xlu1 %3302  ;;  %v3792_v2 = vadd.f32 %v3769_v8, %v3603_v45  ;;  %v9304_v30 = vld [vmem:[%s7934_s24 + $0x73] sm:$0xff] }
 0x3cb   : > { %v4044_v63 = vpop.permute.xlu0 %4043  ;;  %v1337_v49 = vadd.f32 %v1314_v18, %v1148_v59  ;;  %12129 = vst [vmem:[#allocation249_spill] sm:$0xff] %v9304_v30  ;;  %v3822_v18 = vld [vmem:[%s7934_s24 + $0x61] sm:$0xff]  ;;  %v7305_v59 = vld [vmem:[%s12105_s5 + $0x18] sm:$0x3]  ;;  %v7304_v56 = vld [vmem:[%s12105_s5 + $0x10] sm:$0xff] }
 0x3cc   : > { %v4508_v10 = vld [vmem:[#allocation2] ss:$2 sm:$0xff]  ;;  %v4532_v23 = vld [vmem:[#allocation2 + $0x1] ss:$2 sm:$0xff]  ;;  %v4147_v55 = vmul.f32 %v9064_v46, %v4044_v63  ;;  %7306 = vmatpush.msk.msra.mxu0 %vm4707_vm1, %v7305_v59 }
 0x3cd   : > { %v4555_v0 = vmax.f32 %v4508_v10, %v4532_v23  ;;  %v4568_v44 = vld [vmem:[#allocation2 + $0x2] ss:$2 sm:$0xff]  ;;  %v4604_v12 = vld [vmem:[#allocation2 + $0x3] ss:$2 sm:$0xff]  ;;  %v3981_v10 = vadd.f32 %v3958_v62, %v3792_v2  ;;  %v3982_v62 = vadd.f32 %v3959_v51, %v3793_v53 }
 0x3ce   : > { %4726 = vmatpush.msra.mxu0 %v7304_v56 }
 0x3cf   : > { %v4591_v24 = vmax.f32 %v4555_v0, %v4568_v44  ;;  %v4170_v23 = vadd.f32 %v4147_v55, %v3981_v10  ;;  %v12128_v0 = vld [vmem:[#allocation131_spill] sm:$0xff]  ;;  %v4337_v44 = vmul.f32 %v9075_v35, %v9249_v61  ;;  %v12130_v55 = vld [vmem:[#allocation160_spill] sm:$0xff]  ;;  %v7329_v61 = vld [vmem:[%s12105_s5 + $0x28] sm:$0x3] }
 0x3d0   : > { %3327 = vperm.xlu2 %7557, %v3256_v33   ;;  %3143 = vperm.xlu1 %7556, %v3068_v43   ;;  %v1526_v43 = vadd.f32 %v1503_v13, %v1337_v49  ;;  %v1881_v14 = vmul.f32 %v8932_v22, %v12128_v0  ;;  %v12131_v13 = vld [vmem:[#allocation182_spill] sm:$0xff] }
 0x3d1   : > { %3884 = vperm.xlu0 %7555, %v3821_v32   ;;  %v4627_v5 = vmax.f32 %v4591_v24, %v4604_v12  ;;  %v4010_v32 = vld [vmem:[%s7934_s24 + $0x5a] sm:$0xff]  ;;  %v2070_v24 = vmul.f32 %v8937_v38, %v12130_v55  ;;  %v2259_v10 = vmul.f32 %v8952_v17, %v12131_v13  ;;  %7330 = vmatpush.msk.msra.mxu2 %vm4707_vm1, %v7329_v61 }
 0x3d2   : > { %v9294_v8 = vpop.permute.xlu2 %3307  ;;  %v4233_v63 = vpop.permute.xlu1 %4232  ;;  %v1715_v2 = vadd.f32 %v1692_v25, %v1526_v43  ;;  %v7328_v25 = vld [vmem:[%s12105_s5 + $0x20] sm:$0xff]  ;;  %v12133_v43 = vld [vmem:[#allocation222_spill] sm:$0xff] }
 0x3d3   : > { %12126 = vst [vmem:[#allocation243_spill] sm:$0xff] %v9294_v8  ;;  %v4336_v27 = vmul.f32 %v9075_v35, %v4233_v63  ;;  %v4049_v45 = vpop.permute.xlu0 %4048  ;;  %4899 = vmatpush.msra.mxu2 %v7328_v25  ;;  %v2637_v0 = vmul.f32 %v8965_v36, %v12133_v43  ;;  %v12138_v43 = vld [vmem:[#allocation61_spill] sm:$0xff] }
 0x3d4   : > { %4639 = vst.msk [vmem:[#allocation3] sm:$0xff] %vm4483_vm0, %v4627_v5  ;;  %v4148_v33 = vmul.f32 %v9064_v46, %v4049_v45  ;;  %v1904_v60 = vadd.f32 %v1881_v14, %v1715_v2  ;;  %v4011_v14 = vld [vmem:[%s7934_s24 + $0x62] sm:$0xff] }
 0x3d5   : > { %v4359_v37 = vadd.f32 %v4336_v27, %v4170_v23  ;;  %v12132_v27 = vld [vmem:[#allocation191_spill] sm:$0xff] }
 0x3d6   : > { %v4171_v57 = vadd.f32 %v4148_v33, %v3982_v62  ;;  %v2093_v23 = vadd.f32 %v2070_v24, %v1904_v60  ;;  %v2448_v45 = vmul.f32 %v8960_v11, %v12132_v27  ;;  %v9364_v27 = vld [vmem:[%s7934_s24 + $0x7b] sm:$0xff] }
 0x3d7   : > { %v4386_v53 = vadd.f32 %v9094_v41, %v4359_v37  ;;  %v3445_v37 = vld [vmem:[%s7934_s24 + $0x67] sm:$0xff]  ;;  %12136 = vst [vmem:[#allocation41_spill] sm:$0xff] %v9364_v27 }
 0x3d8   : > { %v4360_v12 = vadd.f32 %v4337_v44, %v4171_v57  ;;  %2770 = vperm.xlu2 %7557, %v9304_v30   ;;  %4073 = vperm.xlu1 %7556, %v4010_v32   ;;  %v2282_v33 = vadd.f32 %v2259_v10, %v2093_v23  ;;  %v3257_v32 = vld [vmem:[%s7934_s24 + $0x6e] sm:$0xff] }
 0x3d9   : > { %7593 = vtanh.f32 %v4386_v53  ;;  %3889 = vperm.xlu0 %7555, %v3822_v18   ;;  %v12134_v18 = vld [vmem:[#allocation242_spill] sm:$0xff]  ;;  %v3015_v53 = vmul.f32 %v8987_v39, %v9130_v47  ;;  %v2880_v23 = vld [vmem:[%s7934_s24 + $0x74] sm:$0xff] }
 0x3da   : > { %v4387_v5 = vadd.f32 %v9094_v41, %v4360_v12  ;;  %v9324_v51 = vpop.permute.xlu2 %3312  ;;  %v9326_v63 = vpop.permute.xlu1 %3675  ;;  %v2471_v57 = vadd.f32 %v2448_v45, %v2282_v33  ;;  %v2826_v2 = vmul.f32 %v8976_v54, %v12134_v18  ;;  %v12137_v45 = vld [vmem:[#allocation23_spill] sm:$0xff] }
 0x3db   : > { %v4652_v49 = vld [vmem:[#allocation3] sm:$0xff]  ;;  %v9338_v62 = vpop.permute.xlu0 %3491  ;;  %v748_v33 = vmul.f32 %v8885_v20, %v12137_v45  ;;  %v12144_v45 = vld [vmem:[#allocation121_spill] sm:$0xff] }
 0x3dc   : > { %7318 = vmatmul.msk.f32.vlgmr.msra.gmra.mxu1 %vm4483_vm0, %v4652_v49  ;;  %7595 = vtanh.f32 %v4387_v5  ;;  %v2660_v24 = vadd.f32 %v2637_v0, %v2471_v57  ;;  %v12135_v49 = vld [vmem:[#allocation32_spill] sm:$0xff]  ;;  %v1126_v0 = vmul.f32 %v8893_v15, %v12138_v43  ;;  %v12139_v57 = vld [vmem:[#allocation83_spill] sm:$0xff] }
 0x3dd   : > { %v937_v56 = vmul.f32 %v8878_v3, %v12135_v49  ;;  %v1315_v18 = vmul.f32 %v8902_v19, %v12139_v57  ;;  %v3634_v57 = vld [vmem:[%s7934_s24 + $0x68] sm:$0xff] }
 0x3de   : > { %v2849_v13 = vadd.f32 %v2826_v2, %v2660_v24 }
 0x3df   : > { %v7594_v44 = vpop.eup %7593 }
 0x3e0   : > { %v4436_v55 = vmul.f32 %v7594_v44, %v9126_v28  ;;  %4078 = vperm.xlu2 %7557, %v4011_v14   ;;  %3516 = vperm.xlu1 %7556, %v3445_v37   ;;  %v3038_v47 = vadd.f32 %v3015_v53, %v2849_v13  ;;  %v4199_v14 = vld [vmem:[%s7934_s24 + $0x5b] sm:$0xff]  ;;  %v3204_v37 = vmul.f32 %v8994_v26, %v9101_v40 }
 0x3e1   : > { %3332 = vperm.xlu0 %7555, %v3257_v32   ;;  %v3393_v32 = vmul.f32 %v9006_v34, %v9251_v16  ;;  %v960_v44 = vadd.f32 %v937_v56, %v748_v33  ;;  %v12141_v40 = vld [vmem:[#allocation92_spill] sm:$0xff]  ;;  %v1693_v33 = vmul.f32 %v8924_v52, %v12144_v45  ;;  %v12147_v45 = vld [vmem:[#allocation86_spill] sm:$0xff] }
 0x3e2   : > { %v7596_v12 = vpop.eup %7595  ;;  %v4463_v59 = vadd.f32 %v9135_v31, %v4436_v55  ;;  %v9351_v61 = vpop.permute.xlu2 %4242  ;;  %v3227_v2 = vadd.f32 %v3204_v37, %v3038_v47  ;;  %v12140_v55 = vld [vmem:[#allocation35_spill] sm:$0xff]  ;;  %v1504_v16 = vmul.f32 %v8907_v9, %v12141_v40  ;;  %v12143_v47 = vld [vmem:[#allocation26_spill] sm:$0xff]  ;;  %v3582_v37 = vmul.f32 %v9029_v1, %v9189_v50 }
 0x3e3   : > { %v9353_v60 = vpop.permute.xlu1 %3118  ;;  %v4437_v10 = vmul.f32 %v7596_v12, %v9126_v28  ;;  %v9356_v5 = vpop.permute.xlu0 %2934  ;;  %v940_v24 = vmul.f32 %v8878_v3, %v12140_v55  ;;  %v1149_v53 = vadd.f32 %v1126_v0, %v960_v44  ;;  %v12145_v0 = vld [vmem:[#allocation64_spill] sm:$0xff]  ;;  %v4200_v44 = vld [vmem:[%s7934_s24 + $0x63] sm:$0xff]  ;;  %v12146_v40 = vld [vmem:[#allocation143_spill] sm:$0xff] }
 0x3e4   : > { %4487 = vst.msk [vmem:[#allocation2 + $0x18] sm:$0xff] %vm4483_vm0, %v4463_v59  ;;  %v3416_v13 = vadd.f32 %v3393_v32, %v3227_v2  ;;  %v3771_v32 = vmul.f32 %v9042_v48, %v9326_v63 }
 0x3e5   : > { %v4464_v25 = vadd.f32 %v9135_v31, %v4437_v10 }
 0x3e7   : > { %4488 = vst.msk [vmem:[#allocation2 + $0x20] sm:$0xff] %vm4483_vm0, %v4464_v25  ;;  %v751_v25 = vmul.f32 %v8885_v20, %v12143_v47 }
 0x3e8   : > { %2959 = vperm.xlu2 %7557, %v2880_v23   ;;  %2775 = vperm.xlu1 %7556, %v9364_v27   ;;  %v1338_v23 = vadd.f32 %v1315_v18, %v1149_v53  ;;  %v1882_v18 = vmul.f32 %v8932_v22, %v12146_v40  ;;  %v3446_v53 = vld [vmem:[%s7934_s24 + $0x6f] sm:$0xff] }
 0x3e9   : > { %4262 = vperm.xlu0 %7555, %v4199_v14   ;;  %v1129_v14 = vmul.f32 %v8893_v15, %v12145_v0  ;;  %v963_v2 = vadd.f32 %v940_v24, %v751_v25  ;;  %v12149_v25 = vld [vmem:[#allocation95_spill] sm:$0xff] }
 0x3ea   : > { %v9383_v12 = vpop.permute.xlu2 %3685  ;;  %v1527_v55 = vadd.f32 %v1504_v16, %v1338_v23  ;;  %v1507_v23 = vmul.f32 %v8907_v9, %v12149_v25 }
 0x3eb   : > { %12142 = vst [vmem:[#allocation15_spill] sm:$0xff] %v9383_v12  ;;  %v9385_v59 = vpop.permute.xlu1 %3123  ;;  %v3865_v10 = vpop.permute.xlu0 %3864  ;;  %v4510_v49 = vld [vmem:[#allocation2 + $0x10] ss:$2 sm:$0xff]  ;;  %v4534_v56 = vld [vmem:[#allocation2 + $0x11] ss:$2 sm:$0xff]  ;;  %v1152_v16 = vadd.f32 %v1129_v14, %v963_v2 }
 0x3ec   : > { %v4556_v43 = vmax.f32 %v4510_v49, %v4534_v56  ;;  %v1318_v49 = vmul.f32 %v8902_v19, %v12147_v45  ;;  %v3605_v56 = vadd.f32 %v3582_v37, %v3416_v13  ;;  %v3960_v0 = vmul.f32 %v9055_v42, %v3865_v10  ;;  %v12148_v12 = vld [vmem:[#allocation152_spill] sm:$0xff]  ;;  %v12150_v45 = vld [vmem:[#allocation181_spill] sm:$0xff] }
 0x3ed   : > { %v1716_v50 = vadd.f32 %v1693_v33, %v1527_v55  ;;  %v2071_v63 = vmul.f32 %v8937_v38, %v12148_v12  ;;  %v2260_v13 = vmul.f32 %v8952_v17, %v12150_v45  ;;  %v12153_v55 = vld [vmem:[#allocation146_spill] sm:$0xff]  ;;  %v12158_v45 = vld [vmem:[#allocation241_spill] sm:$0xff] }
 0x3ee   : > { %v4570_v47 = vld [vmem:[#allocation2 + $0x12] ss:$2 sm:$0xff]  ;;  %v4606_v24 = vld [vmem:[#allocation2 + $0x13] ss:$2 sm:$0xff]  ;;  %v3794_v40 = vadd.f32 %v3771_v32, %v3605_v56  ;;  %v1341_v12 = vadd.f32 %v1318_v49, %v1152_v16 }
 0x3ef   : > { %v4592_v27 = vmax.f32 %v4556_v43, %v4570_v47  ;;  %v1905_v8 = vadd.f32 %v1882_v18, %v1716_v50  ;;  %v12151_v43 = vld [vmem:[#allocation124_spill] sm:$0xff]  ;;  %v1885_v18 = vmul.f32 %v8932_v22, %v12153_v55  ;;  %v3635_v47 = vld [vmem:[%s7934_s24 + $0x70] sm:$0xff]  ;;  %v12157_v22 = vld [vmem:[#allocation17_spill] sm:$0xff] }
 0x3f0   : > { %4267 = vperm.xlu2 %7557, %v4200_v44   ;;  %3705 = vperm.xlu1 %7556, %v3634_v57   ;;  %v1696_v37 = vmul.f32 %v8924_v52, %v12151_v43  ;;  %v3983_v14 = vadd.f32 %v3960_v0, %v3794_v40  ;;  %v12152_v44 = vld [vmem:[#allocation203_spill] sm:$0xff]  ;;  %v1530_v2 = vadd.f32 %v1507_v23, %v1341_v12  ;;  %v12160_v43 = vld [vmem:[#allocation184_spill] sm:$0xff]  ;;  %v12161_v55 = vld [vmem:[#allocation74_spill] sm:$0xff] }
 0x3f1   : > { %3521 = vperm.xlu0 %7555, %v3446_v53   ;;  %v4628_v30 = vmax.f32 %v4592_v27, %v4606_v24  ;;  %v2094_v27 = vadd.f32 %v2071_v63, %v1905_v8  ;;  %v2449_v57 = vmul.f32 %v8960_v11, %v12152_v44  ;;  %v4338_v53 = vmul.f32 %v9075_v35, %v9351_v61  ;;  %v3069_v49 = vld [vmem:[%s7934_s24 + $0x75] sm:$0xff]  ;;  %v12155_v24 = vld [vmem:[#allocation214_spill] sm:$0xff] }
 0x3f2   : > { %v9411_v10 = vpop.permute.xlu2 %3128  ;;  %v12154_v56 = vld [vmem:[#allocation43_spill] sm:$0xff]  ;;  %v2638_v8 = vmul.f32 %v8965_v36, %v12155_v24  ;;  %v1719_v63 = vadd.f32 %v1696_v37, %v1530_v2  ;;  %v750_v40 = vmul.f32 %v8885_v20, %v12157_v22  ;;  %v2263_v37 = vmul.f32 %v8952_v17, %v12160_v43  ;;  %v9495_v43 = vld [vmem:[%s12077_s29] ss:$0 sm:$0xff] }
 0x3f3   : > { %v4054_v33 = vpop.permute.xlu1 %4053  ;;  %v9416_v32 = vpop.permute.xlu0 %3869  ;;  %4640 = vst.msk [vmem:[#allocation3 + $0x8] sm:$0xff] %vm4483_vm0, %v4628_v30  ;;  %v939_v0 = vmul.f32 %v8878_v3, %v12154_v56  ;;  %v2283_v50 = vadd.f32 %v2260_v13, %v2094_v27  ;;  %v2881_v30 = vld [vmem:[%s7934_s24 + $0x7c] sm:$0xff]  ;;  %v12156_v16 = vld [vmem:[#allocation155_spill] sm:$0xff]  ;;  %v3016_v20 = vmul.f32 %v8987_v39, %v9191_v6  ;;  %v1317_v17 = vmul.f32 %v8902_v19, %v12161_v55  ;;  %v9463_v19 = vld [vmem:[%s12077_s29 + $0x4] ss:$0 sm:$0xff] }
 0x3f4   : > { %v4149_v9 = vmul.f32 %v9064_v46, %v4054_v33  ;;  %v2074_v25 = vmul.f32 %v8937_v38, %v12156_v16  ;;  %v2827_v33 = vmul.f32 %v8976_v54, %v12158_v45  ;;  %v12159_v3 = vld [vmem:[#allocation65_spill] sm:$0xff]  ;;  %v1908_v12 = vadd.f32 %v1885_v18, %v1719_v63  ;;  %v3258_v24 = vld [vmem:[%s7934_s24 + $0x76] sm:$0xff] }
 0x3f5   : > { %v2472_v61 = vadd.f32 %v2449_v57, %v2283_v50  ;;  %v1128_v13 = vmul.f32 %v8893_v15, %v12159_v3  ;;  %v962_v38 = vadd.f32 %v939_v0, %v750_v40 }
 0x3f6   : > { %v4172_v52 = vadd.f32 %v4149_v9, %v3983_v14  ;;  %v2097_v18 = vadd.f32 %v2074_v25, %v1908_v12  ;;  %v9477_v25 = vld [vmem:[%s12077_s29 + $0x1] ss:$0 sm:$0xff] }
 0x3f7   : > { %v2661_v9 = vadd.f32 %v2638_v8, %v2472_v61  ;;  %v1151_v56 = vadd.f32 %v1128_v13, %v962_v38  ;;  %v3070_v8 = vld [vmem:[%s7934_s24 + $0x7d] sm:$0xff]  ;;  %v9484_v61 = vld [vmem:[%s12077_s29 + $0x5] ss:$0 sm:$0xff]  ;;  %v3583_v13 = vmul.f32 %v9029_v1, %v9338_v62  ;;  %v9509_v62 = vld [vmem:[%s12077_s29 + $0x6] ss:$0 sm:$0xff] }
 0x3f8   : > { %v4361_v23 = vadd.f32 %v4338_v53, %v4172_v52  ;;  %3710 = vperm.xlu2 %7557, %v3635_v47   ;;  %3148 = vperm.xlu1 %7556, %v3069_v49   ;;  %v12162_v53 = vld [vmem:[#allocation206_spill] sm:$0xff]  ;;  %v3205_v49 = vmul.f32 %v8994_v26, %v9254_v21  ;;  %v2286_v50 = vadd.f32 %v2263_v37, %v2097_v18  ;;  %v9502_v38 = vld [vmem:[%s12077_s29 + $0x2] ss:$0 sm:$0xff] }
 0x3f9   : > { %2964 = vperm.xlu0 %7555, %v2881_v30   ;;  %v2452_v52 = vmul.f32 %v8960_v11, %v12162_v53  ;;  %v2850_v47 = vadd.f32 %v2827_v33, %v2661_v9  ;;  %v12163_v11 = vld [vmem:[#allocation103_spill] sm:$0xff]  ;;  %v12164_v30 = vld [vmem:[#allocation217_spill] sm:$0xff]  ;;  %v3394_v26 = vmul.f32 %v9006_v34, %v9272_v29  ;;  %v1340_v40 = vadd.f32 %v1317_v17, %v1151_v56  ;;  %v12167_v34 = vld [vmem:[#allocation244_spill] sm:$0xff] }
 0x3fa   : > { %v4388_v14 = vadd.f32 %v9094_v41, %v4361_v23  ;;  %v9445_v27 = vpop.permute.xlu2 %3133  ;;  %v4664_v57 = vld [vmem:[#allocation3 + $0x1] sm:$0xff]  ;;  %v1506_v0 = vmul.f32 %v9463_v19, %v12163_v11  ;;  %v2641_v63 = vmul.f32 %v8965_v36, %v12164_v30  ;;  %v3823_v21 = vld [vmem:[%s7934_s24 + $0x69] sm:$0xff]  ;;  %v2830_v29 = vmul.f32 %v8976_v54, %v12167_v34  ;;  %v9528_v11 = vld [vmem:[%s12077_s29 + $0x7] ss:$0 sm:$0xff] }
 0x3fb   : > { %v9447_v44 = vpop.permute.xlu1 %4058  ;;  %v4653_v2 = vld [vmem:[#allocation3 + $0x8] sm:$0xff]  ;;  %7307 = vmatmul.msk.f32.vlgmr.msra.gmra.mxu0 %vm4483_vm0, %v4664_v57  ;;  %v9455_v6 = vpop.permute.xlu0 %3496  ;;  %v3039_v16 = vadd.f32 %v3016_v20, %v2850_v47  ;;  %v2475_v33 = vadd.f32 %v2452_v52, %v2286_v50  ;;  %v12168_v37 = vld [vmem:[#allocation22_spill] sm:$0xff] }
 0x3fc   : > { %v4838_v15 = vld [vmem:[#allocation3 + $0x2] sm:$0xff]  ;;  %7597 = vtanh.f32 %v4388_v14  ;;  %7319 = vmatmul.msk.f32.gmra.mxu1 %vm4483_vm0, %v4653_v2  ;;  %v12166_v36 = vld [vmem:[#allocation125_spill] sm:$0xff]  ;;  %v749_v14 = vmul.f32 %v9495_v43, %v12168_v37  ;;  %v1529_v1 = vadd.f32 %v1506_v0, %v1340_v40  ;;  %v12170_v20 = vld [vmem:[#allocation134_spill] sm:$0xff] }
 0x3fd   : > { %7331 = vmatmul.msk.f32.vlgmr.msra.gmra.mxu2 %vm4483_vm0, %v4838_v15  ;;  %v12165_v23 = vld [vmem:[#allocation44_spill] sm:$0xff]  ;;  %v1695_v45 = vmul.f32 %v9484_v61, %v12166_v36  ;;  %v3228_v3 = vadd.f32 %v3205_v49, %v3039_v16  ;;  %v12169_v54 = vld [vmem:[#allocation53_spill] sm:$0xff]  ;;  %v1884_v57 = vmul.f32 %v9509_v62, %v12170_v20  ;;  %v2664_v2 = vadd.f32 %v2641_v63, %v2475_v33  ;;  %v12171_v47 = vld [vmem:[#allocation82_spill] sm:$0xff] }
 0x3fe   : > { %v938_v22 = vmul.f32 %v9477_v25, %v12165_v23  ;;  %v1127_v9 = vmul.f32 %v9502_v38, %v12169_v54  ;;  %v9521_v52 = vld [vmem:[%s12077_s29 + $0x3] ss:$0 sm:$0xff]  ;;  %v12172_v0 = vld [vmem:[#allocation163_spill] sm:$0xff]  ;;  %v9539_v40 = vld [vmem:[%s12077_s29 + $0x8] ss:$0 sm:$0xff] }
 0x3ff   : > { %v3417_v15 = vadd.f32 %v3394_v26, %v3228_v3  ;;  %v1316_v49 = vmul.f32 %v9521_v52, %v12171_v47  ;;  %v1718_v56 = vadd.f32 %v1695_v45, %v1529_v1  ;;  %v2073_v50 = vmul.f32 %v9528_v11, %v12172_v0  ;;  %v12174_v36 = vld [vmem:[#allocation185_spill] sm:$0xff]  ;;  %v4012_v34 = vld [vmem:[%s7934_s24 + $0x6a] sm:$0xff] }
 0x400   : > { %3337 = vperm.xlu2 %7557, %v3258_v24   ;;  %3153 = vperm.xlu1 %7556, %v3070_v8   ;;  %v961_v53 = vadd.f32 %v938_v22, %v749_v14  ;;  %v2853_v8 = vadd.f32 %v2830_v29, %v2664_v2  ;;  %v2262_v45 = vmul.f32 %v9539_v40, %v12174_v36  ;;  %v9544_v33 = vld [vmem:[%s7934_s24 + $0x83] sm:$0xff]  ;;  %v3824_v37 = vld [vmem:[%s7934_s24 + $0x71] sm:$0xff]  ;;  %v9600_v36 = vld [vmem:[%s12077_s29 + $0xc] ss:$0 sm:$0xff] }
 0x401   : > { %3894 = vperm.xlu0 %7555, %v3823_v21   ;;  %v3606_v30 = vadd.f32 %v3583_v13, %v3417_v15  ;;  %v12173_v21 = vld [vmem:[#allocation104_spill] sm:$0xff]  ;;  %v1907_v22 = vadd.f32 %v1884_v57, %v1718_v56  ;;  %v3772_v29 = vmul.f32 %v9042_v48, %v9270_v58  ;;  %v3961_v13 = vmul.f32 %v9055_v42, %v9416_v32  ;;  %v12175_v54 = vld [vmem:[#allocation113_spill] sm:$0xff]  ;;  %v12176_v1 = vld [vmem:[#allocation194_spill] sm:$0xff] }
 0x402   : > { %v7598_v12 = vpop.eup %7597  ;;  %v9514_v17 = vpop.permute.xlu2 %4063  ;;  %v1150_v26 = vadd.f32 %v1127_v9, %v961_v53  ;;  %v1505_v23 = vmul.f32 %v9463_v19, %v12173_v21  ;;  %v1694_v9 = vmul.f32 %v9484_v61, %v12175_v54  ;;  %v9565_v58 = vld [vmem:[%s12077_s29 + $0x9] ss:$0 sm:$0xff]  ;;  %v4150_v57 = vmul.f32 %v9064_v46, %v9447_v44  ;;  %v9577_v2 = vld [vmem:[%s12077_s29 + $0xa] ss:$0 sm:$0xff] }
 0x403   : > { %v4438_v55 = vmul.f32 %v7598_v12, %v9126_v28  ;;  %v9516_v18 = vpop.permute.xlu1 %3501  ;;  %v2940_v24 = vpop.permute.xlu0 %2939  ;;  %v2096_v48 = vadd.f32 %v2073_v50, %v1907_v22  ;;  %v3795_v20 = vadd.f32 %v3772_v29, %v3606_v30  ;;  %v12177_v15 = vld [vmem:[#allocation225_spill] sm:$0xff]  ;;  %v12178_v47 = vld [vmem:[#allocation142_spill] sm:$0xff]  ;;  %v3447_v29 = vld [vmem:[%s7934_s24 + $0x77] sm:$0xff] }
 0x404   : > { %v3019_v16 = vmul.f32 %v8987_v39, %v2940_v24  ;;  %v9552_v39 = vld [vmem:[%s12077_s29 + $0xd] ss:$0 sm:$0xff]  ;;  %v1339_v14 = vadd.f32 %v1316_v49, %v1150_v26  ;;  %v1883_v46 = vmul.f32 %v9509_v62, %v12178_v47  ;;  %v9590_v50 = vld [vmem:[%s12077_s29 + $0xb] ss:$0 sm:$0xff]  ;;  %v12179_v24 = vld [vmem:[#allocation245_spill] sm:$0xff] }
 0x405   : > { %v4465_v63 = vadd.f32 %v9135_v31, %v4438_v55  ;;  %v3208_v3 = vmul.f32 %v9552_v39, %v9411_v10  ;;  %v2451_v10 = vmul.f32 %v9565_v58, %v12176_v1  ;;  %v2285_v32 = vadd.f32 %v2262_v45, %v2096_v48  ;;  %v12182_v48 = vld [vmem:[#allocation202_spill] sm:$0xff] }
 0x406   : > { %v3042_v12 = vadd.f32 %v3019_v16, %v2853_v8  ;;  %v2640_v55 = vmul.f32 %v9577_v2, %v12177_v15  ;;  %v1528_v53 = vadd.f32 %v1505_v23, %v1339_v14  ;;  %v3984_v44 = vadd.f32 %v3961_v13, %v3795_v20  ;;  %v12180_v16 = vld [vmem:[#allocation164_spill] sm:$0xff]  ;;  %v12181_v13 = vld [vmem:[#allocation173_spill] sm:$0xff]  ;;  %v7341_v20 = vld [vmem:[%s12105_s5 + $0x30] sm:$0xff] }
 0x407   : > { %4489 = vst.msk [vmem:[#allocation2 + $0x28] sm:$0xff] %vm4483_vm0, %v4465_v63  ;;  %v2474_v0 = vadd.f32 %v2451_v10, %v2285_v32  ;;  %v2829_v8 = vmul.f32 %v9590_v50, %v12179_v24  ;;  %v2072_v26 = vmul.f32 %v9528_v11, %v12180_v16  ;;  %v3018_v45 = vmul.f32 %v9600_v36, %v9356_v5  ;;  %v3259_v14 = vld [vmem:[%s7934_s24 + $0x7e] sm:$0xff]  ;;  %v12183_v32 = vld [vmem:[#allocation226_spill] sm:$0xff] }
 0x408   : > { %2780 = vperm.xlu2 %7557, %v9544_v33   ;;  %4083 = vperm.xlu1 %7556, %v4012_v34   ;;  %v9572_v42 = vadd.f32 %v3208_v3, %v3042_v12  ;;  %v1717_v63 = vadd.f32 %v1694_v9, %v1528_v53  ;;  %v4173_v21 = vadd.f32 %v4150_v57, %v3984_v44  ;;  %v4013_v34 = vld [vmem:[%s7934_s24 + $0x72] sm:$0xff]  ;;  %v9633_v24 = vld [vmem:[%s12077_s29 + $0xe] ss:$0 sm:$0xff]  ;;  %v2882_v16 = vld [vmem:[%s7934_s24 + $0x84] sm:$0xff] }
 0x409   : > { %3899 = vperm.xlu0 %7555, %v3824_v37   ;;  %v2663_v22 = vadd.f32 %v2640_v55, %v2474_v0  ;;  %v2261_v12 = vmul.f32 %v9539_v40, %v12181_v13  ;;  %v3207_v9 = vmul.f32 %v9552_v39, %v9385_v59  ;;  %v2450_v1 = vmul.f32 %v9565_v58, %v12182_v48  ;;  %v12184_v44 = vld [vmem:[#allocation235_spill] sm:$0xff] }
 0x40a   : > { %v9583_v49 = vpop.permute.xlu2 %4068  ;;  %v1906_v3 = vadd.f32 %v1883_v46, %v1717_v63  ;;  %v2639_v15 = vmul.f32 %v9577_v2, %v12183_v32  ;;  %v2828_v0 = vmul.f32 %v9590_v50, %v12184_v44  ;;  %v3636_v48 = vld [vmem:[%s7934_s24 + $0x78] sm:$0xff]  ;;  %v12187_v44 = vld [vmem:[#allocation46_spill] sm:$0xff] }
 0x40b   : > { %v9585_v56 = vpop.permute.xlu1 %2944  ;;  %v4248_v30 = vpop.permute.xlu0 %4247  ;;  %v2852_v54 = vadd.f32 %v2829_v8, %v2663_v22  ;;  %v3396_v8 = vmul.f32 %v9633_v24, %v9324_v51  ;;  %v9653_v51 = vld [vmem:[%s12077_s29 + $0x10] ss:$0 sm:$0xff] }
 0x40c   : > { %v4339_v23 = vmul.f32 %v9075_v35, %v4248_v30  ;;  %v7342_v35 = vld [vmem:[%s12105_s5 + $0x38] sm:$0x3]  ;;  %v2095_v5 = vadd.f32 %v2072_v26, %v1906_v3  ;;  %v9640_v30 = vld [vmem:[%s12077_s29 + $0xf] ss:$0 sm:$0xff] }
 0x40d   : > { %7512 = vmatpush.msk.msra.mxu3 %vm4707_vm1, %v7342_v35  ;;  %7343 = vmatpush.msk.msrb.mxu1 %vm4707_vm1, %v7342_v35  ;;  %v3041_v57 = vadd.f32 %v3018_v45, %v2852_v54  ;;  %v3585_v63 = vmul.f32 %v9640_v30, %v9516_v18  ;;  %v9646_v26 = vld [vmem:[%s7934_s24 + $0x8b] sm:$0xff]  ;;  %v3206_v18 = vmul.f32 %v9552_v39, %v9353_v60 }
 0x40e   : > { %v4362_v37 = vadd.f32 %v4339_v23, %v4173_v21  ;;  %v2284_v59 = vadd.f32 %v2261_v12, %v2095_v5  ;;  %v3017_v23 = vmul.f32 %v9600_v36, %v9225_v4  ;;  %v9665_v60 = vld [vmem:[%s12077_s29 + $0x11] ss:$0 sm:$0xff] }
 0x40f   : > { %7513 = vmatpush.msra.mxu3 %v7341_v20  ;;  %5002 = vmatpush.msrb.mxu1 %v7341_v20  ;;  %v3584_v20 = vmul.f32 %v9640_v30, %v9455_v6 }
 0x410   : > { %v4389_v10 = vadd.f32 %v9094_v41, %v4362_v37  ;;  %4088 = vperm.xlu2 %7557, %v4013_v34   ;;  %3526 = vperm.xlu1 %7556, %v3447_v29   ;;  %v3230_v41 = vadd.f32 %v3207_v9, %v3041_v57  ;;  %v2473_v46 = vadd.f32 %v2450_v1, %v2284_v59  ;;  %v12185_v1 = vld [vmem:[#allocation243_spill] sm:$0xff]  ;;  %v3448_v57 = vld [vmem:[%s7934_s24 + $0x7f] sm:$0xff] }
 0x411   : > { %3342 = vperm.xlu0 %7555, %v3259_v14   ;;  %v9687_v59 = vld [vmem:[%s12077_s29 + $0x13] ss:$0 sm:$0xff] }
 0x412   : > { %7599 = vtanh.f32 %v4389_v10  ;;  %v9624_v55 = vpop.permute.xlu2 %2949  ;;  %v2662_v21 = vadd.f32 %v2639_v15, %v2473_v46  ;;  %v3419_v22 = vadd.f32 %v3396_v8, %v3230_v41  ;;  %v3395_v10 = vmul.f32 %v9633_v24, %v12185_v1  ;;  %v12186_v41 = vld [vmem:[#allocation249_spill] sm:$0xff] }
 0x413   : > { %v9626_v53 = vpop.permute.xlu1 %3874  ;;  %v3691_v47 = vpop.permute.xlu0 %3690  ;;  %v4536_v46 = vld [vmem:[#allocation2 + $0x21] ss:$2 sm:$0xff] }
 0x414   : > { %v3774_v45 = vmul.f32 %v9653_v51, %v3691_v47  ;;  %v2851_v29 = vadd.f32 %v2828_v0, %v2662_v21  ;;  %v3608_v3 = vadd.f32 %v3585_v63, %v3419_v22  ;;  %v4512_v47 = vld [vmem:[#allocation2 + $0x20] ss:$2 sm:$0xff]  ;;  %v942_v0 = vmul.f32 %v9477_v25, %v12187_v44 }
 0x415   : > { %v12188_v21 = vld [vmem:[#allocation18_spill] sm:$0xff]  ;;  %v12189_v22 = vld [vmem:[#allocation68_spill] sm:$0xff] }
 0x416   : > { %v3040_v13 = vadd.f32 %v3017_v23, %v2851_v29  ;;  %v3797_v35 = vadd.f32 %v3774_v45, %v3608_v3  ;;  %v753_v23 = vmul.f32 %v9495_v43, %v12188_v21  ;;  %v1131_v45 = vmul.f32 %v9502_v38, %v12189_v22 }
 0x417   : > { %v4557_v3 = vmax.f32 %v4512_v47, %v4536_v46 }
 0x418   : > { %v7600_v34 = vpop.eup %7599  ;;  %2969 = vperm.xlu2 %7557, %v2882_v16   ;;  %2785 = vperm.xlu1 %7556, %v9646_v26   ;;  %v3229_v5 = vadd.f32 %v3206_v18, %v3040_v13 }
 0x419   : > { %v4439_v4 = vmul.f32 %v7600_v34, %v9126_v28  ;;  %4272 = vperm.xlu0 %7555, %v9202_v7   ;;  %v9673_v28 = vld [vmem:[%s12077_s29 + $0x12] ss:$0 sm:$0xff]  ;;  %v9704_v34 = vld [vmem:[%s12083_s27] ss:$0 sm:$0xff] }
 0x41a   : > { %v4258_v12 = vpop.permute.xlu2 %4257  ;;  %v4152_v7 = vmul.f32 %v9673_v28, %v9583_v49  ;;  %v3418_v49 = vadd.f32 %v3395_v10, %v3229_v5  ;;  %v12192_v5 = vld [vmem:[#allocation77_spill] sm:$0xff] }
 0x41b   : > { %v3880_v37 = vpop.permute.xlu1 %3879  ;;  %v4466_v14 = vadd.f32 %v9135_v31, %v4439_v4  ;;  %v9668_v9 = vpop.permute.xlu0 %3317  ;;  %v4341_v32 = vmul.f32 %v9687_v59, %v4258_v12  ;;  %v12190_v4 = vld [vmem:[#allocation47_spill] sm:$0xff]  ;;  %v12193_v10 = vld [vmem:[#allocation25_spill] sm:$0xff] }
 0x41c   : > { %v3963_v54 = vmul.f32 %v9665_v60, %v3880_v37  ;;  %v3607_v6 = vadd.f32 %v3584_v20, %v3418_v49  ;;  %v941_v13 = vmul.f32 %v9477_v25, %v12190_v4  ;;  %v12191_v12 = vld [vmem:[#allocation15_spill] sm:$0xff]  ;;  %v752_v20 = vmul.f32 %v9495_v43, %v12193_v10  ;;  %v12198_v4 = vld [vmem:[#allocation128_spill] sm:$0xff]  ;;  %v12202_v10 = vld [vmem:[#allocation137_spill] sm:$0xff] }
 0x41d   : > { %4490 = vst.msk [vmem:[#allocation2 + $0x30] sm:$0xff] %vm4483_vm0, %v4466_v14  ;;  %v3773_v37 = vmul.f32 %v9653_v51, %v12191_v12  ;;  %v3962_v14 = vmul.f32 %v9665_v60, %v9626_v53  ;;  %v2883_v49 = vld [vmem:[%s7934_s24 + $0x8c] sm:$0xff] }
 0x41e   : > { %v3986_v31 = vadd.f32 %v3963_v54, %v3797_v35  ;;  %v965_v54 = vadd.f32 %v942_v0, %v753_v23  ;;  %v12195_v53 = vld [vmem:[#allocation106_spill] sm:$0xff]  ;;  %v964_v0 = vadd.f32 %v941_v13, %v752_v20  ;;  %v1887_v20 = vmul.f32 %v9509_v62, %v12202_v10  ;;  %v12208_v10 = vld [vmem:[#allocation145_spill] sm:$0xff] }
 0x41f   : > { %v1509_v46 = vmul.f32 %v9463_v19, %v12195_v53  ;;  %v12203_v53 = vld [vmem:[#allocation87_spill] sm:$0xff] }
 0x420   : > { %v4175_v15 = vadd.f32 %v4152_v7, %v3986_v31  ;;  %4277 = vperm.xlu2 %7557, %v12186_v41   ;;  %3715 = vperm.xlu1 %7556, %v3636_v48   ;;  %v1320_v7 = vmul.f32 %v9521_v52, %v12192_v5  ;;  %v3637_v31 = vld [vmem:[%s7934_s24 + $0x80] sm:$0xff]  ;;  %v1154_v47 = vadd.f32 %v1131_v45, %v965_v54  ;;  %v12199_v45 = vld [vmem:[#allocation27_spill] sm:$0xff]  ;;  %v12200_v5 = vld [vmem:[#allocation58_spill] sm:$0xff] }
 0x421   : > { %3531 = vperm.xlu0 %7555, %v3448_v57   ;;  %v3071_v48 = vld [vmem:[%s7934_s24 + $0x85] sm:$0xff]  ;;  %v12194_v57 = vld [vmem:[#allocation56_spill] sm:$0xff]  ;;  %v755_v12 = vmul.f32 %v9495_v43, %v12199_v45 }
 0x422   : > { %v4364_v8 = vadd.f32 %v4341_v32, %v4175_v15  ;;  %v9693_v63 = vpop.permute.xlu2 %3700  ;;  %v1130_v32 = vmul.f32 %v9502_v38, %v12194_v57  ;;  %v3796_v15 = vadd.f32 %v3773_v37, %v3607_v6  ;;  %v1343_v22 = vadd.f32 %v1320_v7, %v1154_v47  ;;  %v9765_v45 = vld [vmem:[%s12085_s4] ss:$0 sm:$0xff] }
 0x423   : > { %v9695_v16 = vpop.permute.xlu1 %3506  ;;  %v9707_v18 = vpop.permute.xlu0 %3322  ;;  %v1698_v6 = vmul.f32 %v9484_v61, %v12198_v4  ;;  %v4151_v37 = vmul.f32 %v9673_v28, %v9514_v17  ;;  %v1133_v7 = vmul.f32 %v9502_v38, %v12200_v5 }
 0x424   : > { %v4391_v29 = vadd.f32 %v9704_v34, %v4364_v8  ;;  %v4572_v35 = vld [vmem:[#allocation2 + $0x22] ss:$2 sm:$0xff]  ;;  %v4608_v41 = vld [vmem:[#allocation2 + $0x23] ss:$2 sm:$0xff]  ;;  %v3985_v23 = vadd.f32 %v3962_v14, %v3796_v15  ;;  %v1153_v13 = vadd.f32 %v1130_v32, %v964_v0  ;;  %v9750_v32 = vld [vmem:[%s12084_s23] ss:$0 sm:$0xff] }
 0x425   : > { %v4593_v1 = vmax.f32 %v4557_v3, %v4572_v35  ;;  %v12196_v8 = vld [vmem:[#allocation49_spill] sm:$0xff]  ;;  %v12204_v0 = vld [vmem:[#allocation166_spill] sm:$0xff] }
 0x426   : > { %7601 = vtanh.f32 %v4391_v29  ;;  %v944_v21 = vmul.f32 %v9477_v25, %v12196_v8  ;;  %v12197_v29 = vld [vmem:[#allocation85_spill] sm:$0xff]  ;;  %v2076_v8 = vmul.f32 %v9528_v11, %v12204_v0  ;;  %v12210_v0 = vld [vmem:[#allocation118_spill] sm:$0xff] }
 0x427   : > { %v4629_v44 = vmax.f32 %v4593_v1, %v4608_v41  ;;  %v1319_v3 = vmul.f32 %v9521_v52, %v12197_v29  ;;  %v12205_v29 = vld [vmem:[#allocation116_spill] sm:$0xff] }
 0x428   : > { %3720 = vperm.xlu2 %7557, %v3637_v31   ;;  %3158 = vperm.xlu1 %7556, %v3071_v48   ;;  %v1532_v31 = vadd.f32 %v1509_v46, %v1343_v22  ;;  %v12201_v48 = vld [vmem:[#allocation107_spill] sm:$0xff]  ;;  %v967_v17 = vadd.f32 %v944_v21, %v755_v12  ;;  %v1322_v46 = vmul.f32 %v9521_v52, %v12203_v53  ;;  %v3260_v22 = vld [vmem:[%s7934_s24 + $0x86] sm:$0xff] }
 0x429   : > { %2974 = vperm.xlu0 %7555, %v2883_v49   ;;  %4641 = vst.msk [vmem:[#allocation3 + $0x10] sm:$0xff] %vm4483_vm0, %v4629_v44  ;;  %v1508_v1 = vmul.f32 %v9463_v19, %v12201_v48  ;;  %v4174_v49 = vadd.f32 %v4151_v37, %v3985_v23  ;;  %v1342_v47 = vadd.f32 %v1319_v3, %v1153_v13  ;;  %v3072_v21 = vld [vmem:[%s7934_s24 + $0x8d] sm:$0xff]  ;;  %v3825_v12 = vld [vmem:[%s7934_s24 + $0x79] sm:$0xff] }
 0x42a   : > { %v9737_v14 = vpop.permute.xlu2 %3327  ;;  %v1721_v44 = vadd.f32 %v1698_v6, %v1532_v31  ;;  %v1697_v4 = vmul.f32 %v9484_v61, %v12205_v29  ;;  %v1156_v13 = vadd.f32 %v1133_v7, %v967_v17  ;;  %v12207_v31 = vld [vmem:[#allocation109_spill] sm:$0xff]  ;;  %v1700_v29 = vmul.f32 %v9484_v61, %v12210_v0 }
 0x42b   : > { %v9739_v35 = vpop.permute.xlu1 %2765  ;;  %v4253_v57 = vpop.permute.xlu0 %4252  ;;  %v1531_v37 = vadd.f32 %v1508_v1, %v1342_v47  ;;  %v1511_v48 = vmul.f32 %v9463_v19, %v12207_v31  ;;  %v12209_v17 = vld [vmem:[#allocation197_spill] sm:$0xff]  ;;  %v12214_v31 = vld [vmem:[#allocation176_spill] sm:$0xff] }
 0x42c   : > { %v7602_v54 = vpop.eup %7601  ;;  %v4340_v41 = vmul.f32 %v9687_v59, %v4253_v57  ;;  %v1910_v6 = vadd.f32 %v1887_v20, %v1721_v44  ;;  %v1886_v57 = vmul.f32 %v9509_v62, %v12208_v10  ;;  %v1345_v1 = vadd.f32 %v1322_v46, %v1156_v13 }
 0x42d   : > { %v4441_v15 = vmul.f32 %v9750_v32, %v7602_v54  ;;  %v12206_v54 = vld [vmem:[#allocation188_spill] sm:$0xff]  ;;  %v1720_v44 = vadd.f32 %v1697_v4, %v1531_v37  ;;  %v2264_v10 = vmul.f32 %v9539_v40, %v12214_v31 }
 0x42e   : > { %v4363_v3 = vadd.f32 %v4340_v41, %v4174_v49  ;;  %v2265_v5 = vmul.f32 %v9539_v40, %v12206_v54  ;;  %v2099_v20 = vadd.f32 %v2076_v8, %v1910_v6  ;;  %v2454_v41 = vmul.f32 %v9565_v58, %v12209_v17  ;;  %v12213_v6 = vld [vmem:[#allocation147_spill] sm:$0xff] }
 0x42f   : > { %v4468_v23 = vadd.f32 %v9765_v45, %v4441_v15  ;;  %v1534_v13 = vadd.f32 %v1511_v48, %v1345_v1  ;;  %v1909_v37 = vadd.f32 %v1886_v57, %v1720_v44  ;;  %v1889_v54 = vmul.f32 %v9509_v62, %v12213_v6  ;;  %v12217_v48 = vld [vmem:[#allocation205_spill] sm:$0xff] }
 0x430   : > { %v4390_v53 = vadd.f32 %v9704_v34, %v4363_v3  ;;  %3347 = vperm.xlu2 %7557, %v3260_v22   ;;  %3163 = vperm.xlu1 %7556, %v3072_v21   ;;  %v4665_v15 = vld [vmem:[#allocation3 + $0x9] sm:$0xff]  ;;  %v2288_v21 = vadd.f32 %v2265_v5, %v2099_v20  ;;  %v2453_v57 = vmul.f32 %v9565_v58, %v12217_v48 }
 0x431   : > { %4492 = vst.msk [vmem:[#allocation2 + $0x40] sm:$0xff] %vm4483_vm0, %v4468_v23  ;;  %v4654_v49 = vld [vmem:[#allocation3 + $0x10] sm:$0xff]  ;;  %3904 = vperm.xlu0 %7555, %v3825_v12   ;;  %7308 = vmatmul.msk.f32.gmra.mxu0 %vm4483_vm0, %v4665_v15  ;;  %v12211_v23 = vld [vmem:[#allocation167_spill] sm:$0xff]  ;;  %v12212_v3 = vld [vmem:[#allocation228_spill] sm:$0xff]  ;;  %v1723_v20 = vadd.f32 %v1700_v29, %v1534_v13 }
 0x432   : > { %v4839_v7 = vld [vmem:[#allocation3 + $0xa] sm:$0xff]  ;;  %v2075_v22 = vmul.f32 %v9528_v11, %v12211_v23  ;;  %7603 = vtanh.f32 %v4390_v53  ;;  %7320 = vmatmul.msk.f32.gmra.mxu1 %vm4483_vm0, %v4654_v49  ;;  %v2771_v46 = vpop.permute.xlu2 %2770  ;;  %v2643_v4 = vmul.f32 %v9577_v2, %v12212_v3  ;;  %v2477_v53 = vadd.f32 %v2454_v41, %v2288_v21  ;;  %v12215_v15 = vld [vmem:[#allocation246_spill] sm:$0xff]  ;;  %v9800_v49 = vld [vmem:[%s7934_s24 + $0x93] sm:$0xff] }
 0x433   : > { %v4942_v47 = vld [vmem:[#allocation3 + $0xb] sm:$0xff]  ;;  %7332 = vmatmul.msk.f32.gmra.mxu2 %vm4483_vm0, %v4839_v7  ;;  %v9786_v8 = vpop.permute.xlu1 %3695  ;;  %v9791_v12 = vpop.permute.xlu0 %3511  ;;  %v2832_v5 = vmul.f32 %v9590_v50, %v12215_v15  ;;  %v4014_v7 = vld [vmem:[%s7934_s24 + $0x7a] sm:$0xff]  ;;  %v3021_v23 = vmul.f32 %v9600_v36, %v9624_v55  ;;  %v1912_v21 = vadd.f32 %v1889_v54, %v1723_v20 }
 0x434   : > { %7345 = vmatmul.msk.f32.vlgmr.msra.gmra.mxu3 %vm4483_vm0, %v4942_v47  ;;  %v2098_v17 = vadd.f32 %v2075_v22, %v1909_v37  ;;  %v12216_v47 = vld [vmem:[#allocation169_spill] sm:$0xff]  ;;  %v2666_v44 = vadd.f32 %v2643_v4, %v2477_v53  ;;  %v12219_v29 = vld [vmem:[#allocation178_spill] sm:$0xff] }
 0x435   : > { %v2078_v0 = vmul.f32 %v9528_v11, %v12216_v47  ;;  %v3826_v1 = vld [vmem:[%s7934_s24 + $0x81] sm:$0xff]  ;;  %v2267_v22 = vmul.f32 %v9539_v40, %v12219_v29  ;;  %v12220_v15 = vld [vmem:[#allocation238_spill] sm:$0xff] }
 0x436   : > { %v2287_v3 = vadd.f32 %v2264_v10, %v2098_v17  ;;  %v12218_v6 = vld [vmem:[#allocation229_spill] sm:$0xff]  ;;  %v2855_v13 = vadd.f32 %v2832_v5, %v2666_v44  ;;  %v2831_v55 = vmul.f32 %v9590_v50, %v12220_v15  ;;  %v12222_v44 = vld [vmem:[#allocation231_spill] sm:$0xff] }
 0x437   : > { %v2642_v31 = vmul.f32 %v9577_v2, %v12218_v6  ;;  %v2101_v4 = vadd.f32 %v2078_v0, %v1912_v21  ;;  %v12221_v20 = vld [vmem:[#allocation209_spill] sm:$0xff]  ;;  %v3399_v21 = vmul.f32 %v9633_v24, %v9737_v14  ;;  %v3209_v14 = vmul.f32 %v9552_v39, %v9445_v27 }
 0x438   : > { %v7604_v41 = vpop.eup %7603  ;;  %2790 = vperm.xlu2 %7557, %v9800_v49   ;;  %4093 = vperm.xlu1 %7556, %v4014_v7   ;;  %v2476_v53 = vadd.f32 %v2453_v57, %v2287_v3  ;;  %v2456_v7 = vmul.f32 %v9565_v58, %v12221_v20  ;;  %v3044_v17 = vadd.f32 %v3021_v23, %v2855_v13  ;;  %v4015_v3 = vld [vmem:[%s7934_s24 + $0x82] sm:$0xff]  ;;  %v3261_v13 = vld [vmem:[%s7934_s24 + $0x8e] sm:$0xff] }
 0x439   : > { %v4440_v37 = vmul.f32 %v9750_v32, %v7604_v41  ;;  %3909 = vperm.xlu0 %7555, %v3826_v1   ;;  %v3020_v57 = vmul.f32 %v9600_v36, %v9585_v56  ;;  %v2290_v1 = vadd.f32 %v2267_v22, %v2101_v4  ;;  %v2645_v41 = vmul.f32 %v9577_v2, %v12222_v44  ;;  %v3449_v6 = vld [vmem:[%s7934_s24 + $0x87] sm:$0xff]  ;;  %v9850_v27 = vld [vmem:[%s7934_s24 + $0x9b] sm:$0xff] }
 0x43a   : > { %v4079_v54 = vpop.permute.xlu2 %4078  ;;  %v2665_v0 = vadd.f32 %v2642_v31, %v2476_v53  ;;  %v2834_v31 = vmul.f32 %v9590_v50, %v2771_v46  ;;  %v3398_v4 = vmul.f32 %v9633_v24, %v9707_v18 }
 0x43b   : > { %v3139_v10 = vpop.permute.xlu1 %3138  ;;  %v4467_v47 = vadd.f32 %v9765_v45, %v4440_v37  ;;  %v9822_v48 = vpop.permute.xlu0 %2954  ;;  %v2479_v37 = vadd.f32 %v2456_v7, %v2290_v1 }
 0x43c   : > { %v3210_v5 = vmul.f32 %v9552_v39, %v3139_v10  ;;  %v2854_v29 = vadd.f32 %v2831_v55, %v2665_v0 }
 0x43d   : > { %4491 = vst.msk [vmem:[#allocation2 + $0x38] sm:$0xff] %vm4483_vm0, %v4467_v47  ;;  %v2668_v22 = vadd.f32 %v2645_v41, %v2479_v37 }
 0x43e   : > { %v3233_v23 = vadd.f32 %v3210_v5, %v3044_v17  ;;  %v3043_v56 = vadd.f32 %v3020_v57, %v2854_v29  ;;  %v3587_v17 = vmul.f32 %v9640_v30, %v9791_v12  ;;  %v2884_v57 = vld [vmem:[%s7934_s24 + $0x94] sm:$0xff] }
 0x43f   : > { %v2857_v10 = vadd.f32 %v2834_v31, %v2668_v22  ;;  %v3638_v22 = vld [vmem:[%s7934_s24 + $0x88] sm:$0xff] }
 0x440   : > { %v9835_v53 = vadd.f32 %v3399_v21, %v3233_v23  ;;  %4098 = vperm.xlu2 %7557, %v4015_v3   ;;  %3536 = vperm.xlu1 %7556, %v3449_v6   ;;  %v3232_v7 = vadd.f32 %v3209_v14, %v3043_v56  ;;  %v12223_v3 = vld [vmem:[#allocation41_spill] sm:$0xff]  ;;  %v3776_v6 = vmul.f32 %v9653_v51, %v9693_v63 }
 0x441   : > { %3352 = vperm.xlu0 %7555, %v3261_v13   ;;  %v4154_v14 = vmul.f32 %v9673_v28, %v4079_v54  ;;  %v3586_v63 = vmul.f32 %v9640_v30, %v9695_v16 }
 0x442   : > { %v2960_v15 = vpop.permute.xlu2 %2959  ;;  %v3421_v18 = vadd.f32 %v3398_v4, %v3232_v7 }
 0x443   : > { %v9841_v55 = vpop.permute.xlu1 %3143  ;;  %v3023_v46 = vmul.f32 %v9600_v36, %v2960_v15  ;;  %v3885_v20 = vpop.permute.xlu0 %3884  ;;  %v3450_v15 = vld [vmem:[%s7934_s24 + $0x8f] sm:$0xff] }
 0x444   : > { %v4514_v47 = vld [vmem:[#allocation2 + $0x30] ss:$2 sm:$0xff]  ;;  %v4538_v5 = vld [vmem:[#allocation2 + $0x31] ss:$2 sm:$0xff]  ;;  %v3610_v21 = vadd.f32 %v3587_v17, %v3421_v18  ;;  %v3775_v18 = vmul.f32 %v9653_v51, %v9786_v8 }
 0x445   : > { %v9846_v0 = vadd.f32 %v3023_v46, %v2857_v10  ;;  %v4558_v1 = vmax.f32 %v4514_v47, %v4538_v5  ;;  %v4574_v44 = vld [vmem:[#allocation2 + $0x32] ss:$2 sm:$0xff]  ;;  %v4610_v23 = vld [vmem:[#allocation2 + $0x33] ss:$2 sm:$0xff]  ;;  %v3397_v10 = vmul.f32 %v9633_v24, %v9668_v9 }
 0x446   : > { %v3799_v31 = vadd.f32 %v3776_v6, %v3610_v21  ;;  %v3073_v21 = vld [vmem:[%s7934_s24 + $0x95] sm:$0xff]  ;;  %v12224_v6 = vld [vmem:[#allocation38_spill] sm:$0xff] }
 0x447   : > { %v4594_v41 = vmax.f32 %v4558_v1, %v4574_v44  ;;  %v3420_v16 = vadd.f32 %v3397_v10, %v9572_v42  ;;  %v12225_v8 = vld [vmem:[#allocation28_spill] sm:$0xff] }
 0x448   : > { %2979 = vperm.xlu2 %7557, %v2884_v57   ;;  %2795 = vperm.xlu1 %7556, %v9850_v27  }
 0x449   : > { %4282 = vperm.xlu0 %7555, %v12223_v3   ;;  %v4630_v12 = vmax.f32 %v4594_v41, %v4610_v23  ;;  %v3639_v41 = vld [vmem:[%s7934_s24 + $0x90] sm:$0xff]  ;;  %v3609_v23 = vadd.f32 %v3586_v63, %v3420_v16  ;;  %v3964_v3 = vmul.f32 %v9665_v60, %v3885_v20  ;;  %v12228_v63 = vld [vmem:[#allocation88_spill] sm:$0xff]  ;;  %v12230_v16 = vld [vmem:[#allocation69_spill] sm:$0xff] }
 0x44a   : > { %v4268_v29 = vpop.permute.xlu2 %4267 }
 0x44b   : > { %v4074_v13 = vpop.permute.xlu1 %4073  ;;  %v3890_v37 = vpop.permute.xlu0 %3889  ;;  %4642 = vst.msk [vmem:[#allocation3 + $0x18] sm:$0xff] %vm4483_vm0, %v4630_v12  ;;  %v4343_v46 = vmul.f32 %v9687_v59, %v4268_v29  ;;  %v2885_v12 = vld [vmem:[%s7934_s24 + $0x9c] sm:$0xff]  ;;  %v943_v29 = vmul.f32 %v9477_v25, %v12224_v6  ;;  %v3798_v42 = vadd.f32 %v3775_v18, %v3609_v23  ;;  %v1135_v18 = vmul.f32 %v9502_v38, %v12230_v16 }
 0x44c   : > { %v3965_v56 = vmul.f32 %v9665_v60, %v3890_v37  ;;  %v4153_v37 = vmul.f32 %v9673_v28, %v4074_v13 }
 0x44d   : > { %v3987_v20 = vadd.f32 %v3964_v3, %v3798_v42  ;;  %v12231_v3 = vld [vmem:[#allocation98_spill] sm:$0xff] }
 0x44e   : > { %v3988_v4 = vadd.f32 %v3965_v56, %v3799_v31  ;;  %v754_v31 = vmul.f32 %v9495_v43, %v12225_v8  ;;  %v12226_v56 = vld [vmem:[#allocation67_spill] sm:$0xff] }
 0x450   : > { %v4177_v7 = vadd.f32 %v4154_v14, %v3988_v4  ;;  %4287 = vperm.xlu2 %7557, %v9544_v33   ;;  %3725 = vperm.xlu1 %7556, %v3638_v22   ;;  %v1132_v22 = vmul.f32 %v9502_v38, %v12226_v56 }
 0x451   : > { %3541 = vperm.xlu0 %7555, %v3450_v15   ;;  %v12227_v15 = vld [vmem:[#allocation39_spill] sm:$0xff] }
 0x452   : > { %v4366_v17 = vadd.f32 %v4343_v46, %v4177_v7  ;;  %v9867_v47 = vpop.permute.xlu2 %3710  ;;  %v4666_v5 = vld [vmem:[#allocation3 + $0x11] sm:$0xff]  ;;  %v946_v13 = vmul.f32 %v9477_v25, %v12227_v15  ;;  %v966_v7 = vadd.f32 %v943_v29, %v754_v31 }
 0x453   : > { %v9869_v54 = vpop.permute.xlu1 %3516  ;;  %v4655_v57 = vld [vmem:[#allocation3 + $0x18] sm:$0xff]  ;;  %7309 = vmatmul.msk.f32.gmra.mxu0 %vm4483_vm0, %v4666_v5  ;;  %v9873_v1 = vpop.permute.xlu0 %3332  ;;  %v4176_v5 = vadd.f32 %v4153_v37, %v3987_v20 }
 0x454   : > { %v4840_v9 = vld [vmem:[#allocation3 + $0x12] sm:$0xff]  ;;  %7321 = vmatmul.msk.f32.gmra.mxu1 %vm4483_vm0, %v4655_v57  ;;  %v4393_v44 = vadd.f32 %v9704_v34, %v4366_v17  ;;  %v1321_v17 = vmul.f32 %v9521_v52, %v12228_v63  ;;  %v1155_v23 = vadd.f32 %v1132_v22, %v966_v7  ;;  %v12232_v37 = vld [vmem:[#allocation91_spill] sm:$0xff]  ;;  %v12235_v63 = vld [vmem:[#allocation148_spill] sm:$0xff] }
 0x455   : > { %v4943_v33 = vld [vmem:[#allocation3 + $0x13] sm:$0xff]  ;;  %7333 = vmatmul.msk.f32.gmra.mxu2 %vm4483_vm0, %v4840_v9  ;;  %v1324_v8 = vmul.f32 %v9521_v52, %v12232_v37 }
 0x456   : > { %7346 = vmatmul.msk.f32.gmra.mxu3 %vm4483_vm0, %v4943_v33  ;;  %7605 = vtanh.f32 %v4393_v44  ;;  %v12229_v9 = vld [vmem:[#allocation31_spill] sm:$0xff]  ;;  %v3827_v29 = vld [vmem:[%s7934_s24 + $0x89] sm:$0xff]  ;;  %v1344_v56 = vadd.f32 %v1321_v17, %v1155_v23  ;;  %v1888_v17 = vmul.f32 %v9509_v62, %v12235_v63 }
 0x457   : > { %v757_v33 = vmul.f32 %v9495_v43, %v12229_v9  ;;  %v12233_v20 = vld [vmem:[#allocation127_spill] sm:$0xff] }
 0x458   : > { %3730 = vperm.xlu2 %7557, %v3639_v41   ;;  %3168 = vperm.xlu1 %7556, %v3073_v21   ;;  %v3262_v41 = vld [vmem:[%s7934_s24 + $0x96] sm:$0xff]  ;;  %v1699_v15 = vmul.f32 %v9484_v61, %v12233_v20 }
 0x459   : > { %2984 = vperm.xlu0 %7555, %v2885_v12   ;;  %v3074_v21 = vld [vmem:[%s7934_s24 + $0x9d] sm:$0xff]  ;;  %v1510_v12 = vmul.f32 %v9463_v19, %v12231_v3  ;;  %v969_v42 = vadd.f32 %v946_v13, %v757_v33  ;;  %v12238_v23 = vld [vmem:[#allocation151_spill] sm:$0xff] }
 0x45a   : > { %v9892_v14 = vpop.permute.xlu2 %3337  ;;  %v12236_v33 = vld [vmem:[#allocation129_spill] sm:$0xff]  ;;  %v1891_v3 = vmul.f32 %v9509_v62, %v12238_v23 }
 0x45b   : > { %v9894_v4 = vpop.permute.xlu1 %2775  ;;  %v4263_v10 = vpop.permute.xlu0 %4262  ;;  %v1158_v22 = vadd.f32 %v1135_v18, %v969_v42  ;;  %v1533_v13 = vadd.f32 %v1510_v12, %v1344_v56  ;;  %v1702_v16 = vmul.f32 %v9484_v61, %v12236_v33  ;;  %v9931_v12 = vld [vmem:[%s7934_s24 + $0xa3] sm:$0xff]  ;;  %v12239_v42 = vld [vmem:[#allocation187_spill] sm:$0xff] }
 0x45c   : > { %v7606_v46 = vpop.eup %7605  ;;  %v4342_v57 = vmul.f32 %v9687_v59, %v4263_v10  ;;  %v2266_v37 = vmul.f32 %v9539_v40, %v12239_v42  ;;  %v12240_v56 = vld [vmem:[#allocation159_spill] sm:$0xff] }
 0x45d   : > { %v4443_v44 = vmul.f32 %v9750_v32, %v7606_v46  ;;  %v12234_v46 = vld [vmem:[#allocation99_spill] sm:$0xff]  ;;  %v1347_v9 = vadd.f32 %v1324_v8, %v1158_v22  ;;  %v2080_v61 = vmul.f32 %v9528_v11, %v12240_v56 }
 0x45e   : > { %v4365_v6 = vadd.f32 %v4342_v57, %v4176_v5  ;;  %v1513_v7 = vmul.f32 %v9463_v19, %v12234_v46  ;;  %v12237_v19 = vld [vmem:[#allocation158_spill] sm:$0xff]  ;;  %v12242_v46 = vld [vmem:[#allocation189_spill] sm:$0xff] }
 0x45f   : > { %v4470_v31 = vadd.f32 %v9765_v45, %v4443_v44  ;;  %v1722_v44 = vadd.f32 %v1699_v15, %v1533_v13  ;;  %v3828_v8 = vld [vmem:[%s7934_s24 + $0x91] sm:$0xff] }
 0x460   : > { %v4392_v10 = vadd.f32 %v9704_v34, %v4365_v6  ;;  %3357 = vperm.xlu2 %7557, %v3262_v41   ;;  %3173 = vperm.xlu1 %7556, %v3074_v21   ;;  %v2077_v41 = vmul.f32 %v9528_v11, %v12237_v19  ;;  %v1536_v21 = vadd.f32 %v1513_v7, %v1347_v9  ;;  %v4016_v6 = vld [vmem:[%s7934_s24 + $0x8a] sm:$0xff] }
 0x461   : > { %4494 = vst.msk [vmem:[#allocation2 + $0x50] sm:$0xff] %vm4483_vm0, %v4470_v31  ;;  %3914 = vperm.xlu0 %7555, %v3827_v29   ;;  %v1911_v29 = vadd.f32 %v1888_v17, %v1722_v44  ;;  %v2269_v7 = vmul.f32 %v9539_v40, %v12242_v46  ;;  %v12243_v17 = vld [vmem:[#allocation220_spill] sm:$0xff]  ;;  %v12244_v44 = vld [vmem:[#allocation213_spill] sm:$0xff] }
 0x462   : > { %7607 = vtanh.f32 %v4392_v10  ;;  %v2781_v5 = vpop.permute.xlu2 %2780  ;;  %v1725_v31 = vadd.f32 %v1702_v16, %v1536_v21  ;;  %v12241_v10 = vld [vmem:[#allocation210_spill] sm:$0xff]  ;;  %v2644_v11 = vmul.f32 %v9577_v2, %v12243_v17  ;;  %v2458_v19 = vmul.f32 %v9565_v58, %v12244_v44 }
 0x463   : > { %v9922_v57 = vpop.permute.xlu1 %3705  ;;  %v3522_v18 = vpop.permute.xlu0 %3521  ;;  %v2100_v15 = vadd.f32 %v2077_v41, %v1911_v29  ;;  %v2455_v22 = vmul.f32 %v9565_v58, %v12241_v10  ;;  %v12245_v29 = vld [vmem:[#allocation221_spill] sm:$0xff] }
 0x464   : > { %v1914_v62 = vadd.f32 %v1891_v3, %v1725_v31  ;;  %v2833_v3 = vmul.f32 %v9590_v50, %v9739_v35  ;;  %v2647_v42 = vmul.f32 %v9577_v2, %v12245_v29  ;;  %v3451_v31 = vld [vmem:[%s7934_s24 + $0x97] sm:$0xff]  ;;  %v2836_v35 = vmul.f32 %v9590_v50, %v2781_v5 }
 0x465   : > { %v2289_v63 = vadd.f32 %v2266_v37, %v2100_v15  ;;  %v3401_v37 = vmul.f32 %v9633_v24, %v9892_v14  ;;  %v3211_v14 = vmul.f32 %v9552_v39, %v9841_v55 }
 0x466   : > { %v2103_v16 = vadd.f32 %v2080_v61, %v1914_v62  ;;  %v3022_v61 = vmul.f32 %v9600_v36, %v9822_v48  ;;  %v3400_v48 = vmul.f32 %v9633_v24, %v9873_v1 }
 0x467   : > { %v2478_v23 = vadd.f32 %v2455_v22, %v2289_v63 }
 0x468   : > { %v7608_v20 = vpop.eup %7607  ;;  %2800 = vperm.xlu2 %7557, %v9931_v12   ;;  %4103 = vperm.xlu1 %7556, %v4016_v6   ;;  %v2292_v6 = vadd.f32 %v2269_v7, %v2103_v16 }
 0x469   : > { %v4442_v13 = vmul.f32 %v9750_v32, %v7608_v20  ;;  %3919 = vperm.xlu0 %7555, %v3828_v8   ;;  %v4017_v8 = vld [vmem:[%s7934_s24 + $0x92] sm:$0xff]  ;;  %v2667_v56 = vadd.f32 %v2644_v11, %v2478_v23  ;;  %v3263_v20 = vld [vmem:[%s7934_s24 + $0x9e] sm:$0xff] }
 0x46a   : > { %v4089_v9 = vpop.permute.xlu2 %4088  ;;  %v2481_v15 = vadd.f32 %v2458_v19, %v2292_v6  ;;  %v2886_v11 = vld [vmem:[%s7934_s24 + $0xa4] sm:$0xff] }
 0x46b   : > { %v3149_v33 = vpop.permute.xlu1 %3148  ;;  %v4469_v41 = vadd.f32 %v9765_v45, %v4442_v13  ;;  %v9951_v21 = vpop.permute.xlu0 %2964  ;;  %v2856_v2 = vadd.f32 %v2833_v3, %v2667_v56 }
 0x46c   : > { %v3212_v40 = vmul.f32 %v9552_v39, %v3149_v33  ;;  %v3589_v39 = vmul.f32 %v9640_v30, %v3522_v18  ;;  %v9981_v33 = vld [vmem:[%s7934_s24 + $0xab] sm:$0xff] }
 0x46d   : > { %4493 = vst.msk [vmem:[#allocation2 + $0x48] sm:$0xff] %vm4483_vm0, %v4469_v41  ;;  %v3045_v22 = vadd.f32 %v3022_v61, %v2856_v2 }
 0x46e   : > { %v3235_v58 = vadd.f32 %v3212_v40, %v9846_v0  ;;  %v2670_v0 = vadd.f32 %v2647_v42, %v2481_v15  ;;  %v3778_v40 = vmul.f32 %v9653_v51, %v9867_v47  ;;  %v3588_v47 = vmul.f32 %v9640_v30, %v9869_v54 }
 0x46f   : > { %v3234_v13 = vadd.f32 %v3211_v14, %v3045_v22  ;;  %v3777_v30 = vmul.f32 %v9653_v51, %v9922_v57  ;;  %v3075_v22 = vld [vmem:[%s7934_s24 + $0xa5] sm:$0xff]  ;;  %v12247_v57 = vld [vmem:[#allocation19_spill] sm:$0xff] }
 0x470   : > { %v9967_v10 = vadd.f32 %v3401_v37, %v3235_v58  ;;  %4108 = vperm.xlu2 %7557, %v4017_v8   ;;  %3546 = vperm.xlu1 %7556, %v3451_v31   ;;  %v2859_v50 = vadd.f32 %v2836_v35, %v2670_v0  ;;  %v3640_v37 = vld [vmem:[%s7934_s24 + $0x98] sm:$0xff]  ;;  %v4156_v58 = vmul.f32 %v9673_v28, %v4089_v9  ;;  %v3641_v0 = vld [vmem:[%s7934_s24 + $0xa0] sm:$0xff] }
 0x471   : > { %3362 = vperm.xlu0 %7555, %v3263_v20   ;;  %v3423_v44 = vadd.f32 %v3400_v48, %v3234_v13  ;;  %v3452_v31 = vld [vmem:[%s7934_s24 + $0x9f] sm:$0xff]  ;;  %v3611_v48 = vadd.f32 %v3588_v47, %v9835_v53 }
 0x472   : > { %v2970_v62 = vpop.permute.xlu2 %2969  ;;  %v3829_v47 = vld [vmem:[%s7934_s24 + $0x99] sm:$0xff] }
 0x473   : > { %v9973_v46 = vpop.permute.xlu1 %3153  ;;  %v3025_v5 = vmul.f32 %v9600_v36, %v2970_v62  ;;  %v3895_v7 = vpop.permute.xlu0 %3894  ;;  %v3612_v41 = vadd.f32 %v3589_v39, %v3423_v44  ;;  %v3800_v39 = vadd.f32 %v3777_v30, %v3611_v48 }
 0x474   : > { %v4516_v55 = vld [vmem:[#allocation2 + $0x40] ss:$2 sm:$0xff]  ;;  %v4540_v63 = vld [vmem:[#allocation2 + $0x41] ss:$2 sm:$0xff]  ;;  %v3966_v62 = vmul.f32 %v9665_v60, %v3895_v7 }
 0x475   : > { %v9977_v17 = vadd.f32 %v3025_v5, %v2859_v50  ;;  %v4559_v16 = vmax.f32 %v4516_v55, %v4540_v63  ;;  %v4576_v1 = vld [vmem:[#allocation2 + $0x42] ss:$2 sm:$0xff]  ;;  %v4612_v36 = vld [vmem:[#allocation2 + $0x43] ss:$2 sm:$0xff]  ;;  %v3801_v29 = vadd.f32 %v3778_v40, %v3612_v41  ;;  %v12246_v5 = vld [vmem:[#allocation48_spill] sm:$0xff]  ;;  %v756_v55 = vmul.f32 %v9495_v43, %v12247_v57 }
 0x476   : > { %v2887_v50 = vld [vmem:[%s7934_s24 + $0xac] sm:$0xff]  ;;  %v945_v13 = vmul.f32 %v9477_v25, %v12246_v5  ;;  %v3989_v53 = vadd.f32 %v3966_v62, %v3800_v39  ;;  %v10028_v25 = vld [vmem:[%s12077_s29 + $0x1] ss:$0 sm:$0xff]  ;;  %v12251_v40 = vld [vmem:[#allocation21_spill] sm:$0xff] }
 0x477   : > { %v4595_v19 = vmax.f32 %v4559_v16, %v4576_v1  ;;  %v12248_v63 = vld [vmem:[#allocation70_spill] sm:$0xff]  ;;  %v10082_v39 = vld [vmem:[%s12077_s29 + $0x6] ss:$0 sm:$0xff] }
 0x478   : > { %2989 = vperm.xlu2 %7557, %v2886_v11   ;;  %2805 = vperm.xlu1 %7556, %v9981_v33   ;;  %v1134_v11 = vmul.f32 %v9502_v38, %v12248_v63  ;;  %v968_v1 = vadd.f32 %v945_v13, %v756_v55  ;;  %v12250_v38 = vld [vmem:[#allocation78_spill] sm:$0xff] }
 0x479   : > { %4292 = vperm.xlu0 %7555, %v9646_v26   ;;  %v4631_v18 = vmax.f32 %v4595_v19, %v4612_v36  ;;  %v1323_v19 = vmul.f32 %v9521_v52, %v12250_v38 }
 0x47a   : > { %v4278_v23 = vpop.permute.xlu2 %4277 }
 0x47b   : > { %v4084_v3 = vpop.permute.xlu1 %4083  ;;  %v3900_v6 = vpop.permute.xlu0 %3899  ;;  %4643 = vst.msk [vmem:[#allocation3 + $0x20] sm:$0xff] %vm4483_vm0, %v4631_v18  ;;  %v4345_v56 = vmul.f32 %v9687_v59, %v4278_v23  ;;  %v10038_v18 = vld [vmem:[%s12077_s29] ss:$0 sm:$0xff] }
 0x47c   : > { %v3967_v42 = vmul.f32 %v9665_v60, %v3900_v6  ;;  %v4155_v51 = vmul.f32 %v9673_v28, %v4084_v3  ;;  %v12249_v28 = vld [vmem:[#allocation51_spill] sm:$0xff]  ;;  %v759_v23 = vmul.f32 %v10038_v18, %v12251_v40  ;;  %v10045_v3 = vld [vmem:[%s12077_s29 + $0x2] ss:$0 sm:$0xff] }
 0x47d   : > { %v948_v16 = vmul.f32 %v10028_v25, %v12249_v28  ;;  %v12252_v6 = vld [vmem:[#allocation73_spill] sm:$0xff]  ;;  %v10102_v40 = vld [vmem:[%s7934_s24 + $0xb3] sm:$0xff] }
 0x47e   : > { %v3990_v8 = vadd.f32 %v3967_v42, %v3801_v29  ;;  %v4178_v41 = vadd.f32 %v4155_v51, %v3989_v53  ;;  %v1137_v29 = vmul.f32 %v10045_v3, %v12252_v6  ;;  %v3264_v42 = vld [vmem:[%s7934_s24 + $0xa6] sm:$0xff] }
 0x47f   : > { %v12257_v51 = vld [vmem:[#allocation138_spill] sm:$0xff]  ;;  %v12258_v53 = vld [vmem:[#allocation133_spill] sm:$0xff] }
 0x480   : > { %v4179_v26 = vadd.f32 %v4156_v58, %v3990_v8  ;;  %4297 = vperm.xlu2 %7557, %v9800_v49   ;;  %3735 = vperm.xlu1 %7556, %v3640_v37   ;;  %v3076_v37 = vld [vmem:[%s7934_s24 + $0xad] sm:$0xff]  ;;  %v1157_v58 = vadd.f32 %v1134_v11, %v968_v1  ;;  %v10055_v8 = vld [vmem:[%s12077_s29 + $0x4] ss:$0 sm:$0xff]  ;;  %v1890_v57 = vmul.f32 %v10082_v39, %v12257_v51  ;;  %v12259_v1 = vld [vmem:[#allocation168_spill] sm:$0xff] }
 0x481   : > { %3551 = vperm.xlu0 %7555, %v3452_v31   ;;  %v12253_v31 = vld [vmem:[#allocation108_spill] sm:$0xff] }
 0x482   : > { %v4368_v61 = vadd.f32 %v4345_v56, %v4179_v26  ;;  %v9996_v20 = vpop.permute.xlu2 %3720  ;;  %v4667_v9 = vld [vmem:[#allocation3 + $0x19] sm:$0xff]  ;;  %v1512_v56 = vmul.f32 %v10055_v8, %v12253_v31  ;;  %v1346_v30 = vadd.f32 %v1323_v19, %v1157_v58 }
 0x483   : > { %v9998_v15 = vpop.permute.xlu1 %3526  ;;  %v4656_v35 = vld [vmem:[#allocation3 + $0x20] sm:$0xff]  ;;  %7310 = vmatmul.msk.f32.gmra.mxu0 %vm4483_vm0, %v4667_v9  ;;  %v10002_v14 = vpop.permute.xlu0 %3342  ;;  %v10063_v9 = vld [vmem:[%s12077_s29 + $0x3] ss:$0 sm:$0xff] }
 0x484   : > { %v4841_v2 = vld [vmem:[#allocation3 + $0x1a] sm:$0xff]  ;;  %7322 = vmatmul.msk.f32.gmra.mxu1 %vm4483_vm0, %v4656_v35  ;;  %v4395_v54 = vadd.f32 %v9704_v34, %v4368_v61  ;;  %v971_v61 = vadd.f32 %v948_v16, %v759_v23  ;;  %v12254_v35 = vld [vmem:[#allocation81_spill] sm:$0xff]  ;;  %v1535_v13 = vadd.f32 %v1512_v56, %v1346_v30  ;;  %v4018_v23 = vld [vmem:[%s7934_s24 + $0x9a] sm:$0xff] }
 0x485   : > { %v4944_v49 = vld [vmem:[#allocation3 + $0x1b] sm:$0xff]  ;;  %7334 = vmatmul.msk.f32.gmra.mxu2 %vm4483_vm0, %v4841_v2  ;;  %v1326_v2 = vmul.f32 %v10063_v9, %v12254_v35  ;;  %v12263_v35 = vld [vmem:[#allocation198_spill] sm:$0xff]  ;;  %v12264_v30 = vld [vmem:[#allocation193_spill] sm:$0xff] }
 0x486   : > { %7347 = vmatmul.msk.f32.gmra.mxu3 %vm4483_vm0, %v4944_v49  ;;  %7609 = vtanh.f32 %v4395_v54  ;;  %v10071_v54 = vld [vmem:[%s12077_s29 + $0x5] ss:$0 sm:$0xff]  ;;  %v1160_v62 = vadd.f32 %v1137_v29, %v971_v61  ;;  %v10108_v29 = vld [vmem:[%s12077_s29 + $0x8] ss:$0 sm:$0xff]  ;;  %v12262_v31 = vld [vmem:[#allocation171_spill] sm:$0xff] }
 0x487   : > { %v1704_v28 = vmul.f32 %v10071_v54, %v12258_v53  ;;  %v10118_v61 = vld [vmem:[%s12077_s29 + $0x9] ss:$0 sm:$0xff] }
 0x488   : > { %3740 = vperm.xlu2 %7557, %v3641_v0   ;;  %3178 = vperm.xlu1 %7556, %v3075_v22   ;;  %v12255_v0 = vld [vmem:[#allocation130_spill] sm:$0xff]  ;;  %v1349_v11 = vadd.f32 %v1326_v2, %v1160_v62  ;;  %v2457_v2 = vmul.f32 %v10118_v61, %v12263_v35 }
 0x489   : > { %2994 = vperm.xlu0 %7555, %v2887_v50   ;;  %v1701_v22 = vmul.f32 %v10071_v54, %v12255_v0  ;;  %v12256_v50 = vld [vmem:[#allocation111_spill] sm:$0xff]  ;;  %v2271_v0 = vmul.f32 %v10108_v29, %v12264_v30  ;;  %v10129_v62 = vld [vmem:[%s12077_s29 + $0xa] ss:$0 sm:$0xff] }
 0x48a   : > { %v10021_v60 = vpop.permute.xlu2 %3347  ;;  %v1515_v5 = vmul.f32 %v10055_v8, %v12256_v50  ;;  %v12265_v50 = vld [vmem:[#allocation230_spill] sm:$0xff] }
 0x48b   : > { %v10023_v7 = vpop.permute.xlu1 %2785  ;;  %v4273_v44 = vpop.permute.xlu0 %4272 }
 0x48c   : > { %v7610_v43 = vpop.eup %7609  ;;  %v4344_v36 = vmul.f32 %v9687_v59, %v4273_v44  ;;  %v1724_v44 = vadd.f32 %v1701_v22, %v1535_v13  ;;  %v1538_v19 = vadd.f32 %v1515_v5, %v1349_v11  ;;  %v2646_v5 = vmul.f32 %v10129_v62, %v12265_v50  ;;  %v12266_v11 = vld [vmem:[#allocation201_spill] sm:$0xff] }
 0x48d   : > { %v4445_v52 = vmul.f32 %v9750_v32, %v7610_v43  ;;  %v10095_v43 = vld [vmem:[%s12077_s29 + $0x7] ss:$0 sm:$0xff]  ;;  %v2460_v53 = vmul.f32 %v10118_v61, %v12266_v11 }
 0x48e   : > { %v4367_v26 = vadd.f32 %v4344_v36, %v4178_v41  ;;  %v2079_v38 = vmul.f32 %v10095_v43, %v12259_v1  ;;  %v12260_v41 = vld [vmem:[#allocation141_spill] sm:$0xff]  ;;  %v1913_v6 = vadd.f32 %v1890_v57, %v1724_v44  ;;  %v1727_v58 = vadd.f32 %v1704_v28, %v1538_v19  ;;  %v10141_v44 = vld [vmem:[%s12077_s29 + $0xd] ss:$0 sm:$0xff] }
 0x48f   : > { %v4472_v49 = vadd.f32 %v9765_v45, %v4445_v52  ;;  %v1893_v36 = vmul.f32 %v10082_v39, %v12260_v41  ;;  %v12261_v52 = vld [vmem:[#allocation190_spill] sm:$0xff]  ;;  %v2082_v56 = vmul.f32 %v10095_v43, %v12262_v31 }
 0x490   : > { %v4394_v48 = vadd.f32 %v9704_v34, %v4367_v26  ;;  %3367 = vperm.xlu2 %7557, %v3264_v42   ;;  %3183 = vperm.xlu1 %7556, %v3076_v37   ;;  %v2268_v42 = vmul.f32 %v10108_v29, %v12261_v52  ;;  %v3830_v37 = vld [vmem:[%s7934_s24 + $0xa1] sm:$0xff]  ;;  %v10149_v41 = vld [vmem:[%s12077_s29 + $0xb] ss:$0 sm:$0xff] }
 0x491   : > { %4496 = vst.msk [vmem:[#allocation2 + $0x60] sm:$0xff] %vm4483_vm0, %v4472_v49  ;;  %3924 = vperm.xlu0 %7555, %v3829_v47   ;;  %v2102_v47 = vadd.f32 %v2079_v38, %v1913_v6  ;;  %v1916_v49 = vadd.f32 %v1893_v36, %v1727_v58  ;;  %v2835_v36 = vmul.f32 %v10149_v41, %v9894_v4  ;;  %v12267_v6 = vld [vmem:[#allocation233_spill] sm:$0xff] }
 0x492   : > { %7611 = vtanh.f32 %v4394_v48  ;;  %v2791_v55 = vpop.permute.xlu2 %2790  ;;  %v2649_v52 = vmul.f32 %v10129_v62, %v12267_v6  ;;  %v4019_v58 = vld [vmem:[%s7934_s24 + $0xa2] sm:$0xff] }
 0x493   : > { %v10086_v63 = vpop.permute.xlu1 %3715  ;;  %v10090_v16 = vpop.permute.xlu0 %3531  ;;  %v2291_v48 = vadd.f32 %v2268_v42, %v2102_v47  ;;  %v2105_v57 = vadd.f32 %v2082_v56, %v1916_v49  ;;  %v3403_v42 = vmul.f32 %v9633_v24, %v10021_v60  ;;  %v3453_v31 = vld [vmem:[%s7934_s24 + $0xa7] sm:$0xff] }
 0x494   : > { %v3265_v47 = vld [vmem:[%s7934_s24 + $0xae] sm:$0xff] }
 0x495   : > { %v2480_v19 = vadd.f32 %v2457_v2, %v2291_v48  ;;  %v2838_v2 = vmul.f32 %v10149_v41, %v2791_v55 }
 0x497   : > { %v2669_v56 = vadd.f32 %v2646_v5, %v2480_v19 }
 0x498   : > { %v7612_v26 = vpop.eup %7611  ;;  %2810 = vperm.xlu2 %7557, %v10102_v40   ;;  %4113 = vperm.xlu1 %7556, %v4018_v23   ;;  %v2294_v23 = vadd.f32 %v2271_v0, %v2105_v57 }
 0x499   : > { %v4444_v22 = vmul.f32 %v9750_v32, %v7612_v26  ;;  %3929 = vperm.xlu0 %7555, %v3830_v37   ;;  %v10164_v26 = vld [vmem:[%s12077_s29 + $0xc] ss:$0 sm:$0xff]  ;;  %v2858_v49 = vadd.f32 %v2835_v36, %v2669_v56 }
 0x49a   : > { %v10133_v13 = vpop.permute.xlu2 %4098  ;;  %v3024_v4 = vmul.f32 %v10164_v26, %v9951_v21  ;;  %v2483_v35 = vadd.f32 %v2460_v53, %v2294_v23  ;;  %v3402_v21 = vmul.f32 %v9633_v24, %v10002_v14  ;;  %v2888_v24 = vld [vmem:[%s7934_s24 + $0xb4] sm:$0xff] }
 0x49b   : > { %v3159_v51 = vpop.permute.xlu1 %3158  ;;  %v4471_v28 = vadd.f32 %v9765_v45, %v4444_v22  ;;  %v10144_v38 = vpop.permute.xlu0 %2974  ;;  %v2700_v14 = vld [vmem:[%s7934_s24 + $0xbb] sm:$0x1f] }
 0x49c   : > { %v3214_v1 = vmul.f32 %v10141_v44, %v3159_v51  ;;  %v2672_v30 = vadd.f32 %v2649_v52, %v2483_v35  ;;  %v3047_v0 = vadd.f32 %v3024_v4, %v2858_v49  ;;  %v3642_v35 = vld [vmem:[%s7934_s24 + $0xa8] sm:$0xff] }
 0x49d   : > { %4495 = vst.msk [vmem:[#allocation2 + $0x58] sm:$0xff] %vm4483_vm0, %v4471_v28 }
 0x49e   : > { %v3237_v37 = vadd.f32 %v3214_v1, %v9977_v17  ;;  %v3213_v17 = vmul.f32 %v10141_v44, %v9973_v46  ;;  %v2861_v55 = vadd.f32 %v2838_v2, %v2672_v30  ;;  %v10182_v46 = vld [vmem:[%s12077_s29 + $0xf] ss:$0 sm:$0xff]  ;;  %v10209_v2 = vld [vmem:[%s12077_s29 + $0x12] ss:$0 sm:$0xff] }
 0x49f   : > { %v3591_v57 = vmul.f32 %v10182_v46, %v10090_v16  ;;  %v10194_v16 = vld [vmem:[%s12077_s29 + $0x10] ss:$0 sm:$0xff] }
 0x4a0   : > { %v10170_v60 = vadd.f32 %v3403_v42, %v3237_v37  ;;  %4118 = vperm.xlu2 %7557, %v4019_v58   ;;  %3556 = vperm.xlu1 %7556, %v3453_v31   ;;  %v3236_v51 = vadd.f32 %v3213_v17, %v3047_v0  ;;  %v3780_v37 = vmul.f32 %v10194_v16, %v9996_v20  ;;  %v3454_v17 = vld [vmem:[%s7934_s24 + $0xaf] sm:$0xff] }
 0x4a1   : > { %3372 = vperm.xlu0 %7555, %v3265_v47   ;;  %v10202_v47 = vld [vmem:[%s12077_s29 + $0x11] ss:$0 sm:$0xff]  ;;  %v4158_v20 = vmul.f32 %v10209_v2, %v10133_v13 }
 0x4a2   : > { %v2980_v22 = vpop.permute.xlu2 %2979  ;;  %v3425_v19 = vadd.f32 %v3402_v21, %v3236_v51  ;;  %v3590_v21 = vmul.f32 %v10182_v46, %v9998_v15  ;;  %v3779_v15 = vmul.f32 %v10194_v16, %v10086_v63 }
 0x4a3   : > { %v10176_v48 = vpop.permute.xlu1 %3163  ;;  %v3027_v50 = vmul.f32 %v10164_v26, %v2980_v22  ;;  %v3905_v5 = vpop.permute.xlu0 %3904 }
 0x4a4   : > { %v4518_v11 = vld [vmem:[#allocation2 + $0x50] ss:$2 sm:$0xff]  ;;  %v4542_v53 = vld [vmem:[#allocation2 + $0x51] ss:$2 sm:$0xff]  ;;  %v3614_v6 = vadd.f32 %v3591_v57, %v3425_v19 }
 0x4a5   : > { %v10186_v28 = vadd.f32 %v3027_v50, %v2861_v55  ;;  %v4560_v1 = vmax.f32 %v4518_v11, %v4542_v53  ;;  %v4578_v36 = vld [vmem:[#allocation2 + $0x52] ss:$2 sm:$0xff]  ;;  %v4614_v52 = vld [vmem:[#allocation2 + $0x53] ss:$2 sm:$0xff] }
 0x4a6   : > { %v3803_v4 = vadd.f32 %v3780_v37, %v3614_v6  ;;  %v3643_v53 = vld [vmem:[%s7934_s24 + $0xb0] sm:$0xff]  ;;  %v2889_v19 = vld [vmem:[%s7934_s24 + $0xbc] sm:$0x1f] }
 0x4a7   : > { %v4596_v23 = vmax.f32 %v4560_v1, %v4578_v36  ;;  %v3968_v1 = vmul.f32 %v10202_v47, %v3905_v5  ;;  %v12268_v36 = vld [vmem:[#allocation52_spill] sm:$0xff] }
 0x4a8   : > { %2999 = vperm.xlu2 %7557, %v2888_v24   ;;  %2815 = vperm.xlu1 %7556, %v2700_v14   ;;  %v3077_v24 = vld [vmem:[%s7934_s24 + $0xb5] sm:$0xff]  ;;  %v3613_v14 = vadd.f32 %v3590_v21, %v9967_v10  ;;  %v12273_v21 = vld [vmem:[#allocation33_spill] sm:$0xff] }
 0x4a9   : > { %4302 = vperm.xlu0 %7555, %v9850_v27   ;;  %v4632_v42 = vmax.f32 %v4596_v23, %v4614_v52  ;;  %v947_v23 = vmul.f32 %v10028_v25, %v12268_v36  ;;  %v12276_v36 = vld [vmem:[#allocation93_spill] sm:$0xff] }
 0x4aa   : > { %v4288_v58 = vpop.permute.xlu2 %4287  ;;  %v3802_v6 = vadd.f32 %v3779_v15, %v3613_v14  ;;  %v3078_v15 = vld [vmem:[%s7934_s24 + $0xbd] sm:$0x1f] }
 0x4ab   : > { %v4094_v31 = vpop.permute.xlu1 %4093  ;;  %v3910_v56 = vpop.permute.xlu0 %3909  ;;  %4644 = vst.msk [vmem:[#allocation3 + $0x28] sm:$0xff] %vm4483_vm0, %v4632_v42  ;;  %v4347_v30 = vmul.f32 %v9687_v59, %v4288_v58  ;;  %v12270_v42 = vld [vmem:[#allocation60_spill] sm:$0xff] }
 0x4ac   : > { %v3969_v27 = vmul.f32 %v10202_v47, %v3910_v56  ;;  %v4157_v63 = vmul.f32 %v10209_v2, %v4094_v31  ;;  %v1136_v10 = vmul.f32 %v10045_v3, %v12270_v42  ;;  %v3991_v5 = vadd.f32 %v3968_v1, %v3802_v6  ;;  %v12271_v56 = vld [vmem:[#allocation55_spill] sm:$0xff]  ;;  %v3831_v1 = vld [vmem:[%s7934_s24 + $0xa9] sm:$0xff] }
 0x4ae   : > { %v3992_v49 = vadd.f32 %v3969_v27, %v3803_v4  ;;  %v950_v4 = vmul.f32 %v10028_v25, %v12271_v56 }
 0x4b0   : > { %v4181_v0 = vadd.f32 %v4158_v20, %v3992_v49  ;;  %4307 = vperm.xlu2 %7557, %v9931_v12   ;;  %3745 = vperm.xlu1 %7556, %v3642_v35   ;;  %v12272_v20 = vld [vmem:[#allocation90_spill] sm:$0xff] }
 0x4b1   : > { %3561 = vperm.xlu0 %7555, %v3454_v17   ;;  %v1325_v49 = vmul.f32 %v10063_v9, %v12272_v20  ;;  %v4180_v17 = vadd.f32 %v4157_v63, %v3991_v5  ;;  %v12278_v5 = vld [vmem:[#allocation115_spill] sm:$0xff] }
 0x4b2   : > { %v4370_v22 = vadd.f32 %v4347_v30, %v4181_v0  ;;  %v10218_v55 = vpop.permute.xlu2 %3730  ;;  %v4668_v13 = vld [vmem:[#allocation3 + $0x21] sm:$0xff]  ;;  %v10254_v30 = vld [vmem:[%s12077_s29 + $0x13] ss:$0 sm:$0xff]  ;;  %v1517_v56 = vmul.f32 %v10055_v8, %v12278_v5 }
 0x4b3   : > { %v10220_v50 = vpop.permute.xlu1 %3536  ;;  %v4657_v51 = vld [vmem:[#allocation3 + $0x28] sm:$0xff]  ;;  %7311 = vmatmul.msk.f32.gmra.mxu0 %vm4483_vm0, %v4668_v13  ;;  %v10224_v12 = vpop.permute.xlu0 %3352  ;;  %v12274_v13 = vld [vmem:[#allocation63_spill] sm:$0xff] }
 0x4b4   : > { %v4842_v57 = vld [vmem:[#allocation3 + $0x22] sm:$0xff]  ;;  %7323 = vmatmul.msk.f32.gmra.mxu1 %vm4483_vm0, %v4657_v51  ;;  %v4397_v11 = vadd.f32 %v9704_v34, %v4370_v22  ;;  %v12269_v34 = vld [vmem:[#allocation30_spill] sm:$0xff]  ;;  %v761_v22 = vmul.f32 %v10038_v18, %v12273_v21  ;;  %v1139_v51 = vmul.f32 %v10045_v3, %v12274_v13 }
 0x4b5   : > { %v4945_v59 = vld [vmem:[#allocation3 + $0x23] sm:$0xff]  ;;  %7335 = vmatmul.msk.f32.gmra.mxu2 %vm4483_vm0, %v4842_v57  ;;  %v758_v52 = vmul.f32 %v10038_v18, %v12269_v34 }
 0x4b6   : > { %7348 = vmatmul.msk.f32.gmra.mxu3 %vm4483_vm0, %v4945_v59  ;;  %7613 = vtanh.f32 %v4397_v11  ;;  %v3266_v59 = vld [vmem:[%s7934_s24 + $0xb6] sm:$0xff] }
 0x4b7   : > { %v970_v35 = vadd.f32 %v947_v23, %v758_v52  ;;  %v1328_v23 = vmul.f32 %v10063_v9, %v12276_v36  ;;  %v12277_v34 = vld [vmem:[#allocation120_spill] sm:$0xff]  ;;  %v12284_v36 = vld [vmem:[#allocation175_spill] sm:$0xff] }
 0x4b8   : > { %3750 = vperm.xlu2 %7557, %v3643_v53   ;;  %3188 = vperm.xlu1 %7556, %v3077_v24   ;;  %v12275_v53 = vld [vmem:[#allocation112_spill] sm:$0xff]  ;;  %v1703_v52 = vmul.f32 %v10071_v54, %v12277_v34 }
 0x4b9   : > { %3004 = vperm.xlu0 %7555, %v2889_v19   ;;  %v1159_v11 = vadd.f32 %v1136_v10, %v970_v35  ;;  %v1514_v24 = vmul.f32 %v10055_v8, %v12275_v53  ;;  %v973_v19 = vadd.f32 %v950_v4, %v761_v22  ;;  %v12279_v4 = vld [vmem:[#allocation150_spill] sm:$0xff]  ;;  %v12281_v22 = vld [vmem:[#allocation172_spill] sm:$0xff] }
 0x4ba   : > { %v10243_v37 = vpop.permute.xlu2 %3357  ;;  %v2081_v13 = vmul.f32 %v10095_v43, %v12281_v22  ;;  %v12285_v34 = vld [vmem:[#allocation212_spill] sm:$0xff]  ;;  %v12288_v22 = vld [vmem:[#allocation215_spill] sm:$0xff] }
 0x4bb   : > { %v10245_v58 = vpop.permute.xlu1 %2795  ;;  %v4283_v31 = vpop.permute.xlu0 %4282  ;;  %v1348_v63 = vadd.f32 %v1325_v49, %v1159_v11  ;;  %v1162_v10 = vadd.f32 %v1139_v51, %v973_v19  ;;  %v12280_v49 = vld [vmem:[#allocation123_spill] sm:$0xff]  ;;  %v4020_v11 = vld [vmem:[%s7934_s24 + $0xaa] sm:$0xff] }
 0x4bc   : > { %v7614_v27 = vpop.eup %7613  ;;  %v4346_v0 = vmul.f32 %v10254_v30, %v4283_v31  ;;  %v1892_v31 = vmul.f32 %v10082_v39, %v12279_v4 }
 0x4bd   : > { %v4447_v57 = vmul.f32 %v9750_v32, %v7614_v27  ;;  %v10275_v32 = vld [vmem:[%s12083_s27] ss:$0 sm:$0xff]  ;;  %v1351_v20 = vadd.f32 %v1328_v23, %v1162_v10  ;;  %v2084_v23 = vmul.f32 %v10095_v43, %v12284_v36  ;;  %v12286_v10 = vld [vmem:[#allocation183_spill] sm:$0xff] }
 0x4be   : > { %v4369_v14 = vadd.f32 %v4346_v0, %v4180_v17  ;;  %v1706_v17 = vmul.f32 %v10071_v54, %v12280_v49  ;;  %v2273_v5 = vmul.f32 %v10108_v29, %v12286_v10 }
 0x4bf   : > { %v4474_v6 = vadd.f32 %v9765_v45, %v4447_v57  ;;  %v1537_v45 = vadd.f32 %v1514_v24, %v1348_v63  ;;  %v1540_v51 = vadd.f32 %v1517_v56, %v1351_v20  ;;  %v12282_v57 = vld [vmem:[#allocation153_spill] sm:$0xff]  ;;  %v12283_v24 = vld [vmem:[#allocation180_spill] sm:$0xff] }
 0x4c0   : > { %v4396_v42 = vadd.f32 %v10275_v32, %v4369_v14  ;;  %3377 = vperm.xlu2 %7557, %v3266_v59   ;;  %3193 = vperm.xlu1 %7556, %v3078_v15   ;;  %v1895_v59 = vmul.f32 %v10082_v39, %v12282_v57  ;;  %v3267_v15 = vld [vmem:[%s7934_s24 + $0xbe] sm:$0x1f]  ;;  %v2270_v14 = vmul.f32 %v10108_v29, %v12283_v24 }
 0x4c1   : > { %4498 = vst.msk [vmem:[#allocation2 + $0x70] sm:$0xff] %vm4483_vm0, %v4474_v6  ;;  %3934 = vperm.xlu0 %7555, %v3831_v1   ;;  %v1726_v21 = vadd.f32 %v1703_v52, %v1537_v45  ;;  %v3832_v1 = vld [vmem:[%s7934_s24 + $0xb1] sm:$0xff]  ;;  %v1729_v19 = vadd.f32 %v1706_v17, %v1540_v51  ;;  %v2459_v52 = vmul.f32 %v10118_v61, %v12285_v34  ;;  %v10305_v56 = vld [vmem:[%s12084_s23] ss:$0 sm:$0xff] }
 0x4c2   : > { %7615 = vtanh.f32 %v4396_v42  ;;  %v2801_v27 = vpop.permute.xlu2 %2800  ;;  %v10315_v51 = vld [vmem:[%s12085_s4] ss:$0 sm:$0xff]  ;;  %v3455_v34 = vld [vmem:[%s7934_s24 + $0xb7] sm:$0xff] }
 0x4c3   : > { %v10283_v35 = vpop.permute.xlu1 %3725  ;;  %v3542_v0 = vpop.permute.xlu0 %3541  ;;  %v1915_v53 = vadd.f32 %v1892_v31, %v1726_v21  ;;  %v1918_v42 = vadd.f32 %v1895_v59, %v1729_v19  ;;  %v12287_v31 = vld [vmem:[#allocation234_spill] sm:$0xff] }
 0x4c4   : > { %v2648_v20 = vmul.f32 %v10129_v62, %v12287_v31  ;;  %v10328_v19 = vld [vmem:[%s12077_s29 + $0xe] ss:$0 sm:$0xff] }
 0x4c5   : > { %v2104_v63 = vadd.f32 %v2081_v13, %v1915_v53  ;;  %v2107_v21 = vadd.f32 %v2084_v23, %v1918_v42  ;;  %v2462_v13 = vmul.f32 %v10118_v61, %v12288_v22  ;;  %v2837_v53 = vmul.f32 %v10149_v41, %v10023_v7 }
 0x4c6   : > { %v3405_v36 = vmul.f32 %v10328_v19, %v10243_v37  ;;  %v3026_v7 = vmul.f32 %v10164_v26, %v10144_v38  ;;  %v2840_v42 = vmul.f32 %v10149_v41, %v2801_v27  ;;  %v3404_v38 = vmul.f32 %v10328_v19, %v10224_v12 }
 0x4c7   : > { %v2293_v4 = vadd.f32 %v2270_v14, %v2104_v63  ;;  %v2296_v24 = vadd.f32 %v2273_v5, %v2107_v21  ;;  %v12289_v14 = vld [vmem:[#allocation237_spill] sm:$0xff] }
 0x4c8   : > { %v7616_v6 = vpop.eup %7615  ;;  %3382 = vperm.xlu2 %7557, %v3267_v15   ;;  %4123 = vperm.xlu1 %7556, %v4020_v11  }
 0x4c9   : > { %v4446_v45 = vmul.f32 %v10305_v56, %v7616_v6  ;;  %3939 = vperm.xlu0 %7555, %v3832_v1   ;;  %v2482_v11 = vadd.f32 %v2459_v52, %v2293_v4  ;;  %v2651_v1 = vmul.f32 %v10129_v62, %v12289_v14  ;;  %v4021_v6 = vld [vmem:[%s7934_s24 + $0xb2] sm:$0xff]  ;;  %v2485_v52 = vadd.f32 %v2462_v13, %v2296_v24 }
 0x4ca   : > { %v4109_v49 = vpop.permute.xlu2 %4108 }
 0x4cb   : > { %v3169_v17 = vpop.permute.xlu1 %3168  ;;  %v4473_v57 = vadd.f32 %v10315_v51, %v4446_v45  ;;  %v10319_v15 = vpop.permute.xlu0 %2984  ;;  %v2671_v63 = vadd.f32 %v2648_v20, %v2482_v11  ;;  %v3215_v45 = vmul.f32 %v10141_v44, %v10176_v48  ;;  %v3593_v48 = vmul.f32 %v10182_v46, %v3542_v0 }
 0x4cc   : > { %v3216_v59 = vmul.f32 %v10141_v44, %v3169_v17 }
 0x4cd   : > { %4497 = vst.msk [vmem:[#allocation2 + $0x68] sm:$0xff] %vm4483_vm0, %v4473_v57  ;;  %v2860_v5 = vadd.f32 %v2837_v53, %v2671_v63  ;;  %v3644_v57 = vld [vmem:[%s7934_s24 + $0xb8] sm:$0xff] }
 0x4ce   : > { %v3239_v23 = vadd.f32 %v3216_v59, %v10186_v28  ;;  %v2674_v28 = vadd.f32 %v2651_v1, %v2485_v52  ;;  %v3456_v53 = vld [vmem:[%s7934_s24 + $0xbf] sm:$0x1f] }
 0x4cf   : > { %v3049_v37 = vadd.f32 %v3026_v7, %v2860_v5  ;;  %v3834_v52 = vld [vmem:[%s7934_s24 + $0xc1] sm:$0x1f] }
 0x4d0   : > { %v10339_v10 = vadd.f32 %v3405_v36, %v3239_v23  ;;  %4312 = vperm.xlu2 %7557, %v9981_v33   ;;  %4128 = vperm.xlu1 %7556, %v4021_v6   ;;  %v2863_v27 = vadd.f32 %v2840_v42, %v2674_v28  ;;  %v3782_v36 = vmul.f32 %v10194_v16, %v10218_v55  ;;  %v3833_v42 = vld [vmem:[%s7934_s24 + $0xb9] sm:$0xff] }
 0x4d1   : > { %3566 = vperm.xlu0 %7555, %v3455_v34   ;;  %v3238_v21 = vadd.f32 %v3215_v45, %v3049_v37  ;;  %v3645_v45 = vld [vmem:[%s7934_s24 + $0xc0] sm:$0x1f]  ;;  %v3592_v55 = vmul.f32 %v10182_v46, %v10220_v50  ;;  %v3781_v50 = vmul.f32 %v10194_v16, %v10283_v35 }
 0x4d2   : > { %v2990_v4 = vpop.permute.xlu2 %2989 }
 0x4d3   : > { %v10346_v31 = vpop.permute.xlu1 %3173  ;;  %v3029_v20 = vmul.f32 %v10164_v26, %v2990_v4  ;;  %v3915_v17 = vpop.permute.xlu0 %3914  ;;  %v3427_v11 = vadd.f32 %v3404_v38, %v3238_v21 }
 0x4d4   : > { %v4520_v33 = vld [vmem:[#allocation2 + $0x60] ss:$2 sm:$0xff]  ;;  %v4544_v22 = vld [vmem:[#allocation2 + $0x61] ss:$2 sm:$0xff] }
 0x4d5   : > { %v10350_v13 = vadd.f32 %v3029_v20, %v2863_v27  ;;  %v4561_v59 = vmax.f32 %v4520_v33, %v4544_v22  ;;  %v4580_v12 = vld [vmem:[#allocation2 + $0x62] ss:$2 sm:$0xff]  ;;  %v3616_v14 = vadd.f32 %v3593_v48, %v3427_v11  ;;  %v4616_v1 = vld [vmem:[#allocation2 + $0x63] ss:$2 sm:$0xff]  ;;  %v3615_v11 = vadd.f32 %v3592_v55, %v10170_v60 }
 0x4d6   : > { %v12295_v55 = vld [vmem:[#allocation37_spill] sm:$0xff] }
 0x4d7   : > { %v4597_v24 = vmax.f32 %v4561_v59, %v4580_v12  ;;  %v3805_v7 = vadd.f32 %v3782_v36, %v3616_v14  ;;  %v4023_v59 = vld [vmem:[%s7934_s24 + $0xc2] sm:$0x1f]  ;;  %v4022_v12 = vld [vmem:[%s7934_s24 + $0xba] sm:$0xff] }
 0x4d8   : > { %4317 = vperm.xlu2 %7557, %v10102_v40   ;;  %3755 = vperm.xlu1 %7556, %v3644_v57   ;;  %v4160_v40 = vmul.f32 %v10209_v2, %v4109_v49  ;;  %v4211_v57 = vld [vmem:[%s7934_s24 + $0xbb] sm:$0xff] }
 0x4d9   : > { %3571 = vperm.xlu0 %7555, %v3456_v53   ;;  %v4633_v0 = vmax.f32 %v4597_v24, %v4616_v1  ;;  %v3970_v53 = vmul.f32 %v10202_v47, %v3915_v17  ;;  %v12290_v24 = vld [vmem:[#allocation42_spill] sm:$0xff]  ;;  %v3804_v1 = vadd.f32 %v3781_v50, %v3615_v11  ;;  %v4212_v11 = vld [vmem:[%s7934_s24 + $0xc3] sm:$0x1f] }
 0x4da   : > { %v4298_v23 = vpop.permute.xlu2 %4297  ;;  %v949_v14 = vmul.f32 %v10028_v25, %v12290_v24 }
 0x4db   : > { %v4104_v6 = vpop.permute.xlu1 %4103  ;;  %v3920_v63 = vpop.permute.xlu0 %3919  ;;  %4645 = vst.msk [vmem:[#allocation3 + $0x30] sm:$0xff] %vm4483_vm0, %v4633_v0  ;;  %v4349_v28 = vmul.f32 %v10254_v30, %v4298_v23  ;;  %v12291_v0 = vld [vmem:[#allocation34_spill] sm:$0xff]  ;;  %v12292_v23 = vld [vmem:[#allocation72_spill] sm:$0xff]  ;;  %v3993_v60 = vadd.f32 %v3970_v53, %v3804_v1 }
 0x4dc   : > { %v3971_v34 = vmul.f32 %v10202_v47, %v3920_v63  ;;  %v4159_v35 = vmul.f32 %v10209_v2, %v4104_v6  ;;  %v760_v36 = vmul.f32 %v10038_v18, %v12291_v0  ;;  %v1138_v63 = vmul.f32 %v10045_v3, %v12292_v23 }
 0x4de   : > { %v3994_v5 = vadd.f32 %v3971_v34, %v3805_v7  ;;  %v12293_v34 = vld [vmem:[#allocation45_spill] sm:$0xff]  ;;  %v972_v6 = vadd.f32 %v949_v14, %v760_v36 }
 0x4e0   : > { %v4183_v37 = vadd.f32 %v4160_v40, %v3994_v5  ;;  %3949 = vperm.xlu2 %7557, %v3834_v52   ;;  %3944 = vperm.xlu1 %7556, %v3833_v42   ;;  %v952_v52 = vmul.f32 %v10028_v25, %v12293_v34  ;;  %v12294_v5 = vld [vmem:[#allocation94_spill] sm:$0xff]  ;;  %v1161_v50 = vadd.f32 %v1138_v63, %v972_v6 }
 0x4e1   : > { %3760 = vperm.xlu0 %7555, %v3645_v45   ;;  %v1327_v45 = vmul.f32 %v10063_v9, %v12294_v5 }
 0x4e2   : > { %v4372_v38 = vadd.f32 %v4349_v28, %v4183_v37  ;;  %v10366_v4 = vpop.permute.xlu2 %3740  ;;  %v10370_v20 = vld [vmem:[#allocation3 + $0x29] sm:$0xff]  ;;  %v4182_v28 = vadd.f32 %v4159_v35, %v3993_v60 }
 0x4e3   : > { %v10368_v27 = vpop.permute.xlu1 %3546  ;;  %v4658_v49 = vld [vmem:[#allocation3 + $0x30] sm:$0xff]  ;;  %7312 = vmatmul.msk.f32.gmra.mxu0 %vm4483_vm0, %v10370_v20  ;;  %v10375_v33 = vpop.permute.xlu0 %3362  ;;  %v1350_v1 = vadd.f32 %v1327_v45, %v1161_v50  ;;  %v12299_v35 = vld [vmem:[#allocation132_spill] sm:$0xff]  ;;  %v12302_v45 = vld [vmem:[#allocation135_spill] sm:$0xff] }
 0x4e4   : > { %v4843_v21 = vld [vmem:[#allocation3 + $0x2a] sm:$0xff]  ;;  %7324 = vmatmul.msk.f32.gmra.mxu1 %vm4483_vm0, %v4658_v49  ;;  %v4399_v22 = vadd.f32 %v10275_v32, %v4372_v38  ;;  %v763_v38 = vmul.f32 %v10038_v18, %v12295_v55  ;;  %v12296_v49 = vld [vmem:[#allocation75_spill] sm:$0xff]  ;;  %v1705_v0 = vmul.f32 %v10071_v54, %v12299_v35 }
 0x4e5   : > { %v4946_v48 = vld [vmem:[#allocation3 + $0x2b] sm:$0xff]  ;;  %7336 = vmatmul.msk.f32.gmra.mxu2 %vm4483_vm0, %v4843_v21  ;;  %v1141_v21 = vmul.f32 %v10045_v3, %v12296_v49 }
 0x4e6   : > { %7349 = vmatmul.msk.f32.gmra.mxu3 %vm4483_vm0, %v4946_v48  ;;  %7617 = vtanh.f32 %v4399_v22  ;;  %v12297_v22 = vld [vmem:[#allocation102_spill] sm:$0xff]  ;;  %v975_v53 = vadd.f32 %v952_v52, %v763_v38  ;;  %v12300_v60 = vld [vmem:[#allocation105_spill] sm:$0xff] }
 0x4e7   : > { %v1519_v63 = vmul.f32 %v10055_v8, %v12300_v60  ;;  %v12301_v52 = vld [vmem:[#allocation154_spill] sm:$0xff] }
 0x4e8   : > { %4322 = vperm.xlu2 %7557, %v4211_v57   ;;  %4138 = vperm.xlu1 %7556, %v4023_v59   ;;  %v1516_v57 = vmul.f32 %v10055_v8, %v12297_v22  ;;  %v1164_v23 = vadd.f32 %v1141_v21, %v975_v53  ;;  %v12303_v38 = vld [vmem:[#allocation162_spill] sm:$0xff]  ;;  %v12306_v53 = vld [vmem:[#allocation165_spill] sm:$0xff] }
 0x4e9   : > { %4133 = vperm.xlu0 %7555, %v4022_v12   ;;  %v12298_v12 = vld [vmem:[#allocation97_spill] sm:$0xff]  ;;  %v2083_v49 = vmul.f32 %v10095_v43, %v12303_v38 }
 0x4ea   : > { %v3368_v17 = vpop.permute.xlu2 %3367  ;;  %v1330_v24 = vmul.f32 %v10063_v9, %v12298_v12  ;;  %v1539_v34 = vadd.f32 %v1516_v57, %v1350_v1  ;;  %v12305_v57 = vld [vmem:[#allocation192_spill] sm:$0xff]  ;;  %v2086_v12 = vmul.f32 %v10095_v43, %v12306_v53 }
 0x4eb   : > { %v10394_v7 = vpop.permute.xlu1 %2805  ;;  %v4293_v42 = vpop.permute.xlu0 %4292  ;;  %v12307_v1 = vld [vmem:[#allocation216_spill] sm:$0xff] }
 0x4ec   : > { %v7618_v40 = vpop.eup %7617  ;;  %v4348_v37 = vmul.f32 %v10254_v30, %v4293_v42  ;;  %v1894_v42 = vmul.f32 %v10082_v39, %v12301_v52  ;;  %v1353_v5 = vadd.f32 %v1330_v24, %v1164_v23  ;;  %v1728_v55 = vadd.f32 %v1705_v0, %v1539_v34  ;;  %v12309_v34 = vld [vmem:[#allocation224_spill] sm:$0xff] }
 0x4ed   : > { %v4449_v48 = vmul.f32 %v10305_v56, %v7618_v40  ;;  %v2461_v35 = vmul.f32 %v10118_v61, %v12307_v1  ;;  %v2650_v52 = vmul.f32 %v10129_v62, %v12309_v34 }
 0x4ee   : > { %v4371_v59 = vadd.f32 %v4348_v37, %v4182_v28  ;;  %v1708_v28 = vmul.f32 %v10071_v54, %v12302_v45  ;;  %v1542_v21 = vadd.f32 %v1519_v63, %v1353_v5  ;;  %v1917_v22 = vadd.f32 %v1894_v42, %v1728_v55 }
 0x4ef   : > { %v4476_v14 = vadd.f32 %v10315_v51, %v4449_v48  ;;  %v12304_v48 = vld [vmem:[#allocation157_spill] sm:$0xff] }
 0x4f0   : > { %v4398_v36 = vadd.f32 %v10275_v32, %v4371_v59  ;;  %v1897_v50 = vmul.f32 %v10082_v39, %v12304_v48  ;;  %v2272_v59 = vmul.f32 %v10108_v29, %v12305_v57  ;;  %v12311_v57 = vld [vmem:[#allocation227_spill] sm:$0xff] }
 0x4f1   : > { %4500 = vst.msk [vmem:[#allocation2 + $0x80] sm:$0xff] %vm4483_vm0, %v4476_v14  ;;  %4327 = vperm.xlu0 %7555, %v4212_v11   ;;  %v1731_v11 = vadd.f32 %v1708_v28, %v1542_v21  ;;  %v2106_v14 = vadd.f32 %v2083_v49, %v1917_v22  ;;  %v12310_v28 = vld [vmem:[#allocation219_spill] sm:$0xff] }
 0x4f2   : > { %7619 = vtanh.f32 %v4398_v36  ;;  %v2811_v40 = vpop.permute.xlu2 %2810  ;;  %v12308_v36 = vld [vmem:[#allocation195_spill] sm:$0xff]  ;;  %v2464_v55 = vmul.f32 %v10118_v61, %v12310_v28 }
 0x4f3   : > { %v10420_v6 = vpop.permute.xlu1 %3735  ;;  %v3552_v37 = vpop.permute.xlu0 %3551  ;;  %v1920_v0 = vadd.f32 %v1897_v50, %v1731_v11  ;;  %v2275_v23 = vmul.f32 %v10108_v29, %v12308_v36  ;;  %v2295_v63 = vadd.f32 %v2272_v59, %v2106_v14  ;;  %v2839_v50 = vmul.f32 %v10149_v41, %v10245_v58 }
 0x4f4   : > { %v2653_v59 = vmul.f32 %v10129_v62, %v12311_v57  ;;  %v3407_v11 = vmul.f32 %v10328_v19, %v3368_v17  ;;  %v2842_v1 = vmul.f32 %v10149_v41, %v2811_v40  ;;  %v3406_v17 = vmul.f32 %v10328_v19, %v10375_v33 }
 0x4f5   : > { %v2109_v45 = vadd.f32 %v2086_v12, %v1920_v0  ;;  %v2484_v48 = vadd.f32 %v2461_v35, %v2295_v63  ;;  %v3217_v0 = vmul.f32 %v10141_v44, %v10346_v31  ;;  %v3595_v40 = vmul.f32 %v10182_v46, %v3552_v37 }
 0x4f7   : > { %v2298_v22 = vadd.f32 %v2275_v23, %v2109_v45  ;;  %v2673_v12 = vadd.f32 %v2650_v52, %v2484_v48 }
 0x4f8   : > { %v7620_v24 = vpop.eup %7619 }
 0x4f9   : > { %v4448_v60 = vmul.f32 %v10305_v56, %v7620_v24  ;;  %v3028_v24 = vmul.f32 %v10164_v26, %v10319_v15  ;;  %v2487_v14 = vadd.f32 %v2464_v55, %v2298_v22  ;;  %v2862_v58 = vadd.f32 %v2839_v50, %v2673_v12 }
 0x4fa   : > { %v4119_v42 = vpop.permute.xlu2 %4118  ;;  %v3784_v22 = vmul.f32 %v10194_v16, %v10366_v4 }
 0x4fb   : > { %v3179_v5 = vpop.permute.xlu1 %3178  ;;  %v4475_v38 = vadd.f32 %v10315_v51, %v4448_v60  ;;  %v10443_v21 = vpop.permute.xlu0 %2994  ;;  %v2676_v36 = vadd.f32 %v2653_v59, %v2487_v14  ;;  %v3051_v23 = vadd.f32 %v3028_v24, %v2862_v58  ;;  %v4162_v12 = vmul.f32 %v10209_v2, %v4119_v42 }
 0x4fc   : > { %v3218_v49 = vmul.f32 %v10141_v44, %v3179_v5  ;;  %v3594_v58 = vmul.f32 %v10182_v46, %v10368_v27  ;;  %v3783_v27 = vmul.f32 %v10194_v16, %v10420_v6 }
 0x4fd   : > { %4499 = vst.msk [vmem:[#allocation2 + $0x78] sm:$0xff] %vm4483_vm0, %v4475_v38  ;;  %v2865_v63 = vadd.f32 %v2842_v1, %v2676_v36  ;;  %v3240_v52 = vadd.f32 %v3217_v0, %v3051_v23 }
 0x4fe   : > { %v3241_v53 = vadd.f32 %v3218_v49, %v10350_v13 }
 0x4ff   : > { %v3429_v55 = vadd.f32 %v3406_v17, %v3240_v52 }
 0x500   : > { %v10455_v35 = vadd.f32 %v3407_v11, %v3241_v53 }
 0x501   : > { %v3618_v48 = vadd.f32 %v3595_v40, %v3429_v55 }
 0x502   : > { %v3000_v60 = vpop.permute.xlu2 %2999 }
 0x503   : > { %v10461_v13 = vpop.permute.xlu1 %3183  ;;  %v3031_v15 = vmul.f32 %v10164_v26, %v3000_v60  ;;  %v3925_v34 = vpop.permute.xlu0 %3924  ;;  %v3807_v11 = vadd.f32 %v3784_v22, %v3618_v48 }
 0x504   : > { %v4522_v5 = vld [vmem:[#allocation2 + $0x70] ss:$2 sm:$0xff]  ;;  %v4546_v45 = vld [vmem:[#allocation2 + $0x71] ss:$2 sm:$0xff]  ;;  %v3972_v52 = vmul.f32 %v10202_v47, %v3925_v34 }
 0x505   : > { %v10465_v28 = vadd.f32 %v3031_v15, %v2865_v63  ;;  %v4562_v31 = vmax.f32 %v4522_v5, %v4546_v45  ;;  %v4582_v38 = vld [vmem:[#allocation2 + $0x72] ss:$2 sm:$0xff]  ;;  %v4618_v33 = vld [vmem:[#allocation2 + $0x73] ss:$2 sm:$0xff]  ;;  %v3617_v15 = vadd.f32 %v3594_v58, %v10339_v10  ;;  %v12316_v58 = vld [vmem:[#allocation114_spill] sm:$0xff] }
 0x506   : > { %v12313_v34 = vld [vmem:[#allocation24_spill] sm:$0xff] }
 0x507   : > { %v4598_v49 = vmax.f32 %v4562_v31, %v4582_v38  ;;  %v3806_v40 = vadd.f32 %v3783_v27, %v3617_v15  ;;  %v762_v22 = vmul.f32 %v10038_v18, %v12313_v34 }
 0x509   : > { %v4634_v50 = vmax.f32 %v4598_v49, %v4618_v33  ;;  %v3995_v45 = vadd.f32 %v3972_v52, %v3806_v40  ;;  %v12312_v49 = vld [vmem:[#allocation54_spill] sm:$0xff] }
 0x50a   : > { %v4308_v53 = vpop.permute.xlu2 %4307  ;;  %v951_v48 = vmul.f32 %v10028_v25, %v12312_v49  ;;  %v12319_v49 = vld [vmem:[#allocation174_spill] sm:$0xff] }
 0x50b   : > { %v4114_v57 = vpop.permute.xlu1 %4113  ;;  %v3930_v59 = vpop.permute.xlu0 %3929  ;;  %4646 = vst.msk [vmem:[#allocation3 + $0x38] sm:$0xff] %vm4483_vm0, %v4634_v50  ;;  %v4351_v14 = vmul.f32 %v10254_v30, %v4308_v53 }
 0x50c   : > { %v3973_v37 = vmul.f32 %v10202_v47, %v3930_v59  ;;  %v4161_v5 = vmul.f32 %v10209_v2, %v4114_v57  ;;  %v12314_v59 = vld [vmem:[#allocation76_spill] sm:$0xff]  ;;  %v974_v53 = vadd.f32 %v951_v48, %v762_v22  ;;  %v2085_v48 = vmul.f32 %v10095_v43, %v12319_v49 }
 0x50d   : > { %v1140_v57 = vmul.f32 %v10045_v3, %v12314_v59 }
 0x50e   : > { %v3996_v24 = vadd.f32 %v3973_v37, %v3807_v11  ;;  %v4184_v33 = vadd.f32 %v4161_v5, %v3995_v45  ;;  %v12318_v5 = vld [vmem:[#allocation144_spill] sm:$0xff] }
 0x50f   : > { %v1896_v45 = vmul.f32 %v10082_v39, %v12318_v5 }
 0x510   : > { %v4185_v1 = vadd.f32 %v4162_v12, %v3996_v24  ;;  %v12315_v12 = vld [vmem:[#allocation84_spill] sm:$0xff] }
 0x511   : > { %v1329_v24 = vmul.f32 %v10063_v9, %v12315_v12 }
 0x512   : > { %v4374_v0 = vadd.f32 %v4351_v14, %v4185_v1  ;;  %v10477_v4 = vld [vmem:[#allocation3 + $0x31] sm:$0xff]  ;;  %v10495_v31 = vpop.permute.xlu2 %3750  ;;  %v1163_v1 = vadd.f32 %v1140_v57, %v974_v53 }
 0x513   : > { %v10475_v36 = vpop.permute.xlu1 %3556  ;;  %v10479_v23 = vld [vmem:[#allocation3 + $0x38] sm:$0xff]  ;;  %7313 = vmatmul.msk.f32.gmra.mxu0 %vm4483_vm0, %v10477_v4  ;;  %v10485_v60 = vpop.permute.xlu0 %3372 }
 0x514   : > { %v4844_v17 = vld [vmem:[#allocation3 + $0x32] sm:$0xff]  ;;  %7325 = vmatmul.msk.f32.gmra.mxu1 %vm4483_vm0, %v10479_v23  ;;  %v4401_v63 = vadd.f32 %v10275_v32, %v4374_v0  ;;  %v1518_v0 = vmul.f32 %v10055_v8, %v12316_v58  ;;  %v1352_v27 = vadd.f32 %v1329_v24, %v1163_v1  ;;  %v12322_v24 = vld [vmem:[#allocation236_spill] sm:$0xff]  ;;  %v7355_v58 = vld [vmem:[%s12105_s5 + $0x48] sm:$0x3]  ;;  %v3596_v5 = vmul.f32 %v10182_v46, %v10475_v36 }
 0x515   : > { %v4947_v42 = vld [vmem:[#allocation3 + $0x33] sm:$0xff]  ;;  %7337 = vmatmul.msk.f32.gmra.mxu2 %vm4483_vm0, %v4844_v17  ;;  %7356 = vmatpush.msk.msrb.mxu0 %vm4707_vm1, %v7355_v58 }
 0x516   : > { %7350 = vmatmul.msk.f32.gmra.mxu3 %vm4483_vm0, %v4947_v42  ;;  %7621 = vtanh.f32 %v4401_v63  ;;  %v12317_v63 = vld [vmem:[#allocation136_spill] sm:$0xff]  ;;  %v1541_v40 = vadd.f32 %v1518_v0, %v1352_v27  ;;  %v2841_v27 = vmul.f32 %v10149_v41, %v10394_v7 }
 0x517   : > { %v1707_v15 = vmul.f32 %v10071_v54, %v12317_v63 }
 0x51a   : > { %v10516_v52 = vpop.permute.xlu2 %3377 }
 0x51b   : > { %v10497_v55 = vpop.permute.xlu1 %2815  ;;  %v4303_v6 = vpop.permute.xlu0 %4302 }
 0x51c   : > { %v7622_v38 = vpop.eup %7621  ;;  %v4350_v50 = vmul.f32 %v10254_v30, %v4303_v6 }
 0x51d   : > { %v4451_v10 = vmul.f32 %v10305_v56, %v7622_v38  ;;  %v1730_v38 = vadd.f32 %v1707_v15, %v1541_v40  ;;  %v3030_v15 = vmul.f32 %v10164_v26, %v10443_v21  ;;  %v3408_v21 = vmul.f32 %v10328_v19, %v10485_v60  ;;  %v12324_v60 = vld [vmem:[#allocation36_spill] sm:$0xff] }
 0x51e   : > { %v4373_v11 = vadd.f32 %v4350_v50, %v4184_v33 }
 0x51f   : > { %v4478_v37 = vadd.f32 %v10315_v51, %v4451_v10  ;;  %v1919_v50 = vadd.f32 %v1896_v45, %v1730_v38  ;;  %v12320_v10 = vld [vmem:[#allocation196_spill] sm:$0xff] }
 0x520   : > { %v4400_v14 = vadd.f32 %v10275_v32, %v4373_v11  ;;  %v2274_v34 = vmul.f32 %v10108_v29, %v12320_v10 }
 0x521   : > { %4502 = vst.msk [vmem:[#allocation2 + $0x90] sm:$0xff] %vm4483_vm0, %v4478_v37  ;;  %v2108_v11 = vadd.f32 %v2085_v48, %v1919_v50  ;;  %v12321_v37 = vld [vmem:[#allocation204_spill] sm:$0xff]  ;;  %v3219_v48 = vmul.f32 %v10141_v44, %v10461_v13 }
 0x522   : > { %7623 = vtanh.f32 %v4400_v14  ;;  %v2463_v53 = vmul.f32 %v10118_v61, %v12321_v37  ;;  %v2652_v14 = vmul.f32 %v10129_v62, %v12322_v24  ;;  %v10535_v1 = vpop.permute.xlu2 %3382 }
 0x523   : > { %v3746_v17 = vpop.permute.xlu1 %3745  ;;  %v3562_v42 = vpop.permute.xlu0 %3561  ;;  %v2297_v12 = vadd.f32 %v2274_v34, %v2108_v11  ;;  %v3619_v34 = vadd.f32 %v3596_v5, %v10455_v35  ;;  %v12325_v5 = vld [vmem:[#allocation66_spill] sm:$0xff] }
 0x524   : > { %v3597_v24 = vmul.f32 %v10182_v46, %v3562_v42 }
 0x525   : > { %v2486_v0 = vadd.f32 %v2463_v53, %v2297_v12 }
 0x527   : > { %v2675_v63 = vadd.f32 %v2652_v14, %v2486_v0  ;;  %v12323_v14 = vld [vmem:[#allocation57_spill] sm:$0xff] }
 0x528   : > { %v7624_v6 = vpop.eup %7623 }
 0x529   : > { %v4450_v33 = vmul.f32 %v10305_v56, %v7624_v6  ;;  %v2864_v6 = vadd.f32 %v2841_v27, %v2675_v63 }
 0x52a   : > { %v4313_v11 = vpop.permute.xlu2 %4312 }
 0x52b   : > { %v10525_v22 = vpop.permute.xlu1 %3188  ;;  %v4477_v59 = vadd.f32 %v10315_v51, %v4450_v33  ;;  %v10528_v57 = vpop.permute.xlu0 %3004  ;;  %v3785_v33 = vmul.f32 %v10194_v16, %v3746_v17  ;;  %v3053_v7 = vadd.f32 %v3030_v15, %v2864_v6  ;;  %v953_v17 = vmul.f32 %v10028_v25, %v12323_v14  ;;  %v12326_v25 = vld [vmem:[#allocation96_spill] sm:$0xff] }
 0x52c   : > { %v764_v15 = vmul.f32 %v10038_v18, %v12324_v60  ;;  %v4352_v42 = vmul.f32 %v10254_v30, %v4313_v11 }
 0x52d   : > { %4501 = vst.msk [vmem:[#allocation2 + $0x88] sm:$0xff] %vm4483_vm0, %v4477_v59  ;;  %v3242_v53 = vadd.f32 %v3219_v48, %v3053_v7  ;;  %v3808_v12 = vadd.f32 %v3785_v33, %v3619_v34  ;;  %v1331_v48 = vmul.f32 %v10063_v9, %v12326_v25  ;;  %v3786_v33 = vmul.f32 %v10194_v16, %v10495_v31  ;;  %v12327_v34 = vld [vmem:[#allocation117_spill] sm:$0xff] }
 0x52e   : > { %v1520_v18 = vmul.f32 %v10055_v8, %v12327_v34 }
 0x52f   : > { %v3431_v0 = vadd.f32 %v3408_v21, %v3242_v53 }
 0x531   : > { %v3620_v6 = vadd.f32 %v3597_v24, %v3431_v0 }
 0x533   : > { %v10545_v40 = vpop.permute.xlu1 %3193  ;;  %v3935_v45 = vpop.permute.xlu0 %3934  ;;  %v3809_v21 = vadd.f32 %v3786_v33, %v3620_v6 }
 0x534   : > { %v4524_v38 = vld [vmem:[#allocation2 + $0x80] ss:$2 sm:$0xff]  ;;  %v4548_v49 = vld [vmem:[#allocation2 + $0x81] ss:$2 sm:$0xff]  ;;  %v3974_v59 = vmul.f32 %v10202_v47, %v3935_v45  ;;  %v1142_v45 = vmul.f32 %v10045_v3, %v12325_v5 }
 0x535   : > { %v4563_v50 = vmax.f32 %v4524_v38, %v4548_v49  ;;  %v4584_v10 = vld [vmem:[#allocation2 + $0x82] ss:$2 sm:$0xff]  ;;  %v4620_v37 = vld [vmem:[#allocation2 + $0x83] ss:$2 sm:$0xff]  ;;  %v976_v49 = vadd.f32 %v953_v17, %v764_v15  ;;  %v12329_v17 = vld [vmem:[#allocation156_spill] sm:$0xff] }
 0x536   : > { %v3997_v27 = vadd.f32 %v3974_v59, %v3808_v12 }
 0x537   : > { %v4599_v36 = vmax.f32 %v4563_v50, %v4584_v10  ;;  %v1165_v10 = vadd.f32 %v1142_v45, %v976_v49  ;;  %v12331_v45 = vld [vmem:[#allocation186_spill] sm:$0xff] }
 0x538   : > { %v2276_v6 = vmul.f32 %v10108_v29, %v12331_v45  ;;  %v12332_v49 = vld [vmem:[#allocation218_spill] sm:$0xff]  ;;  %v2843_v29 = vmul.f32 %v10149_v41, %v10497_v55 }
 0x539   : > { %v4635_v13 = vmax.f32 %v4599_v36, %v4620_v37  ;;  %v1354_v59 = vadd.f32 %v1331_v48, %v1165_v10  ;;  %v12328_v36 = vld [vmem:[#allocation126_spill] sm:$0xff]  ;;  %v4318_v37 = vpop.permute.xlu2 %4317  ;;  %v2465_v25 = vmul.f32 %v10118_v61, %v12332_v49  ;;  %v12333_v10 = vld [vmem:[#allocation239_spill] sm:$0xff] }
 0x53a   : > { %v1709_v11 = vmul.f32 %v10071_v54, %v12328_v36  ;;  %v4353_v0 = vmul.f32 %v10254_v30, %v4318_v37  ;;  %v3221_v37 = vmul.f32 %v10141_v44, %v10545_v40 }
 0x53b   : > { %v4124_v58 = vpop.permute.xlu1 %4123  ;;  %v3940_v63 = vpop.permute.xlu0 %3939  ;;  %4647 = vst.msk [vmem:[#allocation3 + $0x40] sm:$0xff] %vm4483_vm0, %v4635_v13  ;;  %v1543_v54 = vadd.f32 %v1520_v18, %v1354_v59 }
 0x53c   : > { %v4163_v35 = vmul.f32 %v10209_v2, %v4124_v58  ;;  %v3975_v7 = vmul.f32 %v10202_v47, %v3940_v63  ;;  %v1898_v58 = vmul.f32 %v10082_v39, %v12329_v17  ;;  %v12330_v63 = vld [vmem:[#allocation177_spill] sm:$0xff] }
 0x53d   : > { %v2087_v60 = vmul.f32 %v10095_v43, %v12330_v63  ;;  %v2654_v43 = vmul.f32 %v10129_v62, %v12333_v10 }
 0x53e   : > { %v4186_v38 = vadd.f32 %v4163_v35, %v3997_v27  ;;  %v3998_v24 = vadd.f32 %v3975_v7, %v3809_v21  ;;  %v1732_v35 = vadd.f32 %v1709_v11, %v1543_v54  ;;  %v3032_v21 = vmul.f32 %v10164_v26, %v10528_v57  ;;  %v7354_v57 = vld [vmem:[%s12105_s5 + $0x40] sm:$0xff] }
 0x53f   : > { %5105 = vmatpush.msrb.mxu0 %v7354_v57  ;;  %v5147_v57 = vld [vmem:[#allocation3 + $0x5] sm:$0xff] }
 0x540   : > { %v4375_v50 = vadd.f32 %v4352_v42, %v4186_v38  ;;  %v1921_v5 = vadd.f32 %v1898_v58, %v1732_v35 }
 0x541   : > { %v3950_v36 = vpop.permute.xlu2 %3949 }
 0x542   : > { %v4402_v3 = vadd.f32 %v10275_v32, %v4375_v50  ;;  %v10576_v9 = vld [vmem:[#allocation3 + $0x39] sm:$0xff]  ;;  %v2110_v39 = vadd.f32 %v2087_v60, %v1921_v5 }
 0x543   : > { %v4129_v53 = vpop.permute.xlu1 %4128  ;;  %v10578_v12 = vld [vmem:[#allocation3 + $0x40] sm:$0xff]  ;;  %7314 = vmatmul.msk.f32.gmra.mxu0 %vm4483_vm0, %v10576_v9  ;;  %v3567_v14 = vpop.permute.xlu0 %3566 }
 0x544   : > { %v4845_v31 = vld [vmem:[#allocation3 + $0x3a] sm:$0xff]  ;;  %7625 = vtanh.f32 %v4402_v3  ;;  %v4164_v13 = vmul.f32 %v10209_v2, %v4129_v53  ;;  %7326 = vmatmul.msk.f32.gmra.mxu1 %vm4483_vm0, %v10578_v12  ;;  %v2299_v7 = vadd.f32 %v2276_v6, %v2110_v39  ;;  %v3220_v3 = vmul.f32 %v10141_v44, %v10525_v22 }
 0x545   : > { %v4948_v8 = vld [vmem:[#allocation3 + $0x3b] sm:$0xff]  ;;  %7338 = vmatmul.msk.f32.gmra.mxu2 %vm4483_vm0, %v4845_v31  ;;  %v3409_v22 = vmul.f32 %v10328_v19, %v10516_v52  ;;  %v3598_v26 = vmul.f32 %v10182_v46, %v3567_v14 }
 0x546   : > { %7351 = vmatmul.msk.f32.gmra.mxu3 %vm4483_vm0, %v4948_v8  ;;  %v4187_v27 = vadd.f32 %v4164_v13, %v3998_v24  ;;  %v2488_v18 = vadd.f32 %v2465_v25, %v2299_v7  ;;  %v3243_v62 = vadd.f32 %v3220_v3, %v10465_v28  ;;  %v7368_v52 = vld [vmem:[%s12105_s5 + $0x58] sm:$0x3]  ;;  %v7367_v13 = vld [vmem:[%s12105_s5 + $0x50] sm:$0xff]  ;;  %v3410_v8 = vmul.f32 %v10328_v19, %v10535_v1 }
 0x547   : > { %7369 = vmatpush.msk.msra.mxu1 %vm4707_vm1, %v7368_v52 }
 0x548   : > { %v4376_v15 = vadd.f32 %v4353_v0, %v4187_v27  ;;  %v2677_v61 = vadd.f32 %v2654_v43, %v2488_v18  ;;  %v3432_v44 = vadd.f32 %v3409_v22, %v3243_v62  ;;  %v7381_v43 = vld [vmem:[%s12105_s5 + $0x68] sm:$0x3] }
 0x549   : > { %5208 = vmatpush.msra.mxu1 %v7367_v13  ;;  %v4323_v60 = vpop.permute.xlu2 %4322  ;;  %7382 = vmatpush.msk.msrb.mxu2 %vm4707_vm1, %v7381_v43  ;;  %v7407_v22 = vld [vmem:[%s12105_s5 + $0x88] sm:$0x3]  ;;  %v5253_v43 = vld [vmem:[#allocation3 + $0x1e] sm:$0xff] }
 0x54a   : > { %v7626_v42 = vpop.eup %7625  ;;  %v4403_v38 = vadd.f32 %v10275_v32, %v4376_v15  ;;  %v2866_v11 = vadd.f32 %v2843_v29, %v2677_v61  ;;  %v3621_v14 = vadd.f32 %v3598_v26, %v3432_v44  ;;  %7408 = vmatpush.msk.msra.mxu0 %vm4707_vm1, %v7407_v22  ;;  %v5359_v22 = vld [vmem:[#allocation3 + $0x37] sm:$0xff] }
 0x54b   : > { %v4452_v48 = vmul.f32 %v10305_v56, %v7626_v42  ;;  %v3756_v33 = vpop.permute.xlu1 %3755  ;;  %v3572_v50 = vpop.permute.xlu0 %3571 }
 0x54c   : > { %7627 = vtanh.f32 %v4403_v38  ;;  %v3055_v31 = vadd.f32 %v3032_v21, %v2866_v11  ;;  %v3787_v40 = vmul.f32 %v10194_v16, %v3756_v33  ;;  %v3599_v54 = vmul.f32 %v10182_v46, %v3572_v50 }
 0x54d   : > { %v4479_v34 = vadd.f32 %v10315_v51, %v4452_v48  ;;  %v4354_v46 = vmul.f32 %v10254_v30, %v4323_v60  ;;  %v3977_v48 = vmul.f32 %v10202_v47, %v3950_v36 }
 0x54e   : > { %v3244_v28 = vadd.f32 %v3221_v37, %v3055_v31  ;;  %v3810_v27 = vadd.f32 %v3787_v40, %v3621_v14 }
 0x54f   : > { %4503 = vst.msk [vmem:[#allocation2 + $0x98] sm:$0xff] %vm4483_vm0, %v4479_v34 }
 0x550   : > { %v3433_v35 = vadd.f32 %v3410_v8, %v3244_v28 }
 0x552   : > { %v7628_v59 = vpop.eup %7627  ;;  %v3622_v5 = vadd.f32 %v3599_v54, %v3433_v35 }
 0x553   : > { %v4453_v53 = vmul.f32 %v10305_v56, %v7628_v59  ;;  %v3945_v41 = vpop.permute.xlu1 %3944  ;;  %v3761_v55 = vpop.permute.xlu0 %3760 }
 0x554   : > { %v3976_v17 = vmul.f32 %v10202_v47, %v3945_v41  ;;  %v3788_v63 = vmul.f32 %v10194_v16, %v3761_v55  ;;  %v7380_v41 = vld [vmem:[%s12105_s5 + $0x60] sm:$0xff]  ;;  %v7393_v55 = vld [vmem:[%s12105_s5 + $0x70] sm:$0xff] }
 0x555   : > { %v4480_v24 = vadd.f32 %v10315_v51, %v4453_v53  ;;  %v4941_v53 = vld [vmem:[#allocation3 + $0x3] sm:$0xff]  ;;  %5311 = vmatpush.msrb.mxu2 %v7380_v41  ;;  %v5050_v41 = vld [vmem:[#allocation3 + $0x34] sm:$0xff] }
 0x556   : > { %v4526_v58 = vld [vmem:[#allocation2 + $0x90] ss:$2 sm:$0xff]  ;;  %v4550_v0 = vld [vmem:[#allocation2 + $0x91] ss:$2 sm:$0xff]  ;;  %v3999_v45 = vadd.f32 %v3976_v17, %v3810_v27  ;;  %v3811_v38 = vadd.f32 %v3788_v63, %v3622_v5 }
 0x557   : > { %4504 = vst.msk [vmem:[#allocation2 + $0xa0] sm:$0xff] %vm4483_vm0, %v4480_v24  ;;  %v4564_v42 = vmax.f32 %v4526_v58, %v4550_v0  ;;  %v5148_v58 = vld [vmem:[#allocation3 + $0xd] sm:$0xff]  ;;  %v5044_v5 = vld [vmem:[#allocation3 + $0x4] sm:$0xff] }
 0x558   : > { %v4000_v7 = vadd.f32 %v3977_v48, %v3811_v38  ;;  %v5151_v38 = vld [vmem:[#allocation3 + $0x25] sm:$0xff]  ;;  %v5046_v48 = vld [vmem:[#allocation3 + $0x14] sm:$0xff] }
 0x55b   : > { %v4134_v15 = vpop.permute.xlu0 %4133  ;;  %v4139_v19 = vpop.permute.xlu1 %4138 }
 0x55c   : > { %v4165_v6 = vmul.f32 %v10209_v2, %v4134_v15  ;;  %v4166_v33 = vmul.f32 %v10209_v2, %v4139_v19  ;;  %v5149_v15 = vld [vmem:[#allocation3 + $0x15] sm:$0xff]  ;;  %v5045_v19 = vld [vmem:[#allocation3 + $0xc] sm:$0xff] }
 0x55e   : > { %v4586_v1 = vld [vmem:[#allocation2 + $0x92] ss:$2 sm:$0xff]  ;;  %v4188_v39 = vadd.f32 %v4165_v6, %v3999_v45  ;;  %v4622_v25 = vld [vmem:[#allocation2 + $0x93] ss:$2 sm:$0xff]  ;;  %v4189_v18 = vadd.f32 %v4166_v33, %v4000_v7 }
 0x55f   : > { %v4600_v49 = vmax.f32 %v4564_v42, %v4586_v1  ;;  %v5250_v45 = vld [vmem:[#allocation3 + $0x6] sm:$0xff]  ;;  %v5150_v42 = vld [vmem:[#allocation3 + $0x1d] sm:$0xff]  ;;  %v5251_v1 = vld [vmem:[#allocation3 + $0xe] sm:$0xff] }
 0x560   : > { %v4377_v16 = vadd.f32 %v4354_v46, %v4188_v39  ;;  %v5353_v6 = vld [vmem:[#allocation3 + $0x7] sm:$0xff]  ;;  %v5354_v46 = vld [vmem:[#allocation3 + $0xf] sm:$0xff] }
 0x561   : > { %v4636_v50 = vmax.f32 %v4600_v49, %v4622_v25  ;;  %v7406_v39 = vld [vmem:[%s12105_s5 + $0x80] sm:$0xff]  ;;  %v7419_v49 = vld [vmem:[%s12105_s5 + $0x90] sm:$0xff]  ;;  %v10704_v25 = vpop.f32.mrf.mxu1 }
 0x562   : > { %v4404_v10 = vadd.f32 %v10275_v32, %v4377_v16  ;;  %5517 = vmatpush.msra.mxu0 %v7406_v39  ;;  %v5252_v33 = vld [vmem:[#allocation3 + $0x16] sm:$0xff]  ;;  %v10777_v39 = vpop.f32.mrf.mxu2 }
 0x563   : > { %4648 = vst.msk [vmem:[#allocation3 + $0x48] sm:$0xff] %vm4483_vm0, %v4636_v50  ;;  %v4328_v34 = vpop.permute.xlu0 %4327  ;;  %v5355_v16 = vld [vmem:[#allocation3 + $0x17] sm:$0xff]  ;;  %v5152_v50 = vld [vmem:[#allocation3 + $0x2d] sm:$0xff] }
 0x564   : > { %7629 = vtanh.f32 %v4404_v10  ;;  %v4355_v47 = vmul.f32 %v10254_v30, %v4328_v34  ;;  %v7394_v30 = vld [vmem:[%s12105_s5 + $0x78] sm:$0x3] }
 0x565   : > { %7395 = vmatpush.msk.msrb.mxu3 %vm4707_vm1, %v7394_v30  ;;  %v5047_v10 = vld [vmem:[#allocation3 + $0x1c] sm:$0xff]  ;;  %v5049_v30 = vld [vmem:[#allocation3 + $0x2c] sm:$0xff] }
 0x566   : > { %v4378_v29 = vadd.f32 %v4355_v47, %v4189_v18  ;;  %v5356_v34 = vld [vmem:[#allocation3 + $0x1f] sm:$0xff]  ;;  %v5153_v18 = vld [vmem:[#allocation3 + $0x35] sm:$0xff] }
 0x567   : > { %5414 = vmatpush.msrb.mxu3 %v7393_v55  ;;  %v5256_v55 = vld [vmem:[#allocation3 + $0x36] sm:$0xff] }
 0x568   : > { %v4405_v2 = vadd.f32 %v10275_v32, %v4378_v29  ;;  %v5048_v29 = vld [vmem:[#allocation3 + $0x24] sm:$0xff] }
 0x569   : > { %v10710_v7 = vpop.f32.mrf.mxu1 }
 0x56a   : > { %v10645_v3 = vld [vmem:[#allocation3 + $0x41] sm:$0xff]  ;;  %v7630_v59 = vpop.eup %7629  ;;  %7631 = vtanh.f32 %v4405_v2 }
 0x56b   : > { %v10647_v61 = vld [vmem:[#allocation3 + $0x48] sm:$0xff]  ;;  %7315 = vmatmul.msk.f32.gmra.mxu0 %vm4483_vm0, %v10645_v3  ;;  %v4454_v32 = vmul.f32 %v10305_v56, %v7630_v59  ;;  %v5154_v59 = vld [vmem:[#allocation3 + $0x3d] sm:$0xff] }
 0x56c   : > { %v4846_v21 = vld [vmem:[#allocation3 + $0x42] sm:$0xff]  ;;  %7327 = vmatmul.msk.f32.gmra.mxu1 %vm4483_vm0, %v10647_v61 }
 0x56d   : > { %v4949_v36 = vld [vmem:[#allocation3 + $0x43] sm:$0xff]  ;;  %7339 = vmatmul.msk.f32.gmra.mxu2 %vm4483_vm0, %v4846_v21  ;;  %v4481_v11 = vadd.f32 %v10315_v51, %v4454_v32  ;;  %v5255_v32 = vld [vmem:[#allocation3 + $0x2e] sm:$0xff] }
 0x56e   : > { %7352 = vmatmul.msk.f32.gmra.mxu3 %vm4483_vm0, %v4949_v36  ;;  %v5254_v2 = vld [vmem:[#allocation3 + $0x26] sm:$0xff] }
 0x56f   : > { %4505 = vst.msk [vmem:[#allocation2 + $0xa8] sm:$0xff] %vm4483_vm0, %v4481_v11  ;;  %v5357_v21 = vld [vmem:[#allocation3 + $0x27] sm:$0xff]  ;;  %v5358_v11 = vld [vmem:[#allocation3 + $0x2f] sm:$0xff] }
 0x570   : > { %v7632_v62 = vpop.eup %7631 }
 0x571   : > { %v4455_v37 = vmul.f32 %v10305_v56, %v7632_v62  ;;  %v7420_v56 = vld [vmem:[%s12105_s5 + $0x98] sm:$0x3]  ;;  %v10716_v47 = vpop.f32.mrf.mxu1  ;;  %v5155_v62 = vld [vmem:[#allocation3 + $0x45] sm:$0xff] }
 0x573   : > { %v4482_v31 = vadd.f32 %v10315_v51, %v4455_v37  ;;  %v10728_v37 = vpop.f32.mrf.mxu0 }
 0x574   : > { %7344 = vmatmul.msk.f32.vlgmr.msrb.gmra.mxu1 %vm4483_vm0, %v4941_v53 }
 0x575   : > { %7421 = vmatpush.msk.msrb.mxu1 %vm4707_vm1, %v7420_v56  ;;  %4507 = vst.msk [vmem:[#allocation2 + $0xb0] sm:$0x1f] %vm4506_vm2, %v4482_v31 }
 0x576   : > { %v4528_v24 = vld [vmem:[#allocation2 + $0xa0] ss:$2 sm:$0xff]  ;;  %v4552_v26 = vld [vmem:[#allocation2 + $0xa1] ss:$2 sm:$0xff] }
 0x577   : > { %v4565_v28 = vmax.f32 %v4528_v24, %v4552_v26  ;;  %5620 = vmatpush.msrb.mxu1 %v7419_v49  ;;  %v5051_v26 = vld [vmem:[#allocation3 + $0x3c] sm:$0xff] }
 0x579   : > { %v10722_v36 = vpop.f32.mrf.mxu1 }
 0x57b   : > { %v10736_v31 = vpop.f32.mrf.mxu0 }
 0x57c   : > { %7370 = vmatmul.msk.f32.vlgmr.msra.gmra.mxu1 %vm4483_vm0, %v5147_v57  ;;  %v4588_v44 = vld [vmem:[#allocation2 + $0xa2] ss:$2 sm:$0xff]  ;;  %v4554_v13 = vld [vmem:[#allocation2 + $0xb1] ss:$2 sm:$0x1]  ;;  %v5257_v57 = vld [vmem:[#allocation3 + $0x3e] sm:$0xff] }
 0x57d   : > { %v4601_v40 = vmax.f32 %v4565_v28, %v4588_v44  ;;  %v4530_v52 = vld [vmem:[#allocation2 + $0xb0] ss:$2 sm:$0x1]  ;;  %v4624_v8 = vld [vmem:[#allocation2 + $0xa3] ss:$2 sm:$0xff]  ;;  %v5360_v28 = vld [vmem:[#allocation3 + $0x3f] sm:$0xff] }
 0x57e   : > { %v4566_v14 = vmax.f32 %v4530_v52, %v4554_v13  ;;  %v4590_v51 = vld [vmem:[#allocation2 + $0xb2] ss:$2 sm:$0x1]  ;;  %v4626_v0 = vld [vmem:[#allocation2 + $0xb3] ss:$2 sm:$0x1] }
 0x57f   : > { %v4637_v54 = vmax.f32 %v4601_v40, %v4624_v8  ;;  %v5559_v44 = vld [vmem:[#allocation3 + $0x9] sm:$0xff] }
 0x580   : > { %v4602_v17 = vmax.f32 %v4566_v14, %v4590_v51  ;;  %v5052_v13 = vld [vmem:[#allocation3 + $0x44] sm:$0xff] }
 0x581   : > { %4649 = vst.msk [vmem:[#allocation3 + $0x50] sm:$0xff] %vm4483_vm0, %v4637_v54  ;;  %v10730_v53 = vpop.f32.mrf.mxu1  ;;  %v5258_v8 = vld [vmem:[#allocation3 + $0x46] sm:$0xff]  ;;  %v5560_v54 = vld [vmem:[#allocation3 + $0x11] sm:$0xff] }
 0x582   : > { %v4638_v27 = vmax.f32 %v4602_v17, %v4626_v0  ;;  %v5361_v14 = vld [vmem:[#allocation3 + $0x47] sm:$0xff] }
 0x583   : > { %v10744_v40 = vpop.f32.mrf.mxu0 }
 0x584   : > { %7371 = vmatmul.msk.f32.gmra.mxu1 %vm4483_vm0, %v5148_v58  ;;  %4651 = vst.msk [vmem:[#allocation3 + $0x58] sm:$0x1] %vm4650_vm3, %v4638_v27 }
 0x588   : > { %v10683_v35 = vld [vmem:[#allocation3 + $0x49] sm:$0xff] }
 0x589   : > { %v4847_v63 = vld [vmem:[#allocation3 + $0x4a] sm:$0xff]  ;;  %7316 = vmatmul.msk.f32.gmra.mxu0 %vm4483_vm0, %v10683_v35  ;;  %v10738_v24 = vpop.f32.mrf.mxu1 }
 0x58a   : > { %v4950_v60 = vld [vmem:[#allocation3 + $0x4b] sm:$0xff]  ;;  %7340 = vmatmul.msk.f32.gmra.mxu2 %vm4483_vm0, %v4847_v63  ;;  %v5561_v63 = vld [vmem:[#allocation3 + $0x19] sm:$0xff] }
 0x58b   : > { %7353 = vmatmul.msk.f32.gmra.mxu3 %vm4483_vm0, %v4950_v60  ;;  %v5156_v56 = vld [vmem:[#allocation3 + $0x4d] sm:$0xff]  ;;  %v10752_v51 = vpop.f32.mrf.mxu0 }
 0x58c   : > { %7372 = vmatmul.msk.f32.gmra.mxu1 %vm4483_vm0, %v5149_v15  ;;  %v5053_v58 = vld [vmem:[#allocation3 + $0x4c] sm:$0xff] }
 0x58d   : > { %v5259_v0 = vld [vmem:[#allocation3 + $0x4e] sm:$0xff] }
 0x58e   : > { %v5362_v27 = vld [vmem:[#allocation3 + $0x4f] sm:$0xff] }
 0x591   : > { %7357 = vmatmul.msk.f32.vlgmr.msrb.gmra.mxu0 %vm4483_vm0, %v5044_v5  ;;  %v10746_v52 = vpop.f32.mrf.mxu1  ;;  %v5456_v5 = vld [vmem:[#allocation3 + $0x8] sm:$0xff] }
 0x592   : > { %7383 = vmatmul.msk.f32.vlgmr.msrb.gmra.mxu2 %vm4483_vm0, %v5250_v45  ;;  %v5562_v45 = vld [vmem:[#allocation3 + $0x21] sm:$0xff] }
 0x593   : > { %7396 = vmatmul.msk.f32.vlgmr.msrb.gmra.mxu3 %vm4483_vm0, %v5353_v6  ;;  %v10760_v60 = vpop.f32.mrf.mxu0 }
 0x594   : > { %7373 = vmatmul.msk.f32.gmra.mxu1 %vm4483_vm0, %v5150_v42 }
 0x599   : > { %7358 = vmatmul.msk.f32.gmra.mxu0 %vm4483_vm0, %v5045_v19  ;;  %v10754_v17 = vpop.f32.mrf.mxu1  ;;  %v5457_v19 = vld [vmem:[#allocation3 + $0x10] sm:$0xff] }
 0x59a   : > { %7384 = vmatmul.msk.f32.gmra.mxu2 %vm4483_vm0, %v5251_v1  ;;  %12334 = vst [vmem:[#allocation29_spill] sm:$0xff] %v10754_v17 }
 0x59b   : > { %7397 = vmatmul.msk.f32.gmra.mxu3 %vm4483_vm0, %v5354_v46  ;;  %v10766_v6 = vpop.f32.mrf.mxu0 }
 0x59c   : > { %7374 = vmatmul.msk.f32.gmra.mxu1 %vm4483_vm0, %v5151_v38  ;;  %v5458_v38 = vld [vmem:[#allocation3 + $0x18] sm:$0xff] }
 0x5a1   : > { %7359 = vmatmul.msk.f32.gmra.mxu0 %vm4483_vm0, %v5046_v48 }
 0x5a2   : > { %7385 = vmatmul.msk.f32.gmra.mxu2 %vm4483_vm0, %v5252_v33  ;;  %v5459_v33 = vld [vmem:[#allocation3 + $0x20] sm:$0xff] }
 0x5a3   : > { %7398 = vmatmul.msk.f32.gmra.mxu3 %vm4483_vm0, %v5355_v16  ;;  %v10773_v1 = vpop.f32.mrf.mxu0  ;;  %v10786_v16 = vpop.f32.mrf.mxu2 }
 0x5a4   : > { %7375 = vmatmul.msk.f32.gmra.mxu1 %vm4483_vm0, %v5152_v50 }
 0x5a9   : > { %7360 = vmatmul.msk.f32.gmra.mxu0 %vm4483_vm0, %v5047_v10  ;;  %v10793_v10 = vpop.f32.mrf.mxu3 }
 0x5aa   : > { %7386 = vmatmul.msk.f32.gmra.mxu2 %vm4483_vm0, %v5253_v43  ;;  %v5460_v43 = vld [vmem:[#allocation3 + $0x28] sm:$0xff] }
 0x5ab   : > { %7399 = vmatmul.msk.f32.gmra.mxu3 %vm4483_vm0, %v5356_v34  ;;  %v10795_v34 = vpop.f32.mrf.mxu2 }
 0x5ac   : > { %7376 = vmatmul.msk.f32.gmra.mxu1 %vm4483_vm0, %v5153_v18 }
 0x5b1   : > { %7361 = vmatmul.msk.f32.gmra.mxu0 %vm4483_vm0, %v5048_v29  ;;  %v10802_v29 = vpop.f32.mrf.mxu3 }
 0x5b2   : > { %7387 = vmatmul.msk.f32.gmra.mxu2 %vm4483_vm0, %v5254_v2 }
 0x5b3   : > { %7400 = vmatmul.msk.f32.gmra.mxu3 %vm4483_vm0, %v5357_v21  ;;  %v10804_v2 = vpop.f32.mrf.mxu2 }
 0x5b4   : > { %7377 = vmatmul.msk.f32.gmra.mxu1 %vm4483_vm0, %v5154_v59 }
 0x5b9   : > { %7362 = vmatmul.msk.f32.gmra.mxu0 %vm4483_vm0, %v5049_v30  ;;  %v10811_v30 = vpop.f32.mrf.mxu3 }
 0x5ba   : > { %7388 = vmatmul.msk.f32.gmra.mxu2 %vm4483_vm0, %v5255_v32 }
 0x5bb   : > { %7401 = vmatmul.msk.f32.gmra.mxu3 %vm4483_vm0, %v5358_v11  ;;  %v10813_v32 = vpop.f32.mrf.mxu2 }
 0x5bc   : > { %7378 = vmatmul.msk.f32.gmra.mxu1 %vm4483_vm0, %v5155_v62 }
 0x5c0   : > { %v10782_v49 = vpop.f32.mrf.mxu0 }
 0x5c1   : > { %7363 = vmatmul.msk.f32.gmra.mxu0 %vm4483_vm0, %v5050_v41  ;;  %v10762_v15 = vpop.f32.mrf.mxu1  ;;  %12335 = vst [vmem:[#allocation50_spill] sm:$0xff] %v10782_v49  ;;  %v10820_v41 = vpop.f32.mrf.mxu3 }
 0x5c2   : > { %7389 = vmatmul.msk.f32.gmra.mxu2 %vm4483_vm0, %v5256_v55 }
 0x5c3   : > { %7402 = vmatmul.msk.f32.gmra.mxu3 %vm4483_vm0, %v5359_v22  ;;  %v10822_v55 = vpop.f32.mrf.mxu2 }
 0x5c4   : > { %7379 = vmatmul.msk.f32.gmra.mxu1 %vm4483_vm0, %v5156_v56 }
 0x5c9   : > { %7364 = vmatmul.msk.f32.gmra.mxu0 %vm4483_vm0, %v5051_v26  ;;  %v10830_v56 = vpop.f32.mrf.mxu3 }
 0x5ca   : > { %7390 = vmatmul.msk.f32.gmra.mxu2 %vm4483_vm0, %v5257_v57 }
 0x5cb   : > { %7403 = vmatmul.msk.f32.gmra.mxu3 %vm4483_vm0, %v5360_v28 }
 0x5cc   : > { %7422 = vmatmul.msk.f32.vlgmr.msrb.gmra.mxu1 %vm4483_vm0, %v5559_v44  ;;  %v5465_v44 = vld [vmem:[#allocation3 + $0x50] sm:$0xff] }
 0x5d1   : > { %7365 = vmatmul.msk.f32.gmra.mxu0 %vm4483_vm0, %v5052_v13  ;;  %v10840_v28 = vpop.f32.mrf.mxu3 }
 0x5d2   : > { %7391 = vmatmul.msk.f32.gmra.mxu2 %vm4483_vm0, %v5258_v8  ;;  %12337 = vst [vmem:[#allocation59_spill] sm:$0xff] %v10840_v28 }
 0x5d3   : > { %7404 = vmatmul.msk.f32.gmra.mxu3 %vm4483_vm0, %v5361_v14 }
 0x5d4   : > { %7423 = vmatmul.msk.f32.gmra.mxu1 %vm4483_vm0, %v5560_v54 }
 0x5d9   : > { %7366 = vmatmul.msk.f32.gmra.mxu0 %vm4483_vm0, %v5053_v58  ;;  %v10847_v8 = vpop.f32.mrf.mxu3 }
 0x5da   : > { %7392 = vmatmul.msk.f32.gmra.mxu2 %vm4483_vm0, %v5259_v0  ;;  %12339 = vst [vmem:[#allocation248_spill] sm:$0xff] %v10847_v8 }
 0x5db   : > { %7405 = vmatmul.msk.f32.gmra.mxu3 %vm4483_vm0, %v5362_v27 }
 0x5dc   : > { %7424 = vmatmul.msk.f32.gmra.mxu1 %vm4483_vm0, %v5561_v63 }
 0x5e1   : > { %7409 = vmatmul.msk.f32.vlgmr.msra.gmra.mxu0 %vm4483_vm0, %v5456_v5 }
 0x5e4   : > { %7425 = vmatmul.msk.f32.gmra.mxu1 %vm4483_vm0, %v5562_v45 }
 0x5e9   : > { %v10768_v42 = vpop.f32.mrf.mxu1  ;;  %7410 = vmatmul.msk.f32.gmra.mxu0 %vm4483_vm0, %v5457_v19 }
 0x5ec   : > { %7426 = vmatmul.msk.f32.gmra.mxu1 %vm4483_vm0, %v10370_v20  ;;  %v4752_v20 = vpop.f32.mrf.mxu0 }
 0x5f1   : > { %v10775_v46 = vpop.f32.mrf.mxu1  ;;  %7411 = vmatmul.msk.f32.gmra.mxu0 %vm4483_vm0, %v5458_v38 }
 0x5f4   : > { %7427 = vmatmul.msk.f32.gmra.mxu1 %vm4483_vm0, %v10477_v4 }
 0x5f9   : > { %v10784_v48 = vpop.f32.mrf.mxu1  ;;  %7412 = vmatmul.msk.f32.gmra.mxu0 %vm4483_vm0, %v5459_v33  ;;  %v4833_v33 = vadd.f32 %v10762_v15, %v4752_v20  ;;  %v4812_v15 = vadd.f32 %v10710_v7, %v10736_v31  ;;  %v5792_v7 = vld [vmem:[%s11805_s9 + $0x10] sm:$0xf] }
 0x5fa   : > { %7441 = vmatpush.msk.msra.mxu3 %vm5817_vm4, %v5792_v7 }
 0x5fc   : > { %7428 = vmatmul.msk.f32.gmra.mxu1 %vm4483_vm0, %v10576_v9  ;;  %v7715_v9 = vld [vmem:[#allocation3 + $0x30] sm:$0xff] }
 0x601   : > { %v10791_v50 = vpop.f32.mrf.mxu1  ;;  %7413 = vmatmul.msk.f32.gmra.mxu0 %vm4483_vm0, %v5460_v43 }
 0x604   : > { %7429 = vmatmul.msk.f32.gmra.mxu1 %vm4483_vm0, %v10645_v3  ;;  %v5568_v3 = vld [vmem:[#allocation3 + $0x51] sm:$0xff] }
 0x606   : > { %v4755_v4 = vpop.f32.mrf.mxu0 }
 0x609   : > { %v10800_v18 = vpop.f32.mrf.mxu1  ;;  %7414 = vmatmul.msk.f32.gmra.mxu0 %vm4483_vm0, %v7715_v9 }
 0x60c   : > { %7430 = vmatmul.msk.f32.gmra.mxu1 %vm4483_vm0, %v10683_v35 }
 0x60e   : > { %v5107_v21 = vpop.f32.mrf.mxu0 }
 0x611   : > { %v10809_v59 = vpop.f32.mrf.mxu1  ;;  %7415 = vmatmul.msk.f32.gmra.mxu0 %vm4483_vm0, %v10479_v23  ;;  %v10832_v23 = vpop.f32.mrf.mxu2 }
 0x614   : > { %7431 = vmatmul.msk.f32.gmra.mxu1 %vm4483_vm0, %v5568_v3  ;;  %v4809_v3 = vadd.f32 %v10704_v25, %v10728_v37  ;;  %v4932_v25 = vadd.f32 %v10786_v16, %v4812_v15 }
 0x616   : > { %v5110_v11 = vpop.f32.mrf.mxu0  ;;  %v5035_v31 = vadd.f32 %v10793_v10, %v4932_v25  ;;  %v10887_v10 = vld [vmem:[%s12343_s6] ss:$0 sm:$0xff]  ;;  %s593_s6 = sand.u32 1, %s7770_s30  }
 0x617   : > { %s594_s22 = scalar_lea.vmem [#allocation8], %s593_s6  ;;  %s7213_s25 = scalar_lea.sflag [#allocation9], %s593_s6 }
 0x618   : > { %v5138_v16 = vadd.f32 %v5110_v11, %v5035_v31  ;;  %s7223_s24 = sshll.u32 %s594_s22, 4  ;;  %s7224_s24 = int_to_ptr.vmem [resolvable:$true] %s7223_s24 }
 0x619   : > { %v10818_v62 = vpop.f32.mrf.mxu1  ;;  %7416 = vmatmul.msk.f32.gmra.mxu0 %vm4483_vm0, %v10578_v12  ;;  %v10842_v13 = vpop.f32.mrf.mxu2 }
 0x61a   : > { %12338 = vst [vmem:[#allocation79_spill] sm:$0xff] %v10842_v13  ;;  %v4931_v13 = vadd.f32 %v10777_v39, %v4809_v3 }
 0x61c   : > { %v5034_v49 = vadd.f32 %v10775_v46, %v4931_v13  ;;  %v7434_v46 = vld [vmem:[%s11805_s9 + $0x28] sm:$0xf]  ;;  %v5241_v13 = vadd.f32 %v10791_v50, %v5138_v16 }
 0x61d   : > { %7435 = vmatpush.msk.msra.mxu2 %vm5817_vm4, %v7434_v46 }
 0x61e   : > { %v10826_v35 = vpop.f32.mrf.mxu0  ;;  %v5137_v20 = vadd.f32 %v5107_v21, %v5034_v49 }
 0x621   : > { %v10828_v22 = vpop.f32.mrf.mxu1  ;;  %7417 = vmatmul.msk.f32.gmra.mxu0 %vm4483_vm0, %v10647_v61  ;;  %v4925_v54 = vpop.f32.mrf.mxu2 }
 0x622   : > { %v5028_v61 = vpop.f32.mrf.mxu3  ;;  %v4939_v43 = vadd.f32 %v4925_v54, %v4833_v33  ;;  %v5240_v33 = vadd.f32 %v10784_v48, %v5137_v20  ;;  %v4815_v48 = vadd.f32 %v10716_v47, %v10744_v40  ;;  %v4818_v40 = vadd.f32 %v10722_v36, %v10752_v51 }
 0x624   : > { %v4934_v50 = vadd.f32 %v10804_v2, %v4818_v40  ;;  %v10905_v2 = vld [vmem:[%s12345_s8] ss:$0 sm:$0xff] }
 0x626   : > { %v10836_v26 = vpop.f32.mrf.mxu0  ;;  %v5037_v36 = vadd.f32 %v10811_v30, %v4934_v50 }
 0x628   : > { %v5140_v15 = vadd.f32 %v10836_v26, %v5037_v36 }
 0x629   : > { %v10838_v57 = vpop.f32.mrf.mxu1  ;;  %7418 = vmatmul.msk.f32.gmra.mxu0 %vm4483_vm0, %v5465_v44  ;;  %v4928_v0 = vpop.f32.mrf.mxu2  ;;  %v5042_v44 = vadd.f32 %v5028_v61, %v4939_v43 }
 0x62a   : > { %12336 = vst [vmem:[#allocation20_spill] sm:$0xff] %v10838_v57  ;;  %v5031_v5 = vpop.f32.mrf.mxu3 }
 0x62e   : > { %v10845_v12 = vpop.f32.mrf.mxu0 }
 0x631   : > { %v10849_v14 = vpop.f32.mrf.mxu1  ;;  %v5313_v45 = vpop.f32.mrf.mxu2 }
 0x632   : > { %12340 = vst [vmem:[#allocation80_spill] sm:$0xff] %v10849_v14  ;;  %v5416_v9 = vpop.f32.mrf.mxu3 }
 0x636   : > { %v10851_v58 = vpop.f32.mrf.mxu0 }
 0x639   : > { %v5234_v27 = vpop.f32.mrf.mxu1  ;;  %v5316_v14 = vpop.f32.mrf.mxu2 }
 0x63a   : > { %v5419_v54 = vpop.f32.mrf.mxu3 }
 0x63e   : > { %v10853_v63 = vpop.f32.mrf.mxu0 }
 0x63f   : > { %12341 = vst [vmem:[#allocation101_spill] sm:$0xff] %v10853_v63  ;;  %v4836_v63 = vadd.f32 %v10768_v42, %v4755_v4  ;;  %v4933_v4 = vadd.f32 %v10795_v34, %v4815_v48 }
 0x641   : > { %v5237_v19 = vpop.f32.mrf.mxu1  ;;  %v4940_v28 = vadd.f32 %v4928_v0, %v4836_v63  ;;  %v5319_v39 = vpop.f32.mrf.mxu2  ;;  %v5344_v63 = vadd.f32 %v5316_v14, %v5241_v13 }
 0x643   : > { %v5043_v37 = vadd.f32 %v5031_v5, %v4940_v28 }
 0x646   : > { %v10855_v38 = vpop.f32.mrf.mxu0 }
 0x647   : > { %12342 = vst [vmem:[#allocation89_spill] sm:$0xff] %v10855_v38 }
 0x649   : > { %v5622_v8 = vpop.f32.mrf.mxu1  ;;  %v5322_v5 = vpop.f32.mrf.mxu2 }
 0x64e   : > { %v5131_v57 = vpop.f32.mrf.mxu0 }
 0x64f   : > { %v5145_v17 = vadd.f32 %v5131_v57, %v5042_v44  ;;  %v5422_v57 = vpop.f32.mrf.mxu3 }
 0x651   : > { %v10863_v38 = vadd.f32 %v5234_v27, %v5145_v17  ;;  %v5625_v42 = vpop.f32.mrf.mxu1  ;;  %v5343_v17 = vadd.f32 %v5313_v45, %v5240_v33  ;;  %v5036_v27 = vadd.f32 %v10802_v29, %v4933_v4  ;;  %v5325_v20 = vpop.f32.mrf.mxu2 }
 0x653   : > { %v5446_v21 = vadd.f32 %v5416_v9, %v5343_v17  ;;  %v5139_v34 = vadd.f32 %v10826_v35, %v5036_v27 }
 0x655   : > { %v5242_v3 = vadd.f32 %v10800_v18, %v5139_v34  ;;  %v4821_v18 = vadd.f32 %v10730_v53, %v10760_v60  ;;  %v7433_v53 = vld [vmem:[%s11805_s9 + $0x20] sm:$0xff]  ;;  %v5791_v60 = vld [vmem:[%s11805_s9 + $0x8] sm:$0xff] }
 0x656   : > { %v5134_v61 = vpop.f32.mrf.mxu0  ;;  %5835 = vmatpush.msra.mxu2 %v7433_v53  ;;  %5885 = vmatpush.msra.mxu3 %v5791_v60 }
 0x657   : > { %v5146_v43 = vadd.f32 %v5134_v61, %v5043_v37  ;;  %v5425_v29 = vpop.f32.mrf.mxu3  ;;  %v5345_v51 = vadd.f32 %v5319_v39, %v5242_v3  ;;  %v4935_v30 = vadd.f32 %v10813_v32, %v4821_v18 }
 0x659   : > { %v10876_v49 = vadd.f32 %v5237_v19, %v5146_v43  ;;  %v5628_v47 = vpop.f32.mrf.mxu1  ;;  %v5447_v19 = vadd.f32 %v5419_v54, %v5344_v63  ;;  %v5448_v61 = vadd.f32 %v5422_v57, %v5345_v51  ;;  %v5243_v43 = vadd.f32 %v10809_v59, %v5140_v15  ;;  %v5328_v57 = vpop.f32.mrf.mxu2  ;;  %v12347_v51 = vld [vmem:[#allocation50_spill] sm:$0xff] }
 0x65a   : > { %v5038_v32 = vadd.f32 %v10820_v41, %v4935_v30  ;;  %v4824_v59 = vadd.f32 %v10738_v24, %v10766_v6  ;;  %v5790_v41 = vld [vmem:[%s11805_s9] sm:$0xff]  ;;  %v12350_v30 = vld [vmem:[#allocation79_spill] sm:$0xff] }
 0x65b   : > { %v5346_v26 = vadd.f32 %v5322_v5, %v5243_v43  ;;  %5886 = vmatpush.msra.mxu3 %v5790_v41  ;;  %v4827_v5 = vadd.f32 %v10746_v52, %v10773_v1  ;;  %v12346_v1 = vld [vmem:[#allocation59_spill] sm:$0xff]  ;;  %v7465_v43 = vld [vmem:[%s11805_s9 + $0x60] sm:$0xff] }
 0x65c   : > { %v5141_v17 = vadd.f32 %v10845_v12, %v5038_v32  ;;  %v4936_v4 = vadd.f32 %v10822_v55, %v4824_v59 }
 0x65e   : > { %v5519_v28 = vpop.f32.mrf.mxu0  ;;  %v5244_v24 = vadd.f32 %v10818_v62, %v5141_v17  ;;  %v5039_v12 = vadd.f32 %v10830_v56, %v4936_v4  ;;  %v4937_v62 = vadd.f32 %v10832_v23, %v4827_v5  ;;  %v7467_v23 = vld [vmem:[%s11805_s9 + $0x70] sm:$0xf]  ;;  %v12352_v17 = vld [vmem:[#allocation248_spill] sm:$0xff] }
 0x65f   : > { %v5549_v0 = vadd.f32 %v5519_v28, %v5446_v21  ;;  %v5428_v7 = vpop.f32.mrf.mxu3  ;;  %v5449_v21 = vadd.f32 %v5425_v29, %v5346_v26  ;;  %7468 = vmatpush.msk.msrb.mxu0 %vm5817_vm4, %v7467_v23  ;;  %v12351_v26 = vld [vmem:[#allocation20_spill] sm:$0xff] }
 0x660   : > { %v5347_v55 = vadd.f32 %v5325_v20, %v5244_v24  ;;  %v12354_v5 = vld [vmem:[#allocation80_spill] sm:$0xff] }
 0x661   : > { %v5652_v45 = vadd.f32 %v5622_v8, %v5549_v0  ;;  %v10899_v8 = vld [vmem:[%s12344_s7] ss:$0 sm:$0xff]  ;;  %v5631_v37 = vpop.f32.mrf.mxu1  ;;  %s7730_s7 = sshra.s32 %s7226_s20, 4  ;;  %s7731_s7 = int_to_ptr.hbm [resolvable:$true] %s7730_s7 }
 0x662   : > { %s7732_s8 = scalar_lea.hbm %s7731_s7, 1  ;;  %p7737_p0 = scmp.lt.s32.totalorder %s7731_s7, %s11815_s19 }
 0x663   : > { %v5666_v11 = vadd.f32 %v10887_v10, %v5652_v45  ;;  %v5142_v45 = vadd.f32 %v10851_v58, %v5039_v12  ;;  %v5040_v58 = vadd.f32 %v12346_v1, %v4937_v62  ;;  %p7733_p11 = scmp.ne.s32.totalorder %s7731_s7, %s7732_s8  ;;  %p7738_p1 = scmp.lt.s32.totalorder %s7736_s2, %s7732_s8 }
 0x665   : > { %7633 = vtanh.f32 %v5666_v11  ;;  %v5450_v11 = vadd.f32 %v5428_v7, %v5347_v55  ;;  %p7734_p12 = pnand %p7733_p11, %p7919_p5  ;;  %p7739_p2 = por %p7738_p1, %p7737_p0 }
 0x666   : > { %v5522_v9 = vpop.f32.mrf.mxu0 }
 0x667   : > { %v5550_v44 = vadd.f32 %v5522_v9, %v5447_v19  ;;  %v5431_v40 = vpop.f32.mrf.mxu3  ;;  %v5245_v19 = vadd.f32 %v10828_v22, %v5142_v45  ;;  %v5331_v9 = vpop.f32.mrf.mxu2  ;;  %v12349_v22 = vld [vmem:[#allocation101_spill] sm:$0xff]  ;;  %p7735_p13 = pneg %p7734_p12 }
 0x668   : > { %v5143_v18 = vadd.f32 %v12349_v22, %v5040_v58  ;;  %v7458_v22 = vld [vmem:[%s11805_s9 + $0x58] sm:$0xf] }
 0x669   : > { %v5653_v35 = vadd.f32 %v5625_v42, %v5550_v44  ;;  %v5634_v13 = vpop.f32.mrf.mxu1  ;;  %v5348_v44 = vadd.f32 %v5328_v57, %v5245_v19  ;;  %7459 = vmatpush.msk.msrb.mxu3 %vm5817_vm4, %v7458_v22  ;;  %p7740_p3 = pnand %p7739_p2, %p7735_p13 }
 0x66b   : > { %v7634_v14 = vpop.eup %7633  ;;  %v5667_v54 = vadd.f32 %v10887_v10, %v5653_v35  ;;  %v12348_v35 = vld [vmem:[#allocation29_spill] sm:$0xff] }
 0x66c   : > { %v5690_v25 = vmul.f32 %v7634_v14, %v10899_v8  ;;  %v4830_v14 = vadd.f32 %v12348_v35, %v12347_v51 }
 0x66d   : > { %7635 = vtanh.f32 %v5667_v54 }
 0x66e   : > { %v5704_v33 = vadd.f32 %v10905_v2, %v5690_v25  ;;  %v5525_v39 = vpop.f32.mrf.mxu0  ;;  %v7466_v25 = vld [vmem:[%s11805_s9 + $0x68] sm:$0xff] }
 0x66f   : > { %v5551_v42 = vadd.f32 %v5525_v39, %v5448_v61  ;;  %6072 = vmatpush.msrb.mxu0 %v7466_v25  ;;  %v4938_v61 = vadd.f32 %v12350_v30, %v4830_v14  ;;  %v7432_v39 = vld [vmem:[%s11805_s9 + $0x18] sm:$0xff]  ;;  %v5334_v4 = vpop.f32.mrf.mxu2  ;;  %v7449_v14 = vld [vmem:[%s11805_s9 + $0x40] sm:$0xf] }
 0x670   : > { %5715 = vst.msk [vmem:[#allocation4] sm:$0xff] %vm5714_vm5, %v5704_v33  ;;  %v5451_v33 = vadd.f32 %v5431_v40, %v5348_v44  ;;  %5836 = vmatpush.msra.mxu2 %v7432_v39 }
 0x671   : > { %v5654_v46 = vadd.f32 %v5628_v47, %v5551_v42  ;;  %v5637_v52 = vpop.f32.mrf.mxu1  ;;  %v5434_v42 = vpop.f32.mrf.mxu3  ;;  %6073 = vmatpush.msrb.mxu0 %v7465_v43 }
 0x672   : > { %7450 = vmatpush.msk.msrb.mxu2 %vm5817_vm4, %v7449_v14 }
 0x673   : > { %v7636_v31 = vpop.eup %7635  ;;  %v5668_v48 = vadd.f32 %v10887_v10, %v5654_v46  ;;  %v5246_v46 = vadd.f32 %v12351_v26, %v5143_v18 }
 0x674   : > { %v5691_v16 = vmul.f32 %v7636_v31, %v10899_v8 }
 0x675   : > { %7637 = vtanh.f32 %v5668_v48  ;;  %v5041_v48 = vadd.f32 %v12352_v17, %v4938_v61 }
 0x676   : > { %v5705_v28 = vadd.f32 %v10905_v2, %v5691_v16  ;;  %v5528_v0 = vpop.f32.mrf.mxu0  ;;  %v5349_v16 = vadd.f32 %v5331_v9, %v5246_v46 }
 0x677   : > { %v5552_v6 = vadd.f32 %v5528_v0, %v5449_v21  ;;  %v12353_v0 = vld [vmem:[#allocation89_spill] sm:$0xff] }
 0x678   : > { %5716 = vst.msk [vmem:[#allocation4 + $0x8] sm:$0xff] %vm5714_vm5, %v5705_v28  ;;  %v5144_v24 = vadd.f32 %v12353_v0, %v5041_v48  ;;  %v5452_v55 = vadd.f32 %v5434_v42, %v5349_v16 }
 0x679   : > { %v5655_v27 = vadd.f32 %v5631_v37, %v5552_v6  ;;  %v5640_v41 = vpop.f32.mrf.mxu1  ;;  %v5437_v40 = vpop.f32.mrf.mxu3 }
 0x67a   : > { %v5247_v45 = vadd.f32 %v12354_v5, %v5144_v24 }
 0x67b   : > { %v7638_v63 = vpop.eup %7637  ;;  %v5669_v47 = vadd.f32 %v10887_v10, %v5655_v27 }
 0x67c   : > { %v5692_v34 = vmul.f32 %v7638_v63, %v10899_v8 }
 0x67d   : > { %7639 = vtanh.f32 %v5669_v47 }
 0x67e   : > { %v5706_v50 = vadd.f32 %v10905_v2, %v5692_v34  ;;  %v5531_v56 = vpop.f32.mrf.mxu0  ;;  %v5350_v34 = vadd.f32 %v5334_v4, %v5247_v45 }
 0x67f   : > { %v5553_v3 = vadd.f32 %v5531_v56, %v5450_v11  ;;  %v5725_v20 = vld [vmem:[#allocation4] ss:$2 sm:$0xff]  ;;  %v5735_v54 = vld [vmem:[#allocation4 + $0x1] ss:$2 sm:$0xff] }
 0x680   : > { %5717 = vst.msk [vmem:[#allocation4 + $0x10] sm:$0xff] %vm5714_vm5, %v5706_v50  ;;  %v5744_v32 = vmax.f32 %v5725_v20, %v5735_v54  ;;  %v5337_v50 = vpop.f32.mrf.mxu2  ;;  %v5453_v58 = vadd.f32 %v5437_v40, %v5350_v34  ;;  %v7447_v34 = vld [vmem:[%s11805_s9 + $0x30] sm:$0xff] }
 0x681   : > { %v5656_v29 = vadd.f32 %v5634_v13, %v5553_v3  ;;  %v5351_v18 = vadd.f32 %v5337_v50, %v10863_v38  ;;  %v5440_v54 = vpop.f32.mrf.mxu3 }
 0x683   : > { %v7640_v36 = vpop.eup %7639  ;;  %v5670_v15 = vadd.f32 %v10887_v10, %v5656_v29 }
 0x684   : > { %v5693_v37 = vmul.f32 %v7640_v36, %v10899_v8 }
 0x685   : > { %7641 = vtanh.f32 %v5670_v15 }
 0x686   : > { %v5707_v53 = vadd.f32 %v10905_v2, %v5693_v37  ;;  %v5534_v60 = vpop.f32.mrf.mxu0 }
 0x687   : > { %v5554_v7 = vadd.f32 %v5534_v60, %v5451_v33  ;;  %v5750_v31 = vld [vmem:[#allocation4 + $0x2] ss:$2 sm:$0xff]  ;;  %v5765_v57 = vld [vmem:[#allocation4 + $0x3] ss:$2 sm:$0xff]  ;;  %v5454_v33 = vadd.f32 %v5440_v54, %v5351_v18 }
 0x688   : > { %5718 = vst.msk [vmem:[#allocation4 + $0x18] sm:$0xff] %vm5714_vm5, %v5707_v53  ;;  %v5759_v59 = vmax.f32 %v5744_v32, %v5750_v31  ;;  %v5340_v39 = vpop.f32.mrf.mxu2 }
 0x689   : > { %v5657_v21 = vadd.f32 %v5637_v52, %v5554_v7  ;;  %v5643_v52 = vpop.f32.mrf.mxu1  ;;  %v5352_v60 = vadd.f32 %v5340_v39, %v10876_v49  ;;  %v5443_v16 = vpop.f32.mrf.mxu3  ;;  %v7448_v49 = vld [vmem:[%s11805_s9 + $0x38] sm:$0xff] }
 0x68a   : > { %v5774_v28 = vmax.f32 %v5759_v59, %v5765_v57  ;;  %5944 = vmatpush.msrb.mxu2 %v7448_v49  ;;  %v7457_v57 = vld [vmem:[%s11805_s9 + $0x50] sm:$0xff] }
 0x68b   : > { %v7642_v13 = vpop.eup %7641  ;;  %v5671_v6 = vadd.f32 %v10887_v10, %v5657_v21  ;;  %v5455_v21 = vadd.f32 %v5443_v16, %v5352_v60  ;;  %6008 = vmatpush.msrb.mxu3 %v7457_v57  ;;  %v6168_v16 = vld [vmem:[%s11809_s13 + $0x70] sm:$0xff] }
 0x68c   : > { %v5694_v12 = vmul.f32 %v7642_v13, %v10899_v8  ;;  %5779 = vst.msk [vmem:[#allocation5] sm:$0xff] %vm5714_vm5, %v5774_v28  ;;  %5945 = vmatpush.msrb.mxu2 %v7447_v34 }
 0x68d   : > { %7643 = vtanh.f32 %v5671_v6 }
 0x68e   : > { %v5708_v27 = vadd.f32 %v10905_v2, %v5694_v12  ;;  %v5537_v63 = vpop.f32.mrf.mxu0 }
 0x68f   : > { %v5555_v47 = vadd.f32 %v5537_v63, %v5452_v55  ;;  %v5727_v9 = vld [vmem:[#allocation4 + $0x10] ss:$2 sm:$0xff]  ;;  %v5737_v3 = vld [vmem:[#allocation4 + $0x11] ss:$2 sm:$0xff] }
 0x690   : > { %5719 = vst.msk [vmem:[#allocation4 + $0x20] sm:$0xff] %vm5714_vm5, %v5708_v27  ;;  %v5745_v23 = vmax.f32 %v5727_v9, %v5737_v3 }
 0x691   : > { %v5658_v62 = vadd.f32 %v5640_v41, %v5555_v47  ;;  %v5646_v43 = vpop.f32.mrf.mxu1 }
 0x693   : > { %v7644_v11 = vpop.eup %7643  ;;  %v5672_v56 = vadd.f32 %v10887_v10, %v5658_v62  ;;  %v5785_v19 = vld [vmem:[#allocation5] sm:$0xff] }
 0x694   : > { %v5695_v1 = vmul.f32 %v7644_v11, %v10899_v8  ;;  %7442 = vmatmul.msk.f32.vlgmr.msra.gmra.mxu3 %vm5714_vm5, %v5785_v19  ;;  %v7456_v62 = vld [vmem:[%s11805_s9 + $0x48] sm:$0xff] }
 0x695   : > { %7645 = vtanh.f32 %v5672_v56  ;;  %6009 = vmatpush.msrb.mxu3 %v7456_v62  ;;  %v11087_v62 = vld [vmem:[%s11806_s10] ss:$0 sm:$0xff] }
 0x696   : > { %v5709_v44 = vadd.f32 %v10905_v2, %v5695_v1  ;;  %v5540_v29 = vpop.f32.mrf.mxu0 }
 0x697   : > { %v5556_v36 = vadd.f32 %v5540_v29, %v5453_v58  ;;  %v5752_v51 = vld [vmem:[#allocation4 + $0x12] ss:$2 sm:$0xff]  ;;  %v5767_v20 = vld [vmem:[#allocation4 + $0x13] ss:$2 sm:$0xff] }
 0x698   : > { %5720 = vst.msk [vmem:[#allocation4 + $0x28] sm:$0xff] %vm5714_vm5, %v5709_v44  ;;  %v5760_v35 = vmax.f32 %v5745_v23, %v5752_v51 }
 0x699   : > { %v5659_v15 = vadd.f32 %v5643_v52, %v5556_v36  ;;  %v5649_v6 = vpop.f32.mrf.mxu1 }
 0x69a   : > { %v5775_v25 = vmax.f32 %v5760_v35, %v5767_v20 }
 0x69b   : > { %v7646_v37 = vpop.eup %7645  ;;  %v5673_v30 = vadd.f32 %v10887_v10, %v5659_v15 }
 0x69c   : > { %v5696_v61 = vmul.f32 %v7646_v37, %v10899_v8  ;;  %5780 = vst.msk [vmem:[#allocation5 + $0x8] sm:$0xff] %vm5714_vm5, %v5775_v25 }
 0x69d   : > { %7647 = vtanh.f32 %v5673_v30 }
 0x69e   : > { %v5710_v38 = vadd.f32 %v10905_v2, %v5696_v61  ;;  %v5543_v42 = vpop.f32.mrf.mxu0 }
 0x69f   : > { %v5557_v53 = vadd.f32 %v5543_v42, %v5454_v33  ;;  %v5729_v26 = vld [vmem:[#allocation4 + $0x20] ss:$2 sm:$0xff]  ;;  %v5739_v46 = vld [vmem:[#allocation4 + $0x21] ss:$2 sm:$0xff] }
 0x6a0   : > { %5721 = vst.msk [vmem:[#allocation4 + $0x30] sm:$0xff] %vm5714_vm5, %v5710_v38  ;;  %v5746_v13 = vmax.f32 %v5729_v26, %v5739_v46 }
 0x6a1   : > { %v5660_v32 = vadd.f32 %v5646_v43, %v5557_v53 }
 0x6a3   : > { %v7648_v7 = vpop.eup %7647  ;;  %v5674_v31 = vadd.f32 %v10887_v10, %v5660_v32  ;;  %v5793_v59 = vld [vmem:[#allocation5 + $0x1] sm:$0xff] }
 0x6a4   : > { %v5786_v17 = vld [vmem:[#allocation5 + $0x8] sm:$0xff]  ;;  %v5697_v4 = vmul.f32 %v7648_v7, %v10899_v8  ;;  %7436 = vmatmul.msk.f32.vlgmr.msra.gmra.mxu2 %vm5714_vm5, %v5793_v59 }
 0x6a5   : > { %v6031_v48 = vld [vmem:[#allocation5 + $0x4] sm:$0xff]  ;;  %7443 = vmatmul.msk.f32.gmra.mxu3 %vm5714_vm5, %v5786_v17  ;;  %7649 = vtanh.f32 %v5674_v31  ;;  %v6170_v31 = vld [vmem:[%s11809_s13 + $0x80] sm:$0xff] }
 0x6a6   : > { %7469 = vmatmul.msk.f32.vlgmr.msrb.gmra.mxu0 %vm5714_vm5, %v6031_v48  ;;  %v5711_v41 = vadd.f32 %v10905_v2, %v5697_v4  ;;  %v5546_v28 = vpop.f32.mrf.mxu0  ;;  %v5967_v61 = vld [vmem:[#allocation5 + $0x3] sm:$0xff] }
 0x6a7   : > { %v5558_v0 = vadd.f32 %v5546_v28, %v5455_v21  ;;  %v5754_v24 = vld [vmem:[#allocation4 + $0x22] ss:$2 sm:$0xff]  ;;  %v5769_v27 = vld [vmem:[#allocation4 + $0x23] ss:$2 sm:$0xff]  ;;  %v5903_v39 = vld [vmem:[#allocation5 + $0x2] sm:$0xff] }
 0x6a8   : > { %5722 = vst.msk [vmem:[#allocation4 + $0x38] sm:$0xff] %vm5714_vm5, %v5711_v41  ;;  %v5761_v12 = vmax.f32 %v5746_v13, %v5754_v24  ;;  %v6172_v7 = vld [vmem:[%s11809_s13 + $0x90] sm:$0xff]  ;;  %v6161_v13 = vld [vmem:[%s11809_s13 + $0x40] sm:$0xff] }
 0x6a9   : > { %v5661_v55 = vadd.f32 %v5649_v6, %v5558_v0  ;;  %6188 = vmatpush.msra.mxu1 %v6172_v7  ;;  %6231 = vmatpush.msra.mxu3 %v6161_v13  ;;  %v6269_v6 = vld [vmem:[%s11809_s13 + $0xe0] sm:$0xff]  ;;  %v6318_v13 = vld [vmem:[%s11809_s13 + $0xf8] sm:$0xff] }
 0x6aa   : > { %v5776_v63 = vmax.f32 %v5761_v12, %v5769_v27  ;;  %v6166_v12 = vld [vmem:[%s11809_s13 + $0x60] sm:$0xff]  ;;  %6285 = vmatpush.msra.mxu2 %v6269_v6 }
 0x6ab   : > { %v7650_v5 = vpop.eup %7649  ;;  %v5675_v45 = vadd.f32 %v10887_v10, %v5661_v55  ;;  %6189 = vmatpush.msra.mxu1 %v6170_v31  ;;  %v6159_v55 = vld [vmem:[%s11809_s13 + $0x30] sm:$0xff] }
 0x6ac   : > { %v5698_v47 = vmul.f32 %v7650_v5, %v10899_v8  ;;  %5781 = vst.msk [vmem:[#allocation5 + $0x10] sm:$0xff] %vm5714_vm5, %v5776_v63  ;;  %6232 = vmatpush.msra.mxu3 %v6159_v55 }
 0x6ad   : > { %7651 = vtanh.f32 %v5675_v45  ;;  %6190 = vmatpush.msra.mxu1 %v6168_v16  ;;  %v6173_v45 = vld [vmem:[%s11809_s13 + $0x98] sm:$0xff] }
 0x6ae   : > { %v5712_v40 = vadd.f32 %v10905_v2, %v5698_v47  ;;  %6208 = vmatpush.msra.mxu0 %v6173_v45 }
 0x6af   : > { %v5731_v10 = vld [vmem:[#allocation4 + $0x30] ss:$2 sm:$0xff]  ;;  %v5741_v11 = vld [vmem:[#allocation4 + $0x31] ss:$2 sm:$0xff]  ;;  %6191 = vmatpush.msra.mxu1 %v6166_v12  ;;  %v6485_v12 = vld [vmem:[%s11809_s13 + $0x1e0] sm:$0xff] }
 0x6b0   : > { %5723 = vst.msk [vmem:[#allocation4 + $0x40] sm:$0xff] %vm5714_vm5, %v5712_v40  ;;  %v5747_v1 = vmax.f32 %v5731_v10, %v5741_v11  ;;  %v6267_v40 = vld [vmem:[%s11809_s13 + $0xd0] sm:$0xff]  ;;  %v6157_v10 = vld [vmem:[%s11809_s13 + $0x20] sm:$0xff]  ;;  %v6171_v11 = vld [vmem:[%s11809_s13 + $0x88] sm:$0xff] }
 0x6b1   : > { %6286 = vmatpush.msra.mxu2 %v6267_v40  ;;  %6233 = vmatpush.msra.mxu3 %v6157_v10 }
 0x6b2   : > { %6209 = vmatpush.msra.mxu0 %v6171_v11 }
 0x6b3   : > { %v7652_v50 = vpop.eup %7651  ;;  %v5794_v56 = vld [vmem:[#allocation5 + $0x9] sm:$0xff] }
 0x6b4   : > { %v5787_v19 = vld [vmem:[#allocation5 + $0x10] sm:$0xff]  ;;  %v5699_v3 = vmul.f32 %v7652_v50, %v10899_v8  ;;  %7437 = vmatmul.msk.f32.gmra.mxu2 %vm5714_vm5, %v5794_v56  ;;  %v6265_v56 = vld [vmem:[%s11809_s13 + $0xc0] sm:$0xff] }
 0x6b5   : > { %v6032_v9 = vld [vmem:[#allocation5 + $0xc] sm:$0xff]  ;;  %7444 = vmatmul.msk.f32.gmra.mxu3 %vm5714_vm5, %v5787_v19  ;;  %6287 = vmatpush.msra.mxu2 %v6265_v56 }
 0x6b6   : > { %7470 = vmatmul.msk.f32.gmra.mxu0 %vm5714_vm5, %v6032_v9  ;;  %v5713_v52 = vadd.f32 %v10905_v2, %v5699_v3  ;;  %v5968_v43 = vld [vmem:[#allocation5 + $0xb] sm:$0xff] }
 0x6b7   : > { %v5756_v58 = vld [vmem:[#allocation4 + $0x32] ss:$2 sm:$0xff]  ;;  %v5771_v29 = vld [vmem:[#allocation4 + $0x33] ss:$2 sm:$0xff] }
 0x6b8   : > { %5724 = vst.msk [vmem:[#allocation4 + $0x48] sm:$0xff] %vm5714_vm5, %v5713_v52  ;;  %v5762_v44 = vmax.f32 %v5747_v1, %v5756_v58  ;;  %v5904_v38 = vld [vmem:[#allocation5 + $0xa] sm:$0xff] }
 0x6b9   : > { %v6155_v9 = vld [vmem:[%s11809_s13 + $0x10] sm:$0xff]  ;;  %v6169_v3 = vld [vmem:[%s11809_s13 + $0x78] sm:$0xff] }
 0x6ba   : > { %v5777_v23 = vmax.f32 %v5762_v44, %v5771_v29  ;;  %v6164_v52 = vld [vmem:[%s11809_s13 + $0x50] sm:$0xff]  ;;  %6234 = vmatpush.msra.mxu3 %v6155_v9  ;;  %6210 = vmatpush.msra.mxu0 %v6169_v3  ;;  %v6167_v29 = vld [vmem:[%s11809_s13 + $0x68] sm:$0xff] }
 0x6bb   : > { %v6263_v1 = vld [vmem:[%s11809_s13 + $0xb0] sm:$0xff]  ;;  %6192 = vmatpush.msra.mxu1 %v6164_v52 }
 0x6bc   : > { %5782 = vst.msk [vmem:[#allocation5 + $0x18] sm:$0xff] %vm5714_vm5, %v5777_v23  ;;  %6288 = vmatpush.msra.mxu2 %v6263_v1  ;;  %v6153_v23 = vld [vmem:[%s11809_s13] sm:$0xff]  ;;  %6211 = vmatpush.msra.mxu0 %v6167_v29 }
 0x6bd   : > { %6235 = vmatpush.msra.mxu3 %v6153_v23 }
 0x6bf   : > { %v5733_v36 = vld [vmem:[#allocation4 + $0x40] ss:$2 sm:$0x7f]  ;;  %v5743_v51 = vld [vmem:[#allocation4 + $0x41] ss:$2 sm:$0x7f] }
 0x6c0   : > { %v5748_v8 = vmax.f32 %v5733_v36, %v5743_v51  ;;  %v5758_v35 = vld [vmem:[#allocation4 + $0x42] ss:$2 sm:$0x7f]  ;;  %v5773_v22 = vld [vmem:[#allocation4 + $0x43] ss:$2 sm:$0x7f] }
 0x6c1   : > { %v6162_v36 = vld [vmem:[%s11809_s13 + $0x48] sm:$0xff] }
 0x6c2   : > { %v5763_v14 = vmax.f32 %v5748_v8, %v5758_v35  ;;  %v6261_v8 = vld [vmem:[%s11809_s13 + $0xa0] sm:$0xff]  ;;  %v6270_v35 = vld [vmem:[%s11809_s13 + $0xe8] sm:$0xff]  ;;  %6251 = vmatpush.msrb.mxu1 %v6162_v36 }
 0x6c3   : > { %v5795_v18 = vld [vmem:[#allocation5 + $0x11] sm:$0xff]  ;;  %6289 = vmatpush.msra.mxu2 %v6261_v8 }
 0x6c4   : > { %v5788_v15 = vld [vmem:[#allocation5 + $0x18] sm:$0xff]  ;;  %7438 = vmatmul.msk.f32.gmra.mxu2 %vm5714_vm5, %v5795_v18  ;;  %v5778_v2 = vmax.f32 %v5763_v14, %v5773_v22  ;;  %v6165_v22 = vld [vmem:[%s11809_s13 + $0x58] sm:$0xff] }
 0x6c5   : > { %v6033_v20 = vld [vmem:[#allocation5 + $0x14] sm:$0xff]  ;;  %7445 = vmatmul.msk.f32.gmra.mxu3 %vm5714_vm5, %v5788_v15  ;;  %6212 = vmatpush.msra.mxu0 %v6165_v22 }
 0x6c6   : > { %7471 = vmatmul.msk.f32.gmra.mxu0 %vm5714_vm5, %v6033_v20  ;;  %5784 = vst.msk [vmem:[#allocation5 + $0x20] sm:$0x7f] %vm5783_vm6, %v5778_v2  ;;  %v5969_v42 = vld [vmem:[#allocation5 + $0x13] sm:$0xff] }
 0x6c7   : > { %v5905_v53 = vld [vmem:[#allocation5 + $0x12] sm:$0xff] }
 0x6c8   : > { %v6160_v18 = vld [vmem:[%s11809_s13 + $0x38] sm:$0xff] }
 0x6c9   : > { %v6326_v15 = vld [vmem:[%s11809_s13 + $0x138] sm:$0xff]  ;;  %6252 = vmatpush.msrb.mxu1 %v6160_v18  ;;  %v6325_v18 = vld [vmem:[%s11809_s13 + $0x130] sm:$0xff] }
 0x6ca   : > { %v6268_v2 = vld [vmem:[%s11809_s13 + $0xd8] sm:$0xff] }
 0x6cd   : > { %v5796_v54 = vld [vmem:[#allocation5 + $0x19] sm:$0xff]  ;;  %v5797_v30 = vld [vmem:[#allocation5 + $0x21] sm:$0x7]  ;;  %v6035_v33 = vld [vmem:[#allocation5 + $0x24] sm:$0x7] }
 0x6ce   : > { %v5789_v25 = vld [vmem:[#allocation5 + $0x20] sm:$0x7]  ;;  %7439 = vmatmul.msk.f32.gmra.mxu2 %vm5714_vm5, %v5796_v54  ;;  %v5971_v26 = vld [vmem:[#allocation5 + $0x23] sm:$0x7]  ;;  %v6493_v54 = vld [vmem:[%s11809_s13 + $0x220] sm:$0xff] }
 0x6cf   : > { %v6034_v37 = vld [vmem:[#allocation5 + $0x1c] sm:$0xff]  ;;  %7446 = vmatmul.msk.f32.gmra.mxu3 %vm5714_vm5, %v5789_v25  ;;  %6509 = vmatpush.msrb.mxu0 %v6493_v54 }
 0x6d0   : > { %7472 = vmatmul.msk.f32.gmra.mxu0 %vm5714_vm5, %v6034_v37  ;;  %v5970_v60 = vld [vmem:[#allocation5 + $0x1b] sm:$0xff] }
 0x6d1   : > { %v5906_v32 = vld [vmem:[#allocation5 + $0x1a] sm:$0xff]  ;;  %v5907_v46 = vld [vmem:[#allocation5 + $0x22] sm:$0x7] }
 0x6d2   : > { %v6158_v37 = vld [vmem:[%s11809_s13 + $0x28] sm:$0xff] }
 0x6d3   : > { %6253 = vmatpush.msrb.mxu1 %v6158_v37 }
 0x6d6   : > { %7440 = vmatmul.msk.f32.gmra.mxu2 %vm5714_vm5, %v5797_v30  ;;  %v6324_v30 = vld [vmem:[%s11809_s13 + $0x128] sm:$0xff] }
 0x6d7   : > { %7460 = vmatmul.msk.f32.vlgmr.msrb.gmra.mxu3 %vm5714_vm5, %v5967_v61  ;;  %v11150_v61 = vld [vmem:[%s11807_s11] ss:$0 sm:$0xff] }
 0x6d8   : > { %7473 = vmatmul.msk.f32.gmra.mxu0 %vm5714_vm5, %v6035_v33  ;;  %6305 = vmatpush.msrb.mxu3 %v6270_v35  ;;  %v6266_v33 = vld [vmem:[%s11809_s13 + $0xc8] sm:$0xff] }
 0x6da   : > { %6306 = vmatpush.msrb.mxu3 %v6268_v2 }
 0x6dc   : > { %6307 = vmatpush.msrb.mxu3 %v6266_v33  ;;  %v6379_v33 = vld [vmem:[%s11809_s13 + $0x170] sm:$0xff] }
 0x6de   : > { %7451 = vmatmul.msk.f32.vlgmr.msrb.gmra.mxu2 %vm5714_vm5, %v5903_v39  ;;  %v6491_v39 = vld [vmem:[%s11809_s13 + $0x210] sm:$0xff] }
 0x6df   : > { %7461 = vmatmul.msk.f32.gmra.mxu3 %vm5714_vm5, %v5968_v43  ;;  %6361 = vmatpush.msrb.mxu2 %v6326_v15  ;;  %v6381_v15 = vld [vmem:[%s11809_s13 + $0x180] sm:$0xff] }
 0x6e0   : > { %6510 = vmatpush.msrb.mxu0 %v6491_v39 }
 0x6e1   : > { %6362 = vmatpush.msrb.mxu2 %v6324_v30  ;;  %v6323_v30 = vld [vmem:[%s11809_s13 + $0x120] sm:$0xff] }
 0x6e6   : > { %7452 = vmatmul.msk.f32.gmra.mxu2 %vm5714_vm5, %v5904_v38  ;;  %v6156_v38 = vld [vmem:[%s11809_s13 + $0x18] sm:$0xff] }
 0x6e7   : > { %7462 = vmatmul.msk.f32.gmra.mxu3 %vm5714_vm5, %v5969_v42  ;;  %v6322_v42 = vld [vmem:[%s11809_s13 + $0x118] sm:$0xff]  ;;  %6254 = vmatpush.msrb.mxu1 %v6156_v38  ;;  %v6603_v38 = vld [vmem:[%s11809_s13 + $0x2b0] sm:$0xff] }
 0x6e8   : > { %6363 = vmatpush.msrb.mxu2 %v6322_v42  ;;  %v6321_v42 = vld [vmem:[%s11809_s13 + $0x110] sm:$0xff] }
 0x6ee   : > { %7453 = vmatmul.msk.f32.gmra.mxu2 %vm5714_vm5, %v5905_v53  ;;  %v11167_v53 = vld [vmem:[%s11808_s12] ss:$0 sm:$0xff] }
 0x6ef   : > { %7463 = vmatmul.msk.f32.gmra.mxu3 %vm5714_vm5, %v5970_v60 }
 0x6f6   : > { %7454 = vmatmul.msk.f32.gmra.mxu2 %vm5714_vm5, %v5906_v32  ;;  %v6264_v32 = vld [vmem:[%s11809_s13 + $0xb8] sm:$0xff] }
 0x6f7   : > { %7464 = vmatmul.msk.f32.gmra.mxu3 %vm5714_vm5, %v5971_v26  ;;  %v6489_v26 = vld [vmem:[%s11809_s13 + $0x200] sm:$0xff] }
 0x6f8   : > { %6308 = vmatpush.msrb.mxu3 %v6264_v32  ;;  %6511 = vmatpush.msrb.mxu0 %v6489_v26  ;;  %v6319_v32 = vld [vmem:[%s11809_s13 + $0x100] sm:$0xff]  ;;  %v6433_v26 = vld [vmem:[%s11809_s13 + $0x1b0] sm:$0xff] }
 0x6fe   : > { %7455 = vmatmul.msk.f32.gmra.mxu2 %vm5714_vm5, %v5907_v46 }
 0x717   : > { %v5888_v59 = vpop.f32.mrf.mxu3 }
 0x723   : > { %v6075_v47 = vpop.f32.mrf.mxu0 }
 0x727   : > { %v5838_v17 = vpop.f32.mrf.mxu2 }
 0x728   : > { %v5891_v48 = vpop.f32.mrf.mxu3  ;;  %v5889_v27 = vadd.f32 %v5888_v59, %v5838_v17  ;;  %v6154_v59 = vld [vmem:[%s11809_s13 + $0x8] sm:$0xff] }
 0x729   : > { %v6320_v17 = vld [vmem:[%s11809_s13 + $0x108] sm:$0xff]  ;;  %6255 = vmatpush.msrb.mxu1 %v6154_v59 }
 0x72a   : > { %6364 = vmatpush.msrb.mxu2 %v6320_v17  ;;  %v6317_v17 = vld [vmem:[%s11809_s13 + $0xf0] sm:$0xff] }
 0x72c   : > { %6365 = vmatpush.msrb.mxu2 %v6318_v13  ;;  %v6599_v13 = vld [vmem:[%s11809_s13 + $0x290] sm:$0xff] }
 0x733   : > { %v6078_v20 = vpop.f32.mrf.mxu0 }
 0x737   : > { %v5841_v4 = vpop.f32.mrf.mxu2 }
 0x738   : > { %v11054_v49 = vpop.f32.mrf.mxu3  ;;  %v5892_v58 = vadd.f32 %v5891_v48, %v5841_v4  ;;  %v6262_v4 = vld [vmem:[%s11809_s13 + $0xa8] sm:$0xff] }
 0x739   : > { %6309 = vmatpush.msrb.mxu3 %v6262_v4  ;;  %v6373_v4 = vld [vmem:[%s11809_s13 + $0x140] sm:$0xff] }
 0x747   : > { %v11056_v21 = vpop.f32.mrf.mxu2 }
 0x748   : > { %v11058_v57 = vpop.f32.mrf.mxu3  ;;  %v5895_v7 = vadd.f32 %v11054_v49, %v11056_v21  ;;  %v6487_v49 = vld [vmem:[%s11809_s13 + $0x1f0] sm:$0xff] }
 0x749   : > { %6512 = vmatpush.msrb.mxu0 %v6487_v49  ;;  %v6382_v49 = vld [vmem:[%s11809_s13 + $0x188] sm:$0xff] }
 0x74b   : > { %6513 = vmatpush.msrb.mxu0 %v6485_v12  ;;  %v6380_v12 = vld [vmem:[%s11809_s13 + $0x178] sm:$0xff] }
 0x751   : > { %v11060_v41 = vpop.f32.mrf.mxu2 }
 0x752   : > { %v11062_v28 = vpop.f32.mrf.mxu3 }
 0x759   : > { %v11067_v0 = vpop.f32.mrf.mxu2 }
 0x75a   : > { %v6011_v24 = vpop.f32.mrf.mxu3  ;;  %v5901_v3 = vadd.f32 %v11062_v28, %v11067_v0 }
 0x761   : > { %v5947_v63 = vpop.f32.mrf.mxu2 }
 0x762   : > { %v5962_v5 = vadd.f32 %v5947_v63, %v5889_v27  ;;  %v6014_v50 = vpop.f32.mrf.mxu3 }
 0x764   : > { %v6026_v34 = vadd.f32 %v6011_v24, %v5962_v5  ;;  %v6081_v24 = vpop.f32.mrf.mxu0  ;;  %v5898_v5 = vadd.f32 %v11058_v57, %v11060_v41 }
 0x766   : > { %v6090_v19 = vadd.f32 %v6075_v47, %v6026_v34 }
 0x768   : > { %v6099_v44 = vadd.f32 %v11087_v62, %v6090_v19 }
 0x769   : > { %v5950_v51 = vpop.f32.mrf.mxu2 }
 0x76a   : > { %7653 = vtanh.f32 %v6099_v44  ;;  %v5963_v14 = vadd.f32 %v5950_v51, %v5892_v58  ;;  %v6017_v60 = vpop.f32.mrf.mxu3 }
 0x76c   : > { %v6027_v25 = vadd.f32 %v6014_v50, %v5963_v14  ;;  %v6084_v11 = vpop.f32.mrf.mxu0 }
 0x76e   : > { %v6091_v43 = vadd.f32 %v6078_v20, %v6027_v25  ;;  %v6605_v25 = vld [vmem:[%s11809_s13 + $0x2c0] sm:$0xff] }
 0x770   : > { %v7654_v46 = vpop.eup %7653  ;;  %v6100_v31 = vadd.f32 %v11087_v62, %v6091_v43  ;;  %v6435_v43 = vld [vmem:[%s11809_s13 + $0x1c0] sm:$0xff] }
 0x771   : > { %v6113_v48 = vmul.f32 %v7654_v46, %v11150_v61  ;;  %v5953_v16 = vpop.f32.mrf.mxu2  ;;  %v6601_v46 = vld [vmem:[%s11809_s13 + $0x2a0] sm:$0xff] }
 0x772   : > { %7655 = vtanh.f32 %v6100_v31  ;;  %v5964_v21 = vadd.f32 %v5953_v16, %v5895_v7  ;;  %v6020_v40 = vpop.f32.mrf.mxu3 }
 0x773   : > { %v6122_v6 = vadd.f32 %v11167_v53, %v6113_v48  ;;  %v6431_v48 = vld [vmem:[%s11809_s13 + $0x1a0] sm:$0xff] }
 0x774   : > { %v6028_v55 = vadd.f32 %v6017_v60, %v5964_v21  ;;  %v6087_v51 = vpop.f32.mrf.mxu0 }
 0x775   : > { %6128 = vst.msk [vmem:[#allocation6] sm:$0xff] %vm6127_vm7, %v6122_v6  ;;  %v6438_v6 = vld [vmem:[%s11809_s13 + $0x1d8] sm:$0xff] }
 0x776   : > { %v6092_v27 = vadd.f32 %v6081_v24, %v6028_v55  ;;  %v6429_v24 = vld [vmem:[%s11809_s13 + $0x190] sm:$0xff] }
 0x777   : > { %v6549_v55 = vld [vmem:[%s11809_s13 + $0x270] sm:$0xff] }
 0x778   : > { %v7656_v63 = vpop.eup %7655  ;;  %v6101_v45 = vadd.f32 %v11087_v62, %v6092_v27  ;;  %v6597_v27 = vld [vmem:[%s11809_s13 + $0x280] sm:$0xff] }
 0x779   : > { %v6114_v47 = vmul.f32 %v7656_v63, %v11150_v61  ;;  %v5956_v34 = vpop.f32.mrf.mxu2  ;;  %v6436_v63 = vld [vmem:[%s11809_s13 + $0x1c8] sm:$0xff] }
 0x77a   : > { %7657 = vtanh.f32 %v6101_v45  ;;  %v5965_v10 = vadd.f32 %v5956_v34, %v5898_v5  ;;  %v6023_v44 = vpop.f32.mrf.mxu3  ;;  %v6717_v5 = vld [vmem:[%s11809_s13 + $0x360] sm:$0xff]  ;;  %v6378_v45 = vld [vmem:[%s11809_s13 + $0x168] sm:$0xff]  ;;  %v6715_v34 = vld [vmem:[%s11809_s13 + $0x350] sm:$0xff] }
 0x77b   : > { %v6123_v50 = vadd.f32 %v11167_v53, %v6114_v47  ;;  %v6547_v47 = vld [vmem:[%s11809_s13 + $0x260] sm:$0xff] }
 0x77c   : > { %v6029_v56 = vadd.f32 %v6020_v40, %v5965_v10  ;;  %v6434_v40 = vld [vmem:[%s11809_s13 + $0x1b8] sm:$0xff] }
 0x77d   : > { %6129 = vst.msk [vmem:[#allocation6 + $0x8] sm:$0xff] %vm6127_vm7, %v6123_v50  ;;  %v6376_v10 = vld [vmem:[%s11809_s13 + $0x158] sm:$0xff]  ;;  %v6432_v50 = vld [vmem:[%s11809_s13 + $0x1a8] sm:$0xff] }
 0x77e   : > { %v6093_v19 = vadd.f32 %v6084_v11, %v6029_v56  ;;  %v6545_v11 = vld [vmem:[%s11809_s13 + $0x250] sm:$0xff]  ;;  %v6713_v56 = vld [vmem:[%s11809_s13 + $0x340] sm:$0xff] }
 0x780   : > { %v7658_v9 = vpop.eup %7657  ;;  %v6102_v57 = vadd.f32 %v11087_v62, %v6093_v19 }
 0x781   : > { %v6115_v41 = vmul.f32 %v7658_v9, %v11150_v61  ;;  %v5959_v52 = vpop.f32.mrf.mxu2 }
 0x782   : > { %7659 = vtanh.f32 %v6102_v57  ;;  %v5966_v1 = vadd.f32 %v5959_v52, %v5901_v3  ;;  %v6374_v3 = vld [vmem:[%s11809_s13 + $0x148] sm:$0xff] }
 0x783   : > { %v6124_v58 = vadd.f32 %v11167_v53, %v6115_v41  ;;  %v6543_v41 = vld [vmem:[%s11809_s13 + $0x240] sm:$0xff] }
 0x784   : > { %v6030_v29 = vadd.f32 %v6023_v44, %v5966_v1  ;;  %v6134_v23 = vld [vmem:[#allocation6] ss:$2 sm:$0xff]  ;;  %v6140_v36 = vld [vmem:[#allocation6 + $0x1] ss:$2 sm:$0xff] }
 0x785   : > { %6130 = vst.msk [vmem:[#allocation6 + $0x10] sm:$0xff] %vm6127_vm7, %v6124_v58  ;;  %v6145_v8 = vmax.f32 %v6134_v23, %v6140_v36  ;;  %v6430_v1 = vld [vmem:[%s11809_s13 + $0x198] sm:$0xff]  ;;  %v6494_v58 = vld [vmem:[%s11809_s13 + $0x228] sm:$0xff]  ;;  %v6711_v44 = vld [vmem:[%s11809_s13 + $0x330] sm:$0xff] }
 0x786   : > { %v6094_v35 = vadd.f32 %v6087_v51, %v6030_v29  ;;  %v6541_v29 = vld [vmem:[%s11809_s13 + $0x230] sm:$0xff]  ;;  %v6550_v36 = vld [vmem:[%s11809_s13 + $0x278] sm:$0xff] }
 0x787   : > { %6148 = vst.msk [vmem:[#allocation7] sm:$0xff] %vm6127_vm7, %v6145_v8  ;;  %v6492_v51 = vld [vmem:[%s11809_s13 + $0x218] sm:$0xff] }
 0x788   : > { %v7660_v28 = vpop.eup %7659  ;;  %v6103_v0 = vadd.f32 %v11087_v62, %v6094_v35  ;;  %v6437_v62 = vld [vmem:[%s11809_s13 + $0x1d0] sm:$0xff] }
 0x789   : > { %v6116_v14 = vmul.f32 %v7660_v28, %v11150_v61  ;;  %v6661_v35 = vld [vmem:[%s11809_s13 + $0x310] sm:$0xff]  ;;  %v6709_v28 = vld [vmem:[%s11809_s13 + $0x320] sm:$0xff] }
 0x78a   : > { %7661 = vtanh.f32 %v6103_v0  ;;  %v6548_v0 = vld [vmem:[%s11809_s13 + $0x268] sm:$0xff] }
 0x78b   : > { %v6125_v22 = vadd.f32 %v11167_v53, %v6116_v14  ;;  %v6829_v14 = vld [vmem:[%s11809_s13 + $0x400] sm:$0xff] }
 0x78d   : > { %6131 = vst.msk [vmem:[#allocation6 + $0x18] sm:$0xff] %vm6127_vm7, %v6125_v22  ;;  %v6490_v22 = vld [vmem:[%s11809_s13 + $0x208] sm:$0xff] }
 0x78e   : > { %v6163_v20 = vld [vmem:[#allocation7 + $0x1] sm:$0x1]  ;;  %v6152_v2 = vld [vmem:[#allocation7] sm:$0x1]  ;;  %v6260_v54 = vld [vmem:[#allocation7 + $0x2] sm:$0x1] }
 0x78f   : > { %7474 = vmatmul.msk.f32.vlgmr.msra.gmra.mxu1 %vm6127_vm7, %v6163_v20  ;;  %7475 = vmatmul.msk.f32.vlgmr.msra.gmra.mxu0 %vm6127_vm7, %v6163_v20  ;;  %v6316_v16 = vld [vmem:[#allocation7 + $0x3] sm:$0x1]  ;;  %v11281_v21 = vld [vmem:[#allocation7 + $0x6] sm:$0x1]  ;;  %v6372_v19 = vld [vmem:[#allocation7 + $0x4] sm:$0x1] }
 0x790   : > { %v7662_v37 = vpop.eup %7661  ;;  %7476 = vmatmul.msk.f32.vlgmr.msra.gmra.mxu3 %vm6127_vm7, %v6152_v2  ;;  %7478 = vmatmul.msk.f32.vlgmr.msra.gmra.mxu2 %vm6127_vm7, %v6260_v54  ;;  %v6428_v57 = vld [vmem:[#allocation7 + $0x5] sm:$0x1]  ;;  %v6827_v20 = vld [vmem:[%s11809_s13 + $0x3f0] sm:$0xff] }
 0x791   : > { %v6117_v39 = vmul.f32 %v7662_v37, %v11150_v61  ;;  %6341 = vmatpush.msra.mxu1 %v6325_v18  ;;  %6397 = vmatpush.msra.mxu3 %v6381_v15  ;;  %v6377_v61 = vld [vmem:[%s11809_s13 + $0x160] sm:$0xff]  ;;  %v6546_v15 = vld [vmem:[%s11809_s13 + $0x258] sm:$0xff] }
 0x792   : > { %6453 = vmatpush.msra.mxu2 %v6437_v62  ;;  %6621 = vmatpush.msra.mxu0 %v6605_v25  ;;  %v6659_v18 = vld [vmem:[%s11809_s13 + $0x300] sm:$0xff]  ;;  %v6540_v62 = vld [vmem:[#allocation7 + $0x7] sm:$0x1]  ;;  %v6544_v25 = vld [vmem:[%s11809_s13 + $0x248] sm:$0xff] }
 0x793   : > { %v6126_v60 = vadd.f32 %v11167_v53, %v6117_v39  ;;  %6342 = vmatpush.msra.mxu1 %v6323_v30  ;;  %6398 = vmatpush.msra.mxu3 %v6379_v33  ;;  %v6375_v53 = vld [vmem:[%s11809_s13 + $0x150] sm:$0xff]  ;;  %v6825_v37 = vld [vmem:[%s11809_s13 + $0x3e0] sm:$0xff]  ;;  %v6486_v33 = vld [vmem:[%s11809_s13 + $0x1e8] sm:$0xff] }
 0x794   : > { %6454 = vmatpush.msra.mxu2 %v6435_v43  ;;  %6622 = vmatpush.msra.mxu0 %v6603_v38  ;;  %v6136_v7 = vld [vmem:[#allocation6 + $0x10] ss:$2 sm:$0xff]  ;;  %v6142_v31 = vld [vmem:[#allocation6 + $0x11] ss:$2 sm:$0xff]  ;;  %v6542_v43 = vld [vmem:[%s11809_s13 + $0x238] sm:$0xff] }
 0x795   : > { %6133 = vst.msk [vmem:[#allocation6 + $0x20] sm:$0x7] %vm6132_vm8, %v6126_v60  ;;  %6343 = vmatpush.msra.mxu1 %v6321_v42  ;;  %6399 = vmatpush.msra.mxu3 %v6377_v61  ;;  %v6146_v59 = vmax.f32 %v6136_v7, %v6142_v31  ;;  %v6655_v39 = vld [vmem:[%s11809_s13 + $0x2e0] sm:$0xff]  ;;  %v6606_v38 = vld [vmem:[%s11809_s13 + $0x2c8] sm:$0xff]  ;;  %v6823_v42 = vld [vmem:[%s11809_s13 + $0x3d0] sm:$0xff] }
 0x796   : > { %6455 = vmatpush.msra.mxu2 %v6433_v26  ;;  %6623 = vmatpush.msra.mxu0 %v6601_v46  ;;  %v6653_v61 = vld [vmem:[%s11809_s13 + $0x2d0] sm:$0xff]  ;;  %v6662_v60 = vld [vmem:[%s11809_s13 + $0x318] sm:$0xff]  ;;  %v6821_v46 = vld [vmem:[%s11809_s13 + $0x3c0] sm:$0xff] }
 0x797   : > { %6344 = vmatpush.msra.mxu1 %v6319_v32  ;;  %6400 = vmatpush.msra.mxu3 %v6375_v53  ;;  %6149 = vst.msk [vmem:[#allocation7 + $0x8] sm:$0xff] %vm6127_vm7, %v6146_v59  ;;  %v6604_v32 = vld [vmem:[%s11809_s13 + $0x2b8] sm:$0xff]  ;;  %v6773_v26 = vld [vmem:[%s11809_s13 + $0x3b0] sm:$0xff]  ;;  %v6660_v53 = vld [vmem:[%s11809_s13 + $0x308] sm:$0xff] }
 0x798   : > { %7477 = vmatmul.msk.f32.vlgmr.msrb.gmra.mxu1 %vm6127_vm7, %v6152_v2  ;;  %7479 = vmatmul.msk.f32.vlgmr.msrb.gmra.mxu3 %vm6127_vm7, %v6260_v54  ;;  %v6488_v2 = vld [vmem:[%s11809_s13 + $0x1f8] sm:$0xff]  ;;  %v6657_v54 = vld [vmem:[%s11809_s13 + $0x2f0] sm:$0xff]  ;;  %v6941_v7 = vld [vmem:[%s11809_s13 + $0x4a0] sm:$0xff] }
 0x799   : > { %6345 = vmatpush.msra.mxu1 %v6317_v17  ;;  %7481 = vmatmul.msk.f32.vlgmr.msrb.gmra.mxu2 %vm6127_vm7, %v6316_v16  ;;  %v6602_v31 = vld [vmem:[%s11809_s13 + $0x2a8] sm:$0xff]  ;;  %v6771_v59 = vld [vmem:[%s11809_s13 + $0x3a0] sm:$0xff]  ;;  %v6658_v17 = vld [vmem:[%s11809_s13 + $0x2f8] sm:$0xff] }
 0x79a   : > { %6456 = vmatpush.msra.mxu2 %v6431_v48  ;;  %7486 = vmatmul.msk.f32.vlgmr.msrb.gmra.mxu0 %vm6127_vm7, %v11281_v21  ;;  %v6600_v48 = vld [vmem:[%s11809_s13 + $0x298] sm:$0xff] }
 0x79b   : > { %6401 = vmatpush.msra.mxu3 %v6373_v4  ;;  %6417 = vmatpush.msrb.mxu1 %v6382_v49  ;;  %v6939_v4 = vld [vmem:[%s11809_s13 + $0x490] sm:$0xff] }
 0x79c   : > { %6624 = vmatpush.msra.mxu0 %v6599_v13  ;;  %6457 = vmatpush.msra.mxu2 %v6429_v24  ;;  %v6138_v52 = vld [vmem:[#allocation6 + $0x20] ss:$2 sm:$0x1]  ;;  %v6144_v23 = vld [vmem:[#allocation6 + $0x21] ss:$2 sm:$0x1] }
 0x79d   : > { %6473 = vmatpush.msrb.mxu3 %v6438_v6  ;;  %6418 = vmatpush.msrb.mxu1 %v6380_v12  ;;  %v6147_v8 = vmax.f32 %v6138_v52, %v6144_v23  ;;  %v6769_v49 = vld [vmem:[%s11809_s13 + $0x390] sm:$0xff]  ;;  %v6598_v24 = vld [vmem:[%s11809_s13 + $0x288] sm:$0xff]  ;;  %v6937_v6 = vld [vmem:[%s11809_s13 + $0x480] sm:$0xff] }
 0x79e   : > { %6565 = vmatpush.msrb.mxu2 %v6549_v55  ;;  %6625 = vmatpush.msra.mxu0 %v6597_v27  ;;  %v11333_v9 = vld [vmem:[#allocation7 + $0x8] sm:$0x1]  ;;  %v11403_v30 = vld [vmem:[#allocation7 + $0xa] sm:$0x1]  ;;  %v11465_v13 = vld [vmem:[#allocation7 + $0xc] sm:$0x1] }
 0x79f   : > { %6474 = vmatpush.msrb.mxu3 %v6436_v63  ;;  %6419 = vmatpush.msrb.mxu1 %v6378_v45  ;;  %6151 = vst.msk [vmem:[#allocation7 + $0x10] sm:$0x1] %vm6150_vm9, %v6147_v8  ;;  %v6767_v12 = vld [vmem:[%s11809_s13 + $0x380] sm:$0xff]  ;;  %v6654_v55 = vld [vmem:[%s11809_s13 + $0x2d8] sm:$0xff]  ;;  %v6718_v27 = vld [vmem:[%s11809_s13 + $0x368] sm:$0xff] }
 0x7a0   : > { %6733 = vmatpush.msrb.mxu0 %v6717_v5  ;;  %6566 = vmatpush.msrb.mxu2 %v6547_v47  ;;  %v6935_v63 = vld [vmem:[%s11809_s13 + $0x470] sm:$0xff]  ;;  %v6774_v45 = vld [vmem:[%s11809_s13 + $0x3b8] sm:$0xff] }
 0x7a1   : > { %6475 = vmatpush.msrb.mxu3 %v6434_v40  ;;  %6420 = vmatpush.msrb.mxu1 %v6376_v10  ;;  %v6765_v5 = vld [vmem:[%s11809_s13 + $0x370] sm:$0xff]  ;;  %v6716_v47 = vld [vmem:[%s11809_s13 + $0x358] sm:$0xff]  ;;  %v6772_v10 = vld [vmem:[%s11809_s13 + $0x3a8] sm:$0xff] }
 0x7a2   : > { %6734 = vmatpush.msrb.mxu0 %v6715_v34  ;;  %6567 = vmatpush.msrb.mxu2 %v6545_v11  ;;  %v6885_v40 = vld [vmem:[%s11809_s13 + $0x450] sm:$0xff]  ;;  %v6933_v34 = vld [vmem:[%s11809_s13 + $0x460] sm:$0xff]  ;;  %v6766_v23 = vld [vmem:[%s11809_s13 + $0x378] sm:$0xff] }
 0x7a3   : > { %7480 = vmatmul.msk.f32.vlgmr.msra.gmra.mxu1 %vm6127_vm7, %v6316_v16  ;;  %7482 = vmatmul.msk.f32.vlgmr.msra.gmra.mxu3 %vm6127_vm7, %v6372_v19  ;;  %v6652_v16 = vld [vmem:[#allocation7 + $0x9] sm:$0x1]  ;;  %v6881_v52 = vld [vmem:[%s11809_s13 + $0x430] sm:$0xff] }
 0x7a4   : > { %7484 = vmatmul.msk.f32.vlgmr.msra.gmra.mxu2 %vm6127_vm7, %v6428_v57  ;;  %6476 = vmatpush.msrb.mxu3 %v6432_v50  ;;  %v7053_v11 = vld [vmem:[%s11809_s13 + $0x540] sm:$0xff]  ;;  %v6714_v50 = vld [vmem:[%s11809_s13 + $0x348] sm:$0xff]  ;;  %v6877_v8 = vld [vmem:[%s11809_s13 + $0x410] sm:$0xff] }
 0x7a5   : > { %7490 = vmatmul.msk.f32.vlgmr.msra.gmra.mxu0 %vm6127_vm7, %v11333_v9  ;;  %6421 = vmatpush.msrb.mxu1 %v6374_v3  ;;  %v6770_v3 = vld [vmem:[%s11809_s13 + $0x398] sm:$0xff] }
 0x7a6   : > { %6735 = vmatpush.msrb.mxu0 %v6713_v56  ;;  %6568 = vmatpush.msrb.mxu2 %v6543_v41  ;;  %v6883_v56 = vld [vmem:[%s11809_s13 + $0x440] sm:$0xff] }
 0x7a7   : > { %6477 = vmatpush.msrb.mxu3 %v6430_v1  ;;  %6529 = vmatpush.msra.mxu1 %v6494_v58  ;;  %v11527_v41 = vld [vmem:[#allocation7 + $0xe] sm:$0x1]  ;;  %v6768_v1 = vld [vmem:[%s11809_s13 + $0x388] sm:$0xff] }
 0x7a8   : > { %6736 = vmatpush.msrb.mxu0 %v6711_v44  ;;  %6569 = vmatpush.msrb.mxu2 %v6541_v29  ;;  %v7049_v58 = vld [vmem:[%s11809_s13 + $0x520] sm:$0xff]  ;;  %v6710_v44 = vld [vmem:[%s11809_s13 + $0x328] sm:$0xff] }
 0x7a9   : > { %6585 = vmatpush.msra.mxu3 %v6550_v36  ;;  %6530 = vmatpush.msra.mxu1 %v6492_v51  ;;  %v6879_v29 = vld [vmem:[%s11809_s13 + $0x420] sm:$0xff]  ;;  %v6830_v36 = vld [vmem:[%s11809_s13 + $0x408] sm:$0xff]  ;;  %v7047_v51 = vld [vmem:[%s11809_s13 + $0x510] sm:$0xff] }
 0x7aa   : > { %6677 = vmatpush.msra.mxu2 %v6661_v35  ;;  %6737 = vmatpush.msrb.mxu0 %v6709_v28  ;;  %v6886_v35 = vld [vmem:[%s11809_s13 + $0x458] sm:$0xff] }
 0x7ab   : > { %6586 = vmatpush.msra.mxu3 %v6548_v0  ;;  %6531 = vmatpush.msra.mxu1 %v6490_v22  ;;  %v6828_v28 = vld [vmem:[%s11809_s13 + $0x3f8] sm:$0xff]  ;;  %v6997_v0 = vld [vmem:[%s11809_s13 + $0x4f0] sm:$0xff]  ;;  %v6884_v22 = vld [vmem:[%s11809_s13 + $0x448] sm:$0xff] }
 0x7ac   : > { %6845 = vmatpush.msra.mxu0 %v6829_v14  ;;  %6678 = vmatpush.msra.mxu2 %v6659_v18  ;;  %v7045_v14 = vld [vmem:[%s11809_s13 + $0x500] sm:$0xff]  ;;  %v6826_v18 = vld [vmem:[%s11809_s13 + $0x3e8] sm:$0xff] }
 0x7ad   : > { %6587 = vmatpush.msra.mxu3 %v6546_v15  ;;  %7483 = vmatmul.msk.f32.vlgmr.msrb.gmra.mxu1 %vm6127_vm7, %v6372_v19  ;;  %v6764_v19 = vld [vmem:[#allocation7 + $0xb] sm:$0x1]  ;;  %v6876_v15 = vld [vmem:[#allocation7 + $0xd] sm:$0x1] }
 0x7ae   : > { %6846 = vmatpush.msra.mxu0 %v6827_v20  ;;  %7485 = vmatmul.msk.f32.vlgmr.msrb.gmra.mxu3 %vm6127_vm7, %v6428_v57  ;;  %v7051_v57 = vld [vmem:[%s11809_s13 + $0x530] sm:$0xff]  ;;  %v6995_v20 = vld [vmem:[%s11809_s13 + $0x4e0] sm:$0xff] }
 0x7af   : > { %6532 = vmatpush.msra.mxu1 %v6488_v2  ;;  %7488 = vmatmul.msk.f32.vlgmr.msrb.gmra.mxu2 %vm6127_vm7, %v6540_v62  ;;  %v6882_v2 = vld [vmem:[%s11809_s13 + $0x438] sm:$0xff] }
 0x7b0   : > { %6679 = vmatpush.msra.mxu2 %v6657_v54  ;;  %7494 = vmatmul.msk.f32.vlgmr.msrb.gmra.mxu0 %vm6127_vm7, %v11403_v30  ;;  %v7044_v54 = vld [vmem:[#allocation7 + $0x10] sm:$0x1] }
 0x7b1   : > { %6588 = vmatpush.msra.mxu3 %v6544_v25  ;;  %6847 = vmatpush.msra.mxu0 %v6825_v37  ;;  %v6993_v25 = vld [vmem:[%s11809_s13 + $0x4d0] sm:$0xff]  ;;  %v6880_v37 = vld [vmem:[%s11809_s13 + $0x428] sm:$0xff] }
 0x7b2   : > { %6533 = vmatpush.msra.mxu1 %v6486_v33  ;;  %6680 = vmatpush.msra.mxu2 %v6655_v39  ;;  %v6991_v33 = vld [vmem:[%s11809_s13 + $0x4c0] sm:$0xff]  ;;  %v6878_v39 = vld [vmem:[%s11809_s13 + $0x418] sm:$0xff] }
 0x7b3   : > { %6589 = vmatpush.msra.mxu3 %v6542_v43  ;;  %6848 = vmatpush.msra.mxu0 %v6823_v42  ;;  %v6942_v43 = vld [vmem:[%s11809_s13 + $0x4a8] sm:$0xff]  ;;  %v6989_v42 = vld [vmem:[%s11809_s13 + $0x4b0] sm:$0xff] }
 0x7b4   : > { %6641 = vmatpush.msrb.mxu1 %v6606_v38  ;;  %6681 = vmatpush.msra.mxu2 %v6653_v61  ;;  %v6998_v38 = vld [vmem:[%s11809_s13 + $0x4f8] sm:$0xff] }
 0x7b5   : > { %6697 = vmatpush.msrb.mxu3 %v6662_v60  ;;  %6849 = vmatpush.msra.mxu0 %v6821_v46  ;;  %v6940_v61 = vld [vmem:[%s11809_s13 + $0x498] sm:$0xff]  ;;  %v6996_v60 = vld [vmem:[%s11809_s13 + $0x4e8] sm:$0xff] }
 0x7b6   : > { %6642 = vmatpush.msrb.mxu1 %v6604_v32  ;;  %6789 = vmatpush.msrb.mxu2 %v6773_v26  ;;  %v6938_v32 = vld [vmem:[%s11809_s13 + $0x488] sm:$0xff]  ;;  %v6988_v26 = vld [vmem:[#allocation7 + $0xf] sm:$0x1]  ;;  %v6994_v46 = vld [vmem:[%s11809_s13 + $0x4d8] sm:$0xff] }
 0x7b7   : > { %6698 = vmatpush.msrb.mxu3 %v6660_v53  ;;  %6957 = vmatpush.msrb.mxu0 %v6941_v7  ;;  %v6936_v53 = vld [vmem:[%s11809_s13 + $0x478] sm:$0xff]  ;;  %v6992_v7 = vld [vmem:[%s11809_s13 + $0x4c8] sm:$0xff] }
 0x7b8   : > { %6643 = vmatpush.msrb.mxu1 %v6602_v31  ;;  %6790 = vmatpush.msrb.mxu2 %v6771_v59  ;;  %v6934_v31 = vld [vmem:[%s11809_s13 + $0x468] sm:$0xff]  ;;  %v6990_v59 = vld [vmem:[%s11809_s13 + $0x4b8] sm:$0xff] }
 0x7b9   : > { %7487 = vmatmul.msk.f32.vlgmr.msra.gmra.mxu1 %vm6127_vm7, %v11281_v21  ;;  %7489 = vmatmul.msk.f32.vlgmr.msra.gmra.mxu3 %vm6127_vm7, %v6540_v62  ;;  %v6656_v21 = vld [vmem:[%s11809_s13 + $0x2e8] sm:$0xff]  ;;  %v6824_v62 = vld [vmem:[%s11809_s13 + $0x3d8] sm:$0xff] }
 0x7ba   : > { %7492 = vmatmul.msk.f32.vlgmr.msra.gmra.mxu2 %vm6127_vm7, %v6652_v16  ;;  %6699 = vmatpush.msrb.mxu3 %v6658_v17  ;;  %v7054_v17 = vld [vmem:[%s11809_s13 + $0x548] sm:$0xff] }
 0x7bb   : > { %7498 = vmatmul.msk.f32.vlgmr.msra.gmra.mxu0 %vm6127_vm7, %v11465_v13  ;;  %6644 = vmatpush.msrb.mxu1 %v6600_v48  ;;  %v7052_v48 = vld [vmem:[%s11809_s13 + $0x538] sm:$0xff] }
 0x7bc   : > { %6958 = vmatpush.msrb.mxu0 %v6939_v4  ;;  %6791 = vmatpush.msrb.mxu2 %v6769_v49  ;;  %v7048_v4 = vld [vmem:[%s11809_s13 + $0x518] sm:$0xff]  ;;  %v7046_v49 = vld [vmem:[%s11809_s13 + $0x508] sm:$0xff] }
 0x7bd   : > { %6700 = vmatpush.msrb.mxu3 %v6656_v21  ;;  %6645 = vmatpush.msrb.mxu1 %v6598_v24 }
 0x7be   : > { %6959 = vmatpush.msrb.mxu0 %v6937_v6  ;;  %6792 = vmatpush.msrb.mxu2 %v6767_v12 }
 0x7bf   : > { %6701 = vmatpush.msrb.mxu3 %v6654_v55  ;;  %6753 = vmatpush.msra.mxu1 %v6718_v27 }
 0x7c0   : > { %6960 = vmatpush.msrb.mxu0 %v6935_v63  ;;  %6793 = vmatpush.msrb.mxu2 %v6765_v5  ;;  %v7125_v63 = vld [vmem:[%s11811_s15 + $0x78] sm:$0xff] }
 0x7c1   : > { %6809 = vmatpush.msra.mxu3 %v6774_v45  ;;  %6754 = vmatpush.msra.mxu1 %v6716_v47  ;;  %v7124_v45 = vld [vmem:[%s11811_s15 + $0x70] sm:$0xff] }
 0x7c2   : > { %6901 = vmatpush.msra.mxu2 %v6885_v40  ;;  %6961 = vmatpush.msrb.mxu0 %v6933_v34 }
 0x7c3   : > { %6810 = vmatpush.msra.mxu3 %v6772_v10  ;;  %7491 = vmatmul.msk.f32.vlgmr.msrb.gmra.mxu1 %vm6127_vm7, %v11333_v9  ;;  %v6712_v9 = vld [vmem:[%s11809_s13 + $0x338] sm:$0xff] }
 0x7c4   : > { %7069 = vmatpush.msra.mxu0 %v7053_v11  ;;  %7493 = vmatmul.msk.f32.vlgmr.msrb.gmra.mxu3 %vm6127_vm7, %v6652_v16  ;;  %v7050_v16 = vld [vmem:[%s11809_s13 + $0x528] sm:$0xff] }
 0x7c5   : > { %6755 = vmatpush.msra.mxu1 %v6714_v50  ;;  %7496 = vmatmul.msk.f32.vlgmr.msrb.gmra.mxu2 %vm6127_vm7, %v6764_v19  ;;  %v7123_v11 = vld [vmem:[%s11811_s15 + $0x68] sm:$0xff]  ;;  %v7122_v50 = vld [vmem:[%s11811_s15 + $0x60] sm:$0xff] }
 0x7c6   : > { %6902 = vmatpush.msra.mxu2 %v6883_v56  ;;  %7502 = vmatmul.msk.f32.vlgmr.msrb.gmra.mxu0 %vm6127_vm7, %v11527_v41  ;;  %v7121_v56 = vld [vmem:[%s11811_s15 + $0x58] sm:$0xff] }
 0x7c7   : > { %6811 = vmatpush.msra.mxu3 %v6770_v3  ;;  %7070 = vmatpush.msra.mxu0 %v7051_v57  ;;  %v7120_v57 = vld [vmem:[%s11811_s15 + $0x50] sm:$0xff] }
 0x7c8   : > { %6756 = vmatpush.msra.mxu1 %v6712_v9  ;;  %6903 = vmatpush.msra.mxu2 %v6881_v52  ;;  %v7119_v9 = vld [vmem:[%s11811_s15 + $0x48] sm:$0xff]  ;;  %v7118_v52 = vld [vmem:[%s11811_s15 + $0x40] sm:$0xff] }
 0x7c9   : > { %6812 = vmatpush.msra.mxu3 %v6768_v1  ;;  %7071 = vmatpush.msra.mxu0 %v7049_v58 }
 0x7ca   : > { %6757 = vmatpush.msra.mxu1 %v6710_v44  ;;  %6904 = vmatpush.msra.mxu2 %v6879_v29  ;;  %v7117_v29 = vld [vmem:[%s11811_s15 + $0x38] sm:$0xff] }
 0x7cb   : > { %6813 = vmatpush.msra.mxu3 %v6766_v23  ;;  %7072 = vmatpush.msra.mxu0 %v7047_v51 }
 0x7cc   : > { %6865 = vmatpush.msrb.mxu1 %v6830_v36  ;;  %6905 = vmatpush.msra.mxu2 %v6877_v8  ;;  %v7116_v8 = vld [vmem:[%s11811_s15 + $0x30] sm:$0xff] }
 0x7cd   : > { %6921 = vmatpush.msrb.mxu3 %v6886_v35  ;;  %7073 = vmatpush.msra.mxu0 %v7045_v14  ;;  %v7115_v14 = vld [vmem:[%s11811_s15 + $0x28] sm:$0xff] }
 0x7ce   : > { %6866 = vmatpush.msrb.mxu1 %v6828_v28  ;;  %7013 = vmatpush.msrb.mxu2 %v6997_v0 }
 0x7cf   : > { %7495 = vmatmul.msk.f32.vlgmr.msra.gmra.mxu1 %vm6127_vm7, %v11403_v30  ;;  %7497 = vmatmul.msk.f32.vlgmr.msra.gmra.mxu3 %vm6127_vm7, %v6764_v19  ;;  %v6822_v30 = vld [vmem:[%s11809_s13 + $0x3c8] sm:$0xff] }
 0x7d0   : > { %7500 = vmatmul.msk.f32.vlgmr.msra.gmra.mxu2 %vm6127_vm7, %v6876_v15  ;;  %6922 = vmatpush.msrb.mxu3 %v6884_v22 }
 0x7d1   : > { %7506 = vmatmul.msk.f32.vlgmr.msra.gmra.mxu0 %vm6127_vm7, %v7044_v54  ;;  %6867 = vmatpush.msrb.mxu1 %v6826_v18 }
 0x7d2   : > { %7014 = vmatpush.msrb.mxu2 %v6995_v20  ;;  %6923 = vmatpush.msrb.mxu3 %v6882_v2 }
 0x7d3   : > { %6868 = vmatpush.msrb.mxu1 %v6824_v62 }
 0x7d4   : > { %7015 = vmatpush.msrb.mxu2 %v6993_v25  ;;  %6924 = vmatpush.msrb.mxu3 %v6880_v37  ;;  %v7112_v37 = vld [vmem:[%s11811_s15 + $0x10] sm:$0xff] }
 0x7d5   : > { %6869 = vmatpush.msrb.mxu1 %v6822_v30 }
 0x7d6   : > { %7016 = vmatpush.msrb.mxu2 %v6991_v33  ;;  %6925 = vmatpush.msrb.mxu3 %v6878_v39  ;;  %v7111_v39 = vld [vmem:[%s11811_s15 + $0x8] sm:$0xff] }
 0x7d7   : > { %6977 = vmatpush.msra.mxu1 %v6942_v43  ;;  %7501 = vmatmul.msk.f32.vlgmr.msrb.gmra.mxu3 %vm6127_vm7, %v6876_v15  ;;  %v7114_v15 = vld [vmem:[%s11811_s15 + $0x20] sm:$0xff] }
 0x7d8   : > { %7033 = vmatpush.msra.mxu3 %v6998_v38  ;;  %7017 = vmatpush.msrb.mxu2 %v6989_v42  ;;  %v7110_v42 = vld [vmem:[%s11811_s15] sm:$0xff] }
 0x7d9   : > { %7499 = vmatmul.msk.f32.vlgmr.msrb.gmra.mxu1 %vm6127_vm7, %v11465_v13  ;;  %7504 = vmatmul.msk.f32.vlgmr.msrb.gmra.mxu2 %vm6127_vm7, %v6988_v26 }
 0x7da   : > { %6978 = vmatpush.msra.mxu1 %v6940_v61  ;;  %7034 = vmatpush.msra.mxu3 %v6996_v60 }
 0x7db   : > { %7135 = vmatpush.msra.mxu2 %v7125_v63 }
 0x7dc   : > { %6979 = vmatpush.msra.mxu1 %v6938_v32  ;;  %7035 = vmatpush.msra.mxu3 %v6994_v46  ;;  %v7128_v46 = vld [vmem:[%s11811_s15 + $0x90] sm:$0xff] }
 0x7dd   : > { %7136 = vmatpush.msra.mxu2 %v7124_v45  ;;  %v7100_v45 = vld [vmem:[%s11810_s14] sm:$0x3] }
 0x7de   : > { %6980 = vmatpush.msra.mxu1 %v6936_v53  ;;  %7036 = vmatpush.msra.mxu3 %v6992_v7 }
 0x7df   : > { %7137 = vmatpush.msra.mxu2 %v7123_v11 }
 0x7e0   : > { %6981 = vmatpush.msra.mxu1 %v6934_v31  ;;  %7037 = vmatpush.msra.mxu3 %v6990_v59  ;;  %v7127_v59 = vld [vmem:[%s11811_s15 + $0x88] sm:$0xff] }
 0x7e1   : > { %7503 = vmatmul.msk.f32.vlgmr.msra.gmra.mxu1 %vm6127_vm7, %v11527_v41  ;;  %7505 = vmatmul.msk.f32.vlgmr.msra.gmra.mxu3 %vm6127_vm7, %v6988_v26  ;;  %v7129_v26 = vld [vmem:[%s11811_s15 + $0x98] sm:$0xff] }
 0x7e2   : > { %7089 = vmatpush.msrb.mxu1 %v7054_v17  ;;  %7138 = vmatpush.msra.mxu2 %v7122_v50  ;;  %v7126_v17 = vld [vmem:[%s11811_s15 + $0x80] sm:$0xff]  ;;  %v7102_v50 = vperm.slane %v7100_v45, 0 }
 0x7e3   : > { %7167 = vmatpush.msrb.mxu3 %v7129_v26 }
 0x7e4   : > { %7090 = vmatpush.msrb.mxu1 %v7052_v48  ;;  %7139 = vmatpush.msra.mxu2 %v7121_v56 }
 0x7e5   : > { %7168 = vmatpush.msrb.mxu3 %v7128_v46 }
 0x7e6   : > { %7091 = vmatpush.msrb.mxu1 %v7050_v16  ;;  %7140 = vmatpush.msra.mxu2 %v7120_v57 }
 0x7e7   : > { %7169 = vmatpush.msrb.mxu3 %v7127_v59 }
 0x7e8   : > { %7092 = vmatpush.msrb.mxu1 %v7048_v4  ;;  %7141 = vmatpush.msra.mxu2 %v7119_v9 }
 0x7e9   : > { %7170 = vmatpush.msrb.mxu3 %v7126_v17 }
 0x7ea   : > { %7093 = vmatpush.msrb.mxu1 %v7046_v49  ;;  %7142 = vmatpush.msra.mxu2 %v7118_v52 }
 0x7eb   : > { %7507 = vmatmul.msk.f32.vlgmr.msrb.gmra.mxu1 %vm6127_vm7, %v7044_v54  ;;  %v7113_v54 = vld [vmem:[%s11811_s15 + $0x18] sm:$0xff] }
 0x7ec   : > { %7143 = vmatpush.msra.mxu2 %v7117_v29 }
 0x7ee   : > { %7144 = vmatpush.msra.mxu2 %v7116_v8  ;;  %v7184_v8 = vld [vmem:[%s11813_s17 + $0x40] sm:$0xff] }
 0x7f0   : > { %7145 = vmatpush.msra.mxu2 %v7115_v14  ;;  %v7180_v14 = vld [vmem:[%s11813_s17 + $0x20] sm:$0xff] }
 0x7f2   : > { %7146 = vmatpush.msra.mxu2 %v7114_v15  ;;  %v7177_v15 = vld [vmem:[%s11813_s17 + $0x8] sm:$0xff] }
 0x7f4   : > { %7147 = vmatpush.msra.mxu2 %v7113_v54 }
 0x7f6   : > { %7148 = vmatpush.msra.mxu2 %v7112_v37 }
 0x7f8   : > { %7149 = vmatpush.msra.mxu2 %v7111_v39 }
 0x7fa   : > { %7150 = vmatpush.msra.mxu2 %v7110_v42 }
 0x80c   : > { %v6194_v13 = vpop.f32.mrf.mxu1  ;;  %v6214_v27 = vpop.f32.mrf.mxu0 }
 0x813   : > { %v6237_v21 = vpop.f32.mrf.mxu3  ;;  %v6291_v24 = vpop.f32.mrf.mxu2 }
 0x814   : > { %v6238_v19 = vadd.f32 %v6237_v21, %v6194_v13  ;;  %v7185_v13 = vld [vmem:[%s11813_s17 + $0x48] sm:$0xff] }
 0x815   : > { %v6257_v6 = vpop.f32.mrf.mxu1  ;;  %7197 = vmatpush.msra.mxu3 %v7185_v13 }
 0x816   : > { %v6314_v58 = vadd.f32 %v6291_v24, %v6238_v19  ;;  %v6258_v51 = vadd.f32 %v6257_v6, %v6214_v27 }
 0x817   : > { %v6515_v34 = vpop.f32.mrf.mxu0  ;;  %7198 = vmatpush.msra.mxu3 %v7184_v8 }
 0x81b   : > { %v6311_v12 = vpop.f32.mrf.mxu3 }
 0x81c   : > { %v6367_v55 = vpop.f32.mrf.mxu2  ;;  %v6315_v28 = vadd.f32 %v6311_v12, %v6258_v51 }
 0x81e   : > { %v6371_v2 = vadd.f32 %v6367_v55, %v6315_v28  ;;  %v7182_v28 = vld [vmem:[%s11813_s17 + $0x30] sm:$0xff] }
 0x820   : > { %v6347_v5 = vpop.f32.mrf.mxu1 }
 0x821   : > { %v6370_v23 = vadd.f32 %v6347_v5, %v6314_v58  ;;  %v7103_v58 = vperm.slane %v7100_v45, 1 }
 0x822   : > { %v6627_v1 = vpop.f32.mrf.mxu0 }
 0x826   : > { %v6403_v47 = vpop.f32.mrf.mxu3 }
 0x827   : > { %v6459_v40 = vpop.f32.mrf.mxu2  ;;  %v6426_v36 = vadd.f32 %v6403_v47, %v6370_v23 }
 0x829   : > { %v6482_v22 = vadd.f32 %v6459_v40, %v6426_v36 }
 0x82a   : > { %v6423_v10 = vpop.f32.mrf.mxu1 }
 0x82b   : > { %v6538_v62 = vadd.f32 %v6515_v34, %v6482_v22  ;;  %v6427_v25 = vadd.f32 %v6423_v10, %v6371_v2  ;;  %v7179_v22 = vld [vmem:[%s11813_s17 + $0x18] sm:$0xff]  ;;  %v7130_v2 = vld [vmem:[%s11812_s16] sm:$0x1] }
 0x82d   : > { %v6739_v18 = vpop.f32.mrf.mxu0 }
 0x831   : > { %v6479_v3 = vpop.f32.mrf.mxu3 }
 0x832   : > { %v6571_v41 = vpop.f32.mrf.mxu2  ;;  %v6483_v33 = vadd.f32 %v6479_v3, %v6427_v25 }
 0x833   : > { %v6594_v30 = vadd.f32 %v6571_v41, %v6538_v62 }
 0x835   : > { %v6650_v61 = vadd.f32 %v6627_v1, %v6594_v30 }
 0x836   : > { %v6535_v44 = vpop.f32.mrf.mxu1 }
 0x837   : > { %v6539_v60 = vadd.f32 %v6535_v44, %v6483_v33  ;;  %v7186_v33 = vld [vmem:[%s11814_s18] sm:$0x1] }
 0x838   : > { %v6851_v32 = vpop.f32.mrf.mxu0 }
 0x83c   : > { %v6591_v35 = vpop.f32.mrf.mxu3 }
 0x83d   : > { %v6683_v0 = vpop.f32.mrf.mxu2  ;;  %v6595_v31 = vadd.f32 %v6591_v35, %v6539_v60  ;;  %v7183_v35 = vld [vmem:[%s11813_s17 + $0x38] sm:$0xff] }
 0x83e   : > { %v6706_v53 = vadd.f32 %v6683_v0, %v6650_v61  ;;  %7199 = vmatpush.msra.mxu3 %v7183_v35  ;;  %v7181_v0 = vld [vmem:[%s11813_s17 + $0x28] sm:$0xff] }
 0x840   : > { %v6647_v20 = vpop.f32.mrf.mxu1  ;;  %v6762_v48 = vadd.f32 %v6739_v18, %v6706_v53  ;;  %7200 = vmatpush.msra.mxu3 %v7182_v28  ;;  %v7178_v18 = vld [vmem:[%s11813_s17 + $0x10] sm:$0xff] }
 0x841   : > { %v6651_v16 = vadd.f32 %v6647_v20, %v6595_v31  ;;  %v7176_v20 = vld [vmem:[%s11813_s17] sm:$0xff] }
 0x842   : > { %7201 = vmatpush.msra.mxu3 %v7181_v0 }
 0x843   : > { %v6963_v6 = vpop.f32.mrf.mxu0 }
 0x844   : > { %7202 = vmatpush.msra.mxu3 %v7180_v14 }
 0x846   : > { %7203 = vmatpush.msra.mxu3 %v7179_v22 }
 0x847   : > { %v6703_v43 = vpop.f32.mrf.mxu3 }
 0x848   : > { %v6795_v38 = vpop.f32.mrf.mxu2  ;;  %v6707_v21 = vadd.f32 %v6703_v43, %v6651_v16  ;;  %7204 = vmatpush.msra.mxu3 %v7178_v18 }
 0x849   : > { %v6818_v4 = vadd.f32 %v6795_v38, %v6762_v48 }
 0x84a   : > { %7205 = vmatpush.msra.mxu3 %v7177_v15 }
 0x84b   : > { %v6874_v55 = vadd.f32 %v6851_v32, %v6818_v4 }
 0x84c   : > { %v6759_v7 = vpop.f32.mrf.mxu1  ;;  %7206 = vmatpush.msra.mxu3 %v7176_v20 }
 0x84d   : > { %v6763_v27 = vadd.f32 %v6759_v7, %v6707_v21 }
 0x84e   : > { %v7075_v19 = vpop.f32.mrf.mxu0 }
 0x852   : > { %v6815_v49 = vpop.f32.mrf.mxu3 }
 0x853   : > { %v6907_v24 = vpop.f32.mrf.mxu2  ;;  %v6819_v5 = vadd.f32 %v6815_v49, %v6763_v27 }
 0x854   : > { %v6930_v63 = vadd.f32 %v6907_v24, %v6874_v55 }
 0x856   : > { %v6871_v12 = vpop.f32.mrf.mxu1  ;;  %v6986_v40 = vadd.f32 %v6963_v6, %v6930_v63 }
 0x857   : > { %v6875_v34 = vadd.f32 %v6871_v12, %v6819_v5 }
 0x85a   : > { %v6927_v47 = vpop.f32.mrf.mxu3 }
 0x85b   : > { %v6931_v3 = vadd.f32 %v6927_v47, %v6875_v34 }
 0x85c   : > { %v7019_v10 = vpop.f32.mrf.mxu2 }
 0x85d   : > { %v7042_v11 = vadd.f32 %v7019_v10, %v6986_v40 }
 0x85e   : > { %v6983_v56 = vpop.f32.mrf.mxu1 }
 0x85f   : > { %v7098_v57 = vadd.f32 %v7075_v19, %v7042_v11  ;;  %v6987_v9 = vadd.f32 %v6983_v56, %v6931_v3 }
 0x861   : > { %v7106_v41 = vadd.f32 %v7102_v50, %v7098_v57 }
 0x863   : > { %7663 = vtanh.f32 %v7106_v41 }
 0x864   : > { %v7039_v52 = vpop.f32.mrf.mxu3 }
 0x865   : > { %v7043_v1 = vadd.f32 %v7039_v52, %v6987_v9 }
 0x868   : > { %v7095_v44 = vpop.f32.mrf.mxu1 }
 0x869   : > { %v7099_v29 = vadd.f32 %v7095_v44, %v7043_v1  ;;  %v7664_v36 = vpop.eup %7663 }
 0x86a   : > { %7151 = vmatmul.f32.vlgmr.msra.gmra.mxu2 %v7664_v36 }
 0x86b   : > { %v7107_v23 = vadd.f32 %v7103_v58, %v7099_v29 }
 0x86d   : > { %7665 = vtanh.f32 %v7107_v23 }
 0x873   : > { %v7666_v51 = vpop.eup %7665 }
 0x874   : > { %7508 = vmatmul.msk.f32.vlgmr.msrb.gmra.mxu3 %vm7131_vm10, %v7666_v51 }
 0x8ed   : > { %v7152_v54 = vpop.f32.mrf.mxu2 }
 0x8ee   : > { %v7153_v62 = vadd.f32 %v7152_v54, %v7130_v2 }
 0x8f7   : > { %v7172_v25 = vpop.f32.mrf.mxu3 }
 0x8f8   : > { %v7173_v37 = vadd.f32 %v7172_v25, %v7153_v62 }
 0x8fa   : > { %7667 = vtanh.f32 %v7173_v37 }
 0x900   : > { %v7668_v30 = vpop.eup %7667 }
 0x901   : > { %7509 = vmatmul.msk.f32.vlgmr.msra.gmra.mxu3 %vm7187_vm11, %v7668_v30 }
 0x984   : > { %v7208_v39 = vpop.f32.mrf.mxu3 }
 0x985   : > { %v7209_v43 = vadd.f32 %v7208_v39, %v7186_v33 }
 0x987   : > { %7211 = vst.msk [vmem:[%s594_s22] sm:$0x1] %vm4650_vm3, %v7209_v43 }
 0x988   : > { %7743 = shalt.err (!%p7740_p3)
}
 0x989   : > { %7515 = dma.vmem_to_hbm [thread:$0]  (%p7919_p5), %s7224_s24, 16, %s7226_s20, %s7213_s25  }
 0x98a PF: > { %p7521_p4 = scmp.ge.s32.totalorder %s7778_s21, 2  ;;  %s7237_s28 = sand.u32 1, %s7766_s0  }
 0x98b   : > { %s7238_s22 = scalar_lea.sflag [#allocation9], %s7237_s28 }
 0x98c   : > { %p7518_p7 = pnand %p7521_p4, %p7923_p6 }
 0x98e   : > { %p7519_p8 = pneg %p7518_p7 }
 0x990   : > { %7761 = dma.done.wait (%p7519_p8), %s7238_s22, 16  }
 0x991   : > { %7763 = vsyncadd (%p7519_p8), %s7238_s22, 4294967280  ;;  %s12356_s21 = sld [smem:[#allocation12_spill]]  ;;  %s12359_s0 = smov %s7770_s30 }
 0x992   : > { %s12357_s7 = sld [smem:[#allocation11_spill]] }
 0x993   : > { %s12358_s20 = sld [smem:[#allocation13_spill]] }
 0x997   : > { %p29_p9 = scmp.ge.s32.totalorder %s12356_s21, 4  }
 0x998   : > { %s12360_s30 = smov %s12357_s7 }
 0x999   :  { %31 = sbr.rel (!%p29_p9) target bundleno = 13 (0xd), region = 234 }
 0x99e   :  { %7243 = vsyncpa [#allocation9], 1 }
 0x99f   :  { %7245 = vsyncpa [#allocation9 + $0x1], 1 }

</bundles_post_ra>
